<compile_context>
chip_gen: v5e
topology: v5e:2x2
jax: 0.10.0
libtpu: 0.0.40
codegen_flags: <defaults>
</compile_context>

<pallas_src>
import jax
import jax.numpy as jnp
from jax import lax
from jax.experimental import pallas as pl
from jax.experimental.pallas import tpu as pltpu

BN_EPS = 1e-5
LANE = 128          # channel padding target (TPU lane width)
SUBLANE = 8         # sublane width (second-minor dim alignment)


def _round_up(x, m):
    return (x + m - 1) // m * m


def _vmem_limit_bytes():
    """Scoped-VMEM budget derived from the chip's physical VMEM (≈75%)."""
    try:
        cap = pltpu.get_tpu_info().vmem_capacity_bytes
    except Exception:
        cap = 64 * 1024 * 1024          # conservative fallback (v7x-sized)
    return max(32 * 1024 * 1024, int(cap) * 3 // 4)


def _cout_tile(cout_p):
    """256-wide Cout tiles on 256-wide MXUs (v6e/v7x); 128 on v5e and older."""
    if cout_p % 256 == 0:
        try:
            kind = jax.devices()[0].device_kind.lower()
        except Exception:
            kind = ""
        if not any(t in kind for t in ("v2", "v3", "v4", "v5")):
            return 256
    return 128


def _row_tile(H, W):
    """Pick the inner row tile so th*W ≈ 256; prefer an exact divisor of H, else pad H."""
    tgt = max(1, min(32, 256 // max(W, 1), H))
    best = 1
    for t in range(tgt, 0, -1):
        if H % t == 0:
            best = t
            break
    if best >= max(1, tgt // 2):
        return best, H                      # exact tiling, no row masking needed
    return tgt, _round_up(H, tgt)           # pad H; kernel masks rows >= H


def _make_conv_stage_kernel(H, W, th, apply_input_bn):
    """3x3 conv (+ optional fused input-BN affine + ReLU) + per-channel sum/sumsq.

    Refs (batch element and Cout tile selected by the grid / BlockSpecs):
      x_ref   : (Hp, Wp, Cin_p) bf16 spatially padded input.  For stage 2 this is the *raw*
                conv1 output; BN1's folded affine + ReLU is applied here, fused into the load.
      w_ref   : (3, 3*Cin_p, CO)  bf16 weights, dx taps folded into the contraction dim.
      a_ref   : (1, Cin_p) f32    input-BN scale  (statically unused for stage 1)
      b_ref   : (1, Cin_p) f32    input-BN shift  (statically unused for stage 1)
      y_ref   : (Hp, Wp, CO) bf16 raw conv output written into an already padded buffer.
      sum_ref : (1, CO) f32       per-(image, Cout-tile) channel sums of the conv output
      ssq_ref : (1, CO) f32       per-(image, Cout-tile) channel sums of squares
    """
    def kernel(x_ref, w_ref, a_ref, b_ref, y_ref, sum_ref, ssq_ref):
        Hp, Wp, cin_p = x_ref.shape
        co = y_ref.shape[-1]
        h_pad = Hp - 2
        n_tiles = h_pad // th
        mask_rows = (h_pad != H)            # only when H was padded to a tile multiple

        sum_ref[...] = jnp.zeros_like(sum_ref)
        ssq_ref[...] = jnp.zeros_like(ssq_ref)

        # Only the two halo rows need explicit zeroing: the interior row-tile stores below write
        # full padded-width rows with the halo/pad columns embedded as zeros (sublane-dense).
        zrow = jnp.zeros((1, Wp, co), y_ref.dtype)
        y_ref[0:1] = zrow
        y_ref[Hp - 1:Hp] = zrow

        if apply_input_bn:
            a_in = a_ref[0]
            b_in = b_ref[0]
            # hoisted column-validity mask (conv zero-padding applies to the post-BN activation)
            col = lax.broadcasted_iota(jnp.int32, (1, Wp, 1), 1)
            col_ok = (col >= 1) & (col <= W)

        zl = jnp.zeros((th, 1, co), y_ref.dtype)
        zr = jnp.zeros((th, Wp - W - 1, co), y_ref.dtype)

        @pl.loop(0, n_tiles)
        def _(t):
            r0 = pl.multiple_of(t * th, th)
            xw = x_ref[pl.ds(r0, th + 2)]                       # (th+2, Wp, Cin_p) bf16
            if apply_input_bn:
                # previous stage's BN folded to one FMA (f32) + ReLU, fused into this load;
                # then zero the conv padding of the *normalized* activation with one select.
                xf = jnp.maximum(xw.astype(jnp.float32) * a_in + b_in, 0.0)
                row = r0 + lax.broadcasted_iota(jnp.int32, (th + 2, 1, 1), 0)
                ok = col_ok & (row >= 1) & (row <= H)
                xw = jnp.where(ok, xf, 0.0)
            xw = xw.astype(jnp.bfloat16)                        # bf16 MXU operands

            # fold the three dx taps into the contraction: K = 3*Cin_p, 3 matmuls instead of 9
            xcat = jnp.concatenate(
                [xw[:, 0:W, :], xw[:, 1:W + 1, :], xw[:, 2:W + 2, :]], axis=-1)

            acc = jnp.zeros((th * W, co), jnp.float32)          # f32 accumulation
            for dy in range(3):
                lhs = xcat[dy:dy + th].reshape(th * W, 3 * cin_p)
                acc = acc + lax.dot_general(
                    lhs, w_ref[dy],
                    dimension_numbers=(((1,), (0,)), ((), ())),
                    preferred_element_type=jnp.float32)

            res = acc.reshape(th, W, co)
            if mask_rows:
                rr = r0 + lax.broadcasted_iota(jnp.int32, (th, 1, 1), 0)
                res = jnp.where(rr < H, res, 0.0)               # drop padded output rows

            # BatchNorm statistics (finished across the whole grid in the wrapper)
            flat = res.reshape(th * W, co)
            sum_ref[...] += jnp.sum(flat, axis=0).reshape(1, co)
            ssq_ref[...] += jnp.sum(flat * flat, axis=0).reshape(1, co)

            # sublane-dense full-width row store; halo/pad columns carried as zeros
            y_ref[pl.ds(r0 + 1, th)] = jnp.concatenate(
                [zl, res.astype(y_ref.dtype), zr], axis=1)

    return kernel


def _conv_stage(x_pad, w_folded, a_in, b_in, *, H, W, th, apply_input_bn):
    """One conv stage over grid (batch, Cout-tile); returns (padded bf16 conv out, sums, sumsqs)."""
    N, Hp, Wp, cin_p = x_pad.shape
    cout_p = w_folded.shape[-1]
    k3 = w_folded.shape[1]
    co_t = _cout_tile(cout_p)
    n_co = cout_p // co_t

    kernel = _make_conv_stage_kernel(H, W, th, apply_input_bn)
    y, sums, ssqs = pl.pallas_call(
        kernel,
        out_shape=(
            jax.ShapeDtypeStruct((N, Hp, Wp, cout_p), jnp.bfloat16),
            jax.ShapeDtypeStruct((N, 1, cout_p), jnp.float32),
            jax.ShapeDtypeStruct((N, 1, cout_p), jnp.float32),
        ),
        grid=(N, n_co),
        in_specs=[
            pl.BlockSpec((None, Hp, Wp, cin_p), lambda n, c: (n, 0, 0, 0)),
            pl.BlockSpec((3, k3, co_t), lambda n, c: (0, 0, c)),
            pl.BlockSpec((1, cin_p), lambda n, c: (0, 0)),
            pl.BlockSpec((1, cin_p), lambda n, c: (0, 0)),
        ],
        out_specs=(
            pl.BlockSpec((None, Hp, Wp, co_t), lambda n, c: (n, 0, 0, c)),
            pl.BlockSpec((None, 1, co_t), lambda n, c: (n, 0, c)),
            pl.BlockSpec((None, 1, co_t), lambda n, c: (n, 0, c)),
        ),
        compiler_params=pltpu.CompilerParams(
            dimension_semantics=("parallel", "parallel"),
            vmem_limit_bytes=_vmem_limit_bytes()),
    )(x_pad, w_folded, a_in, b_in)
    return y, sums, ssqs


def _make_finalize_kernel(H, W, th):
    """BN affine (one FMA) + ReLU of the last conv, cropping the spatial padding."""
    def kernel(x_ref, a_ref, b_ref, o_ref):
        a = a_ref[0]
        b = b_ref[0]

        def do(r0, nrows):
            x = x_ref[pl.ds(r0 + 1, nrows), 1:W + 1, :].astype(jnp.float32)
            o_ref[pl.ds(r0, nrows)] = jnp.maximum(x * a + b, 0.0).astype(o_ref.dtype)

        n_full = H // th
        if n_full > 0:
            @pl.loop(0, n_full)
            def _(t):
                do(pl.multiple_of(t * th, th), th)
        rem = H % th
        if rem:
            do(n_full * th, rem)

    return kernel


def _finalize(y_pad, a, b, *, H, W, th):
    N, Hp, Wp, cp = y_pad.shape
    co_t = _cout_tile(cp)
    n_co = cp // co_t
    return pl.pallas_call(
        _make_finalize_kernel(H, W, th),
        out_shape=jax.ShapeDtypeStruct((N, H, W, cp), jnp.float32),
        grid=(N, n_co),
        in_specs=[
            pl.BlockSpec((None, Hp, Wp, co_t), lambda n, c: (n, 0, 0, c)),
            pl.BlockSpec((1, co_t), lambda n, c: (0, c)),
            pl.BlockSpec((1, co_t), lambda n, c: (0, c)),
        ],
        out_specs=pl.BlockSpec((None, H, W, co_t), lambda n, c: (n, 0, 0, c)),
        compiler_params=pltpu.CompilerParams(
            dimension_semantics=("parallel", "parallel"),
            vmem_limit_bytes=_vmem_limit_bytes()),
    )(y_pad, a, b)


def _bn_scale_shift(sums, ssqs, gamma_p, beta_p, count):
    """Finish the cross-tile BN reduction (tiny per-channel math) and fold BN to one FMA."""
    s = jnp.sum(sums, axis=0).reshape(-1)                   # (Cp,)
    q = jnp.sum(ssqs, axis=0).reshape(-1)
    mean = s / count
    var = jnp.maximum(q / count - mean * mean, 0.0)         # biased variance, f32
    a = gamma_p * lax.rsqrt(var + BN_EPS)
    b = beta_p - mean * a
    return a.reshape(1, -1), b.reshape(1, -1)


def _fold_weights(w, cin_p, cout_p):
    """(3, 3, Cin, Cout) -> (3, 3*Cin_p, Cout_p) bf16 with dx folded into the contraction dim."""
    kh, kw, cin, cout = w.shape
    w_p = jnp.pad(w, ((0, 0), (0, 0), (0, cin_p - cin), (0, cout_p - cout)))
    return w_p.reshape(kh, kw * cin_p, cout_p).astype(jnp.bfloat16)


def double_conv(x_nchw, params):
    """DoubleConv.forward. Input/output in PyTorch NCHW layout."""
    # TODO(synk): BatchNorm2d's running_mean/running_var momentum buffer updates (module state)
    # are not emitted; the forward output does not depend on them.
    w1, g1, be1, w2, g2, be2 = params
    N, cin, H, W = x_nchw.shape
    cmid, cout = w1.shape[-1], w2.shape[-1]
    cin_p = _round_up(cin, LANE)
    cmid_p = _round_up(cmid, LANE)
    cout_p = _round_up(cout, LANE)

    th, h_pad = _row_tile(H, W)
    wp = _round_up(W + 2, SUBLANE)          # sublane-aligned padded width
    hp = h_pad + 2

    # layout glue: NCHW -> NHWC, channel pad to lane width, spatial pad (halo + alignment), bf16.
    x = jnp.transpose(x_nchw, (0, 2, 3, 1))
    x = jnp.pad(x, ((0, 0), (1, hp - H - 1), (1, wp - W - 1), (0, cin_p - cin)))
    x = x.astype(jnp.bfloat16)

    w1f = _fold_weights(w1, cin_p, cmid_p)
    w2f = _fold_weights(w2, cmid_p, cout_p)
    g1p = jnp.pad(g1, (0, cmid_p - cmid))
    be1p = jnp.pad(be1, (0, cmid_p - cmid))
    g2p = jnp.pad(g2, (0, cout_p - cout))
    be2p = jnp.pad(be2, (0, cout_p - cout))

    count = jnp.float32(N * H * W)
    dummy = jnp.zeros((1, cin_p), jnp.float32)

    # stage 1: conv1 (raw, bf16) + batch statistics (f32)
    y1, s1, q1 = _conv_stage(x, w1f, dummy, dummy, H=H, W=W, th=th, apply_input_bn=False)
    a1, b1 = _bn_scale_shift(s1, q1, g1p, be1p, count)
    # stage 2: BN1 + ReLU fused into conv2's input load; conv2 (raw, bf16) + batch statistics
    y2, s2, q2 = _conv_stage(y1, w2f, a1, b1, H=H, W=W, th=th, apply_input_bn=True)
    a2, b2 = _bn_scale_shift(s2, q2, g2p, be2p, count)
    # BN2 + ReLU, crop spatial padding
    out = _finalize(y2, a2, b2, H=H, W=W, th=th)    # (N, H, W, cout_p) f32
    out = out[..., :cout]
    return jnp.transpose(out, (0, 3, 1, 2))         # NHWC -> NCHW


def init_params(key, in_channels, out_channels, mid_channels=None):
    if not mid_channels:
        mid_channels = out_channels
    k1, k2 = jax.random.split(key)
    fan1 = in_channels * 9
    fan2 = mid_channels * 9
    w1 = jax.random.uniform(k1, (3, 3, in_channels, mid_channels), jnp.float32,
                            -1.0 / jnp.sqrt(fan1), 1.0 / jnp.sqrt(fan1))
    w2 = jax.random.uniform(k2, (3, 3, mid_channels, out_channels), jnp.float32,
                            -1.0 / jnp.sqrt(fan2), 1.0 / jnp.sqrt(fan2))
    g1 = jnp.ones((mid_channels,), jnp.float32)
    b1 = jnp.zeros((mid_channels,), jnp.float32)
    g2 = jnp.ones((out_channels,), jnp.float32)
    b2 = jnp.zeros((out_channels,), jnp.float32)
    return (w1, g1, b1, w2, g2, b2)


def _reference(x_nchw, params):
    """Pure-JAX reference (XLA conv) mirroring the kernel's precision choices: conv operands in
    bf16 (f32 accumulation), batch statistics from the f32 conv output, the raw conv output
    stored in bf16 before the BN affine, and all BN math in f32 — matching PyTorch forward math
    up to those storage precisions."""
    w1, g1, b1, w2, g2, b2 = params

    def stage(x, w, g, b):
        wt = jnp.transpose(w, (3, 2, 0, 1)).astype(jnp.bfloat16)   # (Cout, Cin, 3, 3)
        y = lax.conv_general_dilated(
            x.astype(jnp.bfloat16), wt, (1, 1), ((1, 1), (1, 1)),
            dimension_numbers=("NCHW", "OIHW", "NCHW"),
            preferred_element_type=jnp.float32)
        mean = y.mean(axis=(0, 2, 3), keepdims=True)
        var = ((y - mean) ** 2).mean(axis=(0, 2, 3), keepdims=True)
        a = g.reshape(1, -1, 1, 1) * lax.rsqrt(var + BN_EPS)
        bb = b.reshape(1, -1, 1, 1) - mean * a
        y_q = y.astype(jnp.bfloat16).astype(jnp.float32)           # bf16 intermediate storage
        return jnp.maximum(y_q * a + bb, 0.0)

    return stage(stage(x_nchw, w1, g1, b1), w2, g2, b2)


if __name__ == "__main__":
    key = jax.random.PRNGKey(0)
    kx, kp = jax.random.split(key)

    N, Cin, H, W = 2, 4, 16, 16
    Cout = 8
    x = jax.random.normal(kx, (N, Cin, H, W), jnp.float32)
    params = init_params(kp, Cin, Cout)

    out = jax.block_until_ready(jax.jit(double_conv)(x, params))
    assert out.shape == (N, Cout, H, W), out.shape

    ref = jax.block_until_ready(_reference(x, params))
    max_err = float(jnp.max(jnp.abs(out - ref)))
    assert max_err < 1e-2, f"mismatch vs reference: {max_err}"

    print("KERNEL_OK")
</pallas_src>

<mosaic_0001>
module attributes {stable_mosaic.version = 11 : i64} {
  func.func @kernel(%arg0: i32, %arg1: i32, %arg2: memref<1x18x24x128xbf16, #tpu.memory_space<vmem>>, %arg3: memref<3x384x128xbf16, #tpu.memory_space<vmem>>, %arg4: memref<1x128xf32, #tpu.memory_space<vmem>>, %arg5: memref<1x128xf32, #tpu.memory_space<vmem>>, %arg6: memref<1x18x24x128xbf16, #tpu.memory_space<vmem>>, %arg7: memref<1x1x128xf32, #tpu.memory_space<vmem>>, %arg8: memref<1x1x128xf32, #tpu.memory_space<vmem>>) attributes {dimension_semantics = [#tpu.dimension_semantics<parallel>, #tpu.dimension_semantics<parallel>], iteration_bounds = array<i64: 2, 1>, scalar_prefetch = 0 : i64, scratch_operands = 0 : i64, tpu.core_type = #tpu.core_type<tc>, window_params = [{transform_indices = @transform_0, window_bounds = array<i64: 1, 18, 24, 128>}, {transform_indices = @transform_1, window_bounds = array<i64: 3, 384, 128>}, {pipeline_mode = #tpu.pipeline_mode<synchronous>, transform_indices = @transform_2, window_bounds = array<i64: 1, 128>}, {pipeline_mode = #tpu.pipeline_mode<synchronous>, transform_indices = @transform_3, window_bounds = array<i64: 1, 128>}, {transform_indices = @transform_4, window_bounds = array<i64: 1, 18, 24, 128>}, {transform_indices = @transform_5, window_bounds = array<i64: 1, 1, 128>}, {transform_indices = @transform_6, window_bounds = array<i64: 1, 1, 128>}]} {
    %cst = arith.constant 0.000000e+00 : f32
    %0 = vector.broadcast %cst : f32 to vector<1x128xf32>
    %c0 = arith.constant 0 : index
    %c0_0 = arith.constant 0 : index
    %c0_1 = arith.constant 0 : index
    %1 = vector.load %arg7[%c0, %c0_0, %c0_1] : memref<1x1x128xf32, #tpu.memory_space<vmem>>, vector<1x1x128xf32>
    %2 = vector.shape_cast %1 : vector<1x1x128xf32> to vector<1x128xf32>
    %3 = vector.shape_cast %0 : vector<1x128xf32> to vector<1x1x128xf32>
    tpu.vector_store %arg7[%c0, %c0_0, %c0_1], %3 {strides = array<i32>} : memref<1x1x128xf32, #tpu.memory_space<vmem>>, vector<1x1x128xf32>,
    %cst_2 = arith.constant 0.000000e+00 : f32
    %4 = vector.broadcast %cst_2 : f32 to vector<1x128xf32>
    %c0_3 = arith.constant 0 : index
    %c0_4 = arith.constant 0 : index
    %c0_5 = arith.constant 0 : index
    %5 = vector.load %arg8[%c0_3, %c0_4, %c0_5] : memref<1x1x128xf32, #tpu.memory_space<vmem>>, vector<1x1x128xf32>
    %6 = vector.shape_cast %5 : vector<1x1x128xf32> to vector<1x128xf32>
    %7 = vector.shape_cast %4 : vector<1x128xf32> to vector<1x1x128xf32>
    tpu.vector_store %arg8[%c0_3, %c0_4, %c0_5], %7 {strides = array<i32>} : memref<1x1x128xf32, #tpu.memory_space<vmem>>, vector<1x1x128xf32>,
    %cst_6 = arith.constant 0.000000e+00 : bf16
    %8 = vector.broadcast %cst_6 : bf16 to vector<1x24x128xbf16>
    %c0_7 = arith.constant 0 : index
    %c0_8 = arith.constant 0 : index
    %c0_9 = arith.constant 0 : index
    %c0_10 = arith.constant 0 : index
    %9 = vector.load %arg6[%c0_7, %c0_8, %c0_9, %c0_10] : memref<1x18x24x128xbf16, #tpu.memory_space<vmem>>, vector<1x1x24x128xbf16>
    %10 = vector.shape_cast %9 : vector<1x1x24x128xbf16> to vector<1x24x128xbf16>
    %11 = vector.shape_cast %8 : vector<1x24x128xbf16> to vector<1x1x24x128xbf16>
    tpu.vector_store %arg6[%c0_7, %c0_8, %c0_9, %c0_10], %11 {strides = array<i32>} : memref<1x18x24x128xbf16, #tpu.memory_space<vmem>>, vector<1x1x24x128xbf16>,
    %c0_11 = arith.constant 0 : index
    %c17 = arith.constant 17 : index
    %c0_12 = arith.constant 0 : index
    %c0_13 = arith.constant 0 : index
    %12 = vector.load %arg6[%c0_11, %c17, %c0_12, %c0_13] : memref<1x18x24x128xbf16, #tpu.memory_space<vmem>>, vector<1x1x24x128xbf16>
    %13 = vector.shape_cast %12 : vector<1x1x24x128xbf16> to vector<1x24x128xbf16>
    %14 = vector.shape_cast %8 : vector<1x24x128xbf16> to vector<1x1x24x128xbf16>
    tpu.vector_store %arg6[%c0_11, %c17, %c0_12, %c0_13], %14 {strides = array<i32>} : memref<1x18x24x128xbf16, #tpu.memory_space<vmem>>, vector<1x1x24x128xbf16>,
    %cst_14 = arith.constant 0.000000e+00 : bf16
    %15 = vector.broadcast %cst_14 : bf16 to vector<16x1x128xbf16>
    %cst_15 = arith.constant 0.000000e+00 : bf16
    %16 = vector.broadcast %cst_15 : bf16 to vector<16x7x128xbf16>
    %c0_i32 = arith.constant 0 : i32
    %c1_i32 = arith.constant 1 : i32
    %17 = arith.muli %c0_i32, %c1_i32 : i32
    %c0_i32_16 = arith.constant 0 : i32
    %18 = arith.addi %c0_i32_16, %17 : i32
    %c16_i32 = arith.constant 16 : i32
    %19 = arith.muli %18, %c16_i32 : i32
    %20 = tpu.assume_multiple %19, 16 : i32
    %c0_17 = arith.constant 0 : index
    %21 = arith.index_cast %20 : i32 to index
    %c0_18 = arith.constant 0 : index
    %c0_19 = arith.constant 0 : index
    %22 = vector.load %arg2[%c0_17, %21, %c0_18, %c0_19] : memref<1x18x24x128xbf16, #tpu.memory_space<vmem>>, vector<1x18x24x128xbf16>
    %23 = vector.shape_cast %22 : vector<1x18x24x128xbf16> to vector<18x24x128xbf16>
    %24 = vector.extract_strided_slice %23 {offsets = [0, 0, 0], sizes = [18, 16, 128], strides = [1, 1, 1]} : vector<18x24x128xbf16> to vector<18x16x128xbf16>
    %25 = vector.extract_strided_slice %23 {offsets = [0, 1, 0], sizes = [18, 16, 128], strides = [1, 1, 1]} : vector<18x24x128xbf16> to vector<18x16x128xbf16>
    %26 = vector.extract_strided_slice %23 {offsets = [0, 2, 0], sizes = [18, 16, 128], strides = [1, 1, 1]} : vector<18x24x128xbf16> to vector<18x16x128xbf16>
    %27 = tpu.concatenate %24, %25, %26 in 2 : vector<18x16x128xbf16>, vector<18x16x128xbf16>, vector<18x16x128xbf16> -> vector<18x16x384xbf16>
    %cst_20 = arith.constant 0.000000e+00 : f32
    %28 = vector.broadcast %cst_20 : f32 to vector<256x128xf32>
    %29 = vector.extract_strided_slice %27 {offsets = [0, 0, 0], sizes = [16, 16, 384], strides = [1, 1, 1]} : vector<18x16x384xbf16> to vector<16x16x384xbf16>
    %30 = vector.shape_cast %29 : vector<16x16x384xbf16> to vector<256x384xbf16>
    %c0_21 = arith.constant 0 : index
    %c0_22 = arith.constant 0 : index
    %c0_23 = arith.constant 0 : index
    %31 = vector.load %arg3[%c0_21, %c0_22, %c0_23] : memref<3x384x128xbf16, #tpu.memory_space<vmem>>, vector<1x384x128xbf16>
    %32 = vector.shape_cast %31 : vector<1x384x128xbf16> to vector<384x128xbf16>
    %cst_24 = arith.constant dense<0.000000e+00> : vector<256x128xf32>
    %33 = tpu.matmul %30, %32, %cst_24 {dimension_numbers = #tpu.dot_dimension_numbers<[1], [0], [0], [1], [0, 0, 1, 1], [], []>} : vector<256x384xbf16>, vector<384x128xbf16>, vector<256x128xf32> -> vector<256x128xf32>
    %34 = arith.addf %28, %33 : vector<256x128xf32>
    %35 = vector.extract_strided_slice %27 {offsets = [1, 0, 0], sizes = [16, 16, 384], strides = [1, 1, 1]} : vector<18x16x384xbf16> to vector<16x16x384xbf16>
    %36 = vector.shape_cast %35 : vector<16x16x384xbf16> to vector<256x384xbf16>
    %c1 = arith.constant 1 : index
    %c0_25 = arith.constant 0 : index
    %c0_26 = arith.constant 0 : index
    %37 = vector.load %arg3[%c1, %c0_25, %c0_26] : memref<3x384x128xbf16, #tpu.memory_space<vmem>>, vector<1x384x128xbf16>
    %38 = vector.shape_cast %37 : vector<1x384x128xbf16> to vector<384x128xbf16>
    %cst_27 = arith.constant dense<0.000000e+00> : vector<256x128xf32>
    %39 = tpu.matmul %36, %38, %cst_27 {dimension_numbers = #tpu.dot_dimension_numbers<[1], [0], [0], [1], [0, 0, 1, 1], [], []>} : vector<256x384xbf16>, vector<384x128xbf16>, vector<256x128xf32> -> vector<256x128xf32>
    %40 = arith.addf %34, %39 : vector<256x128xf32>
    %41 = vector.extract_strided_slice %27 {offsets = [2, 0, 0], sizes = [16, 16, 384], strides = [1, 1, 1]} : vector<18x16x384xbf16> to vector<16x16x384xbf16>
    %42 = vector.shape_cast %41 : vector<16x16x384xbf16> to vector<256x384xbf16>
    %c2 = arith.constant 2 : index
    %c0_28 = arith.constant 0 : index
    %c0_29 = arith.constant 0 : index
    %43 = vector.load %arg3[%c2, %c0_28, %c0_29] : memref<3x384x128xbf16, #tpu.memory_space<vmem>>, vector<1x384x128xbf16>
    %44 = vector.shape_cast %43 : vector<1x384x128xbf16> to vector<384x128xbf16>
    %cst_30 = arith.constant dense<0.000000e+00> : vector<256x128xf32>
    %45 = tpu.matmul %42, %44, %cst_30 {dimension_numbers = #tpu.dot_dimension_numbers<[1], [0], [0], [1], [0, 0, 1, 1], [], []>} : vector<256x384xbf16>, vector<384x128xbf16>, vector<256x128xf32> -> vector<256x128xf32>
    %46 = arith.addf %40, %45 : vector<256x128xf32>
    %47 = vector.shape_cast %46 : vector<256x128xf32> to vector<16x16x128xf32>
    %48 = vector.shape_cast %47 : vector<16x16x128xf32> to vector<256x128xf32>
    %c0_31 = arith.constant 0 : index
    %c0_32 = arith.constant 0 : index
    %c0_33 = arith.constant 0 : index
    %49 = vector.load %arg7[%c0_31, %c0_32, %c0_33] : memref<1x1x128xf32, #tpu.memory_space<vmem>>, vector<1x1x128xf32>
    %50 = vector.shape_cast %49 : vector<1x1x128xf32> to vector<1x128xf32>
    %cst_34 = arith.constant dense<0.000000e+00> : vector<128xf32>
    %51 = vector.multi_reduction <add>, %48, %cst_34 [0] : vector<256x128xf32> to vector<128xf32>
    %52 = vector.shape_cast %51 : vector<128xf32> to vector<1x128xf32>
    %53 = arith.addf %50, %52 : vector<1x128xf32>
    %c0_35 = arith.constant 0 : index
    %c0_36 = arith.constant 0 : index
    %c0_37 = arith.constant 0 : index
    %54 = vector.load %arg7[%c0_35, %c0_36, %c0_37] : memref<1x1x128xf32, #tpu.memory_space<vmem>>, vector<1x1x128xf32>
    %55 = vector.shape_cast %54 : vector<1x1x128xf32> to vector<1x128xf32>
    %56 = vector.shape_cast %53 : vector<1x128xf32> to vector<1x1x128xf32>
    tpu.vector_store %arg7[%c0_35, %c0_36, %c0_37], %56 {strides = array<i32>} : memref<1x1x128xf32, #tpu.memory_space<vmem>>, vector<1x1x128xf32>,
    %c0_38 = arith.constant 0 : index
    %c0_39 = arith.constant 0 : index
    %c0_40 = arith.constant 0 : index
    %57 = vector.load %arg8[%c0_38, %c0_39, %c0_40] : memref<1x1x128xf32, #tpu.memory_space<vmem>>, vector<1x1x128xf32>
    %58 = vector.shape_cast %57 : vector<1x1x128xf32> to vector<1x128xf32>
    %59 = arith.mulf %48, %48 : vector<256x128xf32>
    %cst_41 = arith.constant dense<0.000000e+00> : vector<128xf32>
    %60 = vector.multi_reduction <add>, %59, %cst_41 [0] : vector<256x128xf32> to vector<128xf32>
    %61 = vector.shape_cast %60 : vector<128xf32> to vector<1x128xf32>
    %62 = arith.addf %58, %61 : vector<1x128xf32>
    %c0_42 = arith.constant 0 : index
    %c0_43 = arith.constant 0 : index
    %c0_44 = arith.constant 0 : index
    %63 = vector.load %arg8[%c0_42, %c0_43, %c0_44] : memref<1x1x128xf32, #tpu.memory_space<vmem>>, vector<1x1x128xf32>
    %64 = vector.shape_cast %63 : vector<1x1x128xf32> to vector<1x128xf32>
    %65 = vector.shape_cast %62 : vector<1x128xf32> to vector<1x1x128xf32>
    tpu.vector_store %arg8[%c0_42, %c0_43, %c0_44], %65 {strides = array<i32>} : memref<1x1x128xf32, #tpu.memory_space<vmem>>, vector<1x1x128xf32>,
    %66 = arith.truncf %47 : vector<16x16x128xf32> to vector<16x16x128xbf16>
    %67 = tpu.concatenate %15, %66, %16 in 1 : vector<16x1x128xbf16>, vector<16x16x128xbf16>, vector<16x7x128xbf16> -> vector<16x24x128xbf16>
    %c1_i32_45 = arith.constant 1 : i32
    %68 = arith.addi %20, %c1_i32_45 : i32
    %c0_46 = arith.constant 0 : index
    %69 = arith.index_cast %68 : i32 to index
    %c0_47 = arith.constant 0 : index
    %c0_48 = arith.constant 0 : index
    %70 = vector.load %arg6[%c0_46, %69, %c0_47, %c0_48] : memref<1x18x24x128xbf16, #tpu.memory_space<vmem>>, vector<1x16x24x128xbf16>
    %71 = vector.shape_cast %70 : vector<1x16x24x128xbf16> to vector<16x24x128xbf16>
    %72 = vector.shape_cast %67 : vector<16x24x128xbf16> to vector<1x16x24x128xbf16>
    tpu.vector_store %arg6[%c0_46, %69, %c0_47, %c0_48], %72 {strides = array<i32>} : memref<1x18x24x128xbf16, #tpu.memory_space<vmem>>, vector<1x16x24x128xbf16>,
    %c1_i32_49 = arith.constant 1 : i32
    return
  }
  func.func @transform_0(%arg0: i32, %arg1: i32) -> (i32, i32, i32, i32) {
    %c0_i32 = arith.constant 0 : i32
    %c0_i32_0 = arith.constant 0 : i32
    %c0_i32_1 = arith.constant 0 : i32
    %c0_i32_2 = arith.constant 0 : i32
    return %arg0, %c0_i32, %c0_i32_0, %c0_i32_1 : i32, i32, i32, i32
  }
  func.func @transform_1(%arg0: i32, %arg1: i32) -> (i32, i32, i32) {
    %c0_i32 = arith.constant 0 : i32
    %c0_i32_0 = arith.constant 0 : i32
    %c0_i32_1 = arith.constant 0 : i32
    return %c0_i32, %c0_i32_0, %arg1 : i32, i32, i32
  }
  func.func @transform_2(%arg0: i32, %arg1: i32) -> (i32, i32) {
    %c0_i32 = arith.constant 0 : i32
    %c0_i32_0 = arith.constant 0 : i32
    %c0_i32_1 = arith.constant 0 : i32
    return %c0_i32, %c0_i32_0 : i32, i32
  }
  func.func @transform_3(%arg0: i32, %arg1: i32) -> (i32, i32) {
    %c0_i32 = arith.constant 0 : i32
    %c0_i32_0 = arith.constant 0 : i32
    %c0_i32_1 = arith.constant 0 : i32
    return %c0_i32, %c0_i32_0 : i32, i32
  }
  func.func @transform_4(%arg0: i32, %arg1: i32) -> (i32, i32, i32, i32) {
    %c0_i32 = arith.constant 0 : i32
    %c0_i32_0 = arith.constant 0 : i32
    %c0_i32_1 = arith.constant 0 : i32
    return %arg0, %c0_i32, %c0_i32_0, %arg1 : i32, i32, i32, i32
  }
  func.func @transform_5(%arg0: i32, %arg1: i32) -> (i32, i32, i32) {
    %c0_i32 = arith.constant 0 : i32
    %c0_i32_0 = arith.constant 0 : i32
    return %arg0, %c0_i32, %arg1 : i32, i32, i32
  }
  func.func @transform_6(%arg0: i32, %arg1: i32) -> (i32, i32, i32) {
    %c0_i32 = arith.constant 0 : i32
    %c0_i32_0 = arith.constant 0 : i32
    return %arg0, %c0_i32, %arg1 : i32, i32, i32
  }
}

module attributes {stable_mosaic.version = 11 : i64} {
  func.func @kernel(%arg0: i32, %arg1: i32, %arg2: memref<1x18x24x128xbf16, #tpu.memory_space<vmem>>, %arg3: memref<1x128xf32, #tpu.memory_space<vmem>>, %arg4: memref<1x128xf32, #tpu.memory_space<vmem>>, %arg5: memref<1x16x16x128xf32, #tpu.memory_space<vmem>>) attributes {dimension_semantics = [#tpu.dimension_semantics<parallel>, #tpu.dimension_semantics<parallel>], iteration_bounds = array<i64: 2, 1>, scalar_prefetch = 0 : i64, scratch_operands = 0 : i64, tpu.core_type = #tpu.core_type<tc>, window_params = [{transform_indices = @transform_0, window_bounds = array<i64: 1, 18, 24, 128>}, {transform_indices = @transform_1, window_bounds = array<i64: 1, 128>}, {transform_indices = @transform_2, window_bounds = array<i64: 1, 128>}, {transform_indices = @transform_3, window_bounds = array<i64: 1, 16, 16, 128>}]} {
    %c0 = arith.constant 0 : index
    %c0_0 = arith.constant 0 : index
    %0 = vector.load %arg3[%c0, %c0_0] : memref<1x128xf32, #tpu.memory_space<vmem>>, vector<1x128xf32>
    %1 = vector.shape_cast %0 : vector<1x128xf32> to vector<128xf32>
    %c0_1 = arith.constant 0 : index
    %c0_2 = arith.constant 0 : index
    %2 = vector.load %arg4[%c0_1, %c0_2] : memref<1x128xf32, #tpu.memory_space<vmem>>, vector<1x128xf32>
    %3 = vector.shape_cast %2 : vector<1x128xf32> to vector<128xf32>
    %c0_i32 = arith.constant 0 : i32
    %c1_i32 = arith.constant 1 : i32
    %4 = arith.muli %c0_i32, %c1_i32 : i32
    %c0_i32_3 = arith.constant 0 : i32
    %5 = arith.addi %c0_i32_3, %4 : i32
    %c16_i32 = arith.constant 16 : i32
    %6 = arith.muli %5, %c16_i32 : i32
    %7 = tpu.assume_multiple %6, 16 : i32
    %c1_i32_4 = arith.constant 1 : i32
    %8 = arith.addi %7, %c1_i32_4 : i32
    %c0_5 = arith.constant 0 : index
    %9 = arith.index_cast %8 : i32 to index
    %c1 = arith.constant 1 : index
    %c0_6 = arith.constant 0 : index
    %10 = vector.load %arg2[%c0_5, %9, %c1, %c0_6] : memref<1x18x24x128xbf16, #tpu.memory_space<vmem>>, vector<1x16x16x128xbf16>
    %11 = vector.shape_cast %10 : vector<1x16x16x128xbf16> to vector<16x16x128xbf16>
    %12 = arith.extf %11 : vector<16x16x128xbf16> to vector<16x16x128xf32>
    %13 = vector.shape_cast %1 : vector<128xf32> to vector<1x1x128xf32>
    %14 = vector.broadcast %13 : vector<1x1x128xf32> to vector<16x16x128xf32>
    %15 = arith.mulf %12, %14 : vector<16x16x128xf32>
    %16 = vector.shape_cast %3 : vector<128xf32> to vector<1x1x128xf32>
    %17 = vector.broadcast %16 : vector<1x1x128xf32> to vector<16x16x128xf32>
    %18 = arith.addf %15, %17 : vector<16x16x128xf32>
    %cst = arith.constant 0.000000e+00 : f32
    %19 = vector.broadcast %cst : f32 to vector<16x16x128xf32>
    %20 = arith.maximumf %18, %19 : vector<16x16x128xf32>
    %c0_7 = arith.constant 0 : index
    %21 = arith.index_cast %7 : i32 to index
    %c0_8 = arith.constant 0 : index
    %c0_9 = arith.constant 0 : index
    %22 = vector.load %arg5[%c0_7, %21, %c0_8, %c0_9] : memref<1x16x16x128xf32, #tpu.memory_space<vmem>>, vector<1x16x16x128xf32>
    %23 = vector.shape_cast %22 : vector<1x16x16x128xf32> to vector<16x16x128xf32>
    %24 = vector.shape_cast %20 : vector<16x16x128xf32> to vector<1x16x16x128xf32>
    tpu.vector_store %arg5[%c0_7, %21, %c0_8, %c0_9], %24 {strides = array<i32>} : memref<1x16x16x128xf32, #tpu.memory_space<vmem>>, vector<1x16x16x128xf32>,
    %c1_i32_10 = arith.constant 1 : i32
    return
  }
  func.func @transform_0(%arg0: i32, %arg1: i32) -> (i32, i32, i32, i32) {
    %c0_i32 = arith.constant 0 : i32
    %c0_i32_0 = arith.constant 0 : i32
    %c0_i32_1 = arith.constant 0 : i32
    return %arg0, %c0_i32, %c0_i32_0, %arg1 : i32, i32, i32, i32
  }
  func.func @transform_1(%arg0: i32, %arg1: i32) -> (i32, i32) {
    %c0_i32 = arith.constant 0 : i32
    %c0_i32_0 = arith.constant 0 : i32
    return %c0_i32, %arg1 : i32, i32
  }
  func.func @transform_2(%arg0: i32, %arg1: i32) -> (i32, i32) {
    %c0_i32 = arith.constant 0 : i32
    %c0_i32_0 = arith.constant 0 : i32
    return %c0_i32, %arg1 : i32, i32
  }
  func.func @transform_3(%arg0: i32, %arg1: i32) -> (i32, i32, i32, i32) {
    %c0_i32 = arith.constant 0 : i32
    %c0_i32_0 = arith.constant 0 : i32
    %c0_i32_1 = arith.constant 0 : i32
    return %arg0, %c0_i32, %c0_i32_0, %arg1 : i32, i32, i32, i32
  }
}

module attributes {stable_mosaic.version = 11 : i64} {
  func.func @kernel(%arg0: i32, %arg1: i32, %arg2: memref<1x18x24x128xbf16, #tpu.memory_space<vmem>>, %arg3: memref<3x384x128xbf16, #tpu.memory_space<vmem>>, %arg4: memref<1x128xf32, #tpu.memory_space<vmem>>, %arg5: memref<1x128xf32, #tpu.memory_space<vmem>>, %arg6: memref<1x18x24x128xbf16, #tpu.memory_space<vmem>>, %arg7: memref<1x1x128xf32, #tpu.memory_space<vmem>>, %arg8: memref<1x1x128xf32, #tpu.memory_space<vmem>>) attributes {dimension_semantics = [#tpu.dimension_semantics<parallel>, #tpu.dimension_semantics<parallel>], iteration_bounds = array<i64: 2, 1>, scalar_prefetch = 0 : i64, scratch_operands = 0 : i64, tpu.core_type = #tpu.core_type<tc>, window_params = [{transform_indices = @transform_0, window_bounds = array<i64: 1, 18, 24, 128>}, {transform_indices = @transform_1, window_bounds = array<i64: 3, 384, 128>}, {pipeline_mode = #tpu.pipeline_mode<synchronous>, transform_indices = @transform_2, window_bounds = array<i64: 1, 128>}, {pipeline_mode = #tpu.pipeline_mode<synchronous>, transform_indices = @transform_3, window_bounds = array<i64: 1, 128>}, {transform_indices = @transform_4, window_bounds = array<i64: 1, 18, 24, 128>}, {transform_indices = @transform_5, window_bounds = array<i64: 1, 1, 128>}, {transform_indices = @transform_6, window_bounds = array<i64: 1, 1, 128>}]} {
    %cst = arith.constant 0.000000e+00 : f32
    %0 = vector.broadcast %cst : f32 to vector<1x128xf32>
    %c0 = arith.constant 0 : index
    %c0_0 = arith.constant 0 : index
    %c0_1 = arith.constant 0 : index
    %1 = vector.load %arg7[%c0, %c0_0, %c0_1] : memref<1x1x128xf32, #tpu.memory_space<vmem>>, vector<1x1x128xf32>
    %2 = vector.shape_cast %1 : vector<1x1x128xf32> to vector<1x128xf32>
    %3 = vector.shape_cast %0 : vector<1x128xf32> to vector<1x1x128xf32>
    tpu.vector_store %arg7[%c0, %c0_0, %c0_1], %3 {strides = array<i32>} : memref<1x1x128xf32, #tpu.memory_space<vmem>>, vector<1x1x128xf32>,
    %cst_2 = arith.constant 0.000000e+00 : f32
    %4 = vector.broadcast %cst_2 : f32 to vector<1x128xf32>
    %c0_3 = arith.constant 0 : index
    %c0_4 = arith.constant 0 : index
    %c0_5 = arith.constant 0 : index
    %5 = vector.load %arg8[%c0_3, %c0_4, %c0_5] : memref<1x1x128xf32, #tpu.memory_space<vmem>>, vector<1x1x128xf32>
    %6 = vector.shape_cast %5 : vector<1x1x128xf32> to vector<1x128xf32>
    %7 = vector.shape_cast %4 : vector<1x128xf32> to vector<1x1x128xf32>
    tpu.vector_store %arg8[%c0_3, %c0_4, %c0_5], %7 {strides = array<i32>} : memref<1x1x128xf32, #tpu.memory_space<vmem>>, vector<1x1x128xf32>,
    %cst_6 = arith.constant 0.000000e+00 : bf16
    %8 = vector.broadcast %cst_6 : bf16 to vector<1x24x128xbf16>
    %c0_7 = arith.constant 0 : index
    %c0_8 = arith.constant 0 : index
    %c0_9 = arith.constant 0 : index
    %c0_10 = arith.constant 0 : index
    %9 = vector.load %arg6[%c0_7, %c0_8, %c0_9, %c0_10] : memref<1x18x24x128xbf16, #tpu.memory_space<vmem>>, vector<1x1x24x128xbf16>
    %10 = vector.shape_cast %9 : vector<1x1x24x128xbf16> to vector<1x24x128xbf16>
    %11 = vector.shape_cast %8 : vector<1x24x128xbf16> to vector<1x1x24x128xbf16>
    tpu.vector_store %arg6[%c0_7, %c0_8, %c0_9, %c0_10], %11 {strides = array<i32>} : memref<1x18x24x128xbf16, #tpu.memory_space<vmem>>, vector<1x1x24x128xbf16>,
    %c0_11 = arith.constant 0 : index
    %c17 = arith.constant 17 : index
    %c0_12 = arith.constant 0 : index
    %c0_13 = arith.constant 0 : index
    %12 = vector.load %arg6[%c0_11, %c17, %c0_12, %c0_13] : memref<1x18x24x128xbf16, #tpu.memory_space<vmem>>, vector<1x1x24x128xbf16>
    %13 = vector.shape_cast %12 : vector<1x1x24x128xbf16> to vector<1x24x128xbf16>
    %14 = vector.shape_cast %8 : vector<1x24x128xbf16> to vector<1x1x24x128xbf16>
    tpu.vector_store %arg6[%c0_11, %c17, %c0_12, %c0_13], %14 {strides = array<i32>} : memref<1x18x24x128xbf16, #tpu.memory_space<vmem>>, vector<1x1x24x128xbf16>,
    %c0_14 = arith.constant 0 : index
    %c0_15 = arith.constant 0 : index
    %15 = vector.load %arg4[%c0_14, %c0_15] : memref<1x128xf32, #tpu.memory_space<vmem>>, vector<1x128xf32>
    %16 = vector.shape_cast %15 : vector<1x128xf32> to vector<128xf32>
    %c0_16 = arith.constant 0 : index
    %c0_17 = arith.constant 0 : index
    %17 = vector.load %arg5[%c0_16, %c0_17] : memref<1x128xf32, #tpu.memory_space<vmem>>, vector<1x128xf32>
    %18 = vector.shape_cast %17 : vector<1x128xf32> to vector<128xf32>
    %19 = tpu.iota {dimensions = array<i32: 1>} : vector<1x24x1xi32>
    %c1_i32 = arith.constant 1 : i32
    %20 = vector.broadcast %c1_i32 : i32 to vector<1x24x1xi32>
    %21 = arith.cmpi sge, %19, %20 : vector<1x24x1xi32>
    %c16_i32 = arith.constant 16 : i32
    %22 = vector.broadcast %c16_i32 : i32 to vector<1x24x1xi32>
    %23 = arith.cmpi sle, %19, %22 : vector<1x24x1xi32>
    %24 = arith.andi %21, %23 : vector<1x24x1xi1>
    %cst_18 = arith.constant 0.000000e+00 : bf16
    %25 = vector.broadcast %cst_18 : bf16 to vector<16x1x128xbf16>
    %cst_19 = arith.constant 0.000000e+00 : bf16
    %26 = vector.broadcast %cst_19 : bf16 to vector<16x7x128xbf16>
    %c0_i32 = arith.constant 0 : i32
    %c1_i32_20 = arith.constant 1 : i32
    %27 = arith.muli %c0_i32, %c1_i32_20 : i32
    %c0_i32_21 = arith.constant 0 : i32
    %28 = arith.addi %c0_i32_21, %27 : i32
    %c16_i32_22 = arith.constant 16 : i32
    %29 = arith.muli %28, %c16_i32_22 : i32
    %30 = tpu.assume_multiple %29, 16 : i32
    %c0_23 = arith.constant 0 : index
    %31 = arith.index_cast %30 : i32 to index
    %c0_24 = arith.constant 0 : index
    %c0_25 = arith.constant 0 : index
    %32 = vector.load %arg2[%c0_23, %31, %c0_24, %c0_25] : memref<1x18x24x128xbf16, #tpu.memory_space<vmem>>, vector<1x18x24x128xbf16>
    %33 = vector.shape_cast %32 : vector<1x18x24x128xbf16> to vector<18x24x128xbf16>
    %34 = arith.extf %33 : vector<18x24x128xbf16> to vector<18x24x128xf32>
    %35 = vector.shape_cast %16 : vector<128xf32> to vector<1x1x128xf32>
    %36 = vector.broadcast %35 : vector<1x1x128xf32> to vector<18x24x128xf32>
    %37 = arith.mulf %34, %36 : vector<18x24x128xf32>
    %38 = vector.shape_cast %18 : vector<128xf32> to vector<1x1x128xf32>
    %39 = vector.broadcast %38 : vector<1x1x128xf32> to vector<18x24x128xf32>
    %40 = arith.addf %37, %39 : vector<18x24x128xf32>
    %cst_26 = arith.constant 0.000000e+00 : f32
    %41 = vector.broadcast %cst_26 : f32 to vector<18x24x128xf32>
    %42 = arith.maximumf %40, %41 : vector<18x24x128xf32>
    %43 = tpu.iota {dimensions = array<i32: 0>} : vector<18x1x1xi32>
    %44 = vector.broadcast %30 : i32 to vector<18x1x1xi32>
    %45 = arith.addi %44, %43 : vector<18x1x1xi32>
    %c1_i32_27 = arith.constant 1 : i32
    %46 = vector.broadcast %c1_i32_27 : i32 to vector<18x1x1xi32>
    %47 = arith.cmpi sge, %45, %46 : vector<18x1x1xi32>
    %48 = vector.broadcast %24 : vector<1x24x1xi1> to vector<18x24x1xi1>
    %49 = vector.broadcast %47 : vector<18x1x1xi1> to vector<18x24x1xi1>
    %50 = arith.andi %48, %49 : vector<18x24x1xi1>
    %c16_i32_28 = arith.constant 16 : i32
    %51 = vector.broadcast %c16_i32_28 : i32 to vector<18x1x1xi32>
    %52 = arith.cmpi sle, %45, %51 : vector<18x1x1xi32>
    %53 = vector.broadcast %52 : vector<18x1x1xi1> to vector<18x24x1xi1>
    %54 = arith.andi %50, %53 : vector<18x24x1xi1>
    %cst_29 = arith.constant 0.000000e+00 : f32
    %55 = vector.shape_cast %54 : vector<18x24x1xi1> to vector<18x24x1xi1>
    %56 = vector.broadcast %55 : vector<18x24x1xi1> to vector<18x24x128xi1>
    %57 = vector.broadcast %cst_29 : f32 to vector<18x24x128xf32>
    %58 = arith.select %56, %42, %57 : vector<18x24x128xi1>, vector<18x24x128xf32>
    %59 = arith.truncf %58 : vector<18x24x128xf32> to vector<18x24x128xbf16>
    %60 = vector.extract_strided_slice %59 {offsets = [0, 0, 0], sizes = [18, 16, 128], strides = [1, 1, 1]} : vector<18x24x128xbf16> to vector<18x16x128xbf16>
    %61 = vector.extract_strided_slice %59 {offsets = [0, 1, 0], sizes = [18, 16, 128], strides = [1, 1, 1]} : vector<18x24x128xbf16> to vector<18x16x128xbf16>
    %62 = vector.extract_strided_slice %59 {offsets = [0, 2, 0], sizes = [18, 16, 128], strides = [1, 1, 1]} : vector<18x24x128xbf16> to vector<18x16x128xbf16>
    %63 = tpu.concatenate %60, %61, %62 in 2 : vector<18x16x128xbf16>, vector<18x16x128xbf16>, vector<18x16x128xbf16> -> vector<18x16x384xbf16>
    %cst_30 = arith.constant 0.000000e+00 : f32
    %64 = vector.broadcast %cst_30 : f32 to vector<256x128xf32>
    %65 = vector.extract_strided_slice %63 {offsets = [0, 0, 0], sizes = [16, 16, 384], strides = [1, 1, 1]} : vector<18x16x384xbf16> to vector<16x16x384xbf16>
    %66 = vector.shape_cast %65 : vector<16x16x384xbf16> to vector<256x384xbf16>
    %c0_31 = arith.constant 0 : index
    %c0_32 = arith.constant 0 : index
    %c0_33 = arith.constant 0 : index
    %67 = vector.load %arg3[%c0_31, %c0_32, %c0_33] : memref<3x384x128xbf16, #tpu.memory_space<vmem>>, vector<1x384x128xbf16>
    %68 = vector.shape_cast %67 : vector<1x384x128xbf16> to vector<384x128xbf16>
    %cst_34 = arith.constant dense<0.000000e+00> : vector<256x128xf32>
    %69 = tpu.matmul %66, %68, %cst_34 {dimension_numbers = #tpu.dot_dimension_numbers<[1], [0], [0], [1], [0, 0, 1, 1], [], []>} : vector<256x384xbf16>, vector<384x128xbf16>, vector<256x128xf32> -> vector<256x128xf32>
    %70 = arith.addf %64, %69 : vector<256x128xf32>
    %71 = vector.extract_strided_slice %63 {offsets = [1, 0, 0], sizes = [16, 16, 384], strides = [1, 1, 1]} : vector<18x16x384xbf16> to vector<16x16x384xbf16>
    %72 = vector.shape_cast %71 : vector<16x16x384xbf16> to vector<256x384xbf16>
    %c1 = arith.constant 1 : index
    %c0_35 = arith.constant 0 : index
    %c0_36 = arith.constant 0 : index
    %73 = vector.load %arg3[%c1, %c0_35, %c0_36] : memref<3x384x128xbf16, #tpu.memory_space<vmem>>, vector<1x384x128xbf16>
    %74 = vector.shape_cast %73 : vector<1x384x128xbf16> to vector<384x128xbf16>
    %cst_37 = arith.constant dense<0.000000e+00> : vector<256x128xf32>
    %75 = tpu.matmul %72, %74, %cst_37 {dimension_numbers = #tpu.dot_dimension_numbers<[1], [0], [0], [1], [0, 0, 1, 1], [], []>} : vector<256x384xbf16>, vector<384x128xbf16>, vector<256x128xf32> -> vector<256x128xf32>
    %76 = arith.addf %70, %75 : vector<256x128xf32>
    %77 = vector.extract_strided_slice %63 {offsets = [2, 0, 0], sizes = [16, 16, 384], strides = [1, 1, 1]} : vector<18x16x384xbf16> to vector<16x16x384xbf16>
    %78 = vector.shape_cast %77 : vector<16x16x384xbf16> to vector<256x384xbf16>
    %c2 = arith.constant 2 : index
    %c0_38 = arith.constant 0 : index
    %c0_39 = arith.constant 0 : index
    %79 = vector.load %arg3[%c2, %c0_38, %c0_39] : memref<3x384x128xbf16, #tpu.memory_space<vmem>>, vector<1x384x128xbf16>
    %80 = vector.shape_cast %79 : vector<1x384x128xbf16> to vector<384x128xbf16>
    %cst_40 = arith.constant dense<0.000000e+00> : vector<256x128xf32>
    %81 = tpu.matmul %78, %80, %cst_40 {dimension_numbers = #tpu.dot_dimension_numbers<[1], [0], [0], [1], [0, 0, 1, 1], [], []>} : vector<256x384xbf16>, vector<384x128xbf16>, vector<256x128xf32> -> vector<256x128xf32>
    %82 = arith.addf %76, %81 : vector<256x128xf32>
    %83 = vector.shape_cast %82 : vector<256x128xf32> to vector<16x16x128xf32>
    %84 = vector.shape_cast %83 : vector<16x16x128xf32> to vector<256x128xf32>
    %c0_41 = arith.constant 0 : index
    %c0_42 = arith.constant 0 : index
    %c0_43 = arith.constant 0 : index
    %85 = vector.load %arg7[%c0_41, %c0_42, %c0_43] : memref<1x1x128xf32, #tpu.memory_space<vmem>>, vector<1x1x128xf32>
    %86 = vector.shape_cast %85 : vector<1x1x128xf32> to vector<1x128xf32>
    %cst_44 = arith.constant dense<0.000000e+00> : vector<128xf32>
    %87 = vector.multi_reduction <add>, %84, %cst_44 [0] : vector<256x128xf32> to vector<128xf32>
    %88 = vector.shape_cast %87 : vector<128xf32> to vector<1x128xf32>
    %89 = arith.addf %86, %88 : vector<1x128xf32>
    %c0_45 = arith.constant 0 : index
    %c0_46 = arith.constant 0 : index
    %c0_47 = arith.constant 0 : index
    %90 = vector.load %arg7[%c0_45, %c0_46, %c0_47] : memref<1x1x128xf32, #tpu.memory_space<vmem>>, vector<1x1x128xf32>
    %91 = vector.shape_cast %90 : vector<1x1x128xf32> to vector<1x128xf32>
    %92 = vector.shape_cast %89 : vector<1x128xf32> to vector<1x1x128xf32>
    tpu.vector_store %arg7[%c0_45, %c0_46, %c0_47], %92 {strides = array<i32>} : memref<1x1x128xf32, #tpu.memory_space<vmem>>, vector<1x1x128xf32>,
    %c0_48 = arith.constant 0 : index
    %c0_49 = arith.constant 0 : index
    %c0_50 = arith.constant 0 : index
    %93 = vector.load %arg8[%c0_48, %c0_49, %c0_50] : memref<1x1x128xf32, #tpu.memory_space<vmem>>, vector<1x1x128xf32>
    %94 = vector.shape_cast %93 : vector<1x1x128xf32> to vector<1x128xf32>
    %95 = arith.mulf %84, %84 : vector<256x128xf32>
    %cst_51 = arith.constant dense<0.000000e+00> : vector<128xf32>
    %96 = vector.multi_reduction <add>, %95, %cst_51 [0] : vector<256x128xf32> to vector<128xf32>
    %97 = vector.shape_cast %96 : vector<128xf32> to vector<1x128xf32>
    %98 = arith.addf %94, %97 : vector<1x128xf32>
    %c0_52 = arith.constant 0 : index
    %c0_53 = arith.constant 0 : index
    %c0_54 = arith.constant 0 : index
    %99 = vector.load %arg8[%c0_52, %c0_53, %c0_54] : memref<1x1x128xf32, #tpu.memory_space<vmem>>, vector<1x1x128xf32>
    %100 = vector.shape_cast %99 : vector<1x1x128xf32> to vector<1x128xf32>
    %101 = vector.shape_cast %98 : vector<1x128xf32> to vector<1x1x128xf32>
    tpu.vector_store %arg8[%c0_52, %c0_53, %c0_54], %101 {strides = array<i32>} : memref<1x1x128xf32, #tpu.memory_space<vmem>>, vector<1x1x128xf32>,
    %102 = arith.truncf %83 : vector<16x16x128xf32> to vector<16x16x128xbf16>
    %103 = tpu.concatenate %25, %102, %26 in 1 : vector<16x1x128xbf16>, vector<16x16x128xbf16>, vector<16x7x128xbf16> -> vector<16x24x128xbf16>
    %c1_i32_55 = arith.constant 1 : i32
    %104 = arith.addi %30, %c1_i32_55 : i32
    %c0_56 = arith.constant 0 : index
    %105 = arith.index_cast %104 : i32 to index
    %c0_57 = arith.constant 0 : index
    %c0_58 = arith.constant 0 : index
    %106 = vector.load %arg6[%c0_56, %105, %c0_57, %c0_58] : memref<1x18x24x128xbf16, #tpu.memory_space<vmem>>, vector<1x16x24x128xbf16>
    %107 = vector.shape_cast %106 : vector<1x16x24x128xbf16> to vector<16x24x128xbf16>
    %108 = vector.shape_cast %103 : vector<16x24x128xbf16> to vector<1x16x24x128xbf16>
    tpu.vector_store %arg6[%c0_56, %105, %c0_57, %c0_58], %108 {strides = array<i32>} : memref<1x18x24x128xbf16, #tpu.memory_space<vmem>>, vector<1x16x24x128xbf16>,
    %c1_i32_59 = arith.constant 1 : i32
    return
  }
  func.func @transform_0(%arg0: i32, %arg1: i32) -> (i32, i32, i32, i32) {
    %c0_i32 = arith.constant 0 : i32
    %c0_i32_0 = arith.constant 0 : i32
    %c0_i32_1 = arith.constant 0 : i32
    %c0_i32_2 = arith.constant 0 : i32
    return %arg0, %c0_i32, %c0_i32_0, %c0_i32_1 : i32, i32, i32, i32
  }
  func.func @transform_1(%arg0: i32, %arg1: i32) -> (i32, i32, i32) {
    %c0_i32 = arith.constant 0 : i32
    %c0_i32_0 = arith.constant 0 : i32
    %c0_i32_1 = arith.constant 0 : i32
    return %c0_i32, %c0_i32_0, %arg1 : i32, i32, i32
  }
  func.func @transform_2(%arg0: i32, %arg1: i32) -> (i32, i32) {
    %c0_i32 = arith.constant 0 : i32
    %c0_i32_0 = arith.constant 0 : i32
    %c0_i32_1 = arith.constant 0 : i32
    return %c0_i32, %c0_i32_0 : i32, i32
  }
  func.func @transform_3(%arg0: i32, %arg1: i32) -> (i32, i32) {
    %c0_i32 = arith.constant 0 : i32
    %c0_i32_0 = arith.constant 0 : i32
    %c0_i32_1 = arith.constant 0 : i32
    return %c0_i32, %c0_i32_0 : i32, i32
  }
  func.func @transform_4(%arg0: i32, %arg1: i32) -> (i32, i32, i32, i32) {
    %c0_i32 = arith.constant 0 : i32
    %c0_i32_0 = arith.constant 0 : i32
    %c0_i32_1 = arith.constant 0 : i32
    return %arg0, %c0_i32, %c0_i32_0, %arg1 : i32, i32, i32, i32
  }
  func.func @transform_5(%arg0: i32, %arg1: i32) -> (i32, i32, i32) {
    %c0_i32 = arith.constant 0 : i32
    %c0_i32_0 = arith.constant 0 : i32
    return %arg0, %c0_i32, %arg1 : i32, i32, i32
  }
  func.func @transform_6(%arg0: i32, %arg1: i32) -> (i32, i32, i32) {
    %c0_i32 = arith.constant 0 : i32
    %c0_i32_0 = arith.constant 0 : i32
    return %arg0, %c0_i32, %arg1 : i32, i32, i32
  }
}

</mosaic_0001>

<bundles_post_ra>
// kernel: double_conv.5
= control target key start
LH: loop header
LB: loop body
LE: loop exit
PB: predicated region body
PF: predicated region fallthrough
CT: control target
= control target key end

     0   :  { %s813_s12 = smov 0   ;;  %s815_s13 = smov 0   ;;  %s1044_s0 = inlined_call_operand.vmem [shape: bf16[2,18,24,128], index: 0, kind: input, shape index: {}]   ;;  %s1045_s1 = inlined_call_operand.vmem [shape: f32[1,128], index: 1, kind: input, shape index: {}]   ;;  %s1046_s2 = inlined_call_operand.vmem [shape: f32[1,128], index: 2, kind: input, shape index: {}]   ;;  %s1047_s3 = inlined_call_operand.vmem [shape: f32[2,16,16,128], index: 3, kind: output, shape index: {}]  }
   0x1   :  { %s817_s14 = smov 0  }
   0x2 LB: > { %s25_s15 = sadd.s32 1, %s787_s13  ;;  %p647_p0 = scmp.ge.s32.totalorder %s791_s14, 1  ;;  %s791_s14 = sphi %s817_s14, %s13_s14   ;;  %s787_s13 = sphi %s815_s13, %s1049_s13   ;;  %s783_s12 = sphi %s813_s12, %s1048_s12  }
   0x3   : > { %p27_p1 = scmp.ge.s32.totalorder %s25_s15, 2  ;;  %p172_p2 = scmp.lt.s32.totalorder %s791_s14, 3 }
   0x5   : > { %s1051_s15 = smov (%p27_p1, %s25_s15), 0  ;;  %p173_p3 = pnand %p647_p0, %p172_p2 }
   0x6   : > { %p208_p4 = scmp.lt.s32.totalorder (!%p173_p3), %s783_s12, 1 }
   0x7   : > { %176 = sbr.rel (%p173_p3) target bundleno = 73 (0x49), region = 32 }
   0xc   : > { %s1053_s12 = smov (!%p208_p4, %s783_s12), 1  ;;  %v842_v0 = vld [vmem:[%s1045_s1] ss:$0 sm:$0xff] }
   0xd   : > { %s742_s16 = smul.u32 216, %s1053_s12  ;;  %v850_v5 = vld [vmem:[%s1046_s2] ss:$0 sm:$0xff]  ;;  %s701_s24 = sshll.u32 %s1053_s12, 8 }
   0xe   : > { %s871_s27 = scalar_lea.vmem %s1047_s3, %s701_s24 }
   0xf   : > { %s837_s19 = scalar_lea.vmem %s1044_s0, %s742_s16 }
  0x10   : > { %v651_v1 = vld [vmem:[%s837_s19 + $0xc] sm:$0xff]   ;;  %v653_v2 = vld [vmem:[%s837_s19 + $0x14] sm:$0x1]  ;;  %v734_v3 = vld [vmem:[%s837_s19 + $0x18] sm:$0xff]  }
  0x11   : > { %v284_v4 = vunpack.c.l.bf16 %v651_v1  ;;  %v285_v6 = vunpack.c.h.bf16 %v651_v1  ;;  %v286_v7 = vunpack.c.l.bf16 %v653_v2  ;;  %v704_v8 = vunpack.c.l.bf16 %v734_v3  ;;  %v656_v9 = vld [vmem:[%s837_s19 + $0x20] sm:$0x1]  ;;  %v657_v10 = vld [vmem:[%s837_s19 + $0x24] sm:$0xff]   ;;  %v659_v27 = vld [vmem:[%s837_s19 + $0x2c] sm:$0x1] }
  0x12   : > { %v705_v11 = vunpack.c.h.bf16 %v734_v3  ;;  %v289_v12 = vunpack.c.l.bf16 %v656_v9  ;;  %v290_v13 = vunpack.c.l.bf16 %v657_v10  ;;  %v291_v14 = vunpack.c.h.bf16 %v657_v10  ;;  %v735_v32 = vld [vmem:[%s837_s19 + $0x30] sm:$0xff]   ;;  %v662_v33 = vld [vmem:[%s837_s19 + $0x38] sm:$0x1]  ;;  %v665_v34 = vld [vmem:[%s837_s19 + $0x44] sm:$0x1] }
  0x13   : > { %v335_v15 = vmul.f32 %v842_v0, %v284_v4  ;;  %v336_v16 = vmul.f32 %v842_v0, %v285_v6  ;;  %v337_v17 = vmul.f32 %v842_v0, %v286_v7  ;;  %v338_v18 = vmul.f32 %v842_v0, %v704_v8  ;;  %v663_v39 = vld [vmem:[%s837_s19 + $0x3c] sm:$0xff]   ;;  %v736_v40 = vld [vmem:[%s837_s19 + $0x48] sm:$0xff]   ;;  %v668_v2 = vld [vmem:[%s837_s19 + $0x50] sm:$0x1] }
  0x14   : > { %v339_v19 = vmul.f32 %v842_v0, %v705_v11  ;;  %v340_v20 = vmul.f32 %v842_v0, %v289_v12  ;;  %v341_v21 = vmul.f32 %v842_v0, %v290_v13  ;;  %v342_v22 = vmul.f32 %v842_v0, %v291_v14  ;;  %v671_v3 = vld [vmem:[%s837_s19 + $0x5c] sm:$0x1]  ;;  %v669_v9 = vld [vmem:[%s837_s19 + $0x54] sm:$0xff]   ;;  %v737_v10 = vld [vmem:[%s837_s19 + $0x60] sm:$0xff]  }
  0x15   : > { %v386_v23 = vadd.f32 %v850_v5, %v335_v15  ;;  %v387_v24 = vadd.f32 %v850_v5, %v336_v16  ;;  %v388_v25 = vadd.f32 %v850_v5, %v337_v17  ;;  %v389_v26 = vadd.f32 %v850_v5, %v338_v18  ;;  %v674_v11 = vld [vmem:[%s837_s19 + $0x68] sm:$0x1] }
  0x16   : > { %v390_v28 = vadd.f32 %v850_v5, %v339_v19  ;;  %v391_v29 = vadd.f32 %v850_v5, %v340_v20  ;;  %v392_v30 = vadd.f32 %v850_v5, %v341_v21  ;;  %v393_v31 = vadd.f32 %v850_v5, %v342_v22 }
  0x17   : > { %v434_v35 = vmax.f32 %v386_v23, 0.0  ;;  %v435_v36 = vmax.f32 %v387_v24, 0.0  ;;  %v436_v37 = vmax.f32 %v388_v25, 0.0  ;;  %v437_v38 = vmax.f32 %v389_v26, 0.0 }
  0x18   : > { %v438_v41 = vmax.f32 %v390_v28, 0.0  ;;  %v439_v42 = vmax.f32 %v391_v29, 0.0  ;;  %v440_v43 = vmax.f32 %v392_v30, 0.0  ;;  %v441_v44 = vmax.f32 %v393_v31, 0.0 }
  0x19   : > { %484 = vst [vmem:[%s871_s27 - $0x1] sm:$0xfe] %v434_v35  ;;  %v292_v45 = vunpack.c.l.bf16 %v659_v27  ;;  %v708_v46 = vunpack.c.l.bf16 %v735_v32  ;;  %v709_v47 = vunpack.c.h.bf16 %v735_v32  ;;  %v295_v48 = vunpack.c.l.bf16 %v662_v33 }
  0x1a   : > { %485 = vst [vmem:[%s871_s27 + $0x7] sm:$0xff] %v435_v36  ;;  %v296_v49 = vunpack.c.l.bf16 %v663_v39  ;;  %v297_v50 = vunpack.c.h.bf16 %v663_v39  ;;  %v298_v51 = vunpack.c.l.bf16 %v665_v34  ;;  %v712_v52 = vunpack.c.l.bf16 %v736_v40 }
  0x1b   : > { %486 = vst [vmem:[%s871_s27 + $0xf] sm:$0x1] %v436_v37  ;;  %v343_v53 = vmul.f32 %v842_v0, %v292_v45  ;;  %v344_v54 = vmul.f32 %v842_v0, %v708_v46  ;;  %v345_v55 = vmul.f32 %v842_v0, %v709_v47  ;;  %v346_v56 = vmul.f32 %v842_v0, %v295_v48  ;;  %v738_v46 = vld [vmem:[%s837_s19 + $0x78] sm:$0xff]   ;;  %v680_v47 = vld [vmem:[%s837_s19 + $0x80] sm:$0x1]  ;;  %v681_v48 = vld [vmem:[%s837_s19 + $0x84] sm:$0xff]  }
  0x1c   : > { %487 = vst [vmem:[%s871_s27 + $0xf] sm:$0xfe] %v437_v38  ;;  %v347_v57 = vmul.f32 %v842_v0, %v296_v49  ;;  %v348_v58 = vmul.f32 %v842_v0, %v297_v50  ;;  %v349_v59 = vmul.f32 %v842_v0, %v298_v51  ;;  %v350_v60 = vmul.f32 %v842_v0, %v712_v52 }
  0x1d   : > { %488 = vst [vmem:[%s871_s27 + $0x17] sm:$0xff] %v438_v41  ;;  %v394_v61 = vadd.f32 %v850_v5, %v343_v53  ;;  %v395_v62 = vadd.f32 %v850_v5, %v344_v54  ;;  %v396_v63 = vadd.f32 %v850_v5, %v345_v55  ;;  %v397_v1 = vadd.f32 %v850_v5, %v346_v56  ;;  %v677_v41 = vld [vmem:[%s837_s19 + $0x74] sm:$0x1] }
  0x1e   : > { %489 = vst [vmem:[%s871_s27 + $0x1f] sm:$0x1] %v439_v42  ;;  %v398_v4 = vadd.f32 %v850_v5, %v347_v57  ;;  %v399_v6 = vadd.f32 %v850_v5, %v348_v58  ;;  %v400_v7 = vadd.f32 %v850_v5, %v349_v59  ;;  %v401_v8 = vadd.f32 %v850_v5, %v350_v60 }
  0x1f   : > { %490 = vst [vmem:[%s871_s27 + $0x1f] sm:$0xfe] %v440_v43  ;;  %v442_v12 = vmax.f32 %v394_v61, 0.0  ;;  %v443_v13 = vmax.f32 %v395_v62, 0.0  ;;  %v444_v14 = vmax.f32 %v396_v63, 0.0  ;;  %v445_v15 = vmax.f32 %v397_v1, 0.0 }
  0x20   : > { %491 = vst [vmem:[%s871_s27 + $0x27] sm:$0xff] %v441_v44  ;;  %v446_v16 = vmax.f32 %v398_v4, 0.0  ;;  %v447_v17 = vmax.f32 %v399_v6, 0.0  ;;  %v448_v18 = vmax.f32 %v400_v7, 0.0  ;;  %v449_v19 = vmax.f32 %v401_v8, 0.0 }
  0x21   : > { %492 = vst [vmem:[%s871_s27 + $0x2f] sm:$0x1] %v442_v12  ;;  %v713_v20 = vunpack.c.h.bf16 %v736_v40  ;;  %v301_v21 = vunpack.c.l.bf16 %v668_v2  ;;  %v302_v22 = vunpack.c.l.bf16 %v669_v9  ;;  %v303_v23 = vunpack.c.h.bf16 %v669_v9  ;;  %v675_v40 = vld [vmem:[%s837_s19 + $0x6c] sm:$0xff]  }
  0x22   : > { %493 = vst [vmem:[%s871_s27 + $0x2f] sm:$0xfe] %v443_v13  ;;  %v304_v24 = vunpack.c.l.bf16 %v671_v3  ;;  %v716_v25 = vunpack.c.l.bf16 %v737_v10  ;;  %v717_v26 = vunpack.c.h.bf16 %v737_v10  ;;  %v307_v27 = vunpack.c.l.bf16 %v674_v11 }
  0x23   : > { %494 = vst [vmem:[%s871_s27 + $0x37] sm:$0xff] %v444_v14  ;;  %v351_v28 = vmul.f32 %v842_v0, %v713_v20  ;;  %v352_v29 = vmul.f32 %v842_v0, %v301_v21  ;;  %v353_v30 = vmul.f32 %v842_v0, %v302_v22  ;;  %v354_v31 = vmul.f32 %v842_v0, %v303_v23  ;;  %v686_v22 = vld [vmem:[%s837_s19 + $0x98] sm:$0x1]  ;;  %v689_v23 = vld [vmem:[%s837_s19 + $0xa4] sm:$0x1] }
  0x24   : > { %495 = vst [vmem:[%s871_s27 + $0x3f] sm:$0x1] %v445_v15  ;;  %v355_v32 = vmul.f32 %v842_v0, %v304_v24  ;;  %v356_v33 = vmul.f32 %v842_v0, %v716_v25  ;;  %v357_v34 = vmul.f32 %v842_v0, %v717_v26  ;;  %v358_v35 = vmul.f32 %v842_v0, %v307_v27  ;;  %v683_v15 = vld [vmem:[%s837_s19 + $0x8c] sm:$0x1] }
  0x25   : > { %496 = vst [vmem:[%s871_s27 + $0x3f] sm:$0xfe] %v446_v16  ;;  %v402_v36 = vadd.f32 %v850_v5, %v351_v28  ;;  %v403_v37 = vadd.f32 %v850_v5, %v352_v29  ;;  %v404_v38 = vadd.f32 %v850_v5, %v353_v30  ;;  %v405_v39 = vadd.f32 %v850_v5, %v354_v31  ;;  %v739_v16 = vld [vmem:[%s837_s19 + $0x90] sm:$0xff]   ;;  %v969_v28 = vld [vmem:[%s837_s19 + $0xa8] sm:$0xff]  }
  0x26   : > { %497 = vst [vmem:[%s871_s27 + $0x47] sm:$0xff] %v447_v17  ;;  %v406_v42 = vadd.f32 %v850_v5, %v355_v32  ;;  %v407_v43 = vadd.f32 %v850_v5, %v356_v33  ;;  %v408_v44 = vadd.f32 %v850_v5, %v357_v34  ;;  %v409_v45 = vadd.f32 %v850_v5, %v358_v35  ;;  %v687_v17 = vld [vmem:[%s837_s19 + $0x9c] sm:$0xff]  }
  0x27   : > { %498 = vst [vmem:[%s871_s27 + $0x4f] sm:$0x1] %v448_v18  ;;  %v450_v49 = vmax.f32 %v402_v36, 0.0  ;;  %v451_v50 = vmax.f32 %v403_v37, 0.0  ;;  %v452_v51 = vmax.f32 %v404_v38, 0.0  ;;  %v453_v52 = vmax.f32 %v405_v39, 0.0 }
  0x28   : > { %499 = vst [vmem:[%s871_s27 + $0x4f] sm:$0xfe] %v449_v19  ;;  %v454_v53 = vmax.f32 %v406_v42, 0.0  ;;  %v455_v54 = vmax.f32 %v407_v43, 0.0  ;;  %v456_v55 = vmax.f32 %v408_v44, 0.0  ;;  %v457_v56 = vmax.f32 %v409_v45, 0.0 }
  0x29   : > { %500 = vst [vmem:[%s871_s27 + $0x57] sm:$0xff] %v450_v49  ;;  %v308_v57 = vunpack.c.l.bf16 %v675_v40  ;;  %v309_v58 = vunpack.c.h.bf16 %v675_v40  ;;  %v310_v59 = vunpack.c.l.bf16 %v677_v41  ;;  %v720_v60 = vunpack.c.l.bf16 %v738_v46 }
  0x2a   : > { %501 = vst [vmem:[%s871_s27 + $0x5f] sm:$0x1] %v451_v50  ;;  %v721_v61 = vunpack.c.h.bf16 %v738_v46  ;;  %v313_v62 = vunpack.c.l.bf16 %v680_v47  ;;  %v314_v63 = vunpack.c.l.bf16 %v681_v48  ;;  %v315_v1 = vunpack.c.h.bf16 %v681_v48 }
  0x2b   : > { %502 = vst [vmem:[%s871_s27 + $0x5f] sm:$0xfe] %v452_v51  ;;  %v359_v2 = vmul.f32 %v842_v0, %v308_v57  ;;  %v360_v3 = vmul.f32 %v842_v0, %v309_v58  ;;  %v361_v4 = vmul.f32 %v842_v0, %v310_v59  ;;  %v362_v6 = vmul.f32 %v842_v0, %v720_v60  ;;  %v693_v59 = vld [vmem:[%s837_s19 + $0xb4] sm:$0xff]   ;;  %v741_v60 = vld [vmem:[%s837_s19 + $0xc0] sm:$0xff]  }
  0x2c   : > { %503 = vst [vmem:[%s871_s27 + $0x67] sm:$0xff] %v453_v52  ;;  %v363_v7 = vmul.f32 %v842_v0, %v721_v61  ;;  %v364_v8 = vmul.f32 %v842_v0, %v313_v62  ;;  %v365_v9 = vmul.f32 %v842_v0, %v314_v63  ;;  %v366_v10 = vmul.f32 %v842_v0, %v315_v1  ;;  %v698_v61 = vld [vmem:[%s837_s19 + $0xc8] sm:$0x1] }
  0x2d   : > { %504 = vst [vmem:[%s871_s27 + $0x6f] sm:$0x1] %v454_v53  ;;  %v410_v11 = vadd.f32 %v850_v5, %v359_v2  ;;  %v411_v12 = vadd.f32 %v850_v5, %v360_v3  ;;  %v412_v13 = vadd.f32 %v850_v5, %v361_v4  ;;  %v413_v14 = vadd.f32 %v850_v5, %v362_v6  ;;  %v692_v53 = vld [vmem:[%s837_s19 + $0xb0] sm:$0x1] }
  0x2e   : > { %505 = vst [vmem:[%s871_s27 + $0x6f] sm:$0xfe] %v455_v54  ;;  %v414_v18 = vadd.f32 %v850_v5, %v363_v7  ;;  %v415_v19 = vadd.f32 %v850_v5, %v364_v8  ;;  %v416_v20 = vadd.f32 %v850_v5, %v365_v9  ;;  %v417_v21 = vadd.f32 %v850_v5, %v366_v10  ;;  %v695_v54 = vld [vmem:[%s837_s19 + $0xbc] sm:$0x1] }
  0x2f   : > { %506 = vst [vmem:[%s871_s27 + $0x77] sm:$0xff] %v456_v55  ;;  %v458_v24 = vmax.f32 %v410_v11, 0.0  ;;  %v459_v25 = vmax.f32 %v411_v12, 0.0  ;;  %v460_v26 = vmax.f32 %v412_v13, 0.0  ;;  %v461_v27 = vmax.f32 %v413_v14, 0.0 }
  0x30   : > { %507 = vst [vmem:[%s871_s27 + $0x7f] sm:$0x1] %v457_v56  ;;  %v462_v29 = vmax.f32 %v414_v18, 0.0  ;;  %v463_v30 = vmax.f32 %v415_v19, 0.0  ;;  %v464_v31 = vmax.f32 %v416_v20, 0.0  ;;  %v465_v32 = vmax.f32 %v417_v21, 0.0 }
  0x31   : > { %508 = vst [vmem:[%s871_s27 + $0x7f] sm:$0xfe] %v458_v24  ;;  %v316_v33 = vunpack.c.l.bf16 %v683_v15  ;;  %v724_v34 = vunpack.c.l.bf16 %v739_v16  ;;  %v725_v35 = vunpack.c.h.bf16 %v739_v16  ;;  %v319_v36 = vunpack.c.l.bf16 %v686_v22 }
  0x32   : > { %509 = vst [vmem:[%s871_s27 + $0x87] sm:$0xff] %v459_v25  ;;  %v320_v37 = vunpack.c.l.bf16 %v687_v17  ;;  %v321_v38 = vunpack.c.h.bf16 %v687_v17  ;;  %v322_v39 = vunpack.c.l.bf16 %v689_v23  ;;  %v728_v40 = vunpack.c.l.bf16 %v969_v28 }
  0x33   : > { %510 = vst [vmem:[%s871_s27 + $0x8f] sm:$0x1] %v460_v26  ;;  %v367_v41 = vmul.f32 %v842_v0, %v316_v33  ;;  %v368_v42 = vmul.f32 %v842_v0, %v724_v34  ;;  %v369_v43 = vmul.f32 %v842_v0, %v725_v35  ;;  %v370_v44 = vmul.f32 %v842_v0, %v319_v36 }
  0x34   : > { %511 = vst [vmem:[%s871_s27 + $0x8f] sm:$0xfe] %v461_v27  ;;  %v371_v45 = vmul.f32 %v842_v0, %v320_v37  ;;  %v372_v46 = vmul.f32 %v842_v0, %v321_v38  ;;  %v373_v47 = vmul.f32 %v842_v0, %v322_v39  ;;  %v374_v48 = vmul.f32 %v842_v0, %v728_v40 }
  0x35   : > { %512 = vst [vmem:[%s871_s27 + $0x97] sm:$0xff] %v462_v29  ;;  %v418_v49 = vadd.f32 %v850_v5, %v367_v41  ;;  %v419_v50 = vadd.f32 %v850_v5, %v368_v42  ;;  %v420_v51 = vadd.f32 %v850_v5, %v369_v43  ;;  %v421_v52 = vadd.f32 %v850_v5, %v370_v44 }
  0x36   : > { %513 = vst [vmem:[%s871_s27 + $0x9f] sm:$0x1] %v463_v30  ;;  %v422_v55 = vadd.f32 %v850_v5, %v371_v45  ;;  %v423_v56 = vadd.f32 %v850_v5, %v372_v46  ;;  %v424_v57 = vadd.f32 %v850_v5, %v373_v47  ;;  %v425_v58 = vadd.f32 %v850_v5, %v374_v48 }
  0x37   : > { %514 = vst [vmem:[%s871_s27 + $0x9f] sm:$0xfe] %v464_v31  ;;  %v466_v62 = vmax.f32 %v418_v49, 0.0  ;;  %v467_v63 = vmax.f32 %v419_v50, 0.0  ;;  %v468_v1 = vmax.f32 %v420_v51, 0.0  ;;  %v469_v2 = vmax.f32 %v421_v52, 0.0 }
  0x38   : > { %515 = vst [vmem:[%s871_s27 + $0xa7] sm:$0xff] %v465_v32  ;;  %v470_v3 = vmax.f32 %v422_v55, 0.0  ;;  %v471_v4 = vmax.f32 %v423_v56, 0.0  ;;  %v472_v6 = vmax.f32 %v424_v57, 0.0  ;;  %v473_v7 = vmax.f32 %v425_v58, 0.0 }
  0x39   : > { %516 = vst [vmem:[%s871_s27 + $0xaf] sm:$0x1] %v466_v62  ;;  %v729_v8 = vunpack.c.h.bf16 %v969_v28  ;;  %v325_v9 = vunpack.c.l.bf16 %v692_v53  ;;  %v326_v10 = vunpack.c.l.bf16 %v693_v59  ;;  %v327_v11 = vunpack.c.h.bf16 %v693_v59 }
  0x3a   : > { %517 = vst [vmem:[%s871_s27 + $0xaf] sm:$0xfe] %v467_v63  ;;  %v328_v12 = vunpack.c.l.bf16 %v695_v54  ;;  %v732_v13 = vunpack.c.l.bf16 %v741_v60  ;;  %v733_v14 = vunpack.c.h.bf16 %v741_v60  ;;  %v331_v15 = vunpack.c.l.bf16 %v698_v61 }
  0x3b   : > { %518 = vst [vmem:[%s871_s27 + $0xb7] sm:$0xff] %v468_v1  ;;  %v375_v16 = vmul.f32 %v842_v0, %v729_v8  ;;  %v376_v17 = vmul.f32 %v842_v0, %v325_v9  ;;  %v377_v18 = vmul.f32 %v842_v0, %v326_v10  ;;  %v378_v19 = vmul.f32 %v842_v0, %v327_v11 }
  0x3c   : > { %519 = vst [vmem:[%s871_s27 + $0xbf] sm:$0x1] %v469_v2  ;;  %v379_v20 = vmul.f32 %v842_v0, %v328_v12  ;;  %v380_v21 = vmul.f32 %v842_v0, %v732_v13  ;;  %v381_v22 = vmul.f32 %v842_v0, %v733_v14  ;;  %v382_v23 = vmul.f32 %v842_v0, %v331_v15 }
  0x3d   : > { %520 = vst [vmem:[%s871_s27 + $0xbf] sm:$0xfe] %v470_v3  ;;  %v426_v24 = vadd.f32 %v850_v5, %v375_v16  ;;  %v427_v25 = vadd.f32 %v850_v5, %v376_v17  ;;  %v428_v26 = vadd.f32 %v850_v5, %v377_v18  ;;  %v429_v27 = vadd.f32 %v850_v5, %v378_v19 }
  0x3e   : > { %521 = vst [vmem:[%s871_s27 + $0xc7] sm:$0xff] %v471_v4  ;;  %v430_v28 = vadd.f32 %v850_v5, %v379_v20  ;;  %v431_v29 = vadd.f32 %v850_v5, %v380_v21  ;;  %v432_v32 = vadd.f32 %v850_v5, %v381_v22  ;;  %v433_v34 = vadd.f32 %v850_v5, %v382_v23 }
  0x3f   : > { %522 = vst [vmem:[%s871_s27 + $0xcf] sm:$0x1] %v472_v6  ;;  %v474_v0 = vmax.f32 %v426_v24, 0.0  ;;  %v475_v30 = vmax.f32 %v427_v25, 0.0  ;;  %v476_v31 = vmax.f32 %v428_v26, 0.0  ;;  %v477_v33 = vmax.f32 %v429_v27, 0.0 }
  0x40   : > { %523 = vst [vmem:[%s871_s27 + $0xcf] sm:$0xfe] %v473_v7  ;;  %v478_v35 = vmax.f32 %v430_v28, 0.0  ;;  %v479_v36 = vmax.f32 %v431_v29, 0.0  ;;  %v480_v37 = vmax.f32 %v432_v32, 0.0  ;;  %v481_v38 = vmax.f32 %v433_v34, 0.0 }
  0x41   : > { %524 = vst [vmem:[%s871_s27 + $0xd7] sm:$0xff] %v474_v0 }
  0x42   : > { %525 = vst [vmem:[%s871_s27 + $0xdf] sm:$0x1] %v475_v30 }
  0x43   : > { %526 = vst [vmem:[%s871_s27 + $0xdf] sm:$0xfe] %v476_v31 }
  0x44   : > { %527 = vst [vmem:[%s871_s27 + $0xe7] sm:$0xff] %v477_v33 }
  0x45   : > { %528 = vst [vmem:[%s871_s27 + $0xef] sm:$0x1] %v478_v35 }
  0x46   : > { %529 = vst [vmem:[%s871_s27 + $0xef] sm:$0xfe] %v479_v36 }
  0x47   : > { %530 = vst [vmem:[%s871_s27 + $0xf7] sm:$0xff] %v480_v37 }
  0x48   : > { %531 = vst [vmem:[%s871_s27 + $0xff] sm:$0x1] %v481_v38 }
  0x49 PF: > { %s13_s14 = sadd.s32 1, %s791_s14   ;;  %s1048_s12 = smov %s787_s13 }
  0x4a   : > { %p10_p5 = scmp.ge.s32.totalorder %s13_s14, 4   ;;  %s1049_s13 = smov %s1051_s15 }
  0x4c   :  { %12 = sbr.rel (!%p10_p5) target bundleno = 2 (0x2), region = 70 }

// kernel: double_conv.3
= control target key start
LH: loop header
LB: loop body
LE: loop exit
PB: predicated region body
PF: predicated region fallthrough
CT: control target
= control target key end

     0   :  { %s3799_s21 = smov 0   ;;  %s3801_s22 = smov 0   ;;  %s4763_s0 = inlined_call_operand.vmem [shape: bf16[2,18,24,128], index: 0, kind: input, shape index: {}]   ;;  %s4764_s1 = inlined_call_operand.vmem [shape: bf16[3,384,128], index: 1, kind: input, shape index: {}]   ;;  %s4765_s2 = inlined_call_operand.vmem [shape: f32[1,128], index: 2, kind: input, shape index: {}, may-alias: {2,3}]   ;;  %s4766_s3 = inlined_call_operand.vmem [shape: f32[1,128], index: 3, kind: input, shape index: {}, may-alias: {2,3}]   ;;  %s4767_s4 = inlined_call_operand.vmem [shape: bf16[2,18,24,128], index: 4, kind: output, shape index: {0}]   ;;  %s4768_s5 = inlined_call_operand.vmem [shape: f32[2,1,128], index: 5, kind: output, shape index: {1}]   ;;  %s4769_s6 = inlined_call_operand.vmem [shape: f32[2,1,128], index: 6, kind: output, shape index: {2}]  }
   0x1   :  { %s3803_s23 = smov 0  }
   0x2 LB: > { %s29_s2 = sadd.s32 1, %s3756_s22  ;;  %p3070_p0 = scmp.ge.s32.totalorder %s3760_s23, 1  ;;  %s3760_s23 = sphi %s3803_s23, %s17_s23   ;;  %s3756_s22 = sphi %s3801_s22, %s4840_s22   ;;  %s3752_s21 = sphi %s3799_s21, %s4839_s21  }
   0x3   : > { %p31_p1 = scmp.ge.s32.totalorder %s29_s2, 2  ;;  %p244_p2 = scmp.lt.s32.totalorder %s3760_s23, 3 }
   0x5   : > { %s4842_s2 = smov (%p31_p1, %s29_s2), 0  ;;  %p245_p3 = pnand %p3070_p0, %p244_p2 }
   0x7   : > { %248 = sbr.rel (%p245_p3) target bundleno = 771 (0x303), region = 36 }
   0xc   : > { %v3631_v0 = vld [vmem:[%s4764_s1 + $0xf8] sm:$0xff]  ;;  %p293_p4 = scmp.lt.s32.totalorder %s3752_s21, 1  ;;  %v3630_v1 = vld [vmem:[%s4764_s1 + $0xf0] sm:$0xff]  ;;  %v3629_v2 = vld [vmem:[%s4764_s1 + $0xe8] sm:$0xff]  ;;  %v3762_v3 = vmov 0   ;;  %vm786_vm1 = vcmask 1046528  }
   0xd   : > { %1100 = vmatpush.bf16.msra.mxu0 %v3631_v0  ;;  %3672 = vmatpush.bf16.msra.mxu1 %v3631_v0  ;;  %v3628_v4 = vld [vmem:[%s4764_s1 + $0xe0] sm:$0xff]  ;;  %v3627_v5 = vld [vmem:[%s4764_s1 + $0xd8] sm:$0xff]  ;;  %v3626_v6 = vld [vmem:[%s4764_s1 + $0xd0] sm:$0xff]  ;;  %vm551_vm0 = vsmask.f32 7424  ;;  %vm2638_vm2 = vcmask 1040384  }
   0xe   : > { %s4844_s21 = smov (!%p293_p4, %s3752_s21), 1  ;;  %3673 = vmatpush.bf16.msra.mxu2 %v3631_v0  ;;  %3674 = vmatpush.bf16.msra.mxu3 %v3631_v0  ;;  %v3625_v7 = vld [vmem:[%s4764_s1 + $0xc8] sm:$0xff]  ;;  %v3624_v8 = vld [vmem:[%s4764_s1 + $0xc0] sm:$0xff]  ;;  %v3647_v9 = vld [vmem:[%s4764_s1 + $0x178] sm:$0xff]  ;;  %vm2639_vm3 = vsmask.f32 256 }
   0xf   : > { %s3696_s27 = smul.u32 216, %s4844_s21  ;;  %v3607_v10 = vld [vmem:[%s4764_s1 + $0x38] sm:$0xff]  ;;  %v3646_v17 = vld [vmem:[%s4764_s1 + $0x170] sm:$0xff]  ;;  %v3645_v21 = vld [vmem:[%s4764_s1 + $0x168] sm:$0xff]  ;;  %s4713_s10 = scalar_lea.vmem %s4768_s5, %s4844_s21 }
  0x10   : > { %v3639_v15 = vld [vmem:[%s4764_s1 + $0x138] sm:$0xff]  ;;  %v3606_v18 = vld [vmem:[%s4764_s1 + $0x30] sm:$0xff]  ;;  %v3605_v22 = vld [vmem:[%s4764_s1 + $0x28] sm:$0xff]  ;;  %s4720_s13 = scalar_lea.vmem %s4769_s6, %s4844_s21 }
  0x11   : > { %1101 = vmatpush.bf16.msra.mxu0 %v3630_v1  ;;  %3675 = vmatpush.bf16.msra.mxu1 %v3630_v1  ;;  %s3834_s8 = scalar_lea.vmem %s4767_s4, %s3696_s27  ;;  %s3862_s3 = scalar_lea.vmem %s4763_s0, %s3696_s27  ;;  %v3615_v16 = vld [vmem:[%s4764_s1 + $0x78] sm:$0xff]  ;;  %v3638_v19 = vld [vmem:[%s4764_s1 + $0x130] sm:$0xff]  ;;  %v3637_v23 = vld [vmem:[%s4764_s1 + $0x128] sm:$0xff] }
  0x12   : > { %3676 = vmatpush.bf16.msra.mxu2 %v3630_v1  ;;  %3677 = vmatpush.bf16.msra.mxu3 %v3630_v1  ;;  %325 = vst [vmem:[%s3834_s8] sm:$0xf] %v3762_v3  ;;  %v3871_v11 = vld [vmem:[%s3862_s3 + $0xc] sm:$0xff]  ;;  %v3874_v12 = vld [vmem:[%s3862_s3 + $0x3c] sm:$0xff]  ;;  %v3993_v49 = vld [vmem:[%s3862_s3 + $0x24] sm:$0xff] }
  0x13   : > { %326 = vst [vmem:[%s3834_s8 + $0x4] sm:$0xf] %v3762_v3  ;;  %v3877_v13 = vld [vmem:[%s3862_s3 + $0x6c] sm:$0xff]  ;;  %v3880_v14 = vld [vmem:[%s3862_s3 + $0x9c] sm:$0xff]  ;;  %v3996_v50 = vld [vmem:[%s3862_s3 + $0x54] sm:$0xff] }
  0x14   : > { %327 = vst [vmem:[%s3834_s8 + $0x8] sm:$0xf] %v3762_v3  ;;  %v3614_v20 = vld [vmem:[%s4764_s1 + $0x70] sm:$0xff]  ;;  %v3613_v24 = vld [vmem:[%s4764_s1 + $0x68] sm:$0xff]  ;;  %v3644_v25 = vld [vmem:[%s4764_s1 + $0x160] sm:$0xff] }
  0x15   : > { %1102 = vmatpush.bf16.msra.mxu0 %v3629_v2  ;;  %3678 = vmatpush.bf16.msra.mxu1 %v3629_v2  ;;  %3073 = vst [vmem:[%s3834_s8 + $0xcc] sm:$0xf] %v3762_v3  ;;  %v3604_v26 = vld [vmem:[%s4764_s1 + $0x20] sm:$0xff]  ;;  %v3643_v29 = vld [vmem:[%s4764_s1 + $0x158] sm:$0xff]  ;;  %v3938_v32 = vld [vmem:[%s3862_s3 + $0x48] sm:$0xff] }
  0x16   : > { %3679 = vmatpush.bf16.msra.mxu2 %v3629_v2  ;;  %3680 = vmatpush.bf16.msra.mxu3 %v3629_v2  ;;  %3074 = vst [vmem:[%s3834_s8 + $0xd0] sm:$0xf] %v3762_v3  ;;  %v3636_v27 = vld [vmem:[%s4764_s1 + $0x120] sm:$0xff]  ;;  %v3603_v30 = vld [vmem:[%s4764_s1 + $0x18] sm:$0xff]  ;;  %v3944_v34 = vld [vmem:[%s3862_s3 + $0xa8] sm:$0xff]  ;;  %v567_v2 = vshll.u32 %v3871_v11, 16 }
  0x17   : > { %3075 = vst [vmem:[%s3834_s8 + $0xd4] sm:$0xf] %v3762_v3  ;;  %v3612_v28 = vld [vmem:[%s4764_s1 + $0x60] sm:$0xff]  ;;  %v3935_v31 = vld [vmem:[%s3862_s3 + $0x18] sm:$0xff]  ;;  %v3642_v37 = vld [vmem:[%s4764_s1 + $0x150] sm:$0xff] }
  0x18   : > { %v3941_v33 = vld [vmem:[%s3862_s3 + $0x78] sm:$0xff]  ;;  %v3602_v38 = vld [vmem:[%s4764_s1 + $0x10] sm:$0xff]  ;;  %v3641_v41 = vld [vmem:[%s4764_s1 + $0x148] sm:$0xff] }
  0x19   : > { %1103 = vmatpush.bf16.msra.mxu0 %v3628_v4  ;;  %3681 = vmatpush.bf16.msra.mxu1 %v3628_v4  ;;  %v3635_v35 = vld [vmem:[%s4764_s1 + $0x118] sm:$0xff]  ;;  %v3634_v39 = vld [vmem:[%s4764_s1 + $0x110] sm:$0xff]  ;;  %v3601_v42 = vld [vmem:[%s4764_s1 + $0x8] sm:$0xff] }
  0x1a   : > { %3682 = vmatpush.bf16.msra.mxu2 %v3628_v4  ;;  %3683 = vmatpush.bf16.msra.mxu3 %v3628_v4  ;;  %v3611_v36 = vld [vmem:[%s4764_s1 + $0x58] sm:$0xff]  ;;  %v3610_v40 = vld [vmem:[%s4764_s1 + $0x50] sm:$0xff]  ;;  %v3633_v43 = vld [vmem:[%s4764_s1 + $0x108] sm:$0xff] }
  0x1b   : > { %v3609_v44 = vld [vmem:[%s4764_s1 + $0x48] sm:$0xff]  ;;  %v3640_v45 = vld [vmem:[%s4764_s1 + $0x140] sm:$0xff]  ;;  %v4002_v52 = vld [vmem:[%s3862_s3 + $0xb4] sm:$0xff] }
  0x1c   : > { %v3600_v46 = vld [vmem:[%s4764_s1] sm:$0xff]  ;;  %v3655_v53 = vld [vmem:[%s4764_s1 + $0x1b8] sm:$0xff]  ;;  %v340_v57 = vld [vmem:[%s3862_s3 + $0x14] sm:$0xf] }
  0x1d   : > { %1104 = vmatpush.bf16.msra.mxu0 %v3627_v5  ;;  %3684 = vmatpush.bf16.msra.mxu1 %v3627_v5  ;;  %v3632_v47 = vld [vmem:[%s4764_s1 + $0x100] sm:$0xff]  ;;  %v3663_v54 = vld [vmem:[%s4764_s1 + $0x1f8] sm:$0xff]  ;;  %v337_v58 = vld [vmem:[%s3862_s3 + $0x8] sm:$0xf]  ;;  %v516_v63 = vunpack.c.l.b16 %v340_v57 }
  0x1e   : > { %3685 = vmatpush.bf16.msra.mxu2 %v3627_v5  ;;  %3686 = vmatpush.bf16.msra.mxu3 %v3627_v5  ;;  %v3608_v48 = vld [vmem:[%s4764_s1 + $0x40] sm:$0xff]  ;;  %v3623_v55 = vld [vmem:[%s4764_s1 + $0xb8] sm:$0xff]  ;;  %v4023_v59 = vld [vmem:[%s3862_s3 + $0x30] sm:$0xff]  ;;  %v515_v1 = vunpack.c.l.b16 %v337_v58 }
  0x1f   : > { %v3999_v51 = vld [vmem:[%s3862_s3 + $0x84] sm:$0xff]  ;;  %v3671_v56 = vld [vmem:[%s4764_s1 + $0x238] sm:$0xff]  ;;  %v4029_v61 = vld [vmem:[%s3862_s3 + $0x90] sm:$0xff]  ;;  %v534_v3 = vpack.c.b16 %v516_v63, %v516_v63  ;;  %v796_v63 = vrot.slane %v3993_v49, 1 }
  0x20   : > { %v4026_v60 = vld [vmem:[%s3862_s3 + $0x60] sm:$0xff]  ;;  %v4042_v4 = vpack.c.b16 %v515_v1, %v515_v1  ;;  %vm4560_vm4 = vmand %vm2638_vm2, %vm2639_vm3 }
  0x21   : > { %1105 = vmatpush.bf16.msra.mxu0 %v3626_v6  ;;  %3687 = vmatpush.bf16.msra.mxu1 %v3626_v6  ;;  %v4032_v62 = vld [vmem:[%s3862_s3 + $0xc0] sm:$0xff] }
  0x22   : > { %3688 = vmatpush.bf16.msra.mxu2 %v3626_v6  ;;  %3689 = vmatpush.bf16.msra.mxu3 %v3626_v6  ;;  %v4035_v0 = vld [vmem:[%s3862_s3] sm:$0xff]  ;;  %v565_v6 = vshrl.u32 %v3871_v11, 16 }
  0x23   : > { %v555_v5 = vshll.u32 %v4035_v0, 16 }
  0x25   : > { %1106 = vmatpush.bf16.msra.mxu0 %v3625_v7  ;;  %3690 = vmatpush.bf16.msra.mxu1 %v3625_v7 }
  0x26   : > { %3691 = vmatpush.bf16.msra.mxu2 %v3625_v7  ;;  %3692 = vmatpush.bf16.msra.mxu3 %v3625_v7  ;;  %v569_v7 = vrot.slane %v567_v2, 1  ;;  %v349_v2 = vld [vmem:[%s3862_s3 + $0x38] sm:$0xf] }
  0x29   : > { %1107 = vmatpush.bf16.msra.mxu0 %v3624_v8  ;;  %3693 = vmatpush.bf16.msra.mxu1 %v3624_v8 }
  0x2a   : > { %3694 = vmatpush.bf16.msra.mxu2 %v3624_v8  ;;  %3695 = vmatpush.bf16.msra.mxu3 %v3624_v8  ;;  %v572_v8 = vshll.u32 %v534_v3, 16 }
  0x2c   : > { %1108 = vmatmul.bf16.vlgmr.msra.gmra.mxu0 %v3871_v11  ;;  %1128 = vmatmul.bf16.vlgmr.msra.gmra.mxu1 %v3874_v12 }
  0x2d   : > { %1148 = vmatmul.bf16.vlgmr.msra.gmra.mxu2 %v3877_v13  ;;  %1168 = vmatmul.bf16.vlgmr.msra.gmra.mxu3 %v3880_v14 }
  0x2e   : > { %1278 = vmatpush.bf16.msrb.mxu2 %v3647_v9  ;;  %1511 = vmatpush.bf16.msrb.mxu3 %v3607_v10  ;;  %v553_v9 = vshrl.u32 %v4035_v0, 16  ;;  %v557_v10 = vrot.slane %v555_v5, 1  ;;  %v519_v5 = vunpack.c.l.b16 %v349_v2  ;;  %v3620_v2 = vld [vmem:[%s4764_s1 + $0xa0] sm:$0xff] }
  0x2f   : > { %1189 = vmatpush.bf16.msrb.mxu1 %v3639_v15  ;;  %1600 = vmatpush.bf16.msrb.mxu0 %v3615_v16  ;;  %v560_v15 = vshll.u32 %v4042_v4, 16  ;;  %v570_v16 = vor.u32 %v569_v7, %v565_v6  ;;  %v603_v7 = vshll.u32 %v4023_v59, 16 }
  0x32   : > { %1279 = vmatpush.bf16.msrb.mxu2 %v3646_v17  ;;  %1512 = vmatpush.bf16.msrb.mxu3 %v3606_v18  ;;  %v574_v17 = vrot.slane %v572_v8, 1  ;;  %v558_v18 = vor.u32 %v557_v10, %v553_v9  ;;  %v3653_v8 = vld [vmem:[%s4764_s1 + $0x1a8] sm:$0xff]  ;;  %v601_v10 = vshrl.u32 %v4023_v59, 16 }
  0x33   : > { %1190 = vmatpush.bf16.msrb.mxu1 %v3638_v19  ;;  %1601 = vmatpush.bf16.msrb.mxu0 %v3614_v20  ;;  %v562_v19 = vrot.slane %v560_v15, 1  ;;  %v790_v20 = vrot.slane %v3871_v11, 1  ;;  %v3661_v9 = vld [vmem:[%s4764_s1 + $0x1e8] sm:$0xff]  ;;  %v605_v15 = vrot.slane %v603_v7, 1 }
  0x36   : > { %1280 = vmatpush.bf16.msrb.mxu2 %v3645_v21  ;;  %1513 = vmatpush.bf16.msrb.mxu3 %v3605_v22  ;;  %v791_v21 = vrot.slane %v534_v3, 1  ;;  %v343_v22 = vld [vmem:[%s3862_s3 + $0x20] sm:$0xf] }
  0x37   : > { %1191 = vmatpush.bf16.msrb.mxu1 %v3637_v23  ;;  %1602 = vmatpush.bf16.msrb.mxu0 %v3613_v24  ;;  %v575_v23 = vsel %vm551_vm0, %v570_v16, %v574_v17  ;;  %v563_v24 = vsel %vm551_vm0, %v558_v18, %v562_v19  ;;  %v3669_v17 = vld [vmem:[%s4764_s1 + $0x228] sm:$0xff]  ;;  %v606_v18 = vor.u32 %v605_v15, %v601_v10  ;;  %v358_v10 = vld [vmem:[%s3862_s3 + $0x5c] sm:$0xf] }
  0x3a   : > { %1281 = vmatpush.bf16.msrb.mxu2 %v3644_v25  ;;  %1514 = vmatpush.bf16.msrb.mxu3 %v3604_v26  ;;  %v517_v25 = vunpack.c.l.b16 %v343_v22  ;;  %v4053_v26 = vsel %vm786_vm1, %v790_v20, %v791_v21  ;;  %v799_v20 = vrot.slane %v4023_v59, 1  ;;  %v352_v22 = vld [vmem:[%s3862_s3 + $0x44] sm:$0xf] }
  0x3b   : > { %1192 = vmatpush.bf16.msrb.mxu1 %v3636_v27  ;;  %1603 = vmatpush.bf16.msrb.mxu0 %v3612_v28  ;;  %v579_v28 = vshll.u32 %v3935_v31, 16 }
  0x3c   : > { %1113 = vmatmul.bf16.gmra.mxu0 %v3935_v31  ;;  %1133 = vmatmul.bf16.gmra.mxu1 %v3938_v32  ;;  %v535_v27 = vpack.c.b16 %v517_v25, %v517_v25 }
  0x3d   : > { %1153 = vmatmul.bf16.gmra.mxu2 %v3941_v33  ;;  %1173 = vmatmul.bf16.gmra.mxu3 %v3944_v34 }
  0x3e   : > { %1282 = vmatpush.bf16.msrb.mxu2 %v3643_v29  ;;  %1515 = vmatpush.bf16.msrb.mxu3 %v3603_v30  ;;  %v3654_v29 = vld [vmem:[%s4764_s1 + $0x1b0] sm:$0xff] }
  0x3f   : > { %1193 = vmatpush.bf16.msrb.mxu1 %v3635_v35  ;;  %1604 = vmatpush.bf16.msrb.mxu0 %v3611_v36  ;;  %v3662_v30 = vld [vmem:[%s4764_s1 + $0x1f0] sm:$0xff] }
  0x40   : > { %v3622_v35 = vld [vmem:[%s4764_s1 + $0xb0] sm:$0xff] }
  0x41   : > { %v3670_v36 = vld [vmem:[%s4764_s1 + $0x230] sm:$0xff] }
  0x42   : > { %1283 = vmatpush.bf16.msrb.mxu2 %v3642_v37  ;;  %1516 = vmatpush.bf16.msrb.mxu3 %v3602_v38  ;;  %v577_v37 = vshrl.u32 %v3935_v31, 16  ;;  %v581_v38 = vrot.slane %v579_v28, 1  ;;  %v615_v28 = vshll.u32 %v3874_v12, 16 }
  0x43   : > { %1194 = vmatpush.bf16.msrb.mxu1 %v3634_v39  ;;  %1605 = vmatpush.bf16.msrb.mxu0 %v3610_v40  ;;  %v584_v39 = vshll.u32 %v535_v27, 16 }
  0x44   : > { %v582_v40 = vor.u32 %v581_v38, %v577_v37  ;;  %v802_v38 = vrot.slane %v3874_v12, 1 }
  0x46   : > { %1284 = vmatpush.bf16.msrb.mxu2 %v3641_v41  ;;  %1517 = vmatpush.bf16.msrb.mxu3 %v3601_v42  ;;  %v586_v41 = vrot.slane %v584_v39, 1  ;;  %v793_v42 = vrot.slane %v3935_v31, 1 }
  0x47   : > { %1195 = vmatpush.bf16.msrb.mxu1 %v3633_v43  ;;  %1606 = vmatpush.bf16.msrb.mxu0 %v3609_v44  ;;  %v794_v43 = vrot.slane %v535_v27, 1  ;;  %v346_v44 = vld [vmem:[%s3862_s3 + $0x2c] sm:$0xf] }
  0x4a   : > { %1285 = vmatpush.bf16.msrb.mxu2 %v3640_v45  ;;  %1518 = vmatpush.bf16.msrb.mxu3 %v3600_v46  ;;  %v4074_v45 = vsel %vm551_vm0, %v582_v40, %v586_v41  ;;  %v518_v46 = vunpack.c.l.b16 %v346_v44  ;;  %v355_v40 = vld [vmem:[%s3862_s3 + $0x50] sm:$0xf] }
  0x4b   : > { %1196 = vmatpush.bf16.msrb.mxu1 %v3632_v47  ;;  %1607 = vmatpush.bf16.msrb.mxu0 %v3608_v48  ;;  %v4077_v47 = vsel %vm786_vm1, %v793_v42, %v794_v43 }
  0x4c   : > { %1118 = vmatmul.bf16.gmra.mxu0 %v3993_v49  ;;  %1138 = vmatmul.bf16.gmra.mxu1 %v3996_v50  ;;  %v536_v48 = vpack.c.b16 %v518_v46, %v518_v46 }
  0x4d   : > { %1158 = vmatmul.bf16.gmra.mxu2 %v3999_v51  ;;  %1178 = vmatmul.bf16.gmra.mxu3 %v4002_v52 }
  0x4e   : > { %1971 = vmatpush.bf16.msra.mxu2 %v3655_v53  ;;  %2060 = vmatpush.bf16.msra.mxu3 %v3663_v54  ;;  %v591_v53 = vshll.u32 %v3993_v49, 16  ;;  %v589_v54 = vshrl.u32 %v3993_v49, 16  ;;  %v797_v1 = vrot.slane %v536_v48, 1 }
  0x4f   : > { %1689 = vmatpush.bf16.msra.mxu1 %v3623_v55  ;;  %2149 = vmatpush.bf16.msra.mxu0 %v3671_v56  ;;  %v596_v56 = vshll.u32 %v536_v48, 16  ;;  %v627_v48 = vshll.u32 %v3938_v32, 16 }
  0x50   : > { %v593_v55 = vrot.slane %v591_v53, 1  ;;  %v4090_v6 = vsel %vm786_vm1, %v796_v63, %v797_v1  ;;  %v3652_v53 = vld [vmem:[%s4764_s1 + $0x1a0] sm:$0xff] }
  0x51   : > { %v598_v58 = vrot.slane %v596_v56, 1  ;;  %v629_v63 = vrot.slane %v627_v48, 1 }
  0x52   : > { %1972 = vmatpush.bf16.msra.mxu2 %v3654_v29  ;;  %2061 = vmatpush.bf16.msra.mxu3 %v3662_v30  ;;  %v594_v57 = vor.u32 %v593_v55, %v589_v54  ;;  %v613_v29 = vshrl.u32 %v3874_v12, 16  ;;  %v617_v30 = vrot.slane %v615_v28, 1  ;;  %v3660_v54 = vld [vmem:[%s4764_s1 + $0x1e0] sm:$0xff] }
  0x53   : > { %1690 = vmatpush.bf16.msra.mxu1 %v3622_v35  ;;  %2150 = vmatpush.bf16.msra.mxu0 %v3670_v36 }
  0x54   : > { %v4087_v3 = vsel %vm551_vm0, %v594_v57, %v598_v58  ;;  %v618_v36 = vor.u32 %v617_v30, %v613_v29  ;;  %v625_v58 = vshrl.u32 %v3938_v32, 16  ;;  %v637_v30 = vshrl.u32 %v3996_v50, 16 }
  0x56   : > { %1973 = vmatpush.bf16.msra.mxu2 %v3653_v8  ;;  %2062 = vmatpush.bf16.msra.mxu3 %v3661_v9  ;;  %v805_v8 = vrot.slane %v3938_v32, 1 }
  0x57   : > { %2151 = vmatpush.bf16.msra.mxu0 %v3669_v17 }
  0x5a   : > { %1974 = vmatpush.bf16.msra.mxu2 %v3652_v53  ;;  %2063 = vmatpush.bf16.msra.mxu3 %v3660_v54 }
  0x5c   : > { %1123 = vmatmul.bf16.gmra.mxu0 %v4023_v59  ;;  %1143 = vmatmul.bf16.gmra.mxu1 %v4026_v60 }
  0x5d   : > { %1163 = vmatmul.bf16.gmra.mxu2 %v4029_v61  ;;  %1183 = vmatmul.bf16.gmra.mxu3 %v4032_v62 }
  0x6c   : > { %1197 = vmatmul.bf16.vlgmr.msrb.gmra.mxu1 %v575_v23  ;;  %1608 = vmatmul.bf16.vlgmr.msrb.gmra.mxu0 %v563_v24  ;;  %v520_v24 = vunpack.c.l.b16 %v352_v22  ;;  %v639_v22 = vshll.u32 %v3996_v50, 16 }
  0x6d   : > { %1286 = vmatmul.bf16.vlgmr.msrb.gmra.mxu2 %v4053_v26  ;;  %1519 = vmatmul.bf16.vlgmr.msrb.gmra.mxu3 %v4035_v0 }
  0x6e   : > { %v538_v27 = vpack.c.b16 %v520_v24, %v520_v24 }
  0x70   : > { %v620_v35 = vshll.u32 %v538_v27, 16  ;;  %v803_v39 = vrot.slane %v538_v27, 1 }
  0x72   : > { %v622_v37 = vrot.slane %v620_v35, 1  ;;  %v4134_v44 = vsel %vm786_vm1, %v802_v38, %v803_v39  ;;  %v641_v35 = vrot.slane %v639_v22, 1  ;;  %v808_v39 = vrot.slane %v3996_v50, 1  ;;  %v3619_v22 = vld [vmem:[%s4764_s1 + $0x98] sm:$0xff] }
  0x74   : > { %v4131_v43 = vsel %vm551_vm0, %v618_v36, %v622_v37  ;;  %v642_v37 = vor.u32 %v641_v35, %v637_v30  ;;  %v3667_v30 = vld [vmem:[%s4764_s1 + $0x218] sm:$0xff] }
  0x7c   : > { %1202 = vmatmul.bf16.gmra.mxu1 %v4074_v45  ;;  %1613 = vmatmul.bf16.gmra.mxu0 %v575_v23 }
  0x7d   : > { %1291 = vmatmul.bf16.gmra.mxu2 %v4077_v47  ;;  %1524 = vmatmul.bf16.gmra.mxu3 %v3871_v11  ;;  %v537_v11 = vpack.c.b16 %v519_v5, %v519_v5  ;;  %v3668_v5 = vld [vmem:[%s4764_s1 + $0x220] sm:$0xff] }
  0x7e   : > { %2152 = vmatpush.bf16.msra.mxu0 %v3668_v5  ;;  %v3651_v5 = vld [vmem:[%s4764_s1 + $0x198] sm:$0xff] }
  0x7f   : > { %v608_v16 = vshll.u32 %v537_v11, 16  ;;  %v800_v21 = vrot.slane %v537_v11, 1  ;;  %v630_v11 = vor.u32 %v629_v63, %v625_v58  ;;  %1975 = vmatpush.bf16.msra.mxu2 %v3651_v5 }
  0x81   : > { %v610_v19 = vrot.slane %v608_v16, 1  ;;  %v4116_v25 = vsel %vm786_vm1, %v799_v20, %v800_v21 }
  0x82   : > { %2153 = vmatpush.bf16.msra.mxu0 %v3667_v30 }
  0x83   : > { %v4113_v23 = vsel %vm551_vm0, %v606_v18, %v610_v19  ;;  %v522_v19 = vunpack.c.l.b16 %v358_v10  ;;  %v649_v10 = vshrl.u32 %v4026_v60, 16 }
  0x85   : > { %v540_v21 = vpack.c.b16 %v522_v19, %v522_v19 }
  0x87   : > { %v644_v36 = vshll.u32 %v540_v21, 16 }
  0x89   : > { %v646_v38 = vrot.slane %v644_v36, 1 }
  0x8b   : > { %v4203_v54 = vsel %vm551_vm0, %v642_v37, %v646_v38  ;;  %v811_v37 = vrot.slane %v4026_v60, 1 }
  0x8c   : > { %1207 = vmatmul.bf16.gmra.mxu1 %v4087_v3  ;;  %1618 = vmatmul.bf16.gmra.mxu0 %v4074_v45  ;;  %4791 = vst [vmem:[#allocation8_spill] sm:$0xff] %v4203_v54 }
  0x8d   : > { %1296 = vmatmul.bf16.gmra.mxu2 %v4090_v6  ;;  %1529 = vmatmul.bf16.gmra.mxu3 %v3935_v31  ;;  %v3621_v31 = vld [vmem:[%s4764_s1 + $0xa8] sm:$0xff] }
  0x8e   : > { %1691 = vmatpush.bf16.msra.mxu1 %v3621_v31 }
  0x92   : > { %1692 = vmatpush.bf16.msra.mxu1 %v3620_v2  ;;  %v651_v2 = vshll.u32 %v4026_v60, 16 }
  0x94   : > { %v653_v19 = vrot.slane %v651_v2, 1 }
  0x96   : > { %v654_v35 = vor.u32 %v653_v19, %v649_v10  ;;  %1693 = vmatpush.bf16.msra.mxu1 %v3619_v22  ;;  %v663_v19 = vshll.u32 %v3877_v13, 16 }
  0x9c   : > { %1212 = vmatmul.bf16.gmra.mxu1 %v4113_v23  ;;  %1623 = vmatmul.bf16.gmra.mxu0 %v4087_v3 }
  0x9d   : > { %1301 = vmatmul.bf16.gmra.mxu2 %v4116_v25  ;;  %1534 = vmatmul.bf16.gmra.mxu3 %v3993_v49  ;;  %v521_v49 = vunpack.c.l.b16 %v355_v40  ;;  %v361_v40 = vld [vmem:[%s3862_s3 + $0x68] sm:$0xf] }
  0x9e   : > { %v523_v58 = vunpack.c.l.b16 %v361_v40 }
  0x9f   : > { %v539_v46 = vpack.c.b16 %v521_v49, %v521_v49 }
  0xa1   : > { %v632_v1 = vshll.u32 %v539_v46, 16  ;;  %v806_v9 = vrot.slane %v539_v46, 1 }
  0xa3   : > { %v634_v7 = vrot.slane %v632_v1, 1  ;;  %v4176_v20 = vsel %vm786_vm1, %v805_v8, %v806_v9  ;;  %v541_v1 = vpack.c.b16 %v523_v58, %v523_v58 }
  0xa4   : > { %4788 = vst [vmem:[#allocation5_spill] sm:$0xff] %v4176_v20 }
  0xa5   : > { %v4173_v18 = vsel %vm551_vm0, %v630_v11, %v634_v7  ;;  %v3659_v11 = vld [vmem:[%s4764_s1 + $0x1d8] sm:$0xff]  ;;  %v812_v38 = vrot.slane %v541_v1, 1 }
  0xa6   : > { %4787 = vst [vmem:[#allocation4_spill] sm:$0xff] %v4173_v18  ;;  %2064 = vmatpush.bf16.msra.mxu3 %v3659_v11 }
  0xa7   : > { %v4248_v10 = vsel %vm786_vm1, %v811_v37, %v812_v38  ;;  %v665_v37 = vrot.slane %v663_v19, 1 }
  0xa8   : > { %4796 = vst [vmem:[#allocation13_spill] sm:$0xff] %v4248_v10 }
  0xa9   : > { %v4126_v41 = vpop.f32.mrf.mxu0  ;;  %v4128_v42 = vpop.f32.mrf.mxu1 }
  0xac   : > { %1217 = vmatmul.bf16.gmra.mxu1 %v4131_v43  ;;  %1628 = vmatmul.bf16.gmra.mxu0 %v4113_v23 }
  0xad   : > { %1306 = vmatmul.bf16.gmra.mxu2 %v4134_v44  ;;  %1539 = vmatmul.bf16.gmra.mxu3 %v4023_v59 }
  0xb0   : > { %v4147_v55 = vpop.f32.mrf.mxu2  ;;  %v4149_v56 = vpop.f32.mrf.mxu3 }
  0xb1   : > { %4785 = vst [vmem:[#allocation2_spill] sm:$0xff] %v4149_v56  ;;  %v4151_v57 = vpop.f32.mrf.mxu0  ;;  %v4153_v59 = vpop.f32.mrf.mxu1  ;;  %v370_v56 = vld [vmem:[%s3862_s3 + $0x8c] sm:$0xf] }
  0xb8   : > { %v4164_v15 = vpop.f32.mrf.mxu2  ;;  %v4166_v16 = vpop.f32.mrf.mxu3 }
  0xb9   : > { %4786 = vst [vmem:[#allocation3_spill] sm:$0xff] %v4166_v16  ;;  %v4168_v31 = vpop.f32.mrf.mxu0  ;;  %v4170_v17 = vpop.f32.mrf.mxu1 }
  0xbc   : > { %1222 = vmatmul.bf16.gmra.mxu1 %v4173_v18  ;;  %1633 = vmatmul.bf16.gmra.mxu0 %v4131_v43 }
  0xbd   : > { %1311 = vmatmul.bf16.gmra.mxu2 %v4176_v20  ;;  %1544 = vmatmul.bf16.gmra.mxu3 %v3874_v12  ;;  %v809_v12 = vrot.slane %v540_v21, 1  ;;  %v656_v21 = vshll.u32 %v541_v1, 16 }
  0xbf   : > { %v4206_v63 = vsel %vm786_vm1, %v808_v39, %v809_v12  ;;  %v658_v36 = vrot.slane %v656_v21, 1  ;;  %v364_v39 = vld [vmem:[%s3862_s3 + $0x74] sm:$0xf] }
  0xc0   : > { %v4183_v24 = vpop.f32.mrf.mxu2  ;;  %v4185_v27 = vpop.f32.mrf.mxu3  ;;  %4792 = vst [vmem:[#allocation9_spill] sm:$0xff] %v4206_v63  ;;  %v524_v11 = vunpack.c.l.b16 %v364_v39 }
  0xc1   : > { %4789 = vst [vmem:[#allocation6_spill] sm:$0xff] %v4185_v27  ;;  %v4187_v28 = vpop.f32.mrf.mxu0  ;;  %v4189_v29 = vpop.f32.mrf.mxu1  ;;  %v4245_v5 = vsel %vm551_vm0, %v654_v35, %v658_v36  ;;  %v661_v36 = vshrl.u32 %v3877_v13, 16 }
  0xc2   : > { %4795 = vst [vmem:[#allocation12_spill] sm:$0xff] %v4245_v5  ;;  %v542_v1 = vpack.c.b16 %v524_v11, %v524_v11  ;;  %v367_v11 = vld [vmem:[%s3862_s3 + $0x80] sm:$0xf] }
  0xc3   : > { %v666_v39 = vor.u32 %v665_v37, %v661_v36  ;;  %v675_v36 = vshll.u32 %v3941_v33, 16 }
  0xc4   : > { %v668_v38 = vshll.u32 %v542_v1, 16 }
  0xc8   : > { %v4194_v49 = vpop.f32.mrf.mxu2  ;;  %v4196_v46 = vpop.f32.mrf.mxu3 }
  0xc9   : > { %4790 = vst [vmem:[#allocation7_spill] sm:$0xff] %v4196_v46  ;;  %v4198_v48 = vpop.f32.mrf.mxu0  ;;  %v4200_v53 = vpop.f32.mrf.mxu1 }
  0xcc   : > { %1227 = vmatmul.bf16.gmra.mxu1 %v4203_v54  ;;  %1638 = vmatmul.bf16.gmra.mxu0 %v4173_v18 }
  0xcd   : > { %1316 = vmatmul.bf16.gmra.mxu2 %v4206_v63  ;;  %1549 = vmatmul.bf16.gmra.mxu3 %v3938_v32  ;;  %v525_v63 = vunpack.c.l.b16 %v367_v11 }
  0xd0   : > { %v4219_v7 = vpop.f32.mrf.mxu2  ;;  %v4221_v8 = vpop.f32.mrf.mxu3 }
  0xd1   : > { %4793 = vst [vmem:[#allocation10_spill] sm:$0xff] %v4221_v8  ;;  %v4223_v9 = vpop.f32.mrf.mxu0  ;;  %v4225_v32 = vpop.f32.mrf.mxu1  ;;  %v814_v8 = vrot.slane %v3877_v13, 1 }
  0xd8   : > { %v4236_v12 = vpop.f32.mrf.mxu2  ;;  %v4238_v40 = vpop.f32.mrf.mxu3 }
  0xd9   : > { %4794 = vst [vmem:[#allocation11_spill] sm:$0xff] %v4238_v40  ;;  %v4240_v58 = vpop.f32.mrf.mxu0  ;;  %v4242_v2 = vpop.f32.mrf.mxu1  ;;  %v670_v40 = vrot.slane %v668_v38, 1 }
  0xdc   : > { %1232 = vmatmul.bf16.gmra.mxu1 %v4245_v5  ;;  %1643 = vmatmul.bf16.gmra.mxu0 %v4203_v54  ;;  %v4271_v54 = vsel %vm551_vm0, %v666_v39, %v670_v40  ;;  %v3650_v40 = vld [vmem:[%s4764_s1 + $0x190] sm:$0xff] }
  0xdd   : > { %1321 = vmatmul.bf16.gmra.mxu2 %v4248_v10  ;;  %1554 = vmatmul.bf16.gmra.mxu3 %v3996_v50  ;;  %v815_v50 = vrot.slane %v542_v1, 1  ;;  %v543_v1 = vpack.c.b16 %v525_v63, %v525_v63  ;;  %v677_v63 = vrot.slane %v675_v36, 1  ;;  %v817_v36 = vrot.slane %v3941_v33, 1 }
  0xde   : > { %1976 = vmatpush.bf16.msra.mxu2 %v3650_v40  ;;  %v3666_v40 = vld [vmem:[%s4764_s1 + $0x210] sm:$0xff] }
  0xdf   : > { %v4275_v19 = vsel %vm786_vm1, %v814_v8, %v815_v50  ;;  %v680_v50 = vshll.u32 %v543_v1, 16  ;;  %2154 = vmatpush.bf16.msra.mxu0 %v3666_v40  ;;  %v685_v40 = vshrl.u32 %v3999_v51, 16 }
  0xe0   : > { %v4255_v21 = vpop.f32.mrf.mxu2  ;;  %v4257_v22 = vpop.f32.mrf.mxu3  ;;  %4800 = vst [vmem:[#allocation17_spill] sm:$0xff] %v4275_v19 }
  0xe1   : > { %4797 = vst [vmem:[#allocation14_spill] sm:$0xff] %v4257_v22  ;;  %v4259_v30 = vpop.f32.mrf.mxu0  ;;  %v4261_v35 = vpop.f32.mrf.mxu1 }
  0xe8   : > { %v4266_v10 = vpop.f32.mrf.mxu2  ;;  %v4268_v46 = vpop.f32.mrf.mxu3 }
  0xe9   : > { %4798 = vst [vmem:[#allocation15_spill] sm:$0xff] %v4266_v10  ;;  %v1198_v27 = vpop.f32.mrf.mxu1  ;;  %v1609_v22 = vpop.f32.mrf.mxu0  ;;  %v526_v10 = vunpack.c.l.b16 %v370_v56 }
  0xea   : > { %4799 = vst [vmem:[#allocation16_spill] sm:$0xff] %v4268_v46  ;;  %v1199_v16 = vadd.f32 %v1198_v27, %v4126_v41  ;;  %v3658_v41 = vld [vmem:[%s4764_s1 + $0x1d0] sm:$0xff] }
  0xeb   : > { %2065 = vmatpush.bf16.msra.mxu3 %v3658_v41 }
  0xec   : > { %1237 = vmatmul.bf16.gmra.mxu1 %v4271_v54  ;;  %1648 = vmatmul.bf16.gmra.mxu0 %v4245_v5  ;;  %v818_v5 = vrot.slane %v543_v1, 1  ;;  %v687_v1 = vshll.u32 %v3999_v51, 16 }
  0xed   : > { %1326 = vmatmul.bf16.gmra.mxu2 %v4275_v19  ;;  %1559 = vmatmul.bf16.gmra.mxu3 %v4026_v60  ;;  %v673_v60 = vshrl.u32 %v3941_v33, 16  ;;  %v3618_v19 = vld [vmem:[%s4764_s1 + $0x90] sm:$0xff] }
  0xee   : > { %1694 = vmatpush.bf16.msra.mxu1 %v3618_v19  ;;  %v4305_v19 = vsel %vm786_vm1, %v817_v36, %v818_v5 }
  0xef   : > { %v678_v41 = vor.u32 %v677_v63, %v673_v60  ;;  %4802 = vst [vmem:[#allocation19_spill] sm:$0xff] %v4305_v19 }
  0xf0   : > { %v1287_v27 = vpop.f32.mrf.mxu2  ;;  %v1520_v8 = vpop.f32.mrf.mxu3 }
  0xf1   : > { %v1288_v37 = vadd.f32 %v1287_v27, %v1199_v16  ;;  %v1200_v38 = vpop.f32.mrf.mxu1  ;;  %v1611_v39 = vpop.f32.mrf.mxu0  ;;  %v682_v16 = vrot.slane %v680_v50, 1 }
  0xf2   : > { %v1201_v11 = vadd.f32 %v1200_v38, %v4151_v57 }
  0xf3   : > { %v1521_v46 = vadd.f32 %v1520_v8, %v1288_v37  ;;  %v4301_v20 = vsel %vm551_vm0, %v678_v41, %v682_v16  ;;  %v689_v41 = vrot.slane %v687_v1, 1 }
  0xf5   : > { %v4296_v27 = vadd.f32 %v1609_v22, %v1521_v46  ;;  %v544_v22 = vpack.c.b16 %v526_v10, %v526_v10 }
  0xf7   : > { %4801 = vst [vmem:[#allocation18_spill] sm:$0xff] %v4296_v27  ;;  %v692_v16 = vshll.u32 %v544_v22, 16 }
  0xf8   : > { %v1289_v57 = vpop.f32.mrf.mxu2  ;;  %v1522_v8 = vpop.f32.mrf.mxu3 }
  0xf9   : > { %v1290_v37 = vadd.f32 %v1289_v57, %v1201_v11  ;;  %v1203_v38 = vpop.f32.mrf.mxu1  ;;  %v1614_v18 = vpop.f32.mrf.mxu0 }
  0xfa   : > { %v1204_v60 = vadd.f32 %v1203_v38, %v4168_v31  ;;  %v373_v38 = vld [vmem:[%s3862_s3 + $0x98] sm:$0xf] }
  0xfb   : > { %v1523_v46 = vadd.f32 %v1522_v8, %v1290_v37  ;;  %v690_v8 = vor.u32 %v689_v41, %v685_v40  ;;  %v821_v37 = vrot.slane %v544_v22, 1  ;;  %v527_v1 = vunpack.c.l.b16 %v373_v38  ;;  %v3665_v38 = vld [vmem:[%s4764_s1 + $0x208] sm:$0xff] }
  0xfc   : > { %1242 = vmatmul.bf16.gmra.mxu1 %v4301_v20  ;;  %1653 = vmatmul.bf16.gmra.mxu0 %v4271_v54 }
  0xfd   : > { %1331 = vmatmul.bf16.gmra.mxu2 %v4305_v19  ;;  %1564 = vmatmul.bf16.gmra.mxu3 %v3877_v13  ;;  %v4312_v63 = vadd.f32 %v1611_v39, %v1523_v46  ;;  %v694_v13 = vrot.slane %v692_v16, 1  ;;  %v820_v39 = vrot.slane %v3999_v51, 1  ;;  %v545_v22 = vpack.c.b16 %v527_v1, %v527_v1 }
  0xfe   : > { %2155 = vmatpush.bf16.msra.mxu0 %v3665_v38  ;;  %v823_v1 = vrot.slane %v4029_v61, 1 }
  0xff   : > { %4803 = vst [vmem:[#allocation20_spill] sm:$0xff] %v4312_v63  ;;  %v4321_v19 = vsel %vm551_vm0, %v690_v8, %v694_v13  ;;  %v704_v13 = vshll.u32 %v545_v22, 16 }
 0x100   : > { %v1292_v56 = vpop.f32.mrf.mxu2  ;;  %v1525_v31 = vpop.f32.mrf.mxu3 }
 0x101   : > { %v1293_v50 = vadd.f32 %v1292_v56, %v1204_v60  ;;  %v1205_v5 = vpop.f32.mrf.mxu1  ;;  %v1616_v11 = vpop.f32.mrf.mxu0 }
 0x102   : > { %v1206_v36 = vadd.f32 %v1205_v5, %v4187_v28  ;;  %v3649_v5 = vld [vmem:[%s4764_s1 + $0x188] sm:$0xff] }
 0x103   : > { %v1526_v57 = vadd.f32 %v1525_v31, %v1293_v50  ;;  %v4325_v31 = vsel %vm786_vm1, %v820_v39, %v821_v37  ;;  %v699_v50 = vshll.u32 %v4029_v61, 16  ;;  %1977 = vmatpush.bf16.msra.mxu2 %v3649_v5 }
 0x105   : > { %v4316_v10 = vadd.f32 %v1614_v18, %v1526_v57  ;;  %v697_v57 = vshrl.u32 %v4029_v61, 16  ;;  %v701_v8 = vrot.slane %v699_v50, 1 }
 0x108   : > { %v1294_v46 = vpop.f32.mrf.mxu2  ;;  %v1527_v63 = vpop.f32.mrf.mxu3 }
 0x109   : > { %v1295_v60 = vadd.f32 %v1294_v46, %v1206_v36  ;;  %v1208_v56 = vpop.f32.mrf.mxu1  ;;  %v1619_v27 = vpop.f32.mrf.mxu0  ;;  %v702_v46 = vor.u32 %v701_v8, %v697_v57  ;;  %v711_v8 = vshll.u32 %v3880_v14, 16 }
 0x10a   : > { %v1209_v28 = vadd.f32 %v1208_v56, %v4198_v48  ;;  %v3657_v48 = vld [vmem:[%s4764_s1 + $0x1c8] sm:$0xff] }
 0x10b   : > { %v1528_v18 = vadd.f32 %v1527_v63, %v1295_v60  ;;  %2066 = vmatpush.bf16.msra.mxu3 %v3657_v48  ;;  %v706_v60 = vrot.slane %v704_v13, 1 }
 0x10c   : > { %1247 = vmatmul.bf16.gmra.mxu1 %v4321_v19  ;;  %1658 = vmatmul.bf16.gmra.mxu0 %v4301_v20 }
 0x10d   : > { %1336 = vmatmul.bf16.gmra.mxu2 %v4325_v31  ;;  %1569 = vmatmul.bf16.gmra.mxu3 %v3941_v33  ;;  %v4338_v63 = vadd.f32 %v1616_v11, %v1528_v18  ;;  %v3617_v11 = vld [vmem:[%s4764_s1 + $0x88] sm:$0xff]  ;;  %v376_v18 = vld [vmem:[%s3862_s3 + $0xa4] sm:$0xf] }
 0x10e   : > { %1695 = vmatpush.bf16.msra.mxu1 %v3617_v11 }
 0x110   : > { %v1297_v40 = vpop.f32.mrf.mxu2  ;;  %v1530_v41 = vpop.f32.mrf.mxu3 }
 0x111   : > { %v1298_v16 = vadd.f32 %v1297_v40, %v1209_v28  ;;  %v1210_v36 = vpop.f32.mrf.mxu1  ;;  %v1621_v33 = vpop.f32.mrf.mxu0  ;;  %v824_v28 = vrot.slane %v545_v22, 1 }
 0x112   : > { %v1211_v39 = vadd.f32 %v1210_v36, %v4223_v9 }
 0x113   : > { %v1531_v37 = vadd.f32 %v1530_v41, %v1298_v16  ;;  %v4353_v41 = vsel %vm551_vm0, %v702_v46, %v706_v60  ;;  %v528_v16 = vunpack.c.l.b16 %v376_v18  ;;  %v4357_v57 = vsel %vm786_vm1, %v823_v1, %v824_v28 }
 0x114   : > { %v709_v46 = vshrl.u32 %v3880_v14, 16  ;;  %v713_v60 = vrot.slane %v711_v8, 1 }
 0x115   : > { %v4348_v56 = vadd.f32 %v1619_v27, %v1531_v37  ;;  %v546_v22 = vpack.c.b16 %v528_v16, %v528_v16 }
 0x117   : > { %4804 = vst [vmem:[#allocation21_spill] sm:$0xff] %v4348_v56  ;;  %v716_v1 = vshll.u32 %v546_v22, 16 }
 0x118   : > { %v1299_v9 = vpop.f32.mrf.mxu2  ;;  %v1532_v50 = vpop.f32.mrf.mxu3 }
 0x119   : > { %v1300_v5 = vadd.f32 %v1299_v9, %v1211_v39  ;;  %v1213_v48 = vpop.f32.mrf.mxu1  ;;  %v1624_v40 = vpop.f32.mrf.mxu0  ;;  %v714_v9 = vor.u32 %v713_v60, %v709_v46 }
 0x11a   : > { %v1214_v36 = vadd.f32 %v1213_v48, %v4240_v58  ;;  %v379_v48 = vld [vmem:[%s3862_s3 + $0xb0] sm:$0xf] }
 0x11b   : > { %v1533_v27 = vadd.f32 %v1532_v50, %v1300_v5  ;;  %v827_v5 = vrot.slane %v546_v22, 1  ;;  %v529_v8 = vunpack.c.l.b16 %v379_v48  ;;  %v3648_v22 = vld [vmem:[%s4764_s1 + $0x180] sm:$0xff] }
 0x11c   : > { %1252 = vmatmul.bf16.gmra.mxu1 %v4353_v41  ;;  %1663 = vmatmul.bf16.gmra.mxu0 %v4321_v19 }
 0x11d   : > { %1341 = vmatmul.bf16.gmra.mxu2 %v4357_v57  ;;  %1574 = vmatmul.bf16.gmra.mxu3 %v3999_v51  ;;  %v4364_v13 = vadd.f32 %v1621_v33, %v1533_v27  ;;  %v718_v51 = vrot.slane %v716_v1, 1  ;;  %v826_v33 = vrot.slane %v3880_v14, 1  ;;  %v547_v14 = vpack.c.b16 %v529_v8, %v529_v8  ;;  %v382_v8 = vld [vmem:[%s3862_s3 + $0xbc] sm:$0xf] }
 0x11e   : > { %1978 = vmatpush.bf16.msra.mxu2 %v3648_v22 }
 0x11f   : > { %4805 = vst [vmem:[#allocation22_spill] sm:$0xff] %v4364_v13  ;;  %v4373_v56 = vsel %vm551_vm0, %v714_v9, %v718_v51  ;;  %v721_v9 = vshrl.u32 %v3944_v34, 16 }
 0x120   : > { %v1302_v39 = vpop.f32.mrf.mxu2  ;;  %v1535_v58 = vpop.f32.mrf.mxu3 }
 0x121   : > { %v1303_v37 = vadd.f32 %v1302_v39, %v1214_v36  ;;  %v1215_v11 = vpop.f32.mrf.mxu1  ;;  %v1626_v38 = vpop.f32.mrf.mxu0 }
 0x122   : > { %v1216_v28 = vadd.f32 %v1215_v11, %v4259_v30  ;;  %v4376_v30 = vsel %vm786_vm1, %v826_v33, %v827_v5  ;;  %v728_v33 = vshll.u32 %v547_v14, 16 }
 0x123   : > { %v1536_v18 = vadd.f32 %v1535_v58, %v1303_v37  ;;  %v3656_v37 = vld [vmem:[%s4764_s1 + $0x1c0] sm:$0xff] }
 0x124   : > { %2067 = vmatpush.bf16.msra.mxu3 %v3656_v37 }
 0x125   : > { %v4368_v50 = vadd.f32 %v1624_v40, %v1536_v18  ;;  %v723_v40 = vshll.u32 %v3944_v34, 16 }
 0x127   : > { %v725_v51 = vrot.slane %v723_v40, 1 }
 0x128   : > { %v1304_v16 = vpop.f32.mrf.mxu2  ;;  %v1537_v27 = vpop.f32.mrf.mxu3 }
 0x129   : > { %v1305_v36 = vadd.f32 %v1304_v16, %v1216_v28  ;;  %v1218_v39 = vpop.f32.mrf.mxu1  ;;  %v1629_v13 = vpop.f32.mrf.mxu0  ;;  %v726_v48 = vor.u32 %v725_v51, %v721_v9  ;;  %v730_v16 = vrot.slane %v728_v33, 1 }
 0x12a   : > { %v1219_v46 = vadd.f32 %v1218_v39, %v4128_v42  ;;  %v3664_v42 = vld [vmem:[%s4764_s1 + $0x200] sm:$0xff]  ;;  %v830_v39 = vrot.slane %v547_v14, 1  ;;  %v735_v14 = vshll.u32 %v4002_v52, 16 }
 0x12b   : > { %v1538_v58 = vadd.f32 %v1537_v27, %v1305_v36  ;;  %2156 = vmatpush.bf16.msra.mxu0 %v3664_v42  ;;  %v829_v36 = vrot.slane %v3944_v34, 1  ;;  %v4414_v34 = vld [vmem:[%s3862_s3 + $0x9c] sm:$0xff] }
 0x12c   : > { %1257 = vmatmul.bf16.gmra.mxu1 %v4373_v56  ;;  %1668 = vmatmul.bf16.gmra.mxu0 %v4353_v41 }
 0x12d   : > { %1346 = vmatmul.bf16.gmra.mxu2 %v4376_v30  ;;  %1579 = vmatmul.bf16.gmra.mxu3 %v4029_v61  ;;  %v4389_v11 = vadd.f32 %v1626_v38, %v1538_v58  ;;  %v3616_v38 = vld [vmem:[%s4764_s1 + $0x80] sm:$0xff]  ;;  %v4408_v9 = vsel %vm786_vm1, %v829_v36, %v830_v39  ;;  %v737_v36 = vrot.slane %v735_v14, 1 }
 0x12e   : > { %1696 = vmatpush.bf16.msra.mxu1 %v3616_v38 }
 0x130   : > { %v1307_v60 = vpop.f32.mrf.mxu2  ;;  %v1540_v1 = vpop.f32.mrf.mxu3 }
 0x131   : > { %v1308_v61 = vadd.f32 %v1307_v60, %v1219_v46  ;;  %v1220_v28 = vpop.f32.mrf.mxu1  ;;  %v1631_v18 = vpop.f32.mrf.mxu0 }
 0x132   : > { %v1221_v58 = vadd.f32 %v1220_v28, %v4153_v59 }
 0x133   : > { %v1541_v5 = vadd.f32 %v1540_v1, %v1308_v61  ;;  %v4405_v1 = vsel %vm551_vm0, %v726_v48, %v730_v16  ;;  %v530_v61 = vunpack.c.l.b16 %v382_v8  ;;  %v733_v16 = vshrl.u32 %v4002_v52, 16 }
 0x135   : > { %v4399_v27 = vadd.f32 %v1629_v13, %v1541_v5  ;;  %v548_v59 = vpack.c.b16 %v530_v61, %v530_v61  ;;  %v385_v61 = vld [vmem:[%s3862_s3 + $0xc8] sm:$0xf] }
 0x137   : > { %v740_v39 = vshll.u32 %v548_v59, 16 }
 0x138   : > { %v1309_v40 = vpop.f32.mrf.mxu2  ;;  %v1542_v22 = vpop.f32.mrf.mxu3 }
 0x139   : > { %v1310_v37 = vadd.f32 %v1309_v40, %v1221_v58  ;;  %v1223_v46 = vpop.f32.mrf.mxu1  ;;  %v1634_v60 = vpop.f32.mrf.mxu0  ;;  %v738_v58 = vor.u32 %v737_v36, %v733_v16  ;;  %v742_v40 = vrot.slane %v740_v39, 1 }
 0x13a   : > { %v1224_v51 = vadd.f32 %v1223_v46, %v4170_v17 }
 0x13b   : > { %v1543_v13 = vadd.f32 %v1542_v22, %v1310_v37  ;;  %v833_v37 = vrot.slane %v548_v59, 1  ;;  %v4428_v14 = vsel %vm551_vm0, %v738_v58, %v742_v40 }
 0x13c   : > { %1262 = vmatmul.bf16.gmra.mxu1 %v4405_v1  ;;  %1673 = vmatmul.bf16.gmra.mxu0 %v4373_v56 }
 0x13d   : > { %1351 = vmatmul.bf16.gmra.mxu2 %v4408_v9  ;;  %1584 = vmatmul.bf16.gmra.mxu3 %v4414_v34  ;;  %v4418_v28 = vadd.f32 %v1631_v18, %v1543_v13  ;;  %v832_v18 = vrot.slane %v4002_v52, 1 }
 0x13f   : > { %4806 = vst [vmem:[#allocation23_spill] sm:$0xff] %v4418_v28 }
 0x140   : > { %v1312_v33 = vpop.f32.mrf.mxu2  ;;  %v1545_v5 = vpop.f32.mrf.mxu3 }
 0x141   : > { %v1313_v38 = vadd.f32 %v1312_v33, %v1224_v51  ;;  %v1225_v42 = vpop.f32.mrf.mxu1  ;;  %v1636_v48 = vpop.f32.mrf.mxu0 }
 0x142   : > { %v1226_v17 = vadd.f32 %v1225_v42, %v4189_v29  ;;  %v4437_v29 = vld [vmem:[%s3862_s3 + $0xa8] sm:$0xff]  ;;  %v747_v42 = vshll.u32 %v4032_v62, 16 }
 0x143   : > { %v1546_v8 = vadd.f32 %v1545_v5, %v1313_v38  ;;  %v531_v5 = vunpack.c.l.b16 %v385_v61  ;;  %v4431_v38 = vsel %vm786_vm1, %v832_v18, %v833_v37  ;;  %v745_v37 = vshrl.u32 %v4032_v62, 16 }
 0x144   : > { %4808 = vst [vmem:[#allocation25_spill] sm:$0xff] %v4431_v38  ;;  %v749_v61 = vrot.slane %v747_v42, 1 }
 0x145   : > { %v4422_v22 = vadd.f32 %v1634_v60, %v1546_v8  ;;  %v549_v59 = vpack.c.b16 %v531_v5, %v531_v5  ;;  %v835_v5 = vrot.slane %v4032_v62, 1 }
 0x147   : > { %4807 = vst [vmem:[#allocation24_spill] sm:$0xff] %v4422_v22 }
 0x148   : > { %v1314_v46 = vpop.f32.mrf.mxu2  ;;  %v1547_v13 = vpop.f32.mrf.mxu3 }
 0x149   : > { %v1315_v51 = vadd.f32 %v1314_v46, %v1226_v17  ;;  %v1228_v33 = vpop.f32.mrf.mxu1  ;;  %v1639_v28 = vpop.f32.mrf.mxu0  ;;  %v752_v17 = vshll.u32 %v549_v59, 16 }
 0x14a   : > { %v1229_v36 = vadd.f32 %v1228_v33, %v4200_v53 }
 0x14b   : > { %v1548_v60 = vadd.f32 %v1547_v13, %v1315_v51  ;;  %v750_v13 = vor.u32 %v749_v61, %v745_v37  ;;  %v754_v51 = vrot.slane %v752_v17, 1  ;;  %v788_v17 = vrot.slane %v4042_v4, 1 }
 0x14c   : > { %1267 = vmatmul.bf16.gmra.mxu1 %v4428_v14  ;;  %1678 = vmatmul.bf16.gmra.mxu0 %v4405_v1 }
 0x14d   : > { %1356 = vmatmul.bf16.gmra.mxu2 %v4431_v38  ;;  %1589 = vmatmul.bf16.gmra.mxu3 %v4437_v29  ;;  %v4441_v16 = vadd.f32 %v1636_v48, %v1548_v60  ;;  %v836_v48 = vrot.slane %v549_v59, 1  ;;  %v4450_v38 = vsel %vm551_vm0, %v750_v13, %v754_v51 }
 0x14f   : > { %4809 = vst [vmem:[#allocation26_spill] sm:$0xff] %v4441_v16  ;;  %v4453_v42 = vsel %vm786_vm1, %v835_v5, %v836_v48 }
 0x150   : > { %v1317_v39 = vpop.f32.mrf.mxu2  ;;  %v1550_v8 = vpop.f32.mrf.mxu3 }
 0x151   : > { %v1318_v58 = vadd.f32 %v1317_v39, %v1229_v36  ;;  %v1230_v40 = vpop.f32.mrf.mxu1  ;;  %v1641_v18 = vpop.f32.mrf.mxu0 }
 0x152   : > { %v1231_v60 = vadd.f32 %v1230_v40, %v4225_v32 }
 0x153   : > { %v1551_v46 = vadd.f32 %v1550_v8, %v1318_v58 }
 0x155   : > { %v4445_v22 = vadd.f32 %v1639_v28, %v1551_v46 }
 0x158   : > { %v1319_v53 = vpop.f32.mrf.mxu2  ;;  %v1552_v33 = vpop.f32.mrf.mxu3 }
 0x159   : > { %v1320_v16 = vadd.f32 %v1319_v53, %v1231_v60  ;;  %v1233_v36 = vpop.f32.mrf.mxu1  ;;  %v1644_v39 = vpop.f32.mrf.mxu0  ;;  %v3725_v53 = vld [vmem:[%s3862_s3 + $0x18] sm:$0xff] }
 0x15a   : > { %v1234_v32 = vadd.f32 %v1233_v36, %v4242_v2 }
 0x15b   : > { %v1553_v8 = vadd.f32 %v1552_v33, %v1320_v16  ;;  %v787_v16 = vrot.slane %v4035_v0, 1 }
 0x15c   : > { %1272 = vmatmul.bf16.gmra.mxu1 %v4450_v38  ;;  %1683 = vmatmul.bf16.gmra.mxu0 %v4428_v14 }
 0x15d   : > { %1361 = vmatmul.bf16.gmra.mxu2 %v4453_v42  ;;  %1594 = vmatmul.bf16.gmra.mxu3 %v4002_v52  ;;  %v4459_v62 = vadd.f32 %v1641_v18, %v1553_v8  ;;  %v789_v48 = vsel %vm786_vm1, %v787_v16, %v788_v17 }
 0x160   : > { %v1322_v28 = vpop.f32.mrf.mxu2  ;;  %v1555_v59 = vpop.f32.mrf.mxu3 }
 0x161   : > { %v1323_v58 = vadd.f32 %v1322_v28, %v1234_v32  ;;  %v1235_v40 = vpop.f32.mrf.mxu1  ;;  %v1646_v37 = vpop.f32.mrf.mxu0 }
 0x162   : > { %v1236_v13 = vadd.f32 %v1235_v40, %v4261_v35 }
 0x163   : > { %v1556_v61 = vadd.f32 %v1555_v59, %v1323_v58 }
 0x165   : > { %v4464_v46 = vadd.f32 %v1644_v39, %v1556_v61 }
 0x168   : > { %v1324_v52 = vpop.f32.mrf.mxu2  ;;  %v1557_v18 = vpop.f32.mrf.mxu3 }
 0x169   : > { %v1325_v51 = vadd.f32 %v1324_v52, %v1236_v13  ;;  %v1238_v5 = vpop.f32.mrf.mxu1  ;;  %v1649_v2 = vpop.f32.mrf.mxu0 }
 0x16a   : > { %v1239_v4 = vadd.f32 %v1238_v5, %v4147_v55  ;;  %v3726_v55 = vld [vmem:[%s3862_s3 + $0x24] sm:$0xff] }
 0x16b   : > { %v1558_v60 = vadd.f32 %v1557_v18, %v1325_v51 }
 0x16c   : > { %1697 = vmatmul.bf16.vlgmr.msra.gmra.mxu1 %v789_v48  ;;  %2157 = vmatmul.bf16.vlgmr.msra.gmra.mxu0 %v4077_v47 }
 0x16d   : > { %1979 = vmatmul.bf16.vlgmr.msra.gmra.mxu2 %v3725_v53  ;;  %2068 = vmatmul.bf16.vlgmr.msra.gmra.mxu3 %v4074_v45  ;;  %v4471_v0 = vadd.f32 %v1646_v37, %v1558_v60 }
 0x170   : > { %v1327_v35 = vpop.f32.mrf.mxu2  ;;  %v1560_v33 = vpop.f32.mrf.mxu3 }
 0x171   : > { %v1328_v36 = vadd.f32 %v1327_v35, %v1239_v4  ;;  %v1240_v39 = vpop.f32.mrf.mxu1  ;;  %v1651_v8 = vpop.f32.mrf.mxu0 }
 0x172   : > { %v1241_v59 = vadd.f32 %v1240_v39, %v4164_v15 }
 0x173   : > { %v1561_v32 = vadd.f32 %v1560_v33, %v1328_v36 }
 0x175   : > { %v4474_v28 = vadd.f32 %v1649_v2, %v1561_v32 }
 0x178   : > { %v1329_v58 = vpop.f32.mrf.mxu2  ;;  %v1562_v40 = vpop.f32.mrf.mxu3 }
 0x179   : > { %v1330_v61 = vadd.f32 %v1329_v58, %v1241_v59  ;;  %v1243_v16 = vpop.f32.mrf.mxu1  ;;  %v1654_v45 = vpop.f32.mrf.mxu0 }
 0x17a   : > { %v1244_v13 = vadd.f32 %v1243_v16, %v4183_v24  ;;  %v3727_v24 = vld [vmem:[%s3862_s3 + $0x30] sm:$0xff] }
 0x17b   : > { %v1563_v37 = vadd.f32 %v1562_v40, %v1330_v61 }
 0x17c   : > { %1702 = vmatmul.bf16.gmra.mxu1 %v4053_v26  ;;  %2162 = vmatmul.bf16.gmra.mxu0 %v4090_v6 }
 0x17d   : > { %1984 = vmatmul.bf16.gmra.mxu2 %v3726_v55  ;;  %2073 = vmatmul.bf16.gmra.mxu3 %v4087_v3  ;;  %v4481_v17 = vadd.f32 %v1651_v8, %v1563_v37 }
 0x180   : > { %v1332_v52 = vpop.f32.mrf.mxu2  ;;  %v1565_v15 = vpop.f32.mrf.mxu3 }
 0x181   : > { %v1333_v18 = vadd.f32 %v1332_v52, %v1244_v13  ;;  %v1245_v51 = vpop.f32.mrf.mxu1  ;;  %v1656_v5 = vpop.f32.mrf.mxu0 }
 0x182   : > { %v1246_v26 = vadd.f32 %v1245_v51, %v4194_v49 }
 0x183   : > { %v1566_v2 = vadd.f32 %v1565_v15, %v1333_v18 }
 0x185   : > { %v4484_v48 = vadd.f32 %v1654_v45, %v1566_v2 }
 0x188   : > { %v1334_v60 = vpop.f32.mrf.mxu2  ;;  %v1567_v53 = vpop.f32.mrf.mxu3 }
 0x189   : > { %v1335_v4 = vadd.f32 %v1334_v60, %v1246_v26  ;;  %v1248_v35 = vpop.f32.mrf.mxu1  ;;  %v1659_v3 = vpop.f32.mrf.mxu0 }
 0x18a   : > { %v1249_v39 = vadd.f32 %v1248_v35, %v4219_v7  ;;  %v3728_v7 = vld [vmem:[%s3862_s3 + $0x3c] sm:$0xff] }
 0x18b   : > { %v1568_v33 = vadd.f32 %v1567_v53, %v1335_v4 }
 0x18c   : > { %1707 = vmatmul.bf16.gmra.mxu1 %v4077_v47  ;;  %2167 = vmatmul.bf16.gmra.mxu0 %v4116_v25 }
 0x18d   : > { %1989 = vmatmul.bf16.gmra.mxu2 %v3727_v24  ;;  %2078 = vmatmul.bf16.gmra.mxu3 %v4113_v23  ;;  %v4491_v36 = vadd.f32 %v1656_v5, %v1568_v33 }
 0x190   : > { %v1337_v8 = vpop.f32.mrf.mxu2  ;;  %v1570_v49 = vpop.f32.mrf.mxu3 }
 0x191   : > { %v1338_v32 = vadd.f32 %v1337_v8, %v1249_v39  ;;  %v1250_v59 = vpop.f32.mrf.mxu1  ;;  %v1661_v58 = vpop.f32.mrf.mxu0  ;;  %v3729_v39 = vld [vmem:[%s3862_s3 + $0x48] sm:$0xff]  ;;  %v4812_v8 = vld [vmem:[#allocation4_spill] sm:$0xff] }
 0x192   : > { %v1251_v47 = vadd.f32 %v1250_v59, %v4236_v12 }
 0x193   : > { %v1571_v40 = vadd.f32 %v1570_v49, %v1338_v32  ;;  %v4813_v32 = vld [vmem:[#allocation2_spill] sm:$0xff] }
 0x195   : > { %v4494_v61 = vadd.f32 %v1659_v3, %v1571_v40 }
 0x198   : > { %v1339_v16 = vpop.f32.mrf.mxu2  ;;  %v1572_v45 = vpop.f32.mrf.mxu3 }
 0x199   : > { %v1340_v37 = vadd.f32 %v1339_v16, %v1251_v47  ;;  %v1253_v55 = vpop.f32.mrf.mxu1  ;;  %v1664_v23 = vpop.f32.mrf.mxu0 }
 0x19a   : > { %v1254_v15 = vadd.f32 %v1253_v55, %v4255_v21  ;;  %v4811_v21 = vld [vmem:[#allocation5_spill] sm:$0xff] }
 0x19b   : > { %v1573_v13 = vadd.f32 %v1572_v45, %v1340_v37 }
 0x19c   : > { %1712 = vmatmul.bf16.gmra.mxu1 %v4090_v6  ;;  %2172 = vmatmul.bf16.gmra.mxu0 %v4134_v44  ;;  %v4810_v6 = vld [vmem:[#allocation15_spill] sm:$0xff] }
 0x19d   : > { %1994 = vmatmul.bf16.gmra.mxu2 %v3728_v7  ;;  %2083 = vmatmul.bf16.gmra.mxu3 %v4131_v43  ;;  %v4501_v52 = vadd.f32 %v1661_v58, %v1573_v13 }
 0x1a0   : > { %v1342_v18 = vpop.f32.mrf.mxu2  ;;  %v1575_v12 = vpop.f32.mrf.mxu3 }
 0x1a1   : > { %v1343_v51 = vadd.f32 %v1342_v18, %v1254_v15  ;;  %v1255_v5 = vpop.f32.mrf.mxu1  ;;  %v1666_v2 = vpop.f32.mrf.mxu0 }
 0x1a2   : > { %v1256_v53 = vadd.f32 %v1255_v5, %v4810_v6  ;;  %v4815_v5 = vld [vmem:[#allocation9_spill] sm:$0xff] }
 0x1a3   : > { %v1576_v26 = vadd.f32 %v1575_v12, %v1343_v51 }
 0x1a5   : > { %v4504_v60 = vadd.f32 %v1664_v23, %v1576_v26  ;;  %v4816_v26 = vld [vmem:[#allocation8_spill] sm:$0xff] }
 0x1a8   : > { %v1344_v4 = vpop.f32.mrf.mxu2  ;;  %v1577_v35 = vpop.f32.mrf.mxu3 }
 0x1a9   : > { %v1345_v3 = vadd.f32 %v1344_v4, %v1256_v53  ;;  %v1258_v33 = vpop.f32.mrf.mxu1  ;;  %v1669_v43 = vpop.f32.mrf.mxu0  ;;  %v4817_v53 = vld [vmem:[#allocation6_spill] sm:$0xff] }
 0x1aa   : > { %v1259_v59 = vadd.f32 %v1258_v33, %v4813_v32 }
 0x1ab   : > { %v1578_v24 = vadd.f32 %v1577_v35, %v1345_v3 }
 0x1ac   : > { %1717 = vmatmul.bf16.gmra.mxu1 %v4116_v25  ;;  %2177 = vmatmul.bf16.gmra.mxu0 %v4811_v21  ;;  %v4814_v25 = vld [vmem:[#allocation3_spill] sm:$0xff] }
 0x1ad   : > { %1999 = vmatmul.bf16.gmra.mxu2 %v3729_v39  ;;  %2088 = vmatmul.bf16.gmra.mxu3 %v4812_v8  ;;  %v4511_v49 = vadd.f32 %v1666_v2, %v1578_v24  ;;  %v3730_v2 = vld [vmem:[%s3862_s3 + $0x54] sm:$0xff] }
 0x1b0   : > { %v1347_v58 = vpop.f32.mrf.mxu2  ;;  %v1580_v40 = vpop.f32.mrf.mxu3 }
 0x1b1   : > { %v1348_v47 = vadd.f32 %v1347_v58, %v1259_v59  ;;  %v1260_v16 = vpop.f32.mrf.mxu1  ;;  %v1671_v45 = vpop.f32.mrf.mxu0 }
 0x1b2   : > { %v1261_v23 = vadd.f32 %v1260_v16, %v4814_v25  ;;  %v3731_v25 = vld [vmem:[%s3862_s3 + $0x60] sm:$0xff] }
 0x1b3   : > { %v1581_v37 = vadd.f32 %v1580_v40, %v1348_v47 }
 0x1b5   : > { %v4514_v55 = vadd.f32 %v1669_v43, %v1581_v37  ;;  %v4819_v37 = vld [vmem:[#allocation13_spill] sm:$0xff] }
 0x1b8   : > { %v1349_v13 = vpop.f32.mrf.mxu2  ;;  %v1582_v7 = vpop.f32.mrf.mxu3 }
 0x1b9   : > { %v1350_v15 = vadd.f32 %v1349_v13, %v1261_v23  ;;  %v1263_v18 = vpop.f32.mrf.mxu1  ;;  %v1674_v12 = vpop.f32.mrf.mxu0  ;;  %v4820_v23 = vld [vmem:[#allocation12_spill] sm:$0xff] }
 0x1ba   : > { %v1264_v4 = vadd.f32 %v1263_v18, %v4817_v53 }
 0x1bb   : > { %v1583_v51 = vadd.f32 %v1582_v7, %v1350_v15  ;;  %v4821_v7 = vld [vmem:[#allocation10_spill] sm:$0xff] }
 0x1bc   : > { %1722 = vmatmul.bf16.gmra.mxu1 %v4134_v44  ;;  %2182 = vmatmul.bf16.gmra.mxu0 %v4815_v5  ;;  %v4818_v44 = vld [vmem:[#allocation7_spill] sm:$0xff] }
 0x1bd   : > { %2004 = vmatmul.bf16.gmra.mxu2 %v3730_v2  ;;  %2093 = vmatmul.bf16.gmra.mxu3 %v4816_v26  ;;  %v4521_v6 = vadd.f32 %v1671_v45, %v1583_v51 }
 0x1c0   : > { %v1352_v35 = vpop.f32.mrf.mxu2  ;;  %v1585_v3 = vpop.f32.mrf.mxu3 }
 0x1c1   : > { %v1353_v33 = vadd.f32 %v1352_v35, %v1264_v4  ;;  %v1265_v43 = vpop.f32.mrf.mxu1  ;;  %v1676_v24 = vpop.f32.mrf.mxu0 }
 0x1c2   : > { %v1266_v32 = vadd.f32 %v1265_v43, %v4818_v44 }
 0x1c3   : > { %v1586_v39 = vadd.f32 %v1585_v3, %v1353_v33 }
 0x1c5   : > { %v4524_v8 = vadd.f32 %v1674_v12, %v1586_v39 }
 0x1c8   : > { %v1354_v59 = vpop.f32.mrf.mxu2  ;;  %v1587_v58 = vpop.f32.mrf.mxu3 }
 0x1c9   : > { %v1355_v40 = vadd.f32 %v1354_v59, %v1266_v32  ;;  %v1268_v47 = vpop.f32.mrf.mxu1  ;;  %v1679_v16 = vpop.f32.mrf.mxu0  ;;  %v4823_v32 = vld [vmem:[#allocation17_spill] sm:$0xff]  ;;  %v3732_v59 = vld [vmem:[%s3862_s3 + $0x6c] sm:$0xff] }
 0x1ca   : > { %v1269_v15 = vadd.f32 %v1268_v47, %v4821_v7 }
 0x1cb   : > { %v1588_v45 = vadd.f32 %v1587_v58, %v1355_v40  ;;  %v4824_v40 = vld [vmem:[#allocation14_spill] sm:$0xff] }
 0x1cc   : > { %1727 = vmatmul.bf16.gmra.mxu1 %v4811_v21  ;;  %2187 = vmatmul.bf16.gmra.mxu0 %v4819_v37  ;;  %v4822_v21 = vld [vmem:[#allocation11_spill] sm:$0xff] }
 0x1cd   : > { %2009 = vmatmul.bf16.gmra.mxu2 %v3731_v25  ;;  %2098 = vmatmul.bf16.gmra.mxu3 %v4820_v23  ;;  %v4531_v13 = vadd.f32 %v1676_v24, %v1588_v45 }
 0x1d0   : > { %v1357_v18 = vpop.f32.mrf.mxu2  ;;  %v1590_v12 = vpop.f32.mrf.mxu3 }
 0x1d1   : > { %v1358_v51 = vadd.f32 %v1357_v18, %v1269_v15  ;;  %v1270_v2 = vpop.f32.mrf.mxu1  ;;  %v1681_v26 = vpop.f32.mrf.mxu0 }
 0x1d2   : > { %v1271_v35 = vadd.f32 %v1270_v2, %v4822_v21 }
 0x1d3   : > { %v1591_v53 = vadd.f32 %v1590_v12, %v1358_v51 }
 0x1d5   : > { %v4534_v4 = vadd.f32 %v1679_v16, %v1591_v53 }
 0x1d8   : > { %v1359_v3 = vpop.f32.mrf.mxu2  ;;  %v1592_v33 = vpop.f32.mrf.mxu3 }
 0x1d9   : > { %v1360_v43 = vadd.f32 %v1359_v3, %v1271_v35  ;;  %v1273_v39 = vpop.f32.mrf.mxu1  ;;  %v1684_v44 = vpop.f32.mrf.mxu0  ;;  %v4826_v35 = vld [vmem:[#allocation19_spill] sm:$0xff]  ;;  %v3733_v3 = vld [vmem:[%s3862_s3 + $0x78] sm:$0xff] }
 0x1da   : > { %v1274_v47 = vadd.f32 %v1273_v39, %v4824_v40 }
 0x1db   : > { %v1593_v24 = vadd.f32 %v1592_v33, %v1360_v43 }
 0x1dc   : > { %1732 = vmatmul.bf16.gmra.mxu1 %v4815_v5  ;;  %2192 = vmatmul.bf16.gmra.mxu0 %v4823_v32  ;;  %v4825_v5 = vld [vmem:[#allocation16_spill] sm:$0xff] }
 0x1dd   : > { %2014 = vmatmul.bf16.gmra.mxu2 %v3732_v59  ;;  %2103 = vmatmul.bf16.gmra.mxu3 %v4271_v54  ;;  %v4541_v58 = vadd.f32 %v1681_v26, %v1593_v24 }
 0x1e0   : > { %v1362_v16 = vpop.f32.mrf.mxu2  ;;  %v1595_v45 = vpop.f32.mrf.mxu3 }
 0x1e1   : > { %v1363_v25 = vadd.f32 %v1362_v16, %v1274_v47  ;;  %v1275_v23 = vpop.f32.mrf.mxu1  ;;  %v1686_v7 = vpop.f32.mrf.mxu0  ;;  %v4828_v47 = vld [vmem:[#allocation18_spill] sm:$0xff] }
 0x1e2   : > { %v1276_v12 = vadd.f32 %v1275_v23, %v4825_v5 }
 0x1e3   : > { %v1596_v15 = vadd.f32 %v1595_v45, %v1363_v25 }
 0x1e5   : > { %v4544_v18 = vadd.f32 %v1684_v44, %v1596_v15 }
 0x1e8   : > { %v1364_v51 = vpop.f32.mrf.mxu2  ;;  %v1597_v2 = vpop.f32.mrf.mxu3 }
 0x1e9   : > { %v1365_v53 = vadd.f32 %v1364_v51, %v1276_v12  ;;  %v1698_v21 = vpop.f32.mrf.mxu1  ;;  %v2158_v54 = vpop.f32.mrf.mxu0  ;;  %v4829_v12 = vld [vmem:[#allocation20_spill] sm:$0xff] }
 0x1ea   : > { %v1699_v16 = vadd.f32 %v1698_v21, %v4828_v47 }
 0x1eb   : > { %v1598_v26 = vadd.f32 %v1597_v2, %v1365_v53  ;;  %v3734_v53 = vld [vmem:[%s3862_s3 + $0x84] sm:$0xff] }
 0x1ec   : > { %1737 = vmatmul.bf16.gmra.mxu1 %v4819_v37  ;;  %2197 = vmatmul.bf16.gmra.mxu0 %v4826_v35 }
 0x1ed   : > { %2019 = vmatmul.bf16.gmra.mxu2 %v3733_v3  ;;  %2108 = vmatmul.bf16.gmra.mxu3 %v4301_v20  ;;  %v4551_v33 = vadd.f32 %v1686_v7, %v1598_v26 }
 0x1ef   : > { %4827 = vst [vmem:[#allocation15_spill] sm:$0xff] %v4551_v33 }
 0x1f0   : > { %v1980_v43 = vpop.f32.mrf.mxu2  ;;  %v2069_v39 = vpop.f32.mrf.mxu3 }
 0x1f1   : > { %v2070_v44 = vadd.f32 %v2069_v39, %v1980_v43  ;;  %v1700_v24 = vpop.f32.mrf.mxu1  ;;  %v2160_v59 = vpop.f32.mrf.mxu0 }
 0x1f2   : > { %v1701_v51 = vadd.f32 %v1700_v24, %v4829_v12 }
 0x1f3   : > { %v2159_v40 = vadd.f32 %v2158_v54, %v2070_v44 }
 0x1f5   : > { %v2238_v37 = vadd.f32 %v2159_v40, %v1699_v16 }
 0x1f7   : > { %v2382_v7 = vpack.c.bf16 %v2238_v37, %v2238_v37  ;;  %v2311_v21 = vmul.f32 %v2238_v37, %v2238_v37 }
 0x1f8   : > { %v1982_v45 = vpop.f32.mrf.mxu2  ;;  %v2071_v25 = vpop.f32.mrf.mxu3 }
 0x1f9   : > { %v2072_v23 = vadd.f32 %v2071_v25, %v1982_v45  ;;  %v1703_v15 = vpop.f32.mrf.mxu1  ;;  %v2163_v5 = vpop.f32.mrf.mxu0  ;;  %v2446_v44 = vunpack.c.l.b16 %v2382_v7 }
 0x1fa   : > { %v1704_v45 = vadd.f32 %v1703_v15, %v4316_v10 }
 0x1fb   : > { %v2161_v20 = vadd.f32 %v2160_v59, %v2072_v23 }
 0x1fc   : > { %1742 = vmatmul.bf16.gmra.mxu1 %v4823_v32  ;;  %2202 = vmatmul.bf16.gmra.mxu0 %v4325_v31 }
 0x1fd   : > { %v2239_v2 = vadd.f32 %v2161_v20, %v1701_v51  ;;  %2024 = vmatmul.bf16.gmra.mxu2 %v3734_v53  ;;  %2113 = vmatmul.bf16.gmra.mxu3 %v4321_v19 }
 0x1ff   : > { %v2271_v54 = vadd.f32 %v2239_v2, %v2238_v37  ;;  %v2312_v26 = vmul.f32 %v2239_v2, %v2239_v2  ;;  %v2383_v3 = vpack.c.bf16 %v2239_v2, %v2239_v2 }
 0x200   : > { %v1985_v43 = vpop.f32.mrf.mxu2  ;;  %v2074_v39 = vpop.f32.mrf.mxu3 }
 0x201   : > { %v2343_v40 = vadd.f32 %v2312_v26, %v2311_v21  ;;  %v2447_v24 = vunpack.c.l.b16 %v2383_v3  ;;  %v2075_v59 = vadd.f32 %v2074_v39, %v1985_v43  ;;  %v1705_v47 = vpop.f32.mrf.mxu1  ;;  %v2165_v32 = vpop.f32.mrf.mxu0 }
 0x203   : > { %v2478_v16 = vpack.c.b16 %v2447_v24, %v2446_v44  ;;  %v2164_v25 = vadd.f32 %v2163_v5, %v2075_v59 }
 0x205   : > { %v2495_v23 = vshrl.u32 %v2478_v16, 16  ;;  %v2240_v19 = vadd.f32 %v2164_v25, %v1704_v45  ;;  %v2498_v51 = vshll.u32 %v2478_v16, 16 }
 0x207   : > { %v2497_v12 = vrot.slane %v2495_v23, 7  ;;  %v2272_v20 = vadd.f32 %v2271_v54, %v2240_v19  ;;  %v2313_v7 = vmul.f32 %v2240_v19, %v2240_v19  ;;  %v1706_v54 = vadd.f32 %v1705_v47, %v4338_v63 }
 0x208   : > { %v1987_v2 = vpop.f32.mrf.mxu2  ;;  %v2076_v53 = vpop.f32.mrf.mxu3  ;;  %v2384_v23 = vpack.c.bf16 %v2240_v19, %v2240_v19 }
 0x209   : > { %v2500_v21 = vor.u32 %v2498_v51, %v2497_v12  ;;  %v2657_v26 = vsel %vm4560_vm4, %v2497_v12, 0  ;;  %v2344_v3 = vadd.f32 %v2343_v40, %v2313_v7  ;;  %v1708_v10 = vpop.f32.mrf.mxu1  ;;  %v2168_v15 = vpop.f32.mrf.mxu0  ;;  %v2077_v43 = vadd.f32 %v2076_v53, %v1987_v2  ;;  %v3735_v40 = vld [vmem:[%s3862_s3 + $0x90] sm:$0xff] }
 0x20a   : > { %v2708_v5 = vunpack.c.l.b16 %v2657_v26 }
 0x20b   : > { %v2641_v39 = vsel %vm4560_vm4, 0, %v2500_v21  ;;  %v2166_v16 = vadd.f32 %v2165_v32, %v2077_v43  ;;  %v2448_v21 = vunpack.c.l.b16 %v2384_v23  ;;  %v4832_v43 = vld [vmem:[#allocation21_spill] sm:$0xff] }
 0x20c   : > { %v2706_v44 = vunpack.c.l.b16 %v2641_v39  ;;  %v2707_v24 = vunpack.c.h.b16 %v2641_v39  ;;  %v2756_v59 = vpack.c.b16 %v2708_v5, %v2708_v5  ;;  %1747 = vmatmul.bf16.gmra.mxu1 %v4826_v35  ;;  %2207 = vmatmul.bf16.gmra.mxu0 %v4357_v57 }
 0x20d   : > { %2029 = vmatmul.bf16.gmra.mxu2 %v3735_v40  ;;  %2118 = vmatmul.bf16.gmra.mxu3 %v4353_v41  ;;  %v2241_v12 = vadd.f32 %v2166_v16, %v1706_v54  ;;  %v1709_v41 = vadd.f32 %v1708_v10, %v4832_v43 }
 0x20e   : > { %v2754_v45 = vpack.c.b16 %v2706_v44, %v2706_v44  ;;  %v2755_v25 = vpack.c.b16 %v2707_v24, %v2707_v24  ;;  %3534 = vst [vmem:[%s3834_s8 + $0x14] sm:$0xf] %v2756_v59 }
 0x20f   : > { %v2273_v63 = vadd.f32 %v2272_v20, %v2241_v12  ;;  %v2314_v47 = vmul.f32 %v2241_v12, %v2241_v12  ;;  %v2385_v51 = vpack.c.bf16 %v2241_v12, %v2241_v12 }
 0x210   : > { %3532 = vst [vmem:[%s3834_s8 + $0xc] sm:$0xf] %v2754_v45  ;;  %v1990_v7 = vpop.f32.mrf.mxu2  ;;  %v2079_v32 = vpop.f32.mrf.mxu3 }
 0x211   : > { %3533 = vst [vmem:[%s3834_s8 + $0x10] sm:$0xf] %v2755_v25  ;;  %v2080_v35 = vadd.f32 %v2079_v32, %v1990_v7  ;;  %v1710_v2 = vpop.f32.mrf.mxu1  ;;  %v2170_v53 = vpop.f32.mrf.mxu0  ;;  %v2345_v26 = vadd.f32 %v2344_v3, %v2314_v47  ;;  %v2449_v5 = vunpack.c.l.b16 %v2385_v51 }
 0x213   : > { %v2169_v39 = vadd.f32 %v2168_v15, %v2080_v35  ;;  %v2479_v44 = vpack.c.b16 %v2449_v5, %v2448_v21  ;;  %v4833_v15 = vld [vmem:[#allocation22_spill] sm:$0xff] }
 0x214   : > { %v1711_v23 = vadd.f32 %v1710_v2, %v4833_v15 }
 0x215   : > { %v2242_v24 = vadd.f32 %v2169_v39, %v1709_v41  ;;  %v2502_v19 = vshrl.u32 %v2479_v44, 16  ;;  %v2505_v16 = vshll.u32 %v2479_v44, 16 }
 0x217   : > { %v2274_v54 = vadd.f32 %v2273_v63, %v2242_v24  ;;  %v2315_v59 = vmul.f32 %v2242_v24, %v2242_v24  ;;  %v2504_v20 = vrot.slane %v2502_v19, 7  ;;  %v2386_v5 = vpack.c.bf16 %v2242_v24, %v2242_v24 }
 0x218   : > { %v1992_v40 = vpop.f32.mrf.mxu2  ;;  %v2081_v45 = vpop.f32.mrf.mxu3 }
 0x219   : > { %v2346_v12 = vadd.f32 %v2345_v26, %v2315_v59  ;;  %v2082_v25 = vadd.f32 %v2081_v45, %v1992_v40  ;;  %v1713_v7 = vpop.f32.mrf.mxu1  ;;  %v2173_v32 = vpop.f32.mrf.mxu0  ;;  %v2507_v33 = vor.u32 %v2505_v16, %v2504_v20  ;;  %v2658_v3 = vsel %vm4560_vm4, %v2504_v20, 0 }
 0x21a   : > { %v2711_v10 = vunpack.c.l.b16 %v2658_v3  ;;  %v2450_v16 = vunpack.c.l.b16 %v2386_v5  ;;  %v1714_v40 = vadd.f32 %v1713_v7, %v4368_v50 }
 0x21b   : > { %v2171_v47 = vadd.f32 %v2170_v53, %v2082_v25  ;;  %v2642_v63 = vsel %vm4560_vm4, 0, %v2507_v33 }
 0x21c   : > { %1752 = vmatmul.bf16.gmra.mxu1 %v4325_v31  ;;  %2212 = vmatmul.bf16.gmra.mxu0 %v4376_v30  ;;  %v2709_v51 = vunpack.c.l.b16 %v2642_v63  ;;  %v2710_v35 = vunpack.c.h.b16 %v2642_v63  ;;  %v2759_v21 = vpack.c.b16 %v2711_v10, %v2711_v10 }
 0x21d   : > { %v2243_v26 = vadd.f32 %v2171_v47, %v1711_v23  ;;  %2034 = vmatmul.bf16.gmra.mxu2 %v4414_v34  ;;  %2123 = vmatmul.bf16.gmra.mxu3 %v4373_v56 }
 0x21e   : > { %v2757_v2 = vpack.c.b16 %v2709_v51, %v2709_v51  ;;  %v2758_v53 = vpack.c.b16 %v2710_v35, %v2710_v35  ;;  %3537 = vst [vmem:[%s3834_s8 + $0x20] sm:$0xf] %v2759_v21 }
 0x21f   : > { %v2275_v43 = vadd.f32 %v2274_v54, %v2243_v26  ;;  %v2316_v33 = vmul.f32 %v2243_v26, %v2243_v26  ;;  %v2387_v41 = vpack.c.bf16 %v2243_v26, %v2243_v26 }
 0x220   : > { %v1995_v31 = vpop.f32.mrf.mxu2  ;;  %v2084_v39 = vpop.f32.mrf.mxu3  ;;  %3535 = vst [vmem:[%s3834_s8 + $0x18] sm:$0xf] %v2757_v2 }
 0x221   : > { %v2347_v44 = vadd.f32 %v2346_v12, %v2316_v33  ;;  %v2085_v19 = vadd.f32 %v2084_v39, %v1995_v31  ;;  %v1715_v59 = vpop.f32.mrf.mxu1  ;;  %v2175_v20 = vpop.f32.mrf.mxu0  ;;  %3536 = vst [vmem:[%s3834_s8 + $0x1c] sm:$0xf] %v2758_v53  ;;  %v2451_v34 = vunpack.c.l.b16 %v2387_v41 }
 0x222   : > { %v1716_v7 = vadd.f32 %v1715_v59, %v4389_v11 }
 0x223   : > { %v2174_v56 = vadd.f32 %v2173_v32, %v2085_v19  ;;  %v2480_v24 = vpack.c.b16 %v2451_v34, %v2450_v16 }
 0x225   : > { %v2244_v45 = vadd.f32 %v2174_v56, %v1714_v40  ;;  %v2509_v25 = vshrl.u32 %v2480_v24, 16  ;;  %v2512_v15 = vshll.u32 %v2480_v24, 16 }
 0x227   : > { %v2276_v3 = vadd.f32 %v2275_v43, %v2244_v45  ;;  %v2317_v54 = vmul.f32 %v2244_v45, %v2244_v45  ;;  %v2511_v10 = vrot.slane %v2509_v25, 7  ;;  %v2388_v41 = vpack.c.bf16 %v2244_v45, %v2244_v45 }
 0x228   : > { %v1997_v23 = vpop.f32.mrf.mxu2  ;;  %v2086_v47 = vpop.f32.mrf.mxu3 }
 0x229   : > { %v2348_v63 = vadd.f32 %v2347_v44, %v2317_v54  ;;  %v2087_v12 = vadd.f32 %v2086_v47, %v1997_v23  ;;  %v1718_v51 = vpop.f32.mrf.mxu1  ;;  %v2178_v35 = vpop.f32.mrf.mxu0  ;;  %v2514_v21 = vor.u32 %v2512_v15, %v2511_v10  ;;  %v2659_v26 = vsel %vm4560_vm4, %v2511_v10, 0 }
 0x22a   : > { %v2714_v50 = vunpack.c.l.b16 %v2659_v26  ;;  %v2452_v56 = vunpack.c.l.b16 %v2388_v41  ;;  %v1719_v24 = vadd.f32 %v1718_v51, %v4399_v27  ;;  %v4834_v51 = vld [vmem:[#allocation23_spill] sm:$0xff] }
 0x22b   : > { %v2176_v32 = vadd.f32 %v2175_v20, %v2087_v12  ;;  %v2643_v5 = vsel %vm4560_vm4, 0, %v2514_v21 }
 0x22c   : > { %1757 = vmatmul.bf16.gmra.mxu1 %v4357_v57  ;;  %2217 = vmatmul.bf16.gmra.mxu0 %v4408_v9  ;;  %v2712_v2 = vunpack.c.l.b16 %v2643_v5  ;;  %v2713_v53 = vunpack.c.h.b16 %v2643_v5  ;;  %v2762_v43 = vpack.c.b16 %v2714_v50, %v2714_v50 }
 0x22d   : > { %v2245_v33 = vadd.f32 %v2176_v32, %v1716_v7  ;;  %2039 = vmatmul.bf16.gmra.mxu2 %v4437_v29  ;;  %2128 = vmatmul.bf16.gmra.mxu3 %v4405_v1 }
 0x22e   : > { %v2760_v11 = vpack.c.b16 %v2712_v2, %v2712_v2  ;;  %v2761_v31 = vpack.c.b16 %v2713_v53, %v2713_v53  ;;  %3540 = vst [vmem:[%s3834_s8 + $0x2c] sm:$0xf] %v2762_v43  ;;  %v4835_v53 = vld [vmem:[#allocation25_spill] sm:$0xff] }
 0x22f   : > { %v2277_v39 = vadd.f32 %v2276_v3, %v2245_v33  ;;  %v2318_v44 = vmul.f32 %v2245_v33, %v2245_v33  ;;  %v2389_v19 = vpack.c.bf16 %v2245_v33, %v2245_v33 }
 0x230   : > { %v2000_v57 = vpop.f32.mrf.mxu2  ;;  %v2089_v59 = vpop.f32.mrf.mxu3  ;;  %3538 = vst [vmem:[%s3834_s8 + $0x24] sm:$0xf] %v2760_v11 }
 0x231   : > { %v2349_v20 = vadd.f32 %v2348_v63, %v2318_v44  ;;  %v2090_v16 = vadd.f32 %v2089_v59, %v2000_v57  ;;  %v1720_v34 = vpop.f32.mrf.mxu1  ;;  %v2180_v40 = vpop.f32.mrf.mxu0  ;;  %3539 = vst [vmem:[%s3834_s8 + $0x28] sm:$0xf] %v2761_v31  ;;  %v2453_v29 = vunpack.c.l.b16 %v2389_v19  ;;  %v3736_v31 = vld [vmem:[%s3862_s3 + $0xb4] sm:$0xff] }
 0x233   : > { %v2179_v1 = vadd.f32 %v2178_v35, %v2090_v16  ;;  %v2481_v45 = vpack.c.b16 %v2453_v29, %v2452_v56  ;;  %v1721_v35 = vadd.f32 %v1720_v34, %v4834_v51 }
 0x235   : > { %v2246_v25 = vadd.f32 %v2179_v1, %v1719_v24  ;;  %v2516_v54 = vshrl.u32 %v2481_v45, 16  ;;  %v2519_v23 = vshll.u32 %v2481_v45, 16  ;;  %v4836_v45 = vld [vmem:[#allocation24_spill] sm:$0xff] }
 0x237   : > { %v2278_v10 = vadd.f32 %v2277_v39, %v2246_v25  ;;  %v2319_v3 = vmul.f32 %v2246_v25, %v2246_v25  ;;  %v2518_v15 = vrot.slane %v2516_v54, 7  ;;  %v2390_v39 = vpack.c.bf16 %v2246_v25, %v2246_v25 }
 0x238   : > { %v2002_v47 = vpop.f32.mrf.mxu2  ;;  %v2091_v12 = vpop.f32.mrf.mxu3 }
 0x239   : > { %v2350_v21 = vadd.f32 %v2349_v20, %v2319_v3  ;;  %v2092_v63 = vadd.f32 %v2091_v12, %v2002_v47  ;;  %v1723_v26 = vpop.f32.mrf.mxu1  ;;  %v2183_v50 = vpop.f32.mrf.mxu0  ;;  %v2521_v7 = vor.u32 %v2519_v23, %v2518_v15  ;;  %v2660_v32 = vsel %vm4560_vm4, %v2518_v15, 0  ;;  %v388_v47 = vld [vmem:[%s3862_s3 + $0xd4] sm:$0xf] }
 0x23a   : > { %v2717_v27 = vunpack.c.l.b16 %v2660_v32  ;;  %v2454_v24 = vunpack.c.l.b16 %v2390_v39 }
 0x23b   : > { %v2181_v5 = vadd.f32 %v2180_v40, %v2092_v63  ;;  %v2644_v2 = vsel %vm4560_vm4, 0, %v2521_v7 }
 0x23c   : > { %1762 = vmatmul.bf16.gmra.mxu1 %v4376_v30  ;;  %2222 = vmatmul.bf16.gmra.mxu0 %v4835_v53  ;;  %v2715_v43 = vunpack.c.l.b16 %v2644_v2  ;;  %v2716_v33 = vunpack.c.h.b16 %v2644_v2  ;;  %v2765_v41 = vpack.c.b16 %v2717_v27, %v2717_v27  ;;  %v532_v2 = vunpack.c.l.b16 %v388_v47 }
 0x23d   : > { %v2247_v11 = vadd.f32 %v2181_v5, %v1721_v35  ;;  %2044 = vmatmul.bf16.gmra.mxu2 %v3736_v31  ;;  %2133 = vmatmul.bf16.gmra.mxu3 %v4428_v14  ;;  %v1724_v14 = vadd.f32 %v1723_v26, %v4836_v45 }
 0x23e   : > { %v2763_v44 = vpack.c.b16 %v2715_v43, %v2715_v43  ;;  %v2764_v19 = vpack.c.b16 %v2716_v33, %v2716_v33  ;;  %3543 = vst [vmem:[%s3834_s8 + $0x38] sm:$0xf] %v2765_v41  ;;  %v4837_v33 = vld [vmem:[#allocation26_spill] sm:$0xff] }
 0x23f   : > { %v2279_v57 = vadd.f32 %v2278_v10, %v2247_v11  ;;  %v2320_v59 = vmul.f32 %v2247_v11, %v2247_v11  ;;  %v2391_v20 = vpack.c.bf16 %v2247_v11, %v2247_v11 }
 0x240   : > { %v2005_v30 = vpop.f32.mrf.mxu2  ;;  %v2094_v16 = vpop.f32.mrf.mxu3  ;;  %3541 = vst [vmem:[%s3834_s8 + $0x30] sm:$0xf] %v2763_v44 }
 0x241   : > { %v2351_v34 = vadd.f32 %v2350_v21, %v2320_v59  ;;  %v2095_v40 = vadd.f32 %v2094_v16, %v2005_v30  ;;  %v1725_v56 = vpop.f32.mrf.mxu1  ;;  %v2185_v29 = vpop.f32.mrf.mxu0  ;;  %3542 = vst [vmem:[%s3834_s8 + $0x34] sm:$0xf] %v2764_v19  ;;  %v2455_v1 = vunpack.c.l.b16 %v2391_v20  ;;  %v3737_v59 = vld [vmem:[%s3862_s3 + $0xc0] sm:$0xff]  ;;  %v550_v30 = vpack.c.b16 %v532_v2, %v532_v2 }
 0x242   : > { %v1726_v41 = vadd.f32 %v1725_v56, %v4837_v33 }
 0x243   : > { %v2184_v25 = vadd.f32 %v2183_v50, %v2095_v40  ;;  %v2482_v54 = vpack.c.b16 %v2455_v1, %v2454_v24  ;;  %v4620_v50 = vld [vmem:[%s3862_s3 + $0xcc] sm:$0xff] }
 0x244   : > { %v759_v16 = vshll.u32 %v4620_v50, 16 }
 0x245   : > { %v2248_v3 = vadd.f32 %v2184_v25, %v1724_v14  ;;  %v2523_v10 = vshrl.u32 %v2482_v54, 16  ;;  %v2526_v63 = vshll.u32 %v2482_v54, 16 }
 0x247   : > { %v2280_v15 = vadd.f32 %v2279_v57, %v2248_v3  ;;  %v2321_v23 = vmul.f32 %v2248_v3, %v2248_v3  ;;  %v2525_v12 = vrot.slane %v2523_v10, 7  ;;  %v2392_v20 = vpack.c.bf16 %v2248_v3, %v2248_v3 }
 0x248   : > { %v2007_v7 = vpop.f32.mrf.mxu2  ;;  %v2096_v21 = vpop.f32.mrf.mxu3  ;;  %v761_v10 = vrot.slane %v759_v16, 1 }
 0x249   : > { %v2352_v32 = vadd.f32 %v2351_v34, %v2321_v23  ;;  %v2097_v27 = vadd.f32 %v2096_v21, %v2007_v7  ;;  %v1728_v51 = vpop.f32.mrf.mxu1  ;;  %v2188_v35 = vpop.f32.mrf.mxu0  ;;  %v2528_v5 = vor.u32 %v2526_v63, %v2525_v12  ;;  %v2661_v26 = vsel %vm4560_vm4, %v2525_v12, 0 }
 0x24a   : > { %v2720_v43 = vunpack.c.l.b16 %v2661_v26  ;;  %v2456_v54 = vunpack.c.l.b16 %v2392_v20  ;;  %v764_v23 = vshll.u32 %v550_v30, 16  ;;  %v1729_v47 = vadd.f32 %v1728_v51, %v4445_v22 }
 0x24b   : > { %v2186_v11 = vadd.f32 %v2185_v29, %v2097_v27  ;;  %v2645_v31 = vsel %vm4560_vm4, 0, %v2528_v5  ;;  %v838_v7 = vrot.slane %v4620_v50, 1  ;;  %v839_v21 = vrot.slane %v550_v30, 1 }
 0x24c   : > { %1767 = vmatmul.bf16.gmra.mxu1 %v4408_v9  ;;  %2227 = vmatmul.bf16.gmra.mxu0 %v4453_v42  ;;  %v2718_v39 = vunpack.c.l.b16 %v2645_v31  ;;  %v2719_v44 = vunpack.c.h.b16 %v2645_v31  ;;  %v2768_v19 = vpack.c.b16 %v2720_v43, %v2720_v43  ;;  %v766_v5 = vrot.slane %v764_v23, 1 }
 0x24d   : > { %v2249_v57 = vadd.f32 %v2186_v11, %v1726_v41  ;;  %2049 = vmatmul.bf16.gmra.mxu2 %v3737_v59  ;;  %2138 = vmatmul.bf16.gmra.mxu3 %v4450_v38  ;;  %v757_v38 = vshrl.u32 %v4620_v50, 16  ;;  %v840_v22 = vsel %vm786_vm1, %v838_v7, %v839_v21 }
 0x24e   : > { %v2766_v34 = vpack.c.b16 %v2718_v39, %v2718_v39  ;;  %v2767_v40 = vpack.c.b16 %v2719_v44, %v2719_v44  ;;  %3546 = vst [vmem:[%s3834_s8 + $0x44] sm:$0xf] %v2768_v19 }
 0x24f   : > { %v2281_v9 = vadd.f32 %v2280_v15, %v2249_v57  ;;  %v2322_v56 = vmul.f32 %v2249_v57, %v2249_v57  ;;  %v2393_v42 = vpack.c.bf16 %v2249_v57, %v2249_v57 }
 0x250   : > { %v2010_v29 = vpop.f32.mrf.mxu2  ;;  %v2099_v24 = vpop.f32.mrf.mxu3  ;;  %3544 = vst [vmem:[%s3834_s8 + $0x3c] sm:$0xf] %v2766_v34 }
 0x251   : > { %v2353_v1 = vadd.f32 %v2352_v32, %v2322_v56  ;;  %v2100_v45 = vadd.f32 %v2099_v24, %v2010_v29  ;;  %v1730_v14 = vpop.f32.mrf.mxu1  ;;  %v2190_v25 = vpop.f32.mrf.mxu0  ;;  %3545 = vst [vmem:[%s3834_s8 + $0x40] sm:$0xf] %v2767_v40  ;;  %v2457_v3 = vunpack.c.l.b16 %v2393_v42  ;;  %v762_v32 = vor.u32 %v761_v10, %v757_v38 }
 0x252   : > { %v1731_v20 = vadd.f32 %v1730_v14, %v4459_v62 }
 0x253   : > { %v2189_v12 = vadd.f32 %v2188_v35, %v2100_v45  ;;  %v2483_v15 = vpack.c.b16 %v2457_v3, %v2456_v54  ;;  %v767_v57 = vsel %vm551_vm0, %v762_v32, %v766_v5 }
 0x255   : > { %v2250_v63 = vadd.f32 %v2189_v12, %v1729_v47  ;;  %v2530_v27 = vshrl.u32 %v2483_v15, 16  ;;  %v2533_v33 = vshll.u32 %v2483_v15, 16 }
 0x257   : > { %v2282_v26 = vadd.f32 %v2281_v9, %v2250_v63  ;;  %v2323_v2 = vmul.f32 %v2250_v63, %v2250_v63  ;;  %v2532_v43 = vrot.slane %v2530_v27, 7  ;;  %v2394_v42 = vpack.c.bf16 %v2250_v63, %v2250_v63 }
 0x258   : > { %v2012_v41 = vpop.f32.mrf.mxu2  ;;  %v2101_v11 = vpop.f32.mrf.mxu3 }
 0x259   : > { %v2354_v31 = vadd.f32 %v2353_v1, %v2323_v2  ;;  %v2102_v39 = vadd.f32 %v2101_v11, %v2012_v41  ;;  %v1733_v44 = vpop.f32.mrf.mxu1  ;;  %v2193_v19 = vpop.f32.mrf.mxu0  ;;  %v2535_v51 = vor.u32 %v2533_v33, %v2532_v43  ;;  %v2662_v35 = vsel %vm4560_vm4, %v2532_v43, 0 }
 0x25a   : > { %v2723_v59 = vunpack.c.l.b16 %v2662_v35  ;;  %v2458_v10 = vunpack.c.l.b16 %v2394_v42 }
 0x25b   : > { %v2191_v30 = vadd.f32 %v2190_v25, %v2102_v39  ;;  %v2646_v16 = vsel %vm4560_vm4, 0, %v2535_v51 }
 0x25c   : > { %1772 = vmatmul.bf16.gmra.mxu1 %v4835_v53  ;;  %2232 = vmatmul.bf16.gmra.mxu0 %v840_v22  ;;  %v2721_v34 = vunpack.c.l.b16 %v2646_v16  ;;  %v2722_v40 = vunpack.c.h.b16 %v2646_v16  ;;  %v2771_v9 = vpack.c.b16 %v2723_v59, %v2723_v59 }
 0x25d   : > { %v2251_v56 = vadd.f32 %v2191_v30, %v1731_v20  ;;  %2054 = vmatmul.bf16.gmra.mxu2 %v4620_v50  ;;  %2143 = vmatmul.bf16.gmra.mxu3 %v767_v57  ;;  %v1734_v50 = vadd.f32 %v1733_v44, %v4464_v46 }
 0x25e   : > { %v2769_v29 = vpack.c.b16 %v2721_v34, %v2721_v34  ;;  %v2770_v24 = vpack.c.b16 %v2722_v40, %v2722_v40  ;;  %3549 = vst [vmem:[%s3834_s8 + $0x50] sm:$0xf] %v2771_v9 }
 0x25f   : > { %v2283_v62 = vadd.f32 %v2282_v26, %v2251_v56  ;;  %v2324_v1 = vmul.f32 %v2251_v56, %v2251_v56  ;;  %v2395_v45 = vpack.c.bf16 %v2251_v56, %v2251_v56 }
 0x260   : > { %v2015_v14 = vpop.f32.mrf.mxu2  ;;  %v2104_v25 = vpop.f32.mrf.mxu3  ;;  %3547 = vst [vmem:[%s3834_s8 + $0x48] sm:$0xf] %v2769_v29 }
 0x261   : > { %v2355_v53 = vadd.f32 %v2354_v31, %v2324_v1  ;;  %v2105_v38 = vadd.f32 %v2104_v25, %v2015_v14  ;;  %v1735_v54 = vpop.f32.mrf.mxu1  ;;  %v2195_v3 = vpop.f32.mrf.mxu0  ;;  %3548 = vst [vmem:[%s3834_s8 + $0x4c] sm:$0xf] %v2770_v24  ;;  %v2459_v23 = vunpack.c.l.b16 %v2395_v45 }
 0x262   : > { %v1736_v39 = vadd.f32 %v1735_v54, %v4471_v0 }
 0x263   : > { %v2194_v47 = vadd.f32 %v2193_v19, %v2105_v38  ;;  %v2484_v12 = vpack.c.b16 %v2459_v23, %v2458_v10 }
 0x265   : > { %v2252_v15 = vadd.f32 %v2194_v47, %v1734_v50  ;;  %v2537_v63 = vshrl.u32 %v2484_v12, 16  ;;  %v2540_v32 = vshll.u32 %v2484_v12, 16 }
 0x267   : > { %v2284_v7 = vadd.f32 %v2283_v62, %v2252_v15  ;;  %v2325_v21 = vmul.f32 %v2252_v15, %v2252_v15  ;;  %v2539_v27 = vrot.slane %v2537_v63, 7  ;;  %v2396_v59 = vpack.c.bf16 %v2252_v15, %v2252_v15 }
 0x268   : > { %v2017_v5 = vpop.f32.mrf.mxu2  ;;  %v2106_v26 = vpop.f32.mrf.mxu3 }
 0x269   : > { %v2356_v2 = vadd.f32 %v2355_v53, %v2325_v21  ;;  %v2107_v43 = vadd.f32 %v2106_v26, %v2017_v5  ;;  %v1738_v33 = vpop.f32.mrf.mxu1  ;;  %v2198_v41 = vpop.f32.mrf.mxu0  ;;  %v2542_v11 = vor.u32 %v2540_v32, %v2539_v27  ;;  %v2663_v31 = vsel %vm4560_vm4, %v2539_v27, 0 }
 0x26a   : > { %v2726_v46 = vunpack.c.l.b16 %v2663_v31  ;;  %v2460_v62 = vunpack.c.l.b16 %v2396_v59  ;;  %v1739_v45 = vadd.f32 %v1738_v33, %v4474_v28 }
 0x26b   : > { %v2196_v44 = vadd.f32 %v2195_v3, %v2107_v43  ;;  %v2647_v19 = vsel %vm4560_vm4, 0, %v2542_v11 }
 0x26c   : > { %v2724_v22 = vunpack.c.l.b16 %v2647_v19  ;;  %v2725_v51 = vunpack.c.h.b16 %v2647_v19  ;;  %v2774_v35 = vpack.c.b16 %v2726_v46, %v2726_v46 }
 0x26d   : > { %v2253_v57 = vadd.f32 %v2196_v44, %v1736_v39 }
 0x26e   : > { %v2772_v20 = vpack.c.b16 %v2724_v22, %v2724_v22  ;;  %v2773_v30 = vpack.c.b16 %v2725_v51, %v2725_v51  ;;  %3552 = vst [vmem:[%s3834_s8 + $0x5c] sm:$0xf] %v2774_v35 }
 0x26f   : > { %v2285_v16 = vadd.f32 %v2284_v7, %v2253_v57  ;;  %v2326_v34 = vmul.f32 %v2253_v57, %v2253_v57  ;;  %v2397_v40 = vpack.c.bf16 %v2253_v57, %v2253_v57 }
 0x270   : > { %v2020_v9 = vpop.f32.mrf.mxu2  ;;  %v2109_v56 = vpop.f32.mrf.mxu3  ;;  %3550 = vst [vmem:[%s3834_s8 + $0x54] sm:$0xf] %v2772_v20 }
 0x271   : > { %v2357_v0 = vadd.f32 %v2356_v2, %v2326_v34  ;;  %v2110_v42 = vadd.f32 %v2109_v56, %v2020_v9  ;;  %v1740_v29 = vpop.f32.mrf.mxu1  ;;  %v2200_v24 = vpop.f32.mrf.mxu0  ;;  %3551 = vst [vmem:[%s3834_s8 + $0x58] sm:$0xf] %v2773_v30  ;;  %v2461_v1 = vunpack.c.l.b16 %v2397_v40 }
 0x272   : > { %v1741_v32 = vadd.f32 %v1740_v29, %v4481_v17 }
 0x273   : > { %v2199_v14 = vadd.f32 %v2198_v41, %v2110_v42  ;;  %v2485_v25 = vpack.c.b16 %v2461_v1, %v2460_v62 }
 0x275   : > { %v2254_v53 = vadd.f32 %v2199_v14, %v1739_v45  ;;  %v2544_v38 = vshrl.u32 %v2485_v25, 16  ;;  %v2547_v23 = vshll.u32 %v2485_v25, 16 }
 0x277   : > { %v2286_v54 = vadd.f32 %v2285_v16, %v2254_v53  ;;  %v2327_v3 = vmul.f32 %v2254_v53, %v2254_v53  ;;  %v2546_v10 = vrot.slane %v2544_v38, 7  ;;  %v2398_v11 = vpack.c.bf16 %v2254_v53, %v2254_v53 }
 0x278   : > { %v2022_v50 = vpop.f32.mrf.mxu2  ;;  %v2111_v47 = vpop.f32.mrf.mxu3 }
 0x279   : > { %v2358_v12 = vadd.f32 %v2357_v0, %v2327_v3  ;;  %v2112_v15 = vadd.f32 %v2111_v47, %v2022_v50  ;;  %v1743_v63 = vpop.f32.mrf.mxu1  ;;  %v2203_v7 = vpop.f32.mrf.mxu0  ;;  %v2549_v21 = vor.u32 %v2547_v23, %v2546_v10  ;;  %v2664_v27 = vsel %vm4560_vm4, %v2546_v10, 0 }
 0x27a   : > { %v2729_v28 = vunpack.c.l.b16 %v2664_v27  ;;  %v2462_v20 = vunpack.c.l.b16 %v2398_v11  ;;  %v1744_v16 = vadd.f32 %v1743_v63, %v4484_v48 }
 0x27b   : > { %v2201_v5 = vadd.f32 %v2200_v24, %v2112_v15  ;;  %v2648_v26 = vsel %vm4560_vm4, 0, %v2549_v21 }
 0x27c   : > { %v2727_v2 = vunpack.c.l.b16 %v2648_v26  ;;  %v2728_v43 = vunpack.c.h.b16 %v2648_v26  ;;  %v2777_v33 = vpack.c.b16 %v2729_v28, %v2729_v28 }
 0x27d   : > { %v2255_v41 = vadd.f32 %v2201_v5, %v1741_v32 }
 0x27e   : > { %v2775_v31 = vpack.c.b16 %v2727_v2, %v2727_v2  ;;  %v2776_v46 = vpack.c.b16 %v2728_v43, %v2728_v43  ;;  %3555 = vst [vmem:[%s3834_s8 + $0x68] sm:$0xf] %v2777_v33 }
 0x27f   : > { %v2287_v39 = vadd.f32 %v2286_v54, %v2255_v41  ;;  %v2328_v44 = vmul.f32 %v2255_v41, %v2255_v41  ;;  %v2399_v19 = vpack.c.bf16 %v2255_v41, %v2255_v41 }
 0x280   : > { %v2025_v22 = vpop.f32.mrf.mxu2  ;;  %v2114_v51 = vpop.f32.mrf.mxu3  ;;  %3553 = vst [vmem:[%s3834_s8 + $0x60] sm:$0xf] %v2775_v31 }
 0x281   : > { %v2359_v17 = vadd.f32 %v2358_v12, %v2328_v44  ;;  %v2115_v35 = vadd.f32 %v2114_v51, %v2025_v22  ;;  %v1745_v57 = vpop.f32.mrf.mxu1  ;;  %v2205_v59 = vpop.f32.mrf.mxu0  ;;  %3554 = vst [vmem:[%s3834_s8 + $0x64] sm:$0xf] %v2776_v46  ;;  %v2463_v30 = vunpack.c.l.b16 %v2399_v19 }
 0x282   : > { %v1746_v3 = vadd.f32 %v1745_v57, %v4491_v36 }
 0x283   : > { %v2204_v34 = vadd.f32 %v2203_v7, %v2115_v35  ;;  %v2486_v40 = vpack.c.b16 %v2463_v30, %v2462_v20 }
 0x285   : > { %v2256_v9 = vadd.f32 %v2204_v34, %v1744_v16  ;;  %v2551_v56 = vshrl.u32 %v2486_v40, 16  ;;  %v2554_v24 = vshll.u32 %v2486_v40, 16 }
 0x287   : > { %v2288_v0 = vadd.f32 %v2287_v39, %v2256_v9  ;;  %v2329_v42 = vmul.f32 %v2256_v9, %v2256_v9  ;;  %v2553_v29 = vrot.slane %v2551_v56, 7  ;;  %v2400_v63 = vpack.c.bf16 %v2256_v9, %v2256_v9 }
 0x288   : > { %v2027_v62 = vpop.f32.mrf.mxu2  ;;  %v2116_v1 = vpop.f32.mrf.mxu3 }
 0x289   : > { %v2360_v45 = vadd.f32 %v2359_v17, %v2329_v42  ;;  %v2117_v14 = vadd.f32 %v2116_v1, %v2027_v62  ;;  %v1748_v25 = vpop.f32.mrf.mxu1  ;;  %v2208_v53 = vpop.f32.mrf.mxu0  ;;  %v2556_v38 = vor.u32 %v2554_v24, %v2553_v29  ;;  %v2665_v54 = vsel %vm4560_vm4, %v2553_v29, 0 }
 0x28a   : > { %v2732_v48 = vunpack.c.l.b16 %v2665_v54  ;;  %v2464_v41 = vunpack.c.l.b16 %v2400_v63  ;;  %v1749_v31 = vadd.f32 %v1748_v25, %v4494_v61 }
 0x28b   : > { %v2206_v10 = vadd.f32 %v2205_v59, %v2117_v14  ;;  %v2649_v23 = vsel %vm4560_vm4, 0, %v2556_v38 }
 0x28c   : > { %v2730_v50 = vunpack.c.l.b16 %v2649_v23  ;;  %v2731_v47 = vunpack.c.h.b16 %v2649_v23  ;;  %v2780_v12 = vpack.c.b16 %v2732_v48, %v2732_v48 }
 0x28d   : > { %v2257_v15 = vadd.f32 %v2206_v10, %v1746_v3 }
 0x28e   : > { %v2778_v7 = vpack.c.b16 %v2730_v50, %v2730_v50  ;;  %v2779_v21 = vpack.c.b16 %v2731_v47, %v2731_v47  ;;  %3558 = vst [vmem:[%s3834_s8 + $0x74] sm:$0xf] %v2780_v12 }
 0x28f   : > { %v2289_v27 = vadd.f32 %v2288_v0, %v2257_v15  ;;  %v2330_v28 = vmul.f32 %v2257_v15, %v2257_v15  ;;  %v2401_v32 = vpack.c.bf16 %v2257_v15, %v2257_v15 }
 0x290   : > { %v2030_v5 = vpop.f32.mrf.mxu2  ;;  %v2119_v26 = vpop.f32.mrf.mxu3  ;;  %3556 = vst [vmem:[%s3834_s8 + $0x6c] sm:$0xf] %v2778_v7 }
 0x291   : > { %v2361_v36 = vadd.f32 %v2360_v45, %v2330_v28  ;;  %v2120_v2 = vadd.f32 %v2119_v26, %v2030_v5  ;;  %v1750_v43 = vpop.f32.mrf.mxu1  ;;  %v2210_v33 = vpop.f32.mrf.mxu0  ;;  %3557 = vst [vmem:[%s3834_s8 + $0x70] sm:$0xf] %v2779_v21  ;;  %v2465_v11 = vunpack.c.l.b16 %v2401_v32 }
 0x292   : > { %v1751_v56 = vadd.f32 %v1750_v43, %v4501_v52 }
 0x293   : > { %v2209_v46 = vadd.f32 %v2208_v53, %v2120_v2  ;;  %v2487_v39 = vpack.c.b16 %v2465_v11, %v2464_v41 }
 0x295   : > { %v2258_v44 = vadd.f32 %v2209_v46, %v1749_v31  ;;  %v2558_v19 = vshrl.u32 %v2487_v39, 16  ;;  %v2561_v35 = vshll.u32 %v2487_v39, 16 }
 0x297   : > { %v2290_v22 = vadd.f32 %v2289_v27, %v2258_v44  ;;  %v2331_v51 = vmul.f32 %v2258_v44, %v2258_v44  ;;  %v2560_v17 = vrot.slane %v2558_v19, 7  ;;  %v2402_v45 = vpack.c.bf16 %v2258_v44, %v2258_v44 }
 0x298   : > { %v2032_v57 = vpop.f32.mrf.mxu2  ;;  %v2121_v59 = vpop.f32.mrf.mxu3 }
 0x299   : > { %v2362_v20 = vadd.f32 %v2361_v36, %v2331_v51  ;;  %v2122_v30 = vadd.f32 %v2121_v59, %v2032_v57  ;;  %v1753_v16 = vpop.f32.mrf.mxu1  ;;  %v2213_v34 = vpop.f32.mrf.mxu0  ;;  %v2563_v40 = vor.u32 %v2561_v35, %v2560_v17  ;;  %v2666_v9 = vsel %vm4560_vm4, %v2560_v17, 0 }
 0x29a   : > { %v2735_v61 = vunpack.c.l.b16 %v2666_v9  ;;  %v2466_v47 = vunpack.c.l.b16 %v2402_v45  ;;  %v1754_v15 = vadd.f32 %v1753_v16, %v4504_v60 }
 0x29b   : > { %v2211_v0 = vadd.f32 %v2210_v33, %v2122_v30  ;;  %v2650_v42 = vsel %vm4560_vm4, 0, %v2563_v40 }
 0x29c   : > { %v2733_v29 = vunpack.c.l.b16 %v2650_v42  ;;  %v2734_v24 = vunpack.c.h.b16 %v2650_v42  ;;  %v2783_v62 = vpack.c.b16 %v2735_v61, %v2735_v61 }
 0x29d   : > { %v2259_v1 = vadd.f32 %v2211_v0, %v1751_v56 }
 0x29e   : > { %v2781_v14 = vpack.c.b16 %v2733_v29, %v2733_v29  ;;  %v2782_v25 = vpack.c.b16 %v2734_v24, %v2734_v24  ;;  %3561 = vst [vmem:[%s3834_s8 + $0x80] sm:$0xf] %v2783_v62 }
 0x29f   : > { %v2291_v53 = vadd.f32 %v2290_v22, %v2259_v1  ;;  %v2332_v38 = vmul.f32 %v2259_v1, %v2259_v1  ;;  %v2403_v54 = vpack.c.bf16 %v2259_v1, %v2259_v1 }
 0x2a0   : > { %v2035_v48 = vpop.f32.mrf.mxu2  ;;  %v2124_v3 = vpop.f32.mrf.mxu3  ;;  %3559 = vst [vmem:[%s3834_s8 + $0x78] sm:$0xf] %v2781_v14 }
 0x2a1   : > { %v2363_v52 = vadd.f32 %v2362_v20, %v2332_v38  ;;  %v2125_v10 = vadd.f32 %v2124_v3, %v2035_v48  ;;  %v1755_v23 = vpop.f32.mrf.mxu1  ;;  %v2215_v50 = vpop.f32.mrf.mxu0  ;;  %3560 = vst [vmem:[%s3834_s8 + $0x7c] sm:$0xf] %v2782_v25  ;;  %v2467_v12 = vunpack.c.l.b16 %v2403_v54 }
 0x2a2   : > { %v1756_v39 = vadd.f32 %v1755_v23, %v4511_v49 }
 0x2a3   : > { %v2214_v63 = vadd.f32 %v2213_v34, %v2125_v10  ;;  %v2488_v7 = vpack.c.b16 %v2467_v12, %v2466_v47 }
 0x2a5   : > { %v2260_v21 = vadd.f32 %v2214_v63, %v1754_v15  ;;  %v2565_v27 = vshrl.u32 %v2488_v7, 16  ;;  %v2568_v26 = vshll.u32 %v2488_v7, 16 }
 0x2a7   : > { %v2292_v28 = vadd.f32 %v2291_v53, %v2260_v21  ;;  %v2333_v32 = vmul.f32 %v2260_v21, %v2260_v21  ;;  %v2567_v5 = vrot.slane %v2565_v27, 7  ;;  %v2404_v57 = vpack.c.bf16 %v2260_v21, %v2260_v21 }
 0x2a8   : > { %v2037_v36 = vpop.f32.mrf.mxu2  ;;  %v2126_v2 = vpop.f32.mrf.mxu3 }
 0x2a9   : > { %v2364_v43 = vadd.f32 %v2363_v52, %v2333_v32  ;;  %v2127_v33 = vadd.f32 %v2126_v2, %v2037_v36  ;;  %v1758_v41 = vpop.f32.mrf.mxu1  ;;  %v2218_v11 = vpop.f32.mrf.mxu0  ;;  %v2570_v31 = vor.u32 %v2568_v26, %v2567_v5  ;;  %v2667_v46 = vsel %vm4560_vm4, %v2567_v5, 0 }
 0x2aa   : > { %v2738_v60 = vunpack.c.l.b16 %v2667_v46  ;;  %v2468_v42 = vunpack.c.l.b16 %v2404_v57  ;;  %v1759_v24 = vadd.f32 %v1758_v41, %v4514_v55 }
 0x2ab   : > { %v2216_v44 = vadd.f32 %v2215_v50, %v2127_v33  ;;  %v2651_v19 = vsel %vm4560_vm4, 0, %v2570_v31 }
 0x2ac   : > { %v2736_v22 = vunpack.c.l.b16 %v2651_v19  ;;  %v2737_v51 = vunpack.c.h.b16 %v2651_v19  ;;  %v2786_v17 = vpack.c.b16 %v2738_v60, %v2738_v60 }
 0x2ad   : > { %v2261_v35 = vadd.f32 %v2216_v44, %v1756_v39 }
 0x2ae   : > { %v2784_v59 = vpack.c.b16 %v2736_v22, %v2736_v22  ;;  %v2785_v20 = vpack.c.b16 %v2737_v51, %v2737_v51  ;;  %3564 = vst [vmem:[%s3834_s8 + $0x8c] sm:$0xf] %v2786_v17 }
 0x2af   : > { %v2293_v30 = vadd.f32 %v2292_v28, %v2261_v35  ;;  %v2334_v16 = vmul.f32 %v2261_v35, %v2261_v35  ;;  %v2405_v34 = vpack.c.bf16 %v2261_v35, %v2261_v35 }
 0x2b0   : > { %v2040_v40 = vpop.f32.mrf.mxu2  ;;  %v2129_v9 = vpop.f32.mrf.mxu3  ;;  %3562 = vst [vmem:[%s3834_s8 + $0x84] sm:$0xf] %v2784_v59 }
 0x2b1   : > { %v2365_v49 = vadd.f32 %v2364_v43, %v2334_v16  ;;  %v2130_v61 = vadd.f32 %v2129_v9, %v2040_v40  ;;  %v1760_v56 = vpop.f32.mrf.mxu1  ;;  %v2220_v0 = vpop.f32.mrf.mxu0  ;;  %3563 = vst [vmem:[%s3834_s8 + $0x88] sm:$0xf] %v2785_v20  ;;  %v2469_v29 = vunpack.c.l.b16 %v2405_v34 }
 0x2b2   : > { %v1761_v15 = vadd.f32 %v1760_v56, %v4521_v6 }
 0x2b3   : > { %v2219_v62 = vadd.f32 %v2218_v11, %v2130_v61  ;;  %v2489_v1 = vpack.c.b16 %v2469_v29, %v2468_v42 }
 0x2b5   : > { %v2262_v45 = vadd.f32 %v2219_v62, %v1759_v24  ;;  %v2572_v14 = vshrl.u32 %v2489_v1, 16  ;;  %v2575_v54 = vshll.u32 %v2489_v1, 16 }
 0x2b7   : > { %v2294_v25 = vadd.f32 %v2293_v30, %v2262_v45  ;;  %v2335_v53 = vmul.f32 %v2262_v45, %v2262_v45  ;;  %v2574_v38 = vrot.slane %v2572_v14, 7  ;;  %v2406_v5 = vpack.c.bf16 %v2262_v45, %v2262_v45 }
 0x2b8   : > { %v2042_v48 = vpop.f32.mrf.mxu2  ;;  %v2131_v3 = vpop.f32.mrf.mxu3 }
 0x2b9   : > { %v2366_v52 = vadd.f32 %v2365_v49, %v2335_v53  ;;  %v2132_v10 = vadd.f32 %v2131_v3, %v2042_v48  ;;  %v1763_v23 = vpop.f32.mrf.mxu1  ;;  %v2223_v50 = vpop.f32.mrf.mxu0  ;;  %v2577_v47 = vor.u32 %v2575_v54, %v2574_v38  ;;  %v2668_v12 = vsel %vm4560_vm4, %v2574_v38, 0 }
 0x2ba   : > { %v2741_v55 = vunpack.c.l.b16 %v2668_v12  ;;  %v2470_v39 = vunpack.c.l.b16 %v2406_v5  ;;  %v1764_v19 = vadd.f32 %v1763_v23, %v4524_v8 }
 0x2bb   : > { %v2221_v63 = vadd.f32 %v2220_v0, %v2132_v10  ;;  %v2652_v7 = vsel %vm4560_vm4, 0, %v2577_v47 }
 0x2bc   : > { %v2739_v21 = vunpack.c.l.b16 %v2652_v7  ;;  %v2740_v27 = vunpack.c.h.b16 %v2652_v7  ;;  %v2789_v28 = vpack.c.b16 %v2741_v55, %v2741_v55 }
 0x2bd   : > { %v2263_v32 = vadd.f32 %v2221_v63, %v1761_v15  ;;  %v3763_v63 = vmov 0.0  }
 0x2be   : > { %v2787_v26 = vpack.c.b16 %v2739_v21, %v2739_v21  ;;  %v2788_v36 = vpack.c.b16 %v2740_v27, %v2740_v27  ;;  %3567 = vst [vmem:[%s3834_s8 + $0x98] sm:$0xf] %v2789_v28 }
 0x2bf   : > { %v2295_v2 = vadd.f32 %v2294_v25, %v2263_v32  ;;  %v2336_v43 = vmul.f32 %v2263_v32, %v2263_v32  ;;  %v2407_v33 = vpack.c.bf16 %v2263_v32, %v2263_v32  ;;  %323 = vst [vmem:[%s4713_s10] sm:$0x1] %v3763_v63 }
 0x2c0   : > { %v2045_v41 = vpop.f32.mrf.mxu2  ;;  %v2134_v11 = vpop.f32.mrf.mxu3  ;;  %3565 = vst [vmem:[%s3834_s8 + $0x90] sm:$0xf] %v2787_v26 }
 0x2c1   : > { %v2367_v6 = vadd.f32 %v2366_v52, %v2336_v43  ;;  %v2135_v31 = vadd.f32 %v2134_v11, %v2045_v41  ;;  %v1765_v46 = vpop.f32.mrf.mxu1  ;;  %v2225_v60 = vpop.f32.mrf.mxu0  ;;  %3566 = vst [vmem:[%s3834_s8 + $0x94] sm:$0xf] %v2788_v36  ;;  %v2471_v44 = vunpack.c.l.b16 %v2407_v33 }
 0x2c2   : > { %v1766_v8 = vadd.f32 %v1765_v46, %v4531_v13  ;;  %324 = vst [vmem:[%s4720_s13] sm:$0x1] %v3763_v63 }
 0x2c3   : > { %v2224_v22 = vadd.f32 %v2223_v50, %v2135_v31  ;;  %v2490_v51 = vpack.c.b16 %v2471_v44, %v2470_v39 }
 0x2c5   : > { %v2264_v17 = vadd.f32 %v2224_v22, %v1764_v19  ;;  %v2579_v35 = vshrl.u32 %v2490_v51, 16  ;;  %v2582_v30 = vshll.u32 %v2490_v51, 16 }
 0x2c7   : > { %v2296_v57 = vadd.f32 %v2295_v2, %v2264_v17  ;;  %v2337_v59 = vmul.f32 %v2264_v17, %v2264_v17  ;;  %v2581_v20 = vrot.slane %v2579_v35, 7  ;;  %v2408_v25 = vpack.c.bf16 %v2264_v17, %v2264_v17 }
 0x2c8   : > { %v2047_v16 = vpop.f32.mrf.mxu2  ;;  %v2136_v34 = vpop.f32.mrf.mxu3 }
 0x2c9   : > { %v2368_v40 = vadd.f32 %v2367_v6, %v2337_v59  ;;  %v2137_v9 = vadd.f32 %v2136_v34, %v2047_v16  ;;  %v1768_v49 = vpop.f32.mrf.mxu1  ;;  %v2584_v61 = vor.u32 %v2582_v30, %v2581_v20  ;;  %v2669_v56 = vsel %vm4560_vm4, %v2581_v20, 0  ;;  %v2228_v29 = vpop.f32.mrf.mxu0 }
 0x2ca   : > { %v2744_v0 = vunpack.c.l.b16 %v2669_v56  ;;  %v2472_v50 = vunpack.c.l.b16 %v2408_v25  ;;  %v1769_v12 = vadd.f32 %v1768_v49, %v4534_v4 }
 0x2cb   : > { %v2226_v42 = vadd.f32 %v2225_v60, %v2137_v9  ;;  %v2653_v24 = vsel %vm4560_vm4, 0, %v2584_v61 }
 0x2cc   : > { %v2742_v62 = vunpack.c.l.b16 %v2653_v24  ;;  %v2743_v1 = vunpack.c.h.b16 %v2653_v24  ;;  %v2792_v45 = vpack.c.b16 %v2744_v0, %v2744_v0 }
 0x2cd   : > { %v2265_v14 = vadd.f32 %v2226_v42, %v1766_v8 }
 0x2ce   : > { %v2790_v53 = vpack.c.b16 %v2742_v62, %v2742_v62  ;;  %v2791_v38 = vpack.c.b16 %v2743_v1, %v2743_v1  ;;  %3570 = vst [vmem:[%s3834_s8 + $0xa4] sm:$0xf] %v2792_v45 }
 0x2cf   : > { %v2297_v54 = vadd.f32 %v2296_v57, %v2265_v14  ;;  %v2338_v48 = vmul.f32 %v2265_v14, %v2265_v14  ;;  %v2409_v13 = vpack.c.bf16 %v2265_v14, %v2265_v14 }
 0x2d0   : > { %v2050_v3 = vpop.f32.mrf.mxu2  ;;  %v2139_v52 = vpop.f32.mrf.mxu3  ;;  %3568 = vst [vmem:[%s3834_s8 + $0x9c] sm:$0xf] %v2790_v53 }
 0x2d1   : > { %v2369_v10 = vadd.f32 %v2368_v40, %v2338_v48  ;;  %v2140_v23 = vadd.f32 %v2139_v52, %v2050_v3  ;;  %3569 = vst [vmem:[%s3834_s8 + $0xa0] sm:$0xf] %v2791_v38  ;;  %v2473_v47 = vunpack.c.l.b16 %v2409_v13  ;;  %v1770_v15 = vpop.f32.mrf.mxu1  ;;  %v2230_v27 = vpop.f32.mrf.mxu0  ;;  %v4838_v52 = vld [vmem:[#allocation15_spill] sm:$0xff] }
 0x2d2   : > { %v1771_v31 = vadd.f32 %v1770_v15, %v4541_v58 }
 0x2d3   : > { %v2229_v55 = vadd.f32 %v2228_v29, %v2140_v23  ;;  %v2491_v7 = vpack.c.b16 %v2473_v47, %v2472_v50 }
 0x2d5   : > { %v2266_v21 = vadd.f32 %v2229_v55, %v1769_v12  ;;  %v2586_v28 = vshrl.u32 %v2491_v7, 16  ;;  %v2589_v36 = vshll.u32 %v2491_v7, 16 }
 0x2d7   : > { %v2298_v32 = vadd.f32 %v2297_v54, %v2266_v21  ;;  %v2339_v5 = vmul.f32 %v2266_v21, %v2266_v21  ;;  %v2588_v26 = vrot.slane %v2586_v28, 7  ;;  %v2410_v17 = vpack.c.bf16 %v2266_v21, %v2266_v21 }
 0x2d8   : > { %v2052_v2 = vpop.f32.mrf.mxu2  ;;  %v2141_v43 = vpop.f32.mrf.mxu3 }
 0x2d9   : > { %v2370_v33 = vadd.f32 %v2369_v10, %v2339_v5  ;;  %v2142_v41 = vadd.f32 %v2141_v43, %v2052_v2  ;;  %v2591_v11 = vor.u32 %v2589_v36, %v2588_v26  ;;  %v2670_v4 = vsel %vm4560_vm4, %v2588_v26, 0  ;;  %v1773_v51 = vpop.f32.mrf.mxu1  ;;  %v2233_v30 = vpop.f32.mrf.mxu0 }
 0x2da   : > { %v2747_v6 = vunpack.c.l.b16 %v2670_v4  ;;  %v2474_v49 = vunpack.c.l.b16 %v2410_v17  ;;  %v1774_v56 = vadd.f32 %v1773_v51, %v4544_v18 }
 0x2db   : > { %v2231_v46 = vadd.f32 %v2230_v27, %v2142_v41  ;;  %v2654_v60 = vsel %vm4560_vm4, 0, %v2591_v11 }
 0x2dc   : > { %v2745_v39 = vunpack.c.l.b16 %v2654_v60  ;;  %v2746_v44 = vunpack.c.h.b16 %v2654_v60  ;;  %v2795_v19 = vpack.c.b16 %v2747_v6, %v2747_v6 }
 0x2dd   : > { %v2267_v22 = vadd.f32 %v2231_v46, %v1771_v31 }
 0x2de   : > { %v2793_v35 = vpack.c.b16 %v2745_v39, %v2745_v39  ;;  %v2794_v57 = vpack.c.b16 %v2746_v44, %v2746_v44  ;;  %3573 = vst [vmem:[%s3834_s8 + $0xb0] sm:$0xf] %v2795_v19 }
 0x2df   : > { %v2299_v59 = vadd.f32 %v2298_v32, %v2267_v22  ;;  %v2340_v20 = vmul.f32 %v2267_v22, %v2267_v22  ;;  %v2411_v16 = vpack.c.bf16 %v2267_v22, %v2267_v22  ;;  %v2270_v22 = vld [vmem:[%s4713_s10] sm:$0x1] }
 0x2e0   : > { %v2055_v58 = vpop.f32.mrf.mxu2  ;;  %v2144_v34 = vpop.f32.mrf.mxu3  ;;  %3571 = vst [vmem:[%s3834_s8 + $0xa8] sm:$0xf] %v2793_v35 }
 0x2e1   : > { %v2371_v40 = vadd.f32 %v2370_v33, %v2340_v20  ;;  %v2145_v9 = vadd.f32 %v2144_v34, %v2055_v58  ;;  %3572 = vst [vmem:[%s3834_s8 + $0xac] sm:$0xf] %v2794_v57  ;;  %v2475_v61 = vunpack.c.l.b16 %v2411_v16  ;;  %v1775_v1 = vpop.f32.mrf.mxu1  ;;  %v2235_v3 = vpop.f32.mrf.mxu0  ;;  %v2310_v20 = vld [vmem:[%s4720_s13] sm:$0x1] }
 0x2e2   : > { %v1776_v10 = vadd.f32 %v1775_v1, %v4838_v52 }
 0x2e3   : > { %v2234_v0 = vadd.f32 %v2233_v30, %v2145_v9  ;;  %v2492_v8 = vpack.c.b16 %v2475_v61, %v2474_v49 }
 0x2e5   : > { %v2268_v42 = vadd.f32 %v2234_v0, %v1774_v56  ;;  %v2593_v29 = vshrl.u32 %v2492_v8, 16  ;;  %v2596_v14 = vshll.u32 %v2492_v8, 16 }
 0x2e7   : > { %v2300_v24 = vadd.f32 %v2299_v59, %v2268_v42  ;;  %v2341_v62 = vmul.f32 %v2268_v42, %v2268_v42  ;;  %v2595_v45 = vrot.slane %v2593_v29, 7  ;;  %v2412_v63 = vpack.c.bf16 %v2268_v42, %v2268_v42 }
 0x2e8   : > { %v2057_v25 = vpop.f32.mrf.mxu2  ;;  %v2146_v53 = vpop.f32.mrf.mxu3 }
 0x2e9   : > { %v2372_v38 = vadd.f32 %v2371_v40, %v2341_v62  ;;  %v2147_v54 = vadd.f32 %v2146_v53, %v2057_v25  ;;  %v2598_v48 = vor.u32 %v2596_v14, %v2595_v45  ;;  %v2671_v13 = vsel %vm4560_vm4, %v2595_v45, 0 }
 0x2ea   : > { %v2750_v18 = vunpack.c.l.b16 %v2671_v13  ;;  %v2476_v36 = vunpack.c.l.b16 %v2412_v63 }
 0x2eb   : > { %v2236_v23 = vadd.f32 %v2235_v3, %v2147_v54  ;;  %v2655_v50 = vsel %vm4560_vm4, 0, %v2598_v48 }
 0x2ec   : > { %v2748_v47 = vunpack.c.l.b16 %v2655_v50  ;;  %v2749_v12 = vunpack.c.h.b16 %v2655_v50  ;;  %v2798_v55 = vpack.c.b16 %v2750_v18, %v2750_v18 }
 0x2ed   : > { %v2269_v15 = vadd.f32 %v2236_v23, %v1776_v10 }
 0x2ee   : > { %v2796_v7 = vpack.c.b16 %v2748_v47, %v2748_v47  ;;  %v2797_v21 = vpack.c.b16 %v2749_v12, %v2749_v12  ;;  %3576 = vst [vmem:[%s3834_s8 + $0xbc] sm:$0xf] %v2798_v55 }
 0x2ef   : > { %v2301_v27 = vadd.f32 %v2300_v24, %v2269_v15  ;;  %v2342_v28 = vmul.f32 %v2269_v15, %v2269_v15  ;;  %v2413_v32 = vpack.c.bf16 %v2269_v15, %v2269_v15 }
 0x2f0   : > { %3574 = vst [vmem:[%s3834_s8 + $0xb4] sm:$0xf] %v2796_v7 }
 0x2f1   : > { %v2302_v5 = vrot.slane %v2301_v27, 4  ;;  %v2373_v26 = vadd.f32 %v2372_v38, %v2342_v28  ;;  %3575 = vst [vmem:[%s3834_s8 + $0xb8] sm:$0xf] %v2797_v21  ;;  %v2477_v2 = vunpack.c.l.b16 %v2413_v32 }
 0x2f3   : > { %v2303_v43 = vadd.f32 %v2302_v5, %v2301_v27  ;;  %v2374_v33 = vrot.slane %v2373_v26, 4  ;;  %v2493_v41 = vpack.c.b16 %v2477_v2, %v2476_v36 }
 0x2f5   : > { %v2304_v11 = vrot.slane %v2303_v43, 2  ;;  %v2375_v4 = vadd.f32 %v2374_v33, %v2373_v26  ;;  %v2600_v6 = vshrl.u32 %v2493_v41, 16  ;;  %v2603_v39 = vshll.u32 %v2493_v41, 16 }
 0x2f7   : > { %v2305_v31 = vadd.f32 %v2304_v11, %v2303_v43  ;;  %v2376_v46 = vrot.slane %v2375_v4, 2  ;;  %v2602_v60 = vrot.slane %v2600_v6, 7 }
 0x2f9   : > { %v2306_v44 = vrot.slane %v2305_v31, 1  ;;  %v2377_v19 = vadd.f32 %v2376_v46, %v2375_v4  ;;  %v2605_v51 = vor.u32 %v2603_v39, %v2602_v60  ;;  %v2672_v17 = vsel %vm4560_vm4, %v2602_v60, 0 }
 0x2fa   : > { %v2753_v59 = vunpack.c.l.b16 %v2672_v17 }
 0x2fb   : > { %v2307_v35 = vadd.f32 %v2306_v44, %v2305_v31  ;;  %v2378_v57 = vrot.slane %v2377_v19, 1  ;;  %v2656_v30 = vsel %vm4560_vm4, 0, %v2605_v51 }
 0x2fc   : > { %v2751_v34 = vunpack.c.l.b16 %v2656_v30  ;;  %v2752_v40 = vunpack.c.h.b16 %v2656_v30  ;;  %v2801_v9 = vpack.c.b16 %v2753_v59, %v2753_v59 }
 0x2fd   : > { %v2308_v16 = vadd.f32 %v2307_v35, %v2270_v22  ;;  %v2379_v58 = vadd.f32 %v2378_v57, %v2377_v19 }
 0x2fe   : > { %v2799_v61 = vpack.c.b16 %v2751_v34, %v2751_v34  ;;  %v2800_v56 = vpack.c.b16 %v2752_v40, %v2752_v40  ;;  %3579 = vst [vmem:[%s3834_s8 + $0xc8] sm:$0xf] %v2801_v9 }
 0x2ff   : > { %2309 = vst [vmem:[%s4713_s10] sm:$0x1] %v2308_v16  ;;  %v2380_v49 = vadd.f32 %v2379_v58, %v2310_v20 }
 0x300   : > { %3577 = vst [vmem:[%s3834_s8 + $0xc0] sm:$0xf] %v2799_v61 }
 0x301   : > { %2381 = vst [vmem:[%s4720_s13] sm:$0x1] %v2380_v49 }
 0x302   : > { %3578 = vst [vmem:[%s3834_s8 + $0xc4] sm:$0xf] %v2800_v56 }
 0x303 PF: > { %s17_s23 = sadd.s32 1, %s3760_s23   ;;  %s4839_s21 = smov %s3756_s22 }
 0x304   : > { %p14_p5 = scmp.ge.s32.totalorder %s17_s23, 4   ;;  %s4840_s22 = smov %s4842_s2 }
 0x306   :  { %16 = sbr.rel (!%p14_p5) target bundleno = 2 (0x2), region = 98 }

// kernel: double_conv.4
= control target key start
LH: loop header
LB: loop body
LE: loop exit
PB: predicated region body
PF: predicated region fallthrough
CT: control target
= control target key end

     0   :  { %s4514_s21 = smov 0   ;;  %s4516_s22 = smov 0   ;;  %s5702_s0 = inlined_call_operand.vmem [shape: bf16[2,18,24,128], index: 0, kind: input, shape index: {}]   ;;  %s5703_s1 = inlined_call_operand.vmem [shape: bf16[3,384,128], index: 1, kind: input, shape index: {}]   ;;  %s5704_s2 = inlined_call_operand.vmem [shape: f32[1,128], index: 2, kind: input, shape index: {}]   ;;  %s5705_s3 = inlined_call_operand.vmem [shape: f32[1,128], index: 3, kind: input, shape index: {}]   ;;  %s5706_s4 = inlined_call_operand.vmem [shape: bf16[2,18,24,128], index: 4, kind: output, shape index: {0}]   ;;  %s5707_s5 = inlined_call_operand.vmem [shape: f32[2,1,128], index: 5, kind: output, shape index: {1}]   ;;  %s5708_s6 = inlined_call_operand.vmem [shape: f32[2,1,128], index: 6, kind: output, shape index: {2}]  }
   0x1   :  { %s4518_s23 = smov 0  }
   0x2 LB: > { %s29_s24 = sadd.s32 1, %s4470_s22  ;;  %p3763_p0 = scmp.ge.s32.totalorder %s4474_s23, 1  ;;  %s4474_s23 = sphi %s4518_s23, %s17_s23   ;;  %s4470_s22 = sphi %s4516_s22, %s5825_s22   ;;  %s4466_s21 = sphi %s4514_s21, %s5824_s21  }
   0x3   : > { %p31_p1 = scmp.ge.s32.totalorder %s29_s24, 2  ;;  %p244_p2 = scmp.lt.s32.totalorder %s4474_s23, 3 }
   0x5   : > { %s5827_s24 = smov (%p31_p1, %s29_s24), 0  ;;  %p245_p3 = pnand %p3763_p0, %p244_p2 }
   0x7   : > { %248 = sbr.rel (%p245_p3) target bundleno = 771 (0x303), region = 36 }
   0xc   : > { %v4234_v0 = vld [vmem:[%s5703_s1 + $0xf8] sm:$0xff]  ;;  %p293_p4 = scmp.lt.s32.totalorder %s4466_s21, 1  ;;  %v334_v1 = vlaneseq  ;;  %v4233_v2 = vld [vmem:[%s5703_s1 + $0xf0] sm:$0xff]  ;;  %v4232_v4 = vld [vmem:[%s5703_s1 + $0xe8] sm:$0xff]  ;;  %v4476_v7 = vmov 0   ;;  %vm1479_vm3 = vcmask 1046528  }
   0xd   : > { %1793 = vmatpush.bf16.msra.mxu0 %v4234_v0  ;;  %4390 = vmatpush.bf16.msra.mxu1 %v4234_v0  ;;  %v4559_v5 = vld [vmem:[%s5704_s2] ss:$0 sm:$0xff]  ;;  %v4230_v37 = vld [vmem:[%s5703_s1 + $0xd8] sm:$0xff]  ;;  %v4229_v55 = vld [vmem:[%s5703_s1 + $0xd0] sm:$0xff]  ;;  %vm1244_vm2 = vsmask.f32 7424 }
   0xe   : > { %s5829_s21 = smov (!%p293_p4, %s4466_s21), 1  ;;  %4391 = vmatpush.bf16.msra.mxu2 %v4234_v0  ;;  %4392 = vmatpush.bf16.msra.mxu3 %v4234_v0  ;;  %v4541_v3 = vshrl.u32 %v334_v1, 7  ;;  %v4564_v6 = vld [vmem:[%s5705_s3] ss:$0 sm:$0xff]  ;;  %vm3331_vm4 = vcmask 1040384  }
   0xf   : > { %s4414_s29 = smul.u32 216, %s5829_s21  ;;  %v4231_v21 = vld [vmem:[%s5703_s1 + $0xe0] sm:$0xff]  ;;  %vm3332_vm5 = vsmask.f32 256  ;;  %s5652_s17 = scalar_lea.vmem %s5707_s5, %s5829_s21 }
  0x10   : > { %vm338_vm0 = vcmp.ge.s32.totalorder %v4541_v3, 1  ;;  %vm5505_vm6 = vmand %vm3331_vm4, %vm3332_vm5  ;;  %s5659_s20 = scalar_lea.vmem %s5708_s6, %s5829_s21 }
  0x11   : > { %1794 = vmatpush.bf16.msra.mxu0 %v4233_v2  ;;  %4393 = vmatpush.bf16.msra.mxu1 %v4233_v2  ;;  %s4549_s10 = scalar_lea.vmem %s5702_s0, %s4414_s29  ;;  %s4554_s13 = scalar_lea.vmem %s5706_s4, %s4414_s29 }
  0x12   : > { %4394 = vmatpush.bf16.msra.mxu2 %v4233_v2  ;;  %4395 = vmatpush.bf16.msra.mxu3 %v4233_v2  ;;  %325 = vst [vmem:[%s4554_s13] sm:$0xf] %v4476_v7  ;;  %v353_v8 = vld [vmem:[%s4549_s10 + $0xc] sm:$0xf]  ;;  %v4569_v9 = vld [vmem:[%s4549_s10 + $0x10] sm:$0xff]   ;;  %v4572_v10 = vld [vmem:[%s4549_s10 + $0x38] sm:$0xff]  }
  0x13   : > { %326 = vst [vmem:[%s4554_s13 + $0x4] sm:$0xf] %v4476_v7  ;;  %v4277_v11 = vunpack.c.l.bf16 %v4569_v9  ;;  %v407_v12 = vunpack.c.l.bf16 %v353_v8  ;;  %v4298_v13 = vunpack.c.h.bf16 %v4572_v10  ;;  %v4578_v14 = vld [vmem:[%s4549_s10 + $0x40] sm:$0xff]   ;;  %v4378_v15 = vld [vmem:[%s4549_s10 + $0x68] sm:$0xff]   ;;  %v4379_v16 = vld [vmem:[%s4549_s10 + $0x70] sm:$0xff]  }
  0x14   : > { %327 = vst [vmem:[%s4554_s13 + $0x8] sm:$0xf] %v4476_v7  ;;  %v4301_v17 = vunpack.c.l.bf16 %v4578_v14  ;;  %v4322_v18 = vunpack.c.h.bf16 %v4378_v15  ;;  %v4325_v19 = vunpack.c.l.bf16 %v4379_v16  ;;  %v4384_v20 = vld [vmem:[%s4549_s10 + $0x98] sm:$0xff]   ;;  %v4385_v25 = vld [vmem:[%s4549_s10 + $0xa0] sm:$0xff]   ;;  %v4374_v60 = vld [vmem:[%s4549_s10 + $0x48] sm:$0xff]  }
  0x15   : > { %1795 = vmatpush.bf16.msra.mxu0 %v4232_v4  ;;  %4396 = vmatpush.bf16.msra.mxu1 %v4232_v4  ;;  %3766 = vst [vmem:[%s4554_s13 + $0xcc] sm:$0xf] %v4476_v7  ;;  %v464_v22 = vmul.f32 %v4559_v5, %v407_v12  ;;  %v465_v23 = vmul.f32 %v4559_v5, %v4277_v11  ;;  %v4346_v32 = vunpack.c.h.bf16 %v4384_v20  ;;  %v4349_v36 = vunpack.c.l.bf16 %v4385_v25  ;;  %v4368_v54 = vld [vmem:[%s4549_s10 + $0x18] sm:$0xff]   ;;  %v4228_v11 = vld [vmem:[%s5703_s1 + $0xc8] sm:$0xff] }
  0x16   : > { %v476_v24 = vmul.f32 %v4559_v5, %v4298_v13  ;;  %4397 = vmatpush.bf16.msra.mxu2 %v4232_v4  ;;  %4398 = vmatpush.bf16.msra.mxu3 %v4232_v4  ;;  %3767 = vst [vmem:[%s4554_s13 + $0xd0] sm:$0xf] %v4476_v7  ;;  %v477_v26 = vmul.f32 %v4559_v5, %v4301_v17  ;;  %v4281_v0 = vunpack.c.l.bf16 %v4368_v54  ;;  %v4380_v1 = vld [vmem:[%s4549_s10 + $0x78] sm:$0xff]   ;;  %v4282_v8 = vunpack.c.h.bf16 %v4368_v54 }
  0x17   : > { %v488_v27 = vmul.f32 %v4559_v5, %v4322_v18  ;;  %v489_v28 = vmul.f32 %v4559_v5, %v4325_v19  ;;  %3768 = vst [vmem:[%s4554_s13 + $0xd4] sm:$0xf] %v4476_v7  ;;  %v521_v29 = vadd.f32 %v4564_v6, %v464_v22  ;;  %v522_v30 = vadd.f32 %v4564_v6, %v465_v23  ;;  %v4218_v54 = vld [vmem:[%s5703_s1 + $0x78] sm:$0xff] }
  0x18   : > { %v533_v31 = vadd.f32 %v4564_v6, %v476_v24  ;;  %v534_v33 = vadd.f32 %v4564_v6, %v477_v26  ;;  %v500_v41 = vmul.f32 %v4559_v5, %v4346_v32  ;;  %v501_v45 = vmul.f32 %v4559_v5, %v4349_v36 }
  0x19   : > { %v545_v34 = vadd.f32 %v4564_v6, %v488_v27  ;;  %v546_v35 = vadd.f32 %v4564_v6, %v489_v28  ;;  %1796 = vmatpush.bf16.msra.mxu0 %v4231_v21  ;;  %4399 = vmatpush.bf16.msra.mxu1 %v4231_v21  ;;  %v575_v38 = vmax.f32 %v521_v29, 0.0  ;;  %v576_v39 = vmax.f32 %v522_v30, 0.0  ;;  %v4227_v30 = vld [vmem:[%s5703_s1 + $0xc0] sm:$0xff] }
  0x1a   : > { %v587_v40 = vmax.f32 %v533_v31, 0.0  ;;  %4400 = vmatpush.bf16.msra.mxu2 %v4231_v21  ;;  %4401 = vmatpush.bf16.msra.mxu3 %v4231_v21  ;;  %v588_v42 = vmax.f32 %v534_v33, 0.0  ;;  %v557_v49 = vadd.f32 %v4564_v6, %v500_v41  ;;  %v558_v57 = vadd.f32 %v4564_v6, %v501_v45  ;;  %v4386_v21 = vld [vmem:[%s4549_s10 + $0xa8] sm:$0xff]  }
  0x1b   : > { %v599_v43 = vmax.f32 %v545_v34, 0.0  ;;  %v600_v44 = vmax.f32 %v546_v35, 0.0  ;;  %v977_v46 = vsel %vm338_vm0, %v575_v38, 0.0  ;;  %v4612_v47 = vpack.c.bf16 %v576_v39, %v576_v39  ;;  %v4250_v38 = vld [vmem:[%s5703_s1 + $0x178] sm:$0xff] }
  0x1c   : > { %v989_v48 = vsel %vm338_vm0, %v587_v40, 0.0  ;;  %v1031_v50 = vpack.c.bf16 %v977_v46, %v977_v46  ;;  %v4617_v52 = vpack.c.bf16 %v588_v42, %v588_v42  ;;  %v611_v59 = vmax.f32 %v557_v49, 0.0  ;;  %v4210_v39 = vld [vmem:[%s5703_s1 + $0x38] sm:$0xff] }
  0x1d   : > { %v1043_v51 = vpack.c.bf16 %v989_v48, %v989_v48  ;;  %v1001_v53 = vsel %vm338_vm0, %v599_v43, 0.0  ;;  %1797 = vmatpush.bf16.msra.mxu0 %v4230_v37  ;;  %4402 = vmatpush.bf16.msra.mxu1 %v4230_v37  ;;  %v1121_v58 = vunpack.c.l.b16 %v4612_v47  ;;  %v1056_v62 = vpack.c.bf16 %v600_v44, %v600_v44 }
  0x1e   : > { %v1055_v56 = vpack.c.bf16 %v1001_v53, %v1001_v53  ;;  %4403 = vmatpush.bf16.msra.mxu2 %v4230_v37  ;;  %4404 = vmatpush.bf16.msra.mxu3 %v4230_v37  ;;  %v1120_v61 = vunpack.c.l.b16 %v1031_v50  ;;  %v612_v63 = vmax.f32 %v558_v57, 0.0  ;;  %v1129_v4 = vunpack.c.l.b16 %v4617_v52  ;;  %v4668_v52 = vld [vmem:[%s4549_s10 + $0x20] sm:$0xff]   ;;  %v4242_v53 = vld [vmem:[%s5703_s1 + $0x138] sm:$0xff]  ;;  %v4249_v57 = vld [vmem:[%s5703_s1 + $0x170] sm:$0xff] }
  0x1f   : > { %v1128_v2 = vunpack.c.l.b16 %v1043_v51  ;;  %v1013_v7 = vsel %vm338_vm0, %v611_v59, 0.0  ;;  %v4305_v16 = vunpack.c.l.bf16 %v4374_v60  ;;  %v467_v17 = vmul.f32 %v4559_v5, %v4281_v0 }
  0x20   : > { %v1136_v12 = vunpack.c.l.b16 %v1055_v56  ;;  %v1067_v13 = vpack.c.bf16 %v1013_v7, %v1013_v7  ;;  %v1068_v15 = vpack.c.bf16 %v612_v63, %v612_v63  ;;  %v468_v18 = vmul.f32 %v4559_v5, %v4282_v8 }
  0x21   : > { %1798 = vmatpush.bf16.msra.mxu0 %v4229_v55  ;;  %4405 = vmatpush.bf16.msra.mxu1 %v4229_v55  ;;  %v4306_v19 = vunpack.c.h.bf16 %v4374_v60  ;;  %v4329_v20 = vunpack.c.l.bf16 %v4380_v1  ;;  %v1137_v22 = vunpack.c.l.b16 %v1056_v62  ;;  %v479_v24 = vmul.f32 %v4559_v5, %v4305_v16  ;;  %v4690_v62 = vld [vmem:[%s4549_s10 + $0x28] sm:$0xff]  }
  0x22   : > { %4406 = vmatpush.bf16.msra.mxu2 %v4229_v55  ;;  %4407 = vmatpush.bf16.msra.mxu3 %v4229_v55  ;;  %v1144_v23 = vunpack.c.l.b16 %v1067_v13  ;;  %v4330_v25 = vunpack.c.h.bf16 %v4380_v1  ;;  %v524_v26 = vadd.f32 %v4564_v6, %v467_v17  ;;  %v525_v27 = vadd.f32 %v4564_v6, %v468_v18  ;;  %v4241_v13 = vld [vmem:[%s5703_s1 + $0x130] sm:$0xff] }
  0x23   : > { %v480_v28 = vmul.f32 %v4559_v5, %v4306_v19  ;;  %v491_v29 = vmul.f32 %v4559_v5, %v4329_v20  ;;  %v1145_v31 = vunpack.c.l.b16 %v1068_v15  ;;  %v536_v32 = vadd.f32 %v4564_v6, %v479_v24  ;;  %v4217_v17 = vld [vmem:[%s5703_s1 + $0x70] sm:$0xff]  ;;  %v4717_v20 = vld [vmem:[%s4549_s10 + $0x80] sm:$0xff]   ;;  %v4248_v24 = vld [vmem:[%s5703_s1 + $0x168] sm:$0xff] }
  0x24   : > { %v492_v33 = vmul.f32 %v4559_v5, %v4330_v25  ;;  %v4353_v34 = vunpack.c.l.bf16 %v4386_v21  ;;  %v578_v35 = vmax.f32 %v524_v26, 0.0  ;;  %v4354_v42 = vunpack.c.h.bf16 %v4386_v21  ;;  %v4720_v21 = vld [vmem:[%s4549_s10 + $0x88] sm:$0xff]  }
  0x25   : > { %1799 = vmatpush.bf16.msra.mxu0 %v4228_v11  ;;  %4408 = vmatpush.bf16.msra.mxu1 %v4228_v11  ;;  %v537_v36 = vadd.f32 %v4564_v6, %v480_v28  ;;  %v548_v37 = vadd.f32 %v4564_v6, %v491_v29  ;;  %v590_v40 = vmax.f32 %v536_v32, 0.0  ;;  %v4658_v44 = vpack.c.b16 %v1121_v58, %v1120_v61  ;;  %v4209_v58 = vld [vmem:[%s5703_s1 + $0x30] sm:$0xff]  ;;  %v4208_v25 = vld [vmem:[%s5703_s1 + $0x28] sm:$0xff] }
  0x26   : > { %4409 = vmatpush.bf16.msra.mxu2 %v4228_v11  ;;  %4410 = vmatpush.bf16.msra.mxu3 %v4228_v11  ;;  %v549_v41 = vadd.f32 %v4564_v6, %v492_v33  ;;  %v503_v43 = vmul.f32 %v4559_v5, %v4353_v34  ;;  %v4660_v45 = vpack.c.b16 %v1129_v4, %v1128_v2  ;;  %v579_v46 = vmax.f32 %v525_v27, 0.0  ;;  %v4699_v2 = vld [vmem:[%s4549_s10 + $0x50] sm:$0xff]   ;;  %v4702_v4 = vld [vmem:[%s4549_s10 + $0x58] sm:$0xff]  }
  0x27   : > { %v602_v47 = vmax.f32 %v548_v37, 0.0  ;;  %v4662_v48 = vpack.c.b16 %v1137_v22, %v1136_v12  ;;  %v4664_v49 = vpack.c.b16 %v1145_v31, %v1144_v23  ;;  %v591_v50 = vmax.f32 %v537_v36, 0.0  ;;  %v4387_v32 = vld [vmem:[%s4549_s10 + $0xb0] sm:$0xff]  }
  0x28   : > { %5735 = vst [vmem:[#allocation2_spill] sm:$0xff] %v4660_v45  ;;  %v504_v51 = vmul.f32 %v4559_v5, %v4354_v42  ;;  %v980_v55 = vsel %vm338_vm0, %v578_v35, 0.0  ;;  %v992_v56 = vsel %vm338_vm0, %v590_v40, 0.0  ;;  %v603_v59 = vmax.f32 %v549_v41, 0.0  ;;  %v4240_v41 = vld [vmem:[%s5703_s1 + $0x128] sm:$0xff] }
  0x29   : > { %1800 = vmatpush.bf16.msra.mxu0 %v4227_v30  ;;  %4411 = vmatpush.bf16.msra.mxu1 %v4227_v30  ;;  %v1004_v60 = vsel %vm338_vm0, %v602_v47, 0.0  ;;  %v560_v61 = vadd.f32 %v4564_v6, %v503_v43  ;;  %v4694_v63 = vpack.c.bf16 %v579_v46, %v579_v46  ;;  %v4286_v1 = vunpack.c.h.bf16 %v4668_v52  ;;  %v4216_v42 = vld [vmem:[%s5703_s1 + $0x68] sm:$0xff]  ;;  %v4247_v46 = vld [vmem:[%s5703_s1 + $0x160] sm:$0xff] }
  0x2a   : > { %4412 = vmatpush.bf16.msra.mxu2 %v4227_v30  ;;  %4413 = vmatpush.bf16.msra.mxu3 %v4227_v30  ;;  %v561_v0 = vadd.f32 %v4564_v6, %v504_v51  ;;  %v1034_v7 = vpack.c.bf16 %v980_v55, %v980_v55  ;;  %v1046_v8 = vpack.c.bf16 %v992_v56, %v992_v56  ;;  %v4289_v18 = vunpack.c.l.bf16 %v4690_v62  ;;  %v4207_v47 = vld [vmem:[%s5703_s1 + $0x20] sm:$0xff] }
  0x2b   : > { %v4706_v11 = vpack.c.bf16 %v591_v50, %v591_v50  ;;  %v614_v12 = vmax.f32 %v560_v61, 0.0  ;;  %v1058_v15 = vpack.c.bf16 %v1004_v60, %v1004_v60  ;;  %v470_v19 = vmul.f32 %v4559_v5, %v4286_v1 }
  0x2c   : > { %1801 = vmatmul.bf16.vlgmr.msra.gmra.mxu0 %v4658_v44  ;;  %1821 = vmatmul.bf16.vlgmr.msra.gmra.mxu1 %v4660_v45  ;;  %v615_v16 = vmax.f32 %v561_v0, 0.0  ;;  %v1059_v22 = vpack.c.bf16 %v603_v59, %v603_v59  ;;  %v4310_v26 = vunpack.c.h.bf16 %v4699_v2  ;;  %v4313_v27 = vunpack.c.l.bf16 %v4702_v4 }
  0x2d   : > { %1841 = vmatmul.bf16.vlgmr.msra.gmra.mxu2 %v4662_v48  ;;  %1861 = vmatmul.bf16.vlgmr.msra.gmra.mxu3 %v4664_v49  ;;  %v1016_v23 = vsel %vm338_vm0, %v614_v12, 0.0  ;;  %v471_v30 = vmul.f32 %v4559_v5, %v4289_v18  ;;  %v527_v31 = vadd.f32 %v4564_v6, %v470_v19  ;;  %v4334_v35 = vunpack.c.h.bf16 %v4717_v20  ;;  %v4215_v12 = vld [vmem:[%s5703_s1 + $0x60] sm:$0xff] }
  0x2e   : > { %1971 = vmatpush.bf16.msrb.mxu2 %v4250_v38  ;;  %2204 = vmatpush.bf16.msrb.mxu3 %v4210_v39  ;;  %v1070_v28 = vpack.c.bf16 %v1016_v23, %v1016_v23  ;;  %v1071_v29 = vpack.c.bf16 %v615_v16, %v615_v16  ;;  %v482_v33 = vmul.f32 %v4559_v5, %v4310_v26  ;;  %v4337_v36 = vunpack.c.l.bf16 %v4720_v21  ;;  %v4206_v16 = vld [vmem:[%s5703_s1 + $0x18] sm:$0xff] }
  0x2f   : > { %1882 = vmatpush.bf16.msrb.mxu1 %v4242_v53  ;;  %2293 = vmatpush.bf16.msrb.mxu0 %v4218_v54  ;;  %v483_v34 = vmul.f32 %v4559_v5, %v4313_v27  ;;  %v1122_v37 = vunpack.c.l.b16 %v1034_v7  ;;  %v1123_v38 = vunpack.c.l.b16 %v4694_v63  ;;  %v1130_v39 = vunpack.c.l.b16 %v1046_v8  ;;  %v4388_v54 = vld [vmem:[%s4549_s10 + $0xb8] sm:$0xff]   ;;  %v4788_v27 = vld [vmem:[%s4549_s10 + $0x60] sm:$0xff]  }
  0x30   : > { %v1131_v40 = vunpack.c.l.b16 %v4706_v11  ;;  %v1138_v43 = vunpack.c.l.b16 %v1058_v15  ;;  %v539_v50 = vadd.f32 %v4564_v6, %v482_v33  ;;  %v494_v51 = vmul.f32 %v4559_v5, %v4334_v35  ;;  %v4239_v11 = vld [vmem:[%s5703_s1 + $0x120] sm:$0xff]  ;;  %v4246_v15 = vld [vmem:[%s5703_s1 + $0x158] sm:$0xff] }
  0x31   : > { %v4358_v53 = vunpack.c.h.bf16 %v4387_v32  ;;  %v1139_v55 = vunpack.c.l.b16 %v1059_v22  ;;  %v1146_v56 = vunpack.c.l.b16 %v1070_v28  ;;  %v528_v59 = vadd.f32 %v4564_v6, %v471_v30  ;;  %v4780_v22 = vld [vmem:[%s4549_s10 + $0x30] sm:$0xff]   ;;  %v4238_v32 = vld [vmem:[%s5703_s1 + $0x118] sm:$0xff] }
  0x32   : > { %1972 = vmatpush.bf16.msrb.mxu2 %v4249_v57  ;;  %2205 = vmatpush.bf16.msrb.mxu3 %v4209_v58  ;;  %v1147_v57 = vunpack.c.l.b16 %v1071_v29  ;;  %v495_v58 = vmul.f32 %v4559_v5, %v4337_v36  ;;  %v581_v60 = vmax.f32 %v527_v31, 0.0  ;;  %v540_v61 = vadd.f32 %v4564_v6, %v483_v34  ;;  %v4214_v33 = vld [vmem:[%s5703_s1 + $0x58] sm:$0xff] }
  0x33   : > { %1883 = vmatpush.bf16.msrb.mxu1 %v4241_v13  ;;  %2294 = vmatpush.bf16.msrb.mxu0 %v4217_v17  ;;  %v551_v63 = vadd.f32 %v4564_v6, %v494_v51  ;;  %v593_v0 = vmax.f32 %v539_v50, 0.0  ;;  %v4361_v7 = vunpack.c.l.bf16 %v4388_v54  ;;  %v506_v8 = vmul.f32 %v4559_v5, %v4358_v53  ;;  %v4237_v54 = vld [vmem:[%s5703_s1 + $0x110] sm:$0xff] }
  0x34   : > { %v552_v1 = vadd.f32 %v4564_v6, %v495_v58  ;;  %v4774_v17 = vpack.c.b16 %v1123_v38, %v1122_v37  ;;  %v4776_v18 = vpack.c.b16 %v1131_v40, %v1130_v39  ;;  %v4782_v23 = vpack.c.b16 %v1139_v55, %v1138_v43  ;;  %v4245_v37 = vld [vmem:[%s5703_s1 + $0x150] sm:$0xff] }
  0x35   : > { %v605_v13 = vmax.f32 %v551_v63, 0.0  ;;  %v507_v19 = vmul.f32 %v4559_v5, %v4361_v7  ;;  %v563_v26 = vadd.f32 %v4564_v6, %v506_v8  ;;  %v983_v28 = vsel %vm338_vm0, %v581_v60, 0.0  ;;  %v4205_v38 = vld [vmem:[%s5703_s1 + $0x10] sm:$0xff]  ;;  %v4244_v60 = vld [vmem:[%s5703_s1 + $0x148] sm:$0xff]  ;;  %v4389_v7 = vld [vmem:[%s4549_s10 + $0xc0] sm:$0xff]  }
  0x36   : > { %1973 = vmatpush.bf16.msrb.mxu2 %v4248_v24  ;;  %2206 = vmatpush.bf16.msrb.mxu3 %v4208_v25  ;;  %5736 = vst [vmem:[#allocation3_spill] sm:$0xff] %v4776_v18  ;;  %v4784_v24 = vpack.c.b16 %v1147_v57, %v1146_v56  ;;  %v582_v25 = vmax.f32 %v528_v59, 0.0  ;;  %v594_v29 = vmax.f32 %v540_v61, 0.0  ;;  %v995_v30 = vsel %vm338_vm0, %v593_v0, 0.0  ;;  %v4213_v55 = vld [vmem:[%s5703_s1 + $0x50] sm:$0xff]  ;;  %v4204_v61 = vld [vmem:[%s5703_s1 + $0x8] sm:$0xff] }
  0x37   : > { %1884 = vmatpush.bf16.msrb.mxu1 %v4240_v41  ;;  %2295 = vmatpush.bf16.msrb.mxu0 %v4216_v42  ;;  %v606_v31 = vmax.f32 %v552_v1, 0.0  ;;  %v1007_v34 = vsel %vm338_vm0, %v605_v13, 0.0  ;;  %v564_v35 = vadd.f32 %v4564_v6, %v507_v19  ;;  %v617_v36 = vmax.f32 %v563_v26, 0.0  ;;  %v4383_v41 = vld [vmem:[%s4549_s10 + $0x90] sm:$0xff]   ;;  %v4212_v26 = vld [vmem:[%s5703_s1 + $0x48] sm:$0xff] }
  0x38   : > { %v4293_v39 = vunpack.c.l.bf16 %v4780_v22  ;;  %v4317_v40 = vunpack.c.l.bf16 %v4788_v27  ;;  %v1037_v42 = vpack.c.bf16 %v983_v28, %v983_v28  ;;  %v1038_v43 = vpack.c.bf16 %v582_v25, %v582_v25  ;;  %v4236_v25 = vld [vmem:[%s5703_s1 + $0x108] sm:$0xff] }
  0x39   : > { %v1050_v50 = vpack.c.bf16 %v594_v29, %v594_v29  ;;  %v1061_v51 = vpack.c.bf16 %v1007_v34, %v1007_v34  ;;  %v1019_v53 = vsel %vm338_vm0, %v617_v36, 0.0  ;;  %v1062_v56 = vpack.c.bf16 %v606_v31, %v606_v31  ;;  %v4243_v31 = vld [vmem:[%s5703_s1 + $0x140] sm:$0xff] }
  0x3a   : > { %1974 = vmatpush.bf16.msrb.mxu2 %v4247_v46  ;;  %2207 = vmatpush.bf16.msrb.mxu3 %v4207_v47  ;;  %v618_v46 = vmax.f32 %v564_v35, 0.0  ;;  %v1049_v47 = vpack.c.bf16 %v995_v30, %v995_v30  ;;  %v4294_v57 = vunpack.c.h.bf16 %v4780_v22  ;;  %v473_v58 = vmul.f32 %v4559_v5, %v4293_v39 }
  0x3b   : > { %1885 = vmatpush.bf16.msrb.mxu1 %v4239_v11  ;;  %2296 = vmatpush.bf16.msrb.mxu0 %v4215_v12  ;;  %v4341_v59 = vunpack.c.l.bf16 %v4383_v41  ;;  %v4318_v63 = vunpack.c.h.bf16 %v4788_v27  ;;  %v485_v0 = vmul.f32 %v4559_v5, %v4317_v40  ;;  %v4342_v1 = vunpack.c.h.bf16 %v4383_v41 }
  0x3c   : > { %1806 = vmatmul.bf16.gmra.mxu0 %v4774_v17  ;;  %1826 = vmatmul.bf16.gmra.mxu1 %v4776_v18  ;;  %v1124_v8 = vunpack.c.l.b16 %v1037_v42  ;;  %v1073_v11 = vpack.c.bf16 %v1019_v53, %v1019_v53  ;;  %v1074_v12 = vpack.c.bf16 %v618_v46, %v618_v46  ;;  %v1133_v19 = vunpack.c.l.b16 %v1050_v50  ;;  %v4211_v46 = vld [vmem:[%s5703_s1 + $0x40] sm:$0xff] }
  0x3d   : > { %1846 = vmatmul.bf16.gmra.mxu2 %v4782_v23  ;;  %1866 = vmatmul.bf16.gmra.mxu3 %v4784_v24  ;;  %v497_v13 = vmul.f32 %v4559_v5, %v4341_v59  ;;  %v1140_v22 = vunpack.c.l.b16 %v1061_v51  ;;  %v1141_v27 = vunpack.c.l.b16 %v1062_v56  ;;  %v474_v28 = vmul.f32 %v4559_v5, %v4294_v57 }
  0x3e   : > { %1975 = vmatpush.bf16.msrb.mxu2 %v4246_v15  ;;  %2208 = vmatpush.bf16.msrb.mxu3 %v4206_v16  ;;  %v1125_v15 = vunpack.c.l.b16 %v1038_v43  ;;  %v1132_v16 = vunpack.c.l.b16 %v1049_v47  ;;  %v530_v29 = vadd.f32 %v4564_v6, %v473_v58  ;;  %v4365_v30 = vunpack.c.l.bf16 %v4389_v7  ;;  %v4235_v43 = vld [vmem:[%s5703_s1 + $0x100] sm:$0xff] }
  0x3f   : > { %1886 = vmatpush.bf16.msrb.mxu1 %v4238_v32  ;;  %2297 = vmatpush.bf16.msrb.mxu0 %v4214_v33  ;;  %v4203_v32 = vld [vmem:[%s5703_s1] sm:$0xff]  ;;  %v486_v33 = vmul.f32 %v4559_v5, %v4318_v63  ;;  %v542_v34 = vadd.f32 %v4564_v6, %v485_v0  ;;  %v498_v35 = vmul.f32 %v4559_v5, %v4342_v1  ;;  %v1148_v36 = vunpack.c.l.b16 %v1073_v11 }
  0x40   : > { %v4366_v39 = vunpack.c.h.bf16 %v4389_v7  ;;  %v4854_v40 = vpack.c.b16 %v1125_v15, %v1124_v8  ;;  %v4856_v41 = vpack.c.b16 %v1133_v19, %v1132_v16  ;;  %v509_v42 = vmul.f32 %v4559_v5, %v4365_v30  ;;  %v4258_v19 = vld [vmem:[%s5703_s1 + $0x1b8] sm:$0xff] }
  0x41   : > { %v4865_v47 = vpack.c.b16 %v1141_v27, %v1140_v22  ;;  %v531_v50 = vadd.f32 %v4564_v6, %v474_v28  ;;  %v584_v51 = vmax.f32 %v530_v29, 0.0  ;;  %v555_v56 = vadd.f32 %v4564_v6, %v498_v35  ;;  %v4266_v22 = vld [vmem:[%s5703_s1 + $0x1f8] sm:$0xff] }
  0x42   : > { %1976 = vmatpush.bf16.msrb.mxu2 %v4245_v37  ;;  %2209 = vmatpush.bf16.msrb.mxu3 %v4205_v38  ;;  %v1149_v37 = vunpack.c.l.b16 %v1074_v12  ;;  %v554_v38 = vadd.f32 %v4564_v6, %v497_v13  ;;  %5737 = vst [vmem:[#allocation4_spill] sm:$0xff] %v4856_v41  ;;  %v510_v53 = vmul.f32 %v4559_v5, %v4366_v39  ;;  %v4879_v7 = vadd.s32 16, %v4541_v3  ;;  %v4274_v28 = vld [vmem:[%s5703_s1 + $0x238] sm:$0xff] }
  0x43   : > { %1887 = vmatpush.bf16.msrb.mxu1 %v4237_v54  ;;  %2298 = vmatpush.bf16.msrb.mxu0 %v4213_v55  ;;  %v543_v54 = vadd.f32 %v4564_v6, %v486_v33  ;;  %v596_v55 = vmax.f32 %v542_v34, 0.0  ;;  %v566_v57 = vadd.f32 %v4564_v6, %v509_v42  ;;  %v585_v0 = vmax.f32 %v531_v50, 0.0 }
  0x44   : > { %v4872_v58 = vpack.c.b16 %v1149_v37, %v1148_v36  ;;  %v608_v59 = vmax.f32 %v554_v38, 0.0  ;;  %v986_v1 = vsel %vm338_vm0, %v584_v51, 0.0  ;;  %v609_v12 = vmax.f32 %v555_v56, 0.0 }
  0x45   : > { %v620_v63 = vmax.f32 %v566_v57, 0.0  ;;  %v597_v11 = vmax.f32 %v543_v54, 0.0  ;;  %v1041_v29 = vpack.c.bf16 %v585_v0, %v585_v0  ;;  %vm343_vm1 = vcmp.le.s32.totalorder %v4879_v7, 16 }
  0x46   : > { %1977 = vmatpush.bf16.msrb.mxu2 %v4244_v60  ;;  %2210 = vmatpush.bf16.msrb.mxu3 %v4204_v61  ;;  %v567_v60 = vadd.f32 %v4564_v6, %v510_v53  ;;  %v4278_v61 = vunpack.c.h.bf16 %v4569_v9  ;;  %v998_v9 = vsel %vm338_vm0, %v596_v55, 0.0  ;;  %v1010_v13 = vsel %vm338_vm0, %v608_v59, 0.0 }
  0x47   : > { %1888 = vmatpush.bf16.msrb.mxu1 %v4236_v25  ;;  %2299 = vmatpush.bf16.msrb.mxu0 %v4212_v26  ;;  %v4226_v25 = vld [vmem:[%s5703_s1 + $0xb8] sm:$0xff]  ;;  %v1040_v26 = vpack.c.bf16 %v986_v1, %v986_v1  ;;  %v1022_v27 = vsel %vm338_vm0, %v620_v63, 0.0  ;;  %v1052_v30 = vpack.c.bf16 %v998_v9, %v998_v9  ;;  %v1064_v33 = vpack.c.bf16 %v1010_v13, %v1010_v13 }
  0x48   : > { %v466_v8 = vmul.f32 %v4559_v5, %v4278_v61  ;;  %v621_v15 = vmax.f32 %v567_v60, 0.0  ;;  %v1065_v34 = vpack.c.bf16 %v609_v12, %v609_v12  ;;  %v1076_v35 = vpack.c.bf16 %v1022_v27, %v1022_v27 }
  0x49   : > { %v4285_v37 = vunpack.c.l.bf16 %v4668_v52  ;;  %v1126_v38 = vunpack.c.l.b16 %v1040_v26  ;;  %v1127_v39 = vunpack.c.l.b16 %v1041_v29  ;;  %v1134_v42 = vunpack.c.l.b16 %v1052_v30 }
  0x4a   : > { %1978 = vmatpush.bf16.msrb.mxu2 %v4243_v31  ;;  %2211 = vmatpush.bf16.msrb.mxu3 %v4203_v32  ;;  %v523_v16 = vadd.f32 %v4564_v6, %v466_v8  ;;  %v1053_v32 = vpack.c.bf16 %v597_v11, %v597_v11  ;;  %v1077_v36 = vpack.c.bf16 %v621_v15, %v621_v15  ;;  %v1143_v50 = vunpack.c.l.b16 %v1065_v34 }
  0x4b   : > { %1889 = vmatpush.bf16.msrb.mxu1 %v4235_v43  ;;  %2300 = vmatpush.bf16.msrb.mxu0 %v4211_v46  ;;  %v1142_v46 = vunpack.c.l.b16 %v1064_v33  ;;  %v1150_v51 = vunpack.c.l.b16 %v1076_v35  ;;  %v4477_v55 = vmov 0.0|0.0   ;;  %v469_v57 = vmul.f32 %v4559_v5, %v4285_v37 }
  0x4c   : > { %1811 = vmatmul.bf16.gmra.mxu0 %v4854_v40  ;;  %1831 = vmatmul.bf16.gmra.mxu1 %v4856_v41  ;;  %v577_v31 = vmax.f32 %v523_v16, 0.0  ;;  %v1135_v43 = vunpack.c.l.b16 %v1053_v32  ;;  %v1151_v53 = vunpack.c.l.b16 %v1077_v36  ;;  %v1118_v56 = vunpack.c.l.b16 %v4477_v55 }
  0x4d   : > { %1851 = vmatmul.bf16.gmra.mxu2 %v4865_v47  ;;  %1871 = vmatmul.bf16.gmra.mxu3 %v4872_v58  ;;  %v4910_v59 = vpack.c.b16 %v1127_v39, %v1126_v38  ;;  %v4914_v61 = vpack.c.b16 %v1143_v50, %v1142_v46  ;;  %v526_v1 = vadd.f32 %v4564_v6, %v469_v57  ;;  %v1260_v11 = vshll.u32 %v4658_v44, 16  ;;  %v4257_v39 = vld [vmem:[%s5703_s1 + $0x1b0] sm:$0xff] }
  0x4e   : > { %2664 = vmatpush.bf16.msra.mxu2 %v4258_v19  ;;  %2753 = vmatpush.bf16.msra.mxu3 %v4266_v22  ;;  %v979_v3 = vsel %vm343_vm1, %v577_v31, 0.0  ;;  %v4912_v60 = vpack.c.b16 %v1135_v43, %v1134_v42  ;;  %v4916_v52 = vpack.c.b16 %v1151_v53, %v1150_v51  ;;  %v4918_v0 = vpack.c.b16 %v1118_v56, %v1118_v56  ;;  %v4265_v42 = vld [vmem:[%s5703_s1 + $0x1f0] sm:$0xff] }
  0x4f   : > { %2382 = vmatpush.bf16.msra.mxu1 %v4226_v25  ;;  %2842 = vmatpush.bf16.msra.mxu0 %v4274_v28  ;;  %v1033_v54 = vpack.c.bf16 %v979_v3, %v979_v3  ;;  %5738 = vst [vmem:[#allocation5_spill] sm:$0xff] %v4910_v59  ;;  %v580_v12 = vmax.f32 %v526_v1, 0.0  ;;  %v1258_v13 = vshrl.u32 %v4658_v44, 16  ;;  %v1262_v15 = vrot.slane %v1260_v11, 1  ;;  %v4225_v43 = vld [vmem:[%s5703_s1 + $0xb0] sm:$0xff] }
  0x50   : > { %5739 = vst [vmem:[#allocation6_spill] sm:$0xff] %v4912_v60  ;;  %v1248_v9 = vshll.u32 %v4918_v0, 16  ;;  %v1246_v19 = vshrl.u32 %v4918_v0, 16  ;;  %v4290_v26 = vunpack.c.h.bf16 %v4690_v62  ;;  %v1483_v31 = vrot.slane %v4658_v44, 1  ;;  %v4273_v50 = vld [vmem:[%s5703_s1 + $0x230] sm:$0xff] }
  0x51   : > { %v1209_v63 = vunpack.c.l.b16 %v1033_v54  ;;  %v982_v25 = vsel %vm343_vm1, %v580_v12, 0.0  ;;  %v1263_v27 = vor.u32 %v1262_v15, %v1258_v13  ;;  %v1272_v38 = vshll.u32 %v4774_v17, 16 }
  0x52   : > { %v1250_v22 = vrot.slane %v1248_v9, 1  ;;  %v1036_v30 = vpack.c.bf16 %v982_v25, %v982_v25  ;;  %v472_v33 = vmul.f32 %v4559_v5, %v4290_v26  ;;  %2665 = vmatpush.bf16.msra.mxu2 %v4257_v39  ;;  %2754 = vmatpush.bf16.msra.mxu3 %v4265_v42  ;;  %v1270_v51 = vshrl.u32 %v4774_v17, 16  ;;  %v4256_v42 = vld [vmem:[%s5703_s1 + $0x1a8] sm:$0xff] }
  0x53   : > { %v1227_v8 = vpack.c.b16 %v1209_v63, %v1209_v63  ;;  %2383 = vmatpush.bf16.msra.mxu1 %v4225_v43  ;;  %2843 = vmatpush.bf16.msra.mxu0 %v4273_v50  ;;  %v1274_v53 = vrot.slane %v1272_v38, 1  ;;  %v4297_v56 = vunpack.c.l.bf16 %v4572_v10  ;;  %v1282_v25 = vshrl.u32 %v4854_v40, 16  ;;  %v4264_v43 = vld [vmem:[%s5703_s1 + $0x1e8] sm:$0xff] }
  0x54   : > { %v1251_v29 = vor.u32 %v1250_v22, %v1246_v19  ;;  %v1210_v36 = vunpack.c.l.b16 %v1036_v30  ;;  %v529_v62 = vadd.f32 %v4564_v6, %v472_v33  ;;  %v1284_v19 = vshll.u32 %v4854_v40, 16 }
  0x55   : > { %v1265_v16 = vshll.u32 %v1227_v8, 16  ;;  %v1484_v32 = vrot.slane %v1227_v8, 1  ;;  %v1275_v57 = vor.u32 %v1274_v53, %v1270_v51  ;;  %v1486_v8 = vrot.slane %v4774_v17, 1 }
  0x56   : > { %v4936_v35 = vsel %vm1244_vm2, %v1251_v29, %v1250_v22  ;;  %v1228_v37 = vpack.c.b16 %v1210_v36, %v1210_v36  ;;  %v583_v46 = vmax.f32 %v529_v62, 0.0  ;;  %v475_v9 = vmul.f32 %v4559_v5, %v4297_v56  ;;  %2666 = vmatpush.bf16.msra.mxu2 %v4256_v42  ;;  %2755 = vmatpush.bf16.msra.mxu3 %v4264_v43  ;;  %v5047_v43 = vld [vmem:[%s5705_s3] ss:$0 sm:$0xff] }
  0x57   : > { %v1267_v28 = vrot.slane %v1265_v16, 1  ;;  %5740 = vst [vmem:[#allocation7_spill] sm:$0xff] %v4936_v35  ;;  %v4939_v3 = vsel %vm1479_vm3, %v1483_v31, %v1484_v32  ;;  %v1286_v26 = vrot.slane %v1284_v19, 1  ;;  %v4302_v29 = vunpack.c.h.bf16 %v4578_v14 }
  0x58   : > { %v1277_v54 = vshll.u32 %v1228_v37, 16  ;;  %v985_v55 = vsel %vm343_vm1, %v583_v46, 0.0  ;;  %v1487_v11 = vrot.slane %v1228_v37, 1  ;;  %v532_v16 = vadd.f32 %v4564_v6, %v475_v9 }
  0x59   : > { %v1268_v34 = vsel %vm1244_vm2, %v1263_v27, %v1267_v28  ;;  %v1039_v1 = vpack.c.bf16 %v985_v55, %v985_v55  ;;  %v1287_v30 = vor.u32 %v1286_v26, %v1282_v25  ;;  %v1489_v33 = vrot.slane %v4854_v40, 1  ;;  %v4272_v55 = vld [vmem:[%s5703_s1 + $0x228] sm:$0xff] }
  0x5a   : > { %v1279_v63 = vrot.slane %v1277_v54, 1  ;;  %v4968_v15 = vsel %vm1479_vm3, %v1486_v8, %v1487_v11  ;;  %v586_v22 = vmax.f32 %v532_v16, 0.0  ;;  %v1296_v39 = vshll.u32 %v4910_v59, 16  ;;  %v4224_v54 = vld [vmem:[%s5703_s1 + $0xa8] sm:$0xff]  ;;  %2844 = vmatpush.bf16.msra.mxu0 %v4272_v55 }
  0x5b   : > { %v1211_v13 = vunpack.c.l.b16 %v1039_v1  ;;  %v1294_v50 = vshrl.u32 %v4910_v59, 16  ;;  %2384 = vmatpush.bf16.msra.mxu1 %v4224_v54  ;;  %v1492_v11 = vrot.slane %v4910_v59, 1  ;;  %v1306_v26 = vshrl.u32 %v4660_v45, 16  ;;  %v4263_v54 = vld [vmem:[%s5703_s1 + $0x1e0] sm:$0xff] }
  0x5c   : > { %1816 = vmatmul.bf16.gmra.mxu0 %v4910_v59  ;;  %1836 = vmatmul.bf16.gmra.mxu1 %v4912_v60  ;;  %v4965_v12 = vsel %vm1244_vm2, %v1275_v57, %v1279_v63  ;;  %v988_v28 = vsel %vm343_vm1, %v586_v22, 0.0  ;;  %v1298_v51 = vrot.slane %v1296_v39, 1  ;;  %v4309_v57 = vunpack.c.l.bf16 %v4699_v2 }
  0x5d   : > { %1856 = vmatmul.bf16.gmra.mxu2 %v4914_v61  ;;  %1876 = vmatmul.bf16.gmra.mxu3 %v4916_v52  ;;  %v1229_v10 = vpack.c.b16 %v1211_v13, %v1211_v13  ;;  %v1042_v32 = vpack.c.bf16 %v988_v28, %v988_v28 }
  0x5e   : > { %v1299_v63 = vor.u32 %v1298_v51, %v1294_v50  ;;  %v481_v13 = vmul.f32 %v4559_v5, %v4309_v57  ;;  %v1320_v51 = vshll.u32 %v4776_v18, 16  ;;  %2756 = vmatpush.bf16.msra.mxu3 %v4263_v54 }
  0x5f   : > { %v1289_v27 = vshll.u32 %v1229_v10, 16  ;;  %v1212_v62 = vunpack.c.l.b16 %v1042_v32 }
  0x60   : > { %v538_v22 = vadd.f32 %v4564_v6, %v481_v13  ;;  %v4223_v13 = vld [vmem:[%s5703_s1 + $0xa0] sm:$0xff] }
  0x61   : > { %v1291_v31 = vrot.slane %v1289_v27, 1  ;;  %v1230_v14 = vpack.c.b16 %v1212_v62, %v1212_v62  ;;  %2385 = vmatpush.bf16.msra.mxu1 %v4223_v13 }
  0x62   : > { %v592_v25 = vmax.f32 %v538_v22, 0.0 }
  0x63   : > { %v4982_v36 = vsel %vm1244_vm2, %v1287_v30, %v1291_v31  ;;  %v1301_v53 = vshll.u32 %v1230_v14, 16  ;;  %v1493_v9 = vrot.slane %v1230_v14, 1 }
  0x65   : > { %v1303_v1 = vrot.slane %v1301_v53, 1  ;;  %v5015_v19 = vsel %vm1479_vm3, %v1492_v11, %v1493_v9  ;;  %v4255_v53 = vld [vmem:[%s5703_s1 + $0x1a0] sm:$0xff]  ;;  %v1322_v11 = vrot.slane %v1320_v51, 1  ;;  %v1332_v51 = vshll.u32 %v4856_v41, 16 }
  0x66   : > { %2667 = vmatpush.bf16.msra.mxu2 %v4255_v53 }
  0x67   : > { %v5012_v16 = vsel %vm1244_vm2, %v1299_v63, %v1303_v1  ;;  %v1334_v13 = vrot.slane %v1332_v51, 1 }
  0x68   : > { %5741 = vst [vmem:[#allocation8_spill] sm:$0xff] %v5012_v16 }
  0x6c   : > { %1890 = vmatmul.bf16.vlgmr.msrb.gmra.mxu1 %v1268_v34  ;;  %2301 = vmatmul.bf16.vlgmr.msrb.gmra.mxu0 %v4936_v35 }
  0x6d   : > { %1979 = vmatmul.bf16.vlgmr.msrb.gmra.mxu2 %v4939_v3  ;;  %2212 = vmatmul.bf16.vlgmr.msrb.gmra.mxu3 %v4918_v0 }
  0x7c   : > { %1895 = vmatmul.bf16.gmra.mxu1 %v4965_v12  ;;  %2306 = vmatmul.bf16.gmra.mxu0 %v1268_v34  ;;  %v1490_v34 = vrot.slane %v1229_v10, 1 }
  0x7d   : > { %1984 = vmatmul.bf16.gmra.mxu2 %v4968_v15  ;;  %2217 = vmatmul.bf16.gmra.mxu3 %v4658_v44  ;;  %v478_v44 = vmul.f32 %v4559_v5, %v4302_v29  ;;  %v1308_v5 = vshll.u32 %v4660_v45, 16  ;;  %v994_v29 = vsel %vm343_vm1, %v592_v25, 0.0 }
  0x7e   : > { %v4985_v37 = vsel %vm1479_vm3, %v1489_v33, %v1490_v34  ;;  %v1048_v32 = vpack.c.bf16 %v994_v29, %v994_v29  ;;  %v1495_v33 = vrot.slane %v4660_v45, 1 }
  0x7f   : > { %v535_v38 = vadd.f32 %v4564_v6, %v478_v44  ;;  %v1310_v27 = vrot.slane %v1308_v5, 1  ;;  %v4314_v6 = vunpack.c.h.bf16 %v4702_v4  ;;  %v5031_v44 = vld [vmem:[%s5704_s2] ss:$0 sm:$0xff] }
  0x80   : > { %v1214_v4 = vunpack.c.l.b16 %v1048_v32 }
  0x81   : > { %v589_v46 = vmax.f32 %v535_v38, 0.0  ;;  %v1311_v30 = vor.u32 %v1310_v27, %v1306_v26  ;;  %v484_v62 = vmul.f32 %v5031_v44, %v4314_v6 }
  0x82   : > { %v1232_v50 = vpack.c.b16 %v1214_v4, %v1214_v4 }
  0x83   : > { %v991_v56 = vsel %vm343_vm1, %v589_v46, 0.0  ;;  %v541_v46 = vadd.f32 %v5047_v43, %v484_v62 }
  0x84   : > { %v1045_v8 = vpack.c.bf16 %v991_v56, %v991_v56  ;;  %v1325_v9 = vshll.u32 %v1232_v50, 16  ;;  %v1499_v29 = vrot.slane %v1232_v50, 1 }
  0x85   : > { %v595_v55 = vmax.f32 %v541_v46, 0.0 }
  0x86   : > { %v1213_v10 = vunpack.c.l.b16 %v1045_v8  ;;  %v1318_v8 = vshrl.u32 %v4776_v18, 16  ;;  %v1327_v26 = vrot.slane %v1325_v9, 1  ;;  %v1330_v9 = vshrl.u32 %v4856_v41, 16 }
  0x87   : > { %v997_v22 = vsel %vm343_vm1, %v595_v55, 0.0 }
  0x88   : > { %v1231_v2 = vpack.c.b16 %v1213_v10, %v1213_v10  ;;  %v4271_v10 = vld [vmem:[%s5703_s1 + $0x220] sm:$0xff]  ;;  %v1323_v25 = vor.u32 %v1322_v11, %v1318_v8  ;;  %v1051_v27 = vpack.c.bf16 %v997_v22, %v997_v22 }
  0x89   : > { %2845 = vmatpush.bf16.msra.mxu0 %v4271_v10 }
  0x8a   : > { %v1313_v28 = vshll.u32 %v1231_v2, 16  ;;  %v1496_v34 = vrot.slane %v1231_v2, 1  ;;  %v4446_v2 = vld [vmem:[%s4549_s10 + $0x68] sm:$0xff]   ;;  %v1215_v62 = vunpack.c.l.b16 %v1051_v27 }
  0x8b   : > { %v4321_v5 = vunpack.c.l.bf16 %v4446_v2  ;;  %v4447_v2 = vld [vmem:[%s4549_s10 + $0x70] sm:$0xff]  }
  0x8c   : > { %1900 = vmatmul.bf16.gmra.mxu1 %v4982_v36  ;;  %2311 = vmatmul.bf16.gmra.mxu0 %v4965_v12  ;;  %v1315_v31 = vrot.slane %v1313_v28, 1  ;;  %v5042_v42 = vsel %vm1479_vm3, %v1495_v33, %v1496_v34  ;;  %v1498_v28 = vrot.slane %v4776_v18, 1  ;;  %v5090_v34 = vsel %vm1244_vm2, %v1323_v25, %v1327_v26 }
  0x8d   : > { %1989 = vmatmul.bf16.gmra.mxu2 %v4985_v37  ;;  %2222 = vmatmul.bf16.gmra.mxu3 %v4774_v17  ;;  %5743 = vst [vmem:[#allocation10_spill] sm:$0xff] %v5042_v42  ;;  %v487_v6 = vmul.f32 %v5031_v44, %v4321_v5  ;;  %v1233_v50 = vpack.c.b16 %v1215_v62, %v1215_v62  ;;  %v4326_v5 = vunpack.c.h.bf16 %v4447_v2 }
  0x8e   : > { %v5039_v39 = vsel %vm1244_vm2, %v1311_v30, %v1315_v31  ;;  %5746 = vst [vmem:[#allocation13_spill] sm:$0xff] %v5090_v34  ;;  %v5093_v4 = vsel %vm1479_vm3, %v1498_v28, %v1499_v29  ;;  %v1335_v25 = vor.u32 %v1334_v13, %v1330_v9  ;;  %v1501_v28 = vrot.slane %v4856_v41, 1 }
  0x8f   : > { %5742 = vst [vmem:[#allocation9_spill] sm:$0xff] %v5039_v39  ;;  %v544_v46 = vadd.f32 %v5047_v43, %v487_v6  ;;  %v1337_v10 = vshll.u32 %v1233_v50, 16  ;;  %v1502_v29 = vrot.slane %v1233_v50, 1  ;;  %v490_v6 = vmul.f32 %v5031_v44, %v4326_v5  ;;  %v4262_v5 = vld [vmem:[%s5703_s1 + $0x1d8] sm:$0xff] }
  0x90   : > { %5747 = vst [vmem:[#allocation14_spill] sm:$0xff] %v5093_v4  ;;  %2757 = vmatpush.bf16.msra.mxu3 %v4262_v5 }
  0x91   : > { %v598_v53 = vmax.f32 %v544_v46, 0.0  ;;  %v1339_v26 = vrot.slane %v1337_v10, 1  ;;  %v5127_v9 = vsel %vm1479_vm3, %v1501_v28, %v1502_v29  ;;  %v547_v13 = vadd.f32 %v5047_v43, %v490_v6 }
  0x92   : > { %5751 = vst [vmem:[#allocation18_spill] sm:$0xff] %v5127_v9  ;;  %v1344_v10 = vshll.u32 %v4912_v60, 16  ;;  %v1342_v6 = vshrl.u32 %v4912_v60, 16 }
  0x93   : > { %v1000_v22 = vsel %vm343_vm1, %v598_v53, 0.0  ;;  %v5124_v53 = vsel %vm1244_vm2, %v1335_v25, %v1339_v26  ;;  %v601_v25 = vmax.f32 %v547_v13, 0.0  ;;  %v4222_v13 = vld [vmem:[%s5703_s1 + $0x98] sm:$0xff] }
  0x94   : > { %v1054_v27 = vpack.c.bf16 %v1000_v22, %v1000_v22  ;;  %5750 = vst [vmem:[#allocation17_spill] sm:$0xff] %v5124_v53  ;;  %v4254_v22 = vld [vmem:[%s5703_s1 + $0x198] sm:$0xff]  ;;  %2386 = vmatpush.bf16.msra.mxu1 %v4222_v13 }
  0x95   : > { %2668 = vmatpush.bf16.msra.mxu2 %v4254_v22  ;;  %v4270_v22 = vld [vmem:[%s5703_s1 + $0x218] sm:$0xff] }
  0x96   : > { %v1216_v2 = vunpack.c.l.b16 %v1054_v27  ;;  %2846 = vmatpush.bf16.msra.mxu0 %v4270_v22  ;;  %v1354_v22 = vshrl.u32 %v4662_v48, 16 }
  0x98   : > { %v1234_v50 = vpack.c.b16 %v1216_v2, %v1216_v2  ;;  %v1346_v2 = vrot.slane %v1344_v10, 1  ;;  %v1504_v10 = vrot.slane %v4912_v60, 1 }
  0x9a   : > { %v1347_v5 = vor.u32 %v1346_v2, %v1342_v6 }
  0x9c   : > { %1905 = vmatmul.bf16.gmra.mxu1 %v5012_v16  ;;  %2316 = vmatmul.bf16.gmra.mxu0 %v4982_v36 }
  0x9d   : > { %1994 = vmatmul.bf16.gmra.mxu2 %v5015_v19  ;;  %2227 = vmatmul.bf16.gmra.mxu3 %v4854_v40 }
  0xa9   : > { %v5034_v38 = vpop.f32.mrf.mxu0  ;;  %v5036_v14 = vpop.f32.mrf.mxu1 }
  0xac   : > { %1910 = vmatmul.bf16.gmra.mxu1 %v5039_v39  ;;  %2321 = vmatmul.bf16.gmra.mxu0 %v5012_v16 }
  0xad   : > { %1999 = vmatmul.bf16.gmra.mxu2 %v5042_v42  ;;  %2232 = vmatmul.bf16.gmra.mxu3 %v4910_v59 }
  0xb0   : > { %v5061_v56 = vpop.f32.mrf.mxu2  ;;  %v5063_v57 = vpop.f32.mrf.mxu3 }
  0xb1   : > { %5744 = vst [vmem:[#allocation11_spill] sm:$0xff] %v5063_v57  ;;  %v5065_v63 = vpop.f32.mrf.mxu0  ;;  %v5067_v1 = vpop.f32.mrf.mxu1  ;;  %v1505_v57 = vrot.slane %v1234_v50, 1 }
  0xb8   : > { %v5081_v30 = vpop.f32.mrf.mxu2  ;;  %v5083_v31 = vpop.f32.mrf.mxu3 }
  0xb9   : > { %5745 = vst [vmem:[#allocation12_spill] sm:$0xff] %v5083_v31  ;;  %v5085_v32 = vpop.f32.mrf.mxu0  ;;  %v5087_v33 = vpop.f32.mrf.mxu1 }
  0xbc   : > { %1915 = vmatmul.bf16.gmra.mxu1 %v5090_v34  ;;  %2326 = vmatmul.bf16.gmra.mxu0 %v5039_v39 }
  0xbd   : > { %2004 = vmatmul.bf16.gmra.mxu2 %v5093_v4  ;;  %2237 = vmatmul.bf16.gmra.mxu3 %v4660_v45 }
  0xc0   : > { %v5101_v54 = vpop.f32.mrf.mxu2  ;;  %v5103_v55 = vpop.f32.mrf.mxu3 }
  0xc1   : > { %5748 = vst [vmem:[#allocation15_spill] sm:$0xff] %v5103_v55  ;;  %v5105_v8 = vpop.f32.mrf.mxu0  ;;  %v5107_v11 = vpop.f32.mrf.mxu1  ;;  %v1003_v55 = vsel %vm343_vm1, %v601_v25, 0.0 }
  0xc2   : > { %v1057_v31 = vpack.c.bf16 %v1003_v55, %v1003_v55  ;;  %v5173_v55 = vsel %vm1479_vm3, %v1504_v10, %v1505_v57 }
  0xc3   : > { %5757 = vst [vmem:[#allocation24_spill] sm:$0xff] %v5173_v55 }
  0xc8   : > { %v5115_v62 = vpop.f32.mrf.mxu2  ;;  %v5117_v46 = vpop.f32.mrf.mxu3 }
  0xc9   : > { %5749 = vst [vmem:[#allocation16_spill] sm:$0xff] %v5117_v46  ;;  %v5119_v35 = vpop.f32.mrf.mxu0  ;;  %v5121_v51 = vpop.f32.mrf.mxu1  ;;  %v1349_v46 = vshll.u32 %v1234_v50, 16  ;;  %v1356_v50 = vshll.u32 %v4662_v48, 16 }
  0xcc   : > { %1920 = vmatmul.bf16.gmra.mxu1 %v5124_v53  ;;  %2331 = vmatmul.bf16.gmra.mxu0 %v5090_v34 }
  0xcd   : > { %2009 = vmatmul.bf16.gmra.mxu2 %v5127_v9  ;;  %2242 = vmatmul.bf16.gmra.mxu3 %v4776_v18  ;;  %v4333_v9 = vunpack.c.l.bf16 %v4717_v20 }
  0xcf   : > { %v493_v25 = vmul.f32 %v5031_v44, %v4333_v9 }
  0xd0   : > { %v5141_v26 = vpop.f32.mrf.mxu2  ;;  %v5143_v27 = vpop.f32.mrf.mxu3 }
  0xd1   : > { %5752 = vst [vmem:[#allocation19_spill] sm:$0xff] %v5141_v26  ;;  %v5145_v28 = vpop.f32.mrf.mxu0  ;;  %v5147_v29 = vpop.f32.mrf.mxu1  ;;  %v550_v6 = vadd.f32 %v5047_v43, %v493_v25 }
  0xd2   : > { %5753 = vst [vmem:[#allocation20_spill] sm:$0xff] %v5143_v27  ;;  %v1351_v27 = vrot.slane %v1349_v46, 1  ;;  %v1217_v46 = vunpack.c.l.b16 %v1057_v31 }
  0xd3   : > { %v604_v2 = vmax.f32 %v550_v6, 0.0 }
  0xd4   : > { %v5170_v39 = vsel %vm1244_vm2, %v1347_v5, %v1351_v27  ;;  %v1235_v9 = vpack.c.b16 %v1217_v46, %v1217_v46  ;;  %v1358_v5 = vrot.slane %v1356_v50, 1  ;;  %v4338_v46 = vunpack.c.h.bf16 %v4720_v21 }
  0xd5   : > { %5756 = vst [vmem:[#allocation23_spill] sm:$0xff] %v5170_v39  ;;  %v1006_v25 = vsel %vm343_vm1, %v604_v2, 0.0 }
  0xd6   : > { %v1361_v10 = vshll.u32 %v1235_v9, 16  ;;  %v1060_v6 = vpack.c.bf16 %v1006_v25, %v1006_v25 }
  0xd8   : > { %v5161_v34 = vpop.f32.mrf.mxu2  ;;  %v5163_v20 = vpop.f32.mrf.mxu3  ;;  %v1218_v2 = vunpack.c.l.b16 %v1060_v6 }
  0xd9   : > { %5754 = vst [vmem:[#allocation21_spill] sm:$0xff] %v5161_v34  ;;  %v5165_v18 = vpop.f32.mrf.mxu0  ;;  %v5167_v4 = vpop.f32.mrf.mxu1 }
  0xda   : > { %5755 = vst [vmem:[#allocation22_spill] sm:$0xff] %v5163_v20  ;;  %v1359_v20 = vor.u32 %v1358_v5, %v1354_v22 }
  0xdc   : > { %1925 = vmatmul.bf16.gmra.mxu1 %v5170_v39  ;;  %2336 = vmatmul.bf16.gmra.mxu0 %v5124_v53  ;;  %v1507_v53 = vrot.slane %v4662_v48, 1 }
  0xdd   : > { %2014 = vmatmul.bf16.gmra.mxu2 %v5173_v55  ;;  %2247 = vmatmul.bf16.gmra.mxu3 %v4856_v41  ;;  %v1363_v55 = vrot.slane %v1361_v10, 1  ;;  %v1508_v41 = vrot.slane %v1235_v9, 1  ;;  %v1236_v9 = vpack.c.b16 %v1218_v2, %v1218_v2 }
  0xdf   : > { %v5200_v34 = vsel %vm1244_vm2, %v1359_v20, %v1363_v55  ;;  %v5204_v22 = vsel %vm1479_vm3, %v1507_v53, %v1508_v41  ;;  %v1368_v20 = vshll.u32 %v4782_v23, 16  ;;  %v4261_v41 = vld [vmem:[%s5703_s1 + $0x1d0] sm:$0xff]  ;;  %v1373_v2 = vshll.u32 %v1236_v9, 16 }
  0xe0   : > { %v5181_v27 = vpop.f32.mrf.mxu2  ;;  %v5183_v31 = vpop.f32.mrf.mxu3  ;;  %5762 = vst [vmem:[#allocation29_spill] sm:$0xff] %v5204_v22  ;;  %2758 = vmatpush.bf16.msra.mxu3 %v4261_v41 }
  0xe1   : > { %5758 = vst [vmem:[#allocation25_spill] sm:$0xff] %v5181_v27  ;;  %v5185_v57 = vpop.f32.mrf.mxu0  ;;  %v5187_v13 = vpop.f32.mrf.mxu1  ;;  %v1370_v6 = vrot.slane %v1368_v20, 1  ;;  %v1375_v41 = vrot.slane %v1373_v2, 1 }
  0xe2   : > { %5759 = vst [vmem:[#allocation26_spill] sm:$0xff] %v5183_v31  ;;  %v496_v31 = vmul.f32 %v5031_v44, %v4338_v46  ;;  %v1366_v46 = vshrl.u32 %v4782_v23, 16 }
  0xe4   : > { %v553_v5 = vadd.f32 %v5047_v43, %v496_v31 }
  0xe8   : > { %v5195_v27 = vpop.f32.mrf.mxu2  ;;  %v5197_v45 = vpop.f32.mrf.mxu3 }
  0xe9   : > { %5760 = vst [vmem:[#allocation27_spill] sm:$0xff] %v5195_v27  ;;  %v1891_v42 = vpop.f32.mrf.mxu1  ;;  %v2302_v50 = vpop.f32.mrf.mxu0 }
  0xea   : > { %5761 = vst [vmem:[#allocation28_spill] sm:$0xff] %v5197_v45  ;;  %v1892_v21 = vadd.f32 %v1891_v42, %v5034_v38  ;;  %v4253_v38 = vld [vmem:[%s5703_s1 + $0x190] sm:$0xff]  ;;  %v607_v42 = vmax.f32 %v553_v5, 0.0 }
  0xeb   : > { %2669 = vmatpush.bf16.msra.mxu2 %v4253_v38  ;;  %v4221_v5 = vld [vmem:[%s5703_s1 + $0x90] sm:$0xff]  ;;  %v1371_v38 = vor.u32 %v1370_v6, %v1366_v46 }
  0xec   : > { %1930 = vmatmul.bf16.gmra.mxu1 %v5200_v34  ;;  %2341 = vmatmul.bf16.gmra.mxu0 %v5170_v39  ;;  %v4448_v39 = vld [vmem:[%s4549_s10 + $0x98] sm:$0xff]  }
  0xed   : > { %2019 = vmatmul.bf16.gmra.mxu2 %v5204_v22  ;;  %2252 = vmatmul.bf16.gmra.mxu3 %v4912_v60  ;;  %v1009_v22 = vsel %vm343_vm1, %v607_v42, 0.0  ;;  %v4345_v60 = vunpack.c.l.bf16 %v4448_v39  ;;  %v1510_v42 = vrot.slane %v4782_v23, 1  ;;  %v5234_v59 = vsel %vm1244_vm2, %v1371_v38, %v1375_v41 }
  0xee   : > { %v1063_v20 = vpack.c.bf16 %v1009_v22, %v1009_v22  ;;  %2387 = vmatpush.bf16.msra.mxu1 %v4221_v5  ;;  %v1378_v41 = vshrl.u32 %v4865_v47, 16 }
  0xef   : > { %v499_v39 = vmul.f32 %v5031_v44, %v4345_v60  ;;  %v1380_v60 = vshll.u32 %v4865_v47, 16 }
  0xf0   : > { %v1980_v53 = vpop.f32.mrf.mxu2  ;;  %v2213_v55 = vpop.f32.mrf.mxu3  ;;  %v1219_v46 = vunpack.c.l.b16 %v1063_v20 }
  0xf1   : > { %v1981_v31 = vadd.f32 %v1980_v53, %v1892_v21  ;;  %v1893_v10 = vpop.f32.mrf.mxu1  ;;  %v2304_v25 = vpop.f32.mrf.mxu0  ;;  %v4269_v21 = vld [vmem:[%s5703_s1 + $0x210] sm:$0xff]  ;;  %v1511_v53 = vrot.slane %v1236_v9, 1  ;;  %v1382_v20 = vrot.slane %v1380_v60, 1 }
  0xf2   : > { %v1894_v45 = vadd.f32 %v1893_v10, %v5065_v63  ;;  %2847 = vmatpush.bf16.msra.mxu0 %v4269_v21 }
  0xf3   : > { %v2214_v27 = vadd.f32 %v2213_v55, %v1981_v31  ;;  %v5238_v6 = vsel %vm1479_vm3, %v1510_v42, %v1511_v53 }
  0xf4   : > { %5764 = vst [vmem:[#allocation31_spill] sm:$0xff] %v5238_v6 }
  0xf5   : > { %v5229_v63 = vadd.f32 %v2302_v50, %v2214_v27  ;;  %v556_v27 = vadd.f32 %v5047_v43, %v499_v39 }
  0xf7   : > { %5763 = vst [vmem:[#allocation30_spill] sm:$0xff] %v5229_v63 }
  0xf8   : > { %v1982_v55 = vpop.f32.mrf.mxu2  ;;  %v2215_v31 = vpop.f32.mrf.mxu3 }
  0xf9   : > { %v1983_v10 = vadd.f32 %v1982_v55, %v1894_v45  ;;  %v1896_v26 = vpop.f32.mrf.mxu1  ;;  %v2307_v16 = vpop.f32.mrf.mxu0  ;;  %v1237_v45 = vpack.c.b16 %v1219_v46, %v1219_v46  ;;  %v4449_v55 = vld [vmem:[%s4549_s10 + $0xa0] sm:$0xff]  }
  0xfa   : > { %v1897_v22 = vadd.f32 %v1896_v26, %v5085_v32  ;;  %v610_v32 = vmax.f32 %v556_v27, 0.0 }
  0xfb   : > { %v2216_v50 = vadd.f32 %v2215_v31, %v1983_v10  ;;  %v1385_v42 = vshll.u32 %v1237_v45, 16  ;;  %v4350_v31 = vunpack.c.h.bf16 %v4449_v55 }
  0xfc   : > { %1935 = vmatmul.bf16.gmra.mxu1 %v5234_v59  ;;  %2346 = vmatmul.bf16.gmra.mxu0 %v5200_v34  ;;  %v1012_v39 = vsel %vm343_vm1, %v610_v32, 0.0 }
  0xfd   : > { %2024 = vmatmul.bf16.gmra.mxu2 %v5238_v6  ;;  %2257 = vmatmul.bf16.gmra.mxu3 %v4662_v48  ;;  %v5246_v9 = vadd.f32 %v2304_v25, %v2216_v50  ;;  %v1383_v25 = vor.u32 %v1382_v20, %v1378_v41  ;;  %v1387_v46 = vrot.slane %v1385_v42, 1  ;;  %v1066_v27 = vpack.c.bf16 %v1012_v39, %v1012_v39 }
  0xfe   : > { %v1392_v20 = vshll.u32 %v4914_v61, 16 }
  0xff   : > { %5765 = vst [vmem:[#allocation32_spill] sm:$0xff] %v5246_v9  ;;  %v502_v9 = vmul.f32 %v5031_v44, %v4350_v31  ;;  %v5258_v32 = vsel %vm1244_vm2, %v1383_v25, %v1387_v46  ;;  %v1220_v55 = vunpack.c.l.b16 %v1066_v27  ;;  %v1390_v25 = vshrl.u32 %v4914_v61, 16 }
 0x100   : > { %v1985_v26 = vpop.f32.mrf.mxu2  ;;  %v2218_v2 = vpop.f32.mrf.mxu3  ;;  %v1394_v46 = vrot.slane %v1392_v20, 1 }
 0x101   : > { %v1986_v5 = vadd.f32 %v1985_v26, %v1897_v22  ;;  %v1898_v21 = vpop.f32.mrf.mxu1  ;;  %v2309_v38 = vpop.f32.mrf.mxu0  ;;  %v1513_v22 = vrot.slane %v4865_v47, 1  ;;  %v1514_v26 = vrot.slane %v1237_v45, 1  ;;  %v1238_v45 = vpack.c.b16 %v1220_v55, %v1220_v55  ;;  %v4220_v55 = vld [vmem:[%s5703_s1 + $0x88] sm:$0xff] }
 0x102   : > { %v1899_v53 = vadd.f32 %v1898_v21, %v5105_v8  ;;  %2388 = vmatpush.bf16.msra.mxu1 %v4220_v55 }
 0x103   : > { %v2219_v10 = vadd.f32 %v2218_v2, %v1986_v5  ;;  %v5262_v5 = vsel %vm1479_vm3, %v1513_v22, %v1514_v26  ;;  %v1397_v27 = vshll.u32 %v1238_v45, 16 }
 0x105   : > { %v5253_v50 = vadd.f32 %v2307_v16, %v2219_v10  ;;  %v559_v16 = vadd.f32 %v5047_v43, %v502_v9 }
 0x107   : > { %v613_v9 = vmax.f32 %v559_v16, 0.0  ;;  %v1395_v16 = vor.u32 %v1394_v46, %v1390_v25 }
 0x108   : > { %v1987_v60 = vpop.f32.mrf.mxu2  ;;  %v2220_v63 = vpop.f32.mrf.mxu3 }
 0x109   : > { %v1988_v6 = vadd.f32 %v1987_v60, %v1899_v53  ;;  %v1901_v8 = vpop.f32.mrf.mxu1  ;;  %v2312_v21 = vpop.f32.mrf.mxu0  ;;  %v1015_v26 = vsel %vm343_vm1, %v613_v9, 0.0  ;;  %v4450_v60 = vld [vmem:[%s4549_s10 + $0xb0] sm:$0xff]  }
 0x10a   : > { %v1902_v2 = vadd.f32 %v1901_v8, %v5119_v35  ;;  %v4252_v35 = vld [vmem:[%s5703_s1 + $0x188] sm:$0xff]  ;;  %v1069_v20 = vpack.c.bf16 %v1015_v26, %v1015_v26 }
 0x10b   : > { %v2221_v41 = vadd.f32 %v2220_v63, %v1988_v6  ;;  %v4260_v63 = vld [vmem:[%s5703_s1 + $0x1c8] sm:$0xff]  ;;  %2670 = vmatpush.bf16.msra.mxu2 %v4252_v35  ;;  %v1516_v35 = vrot.slane %v4914_v61, 1 }
 0x10c   : > { %1940 = vmatmul.bf16.gmra.mxu1 %v5258_v32  ;;  %2351 = vmatmul.bf16.gmra.mxu0 %v5234_v59  ;;  %v1221_v25 = vunpack.c.l.b16 %v1069_v20  ;;  %v1402_v20 = vshrl.u32 %v4664_v49, 16 }
 0x10d   : > { %2029 = vmatmul.bf16.gmra.mxu2 %v5262_v5  ;;  %2262 = vmatmul.bf16.gmra.mxu3 %v4782_v23  ;;  %v5276_v6 = vadd.f32 %v2309_v38, %v2221_v41  ;;  %v4357_v38 = vunpack.c.l.bf16 %v4450_v60  ;;  %v1399_v41 = vrot.slane %v1397_v27, 1 }
 0x10e   : > { %2759 = vmatpush.bf16.msra.mxu3 %v4260_v63  ;;  %v1517_v63 = vrot.slane %v1238_v45, 1  ;;  %v1239_v45 = vpack.c.b16 %v1221_v25, %v1221_v25 }
 0x10f   : > { %5766 = vst [vmem:[#allocation33_spill] sm:$0xff] %v5276_v6  ;;  %v505_v9 = vmul.f32 %v5031_v44, %v4357_v38  ;;  %v5294_v6 = vsel %vm1244_vm2, %v1395_v16, %v1399_v41 }
 0x110   : > { %v1990_v42 = vpop.f32.mrf.mxu2  ;;  %v2223_v53 = vpop.f32.mrf.mxu3  ;;  %v5298_v27 = vsel %vm1479_vm3, %v1516_v35, %v1517_v63  ;;  %v1409_v63 = vshll.u32 %v1239_v45, 16 }
 0x111   : > { %v1991_v39 = vadd.f32 %v1990_v42, %v1902_v2  ;;  %v1903_v31 = vpop.f32.mrf.mxu1  ;;  %v2314_v10 = vpop.f32.mrf.mxu0  ;;  %v4268_v2 = vld [vmem:[%s5703_s1 + $0x208] sm:$0xff]  ;;  %5768 = vst [vmem:[#allocation35_spill] sm:$0xff] %v5298_v27 }
 0x112   : > { %v1904_v22 = vadd.f32 %v1903_v31, %v5145_v28  ;;  %2848 = vmatpush.bf16.msra.mxu0 %v4268_v2  ;;  %v1411_v25 = vrot.slane %v1409_v63, 1 }
 0x113   : > { %v2224_v8 = vadd.f32 %v2223_v53, %v1991_v39 }
 0x115   : > { %v5289_v28 = vadd.f32 %v2312_v21, %v2224_v8  ;;  %v562_v21 = vadd.f32 %v5047_v43, %v505_v9 }
 0x117   : > { %5767 = vst [vmem:[#allocation34_spill] sm:$0xff] %v5289_v28 }
 0x118   : > { %v1992_v42 = vpop.f32.mrf.mxu2  ;;  %v2225_v53 = vpop.f32.mrf.mxu3 }
 0x119   : > { %v1993_v39 = vadd.f32 %v1992_v42, %v1904_v22  ;;  %v1906_v31 = vpop.f32.mrf.mxu1  ;;  %v2317_v60 = vpop.f32.mrf.mxu0  ;;  %v1404_v22 = vshll.u32 %v4664_v49, 16 }
 0x11a   : > { %v1907_v46 = vadd.f32 %v1906_v31, %v5165_v18  ;;  %v616_v18 = vmax.f32 %v562_v21, 0.0 }
 0x11b   : > { %v2226_v26 = vadd.f32 %v2225_v53, %v1993_v39  ;;  %v1406_v35 = vrot.slane %v1404_v22, 1  ;;  %v4451_v53 = vld [vmem:[%s4549_s10 + $0xb8] sm:$0xff]  }
 0x11c   : > { %1945 = vmatmul.bf16.gmra.mxu1 %v5294_v6  ;;  %2356 = vmatmul.bf16.gmra.mxu0 %v5258_v32  ;;  %v1018_v42 = vsel %vm343_vm1, %v616_v18, 0.0  ;;  %v4362_v39 = vunpack.c.h.bf16 %v4451_v53 }
 0x11d   : > { %2034 = vmatmul.bf16.gmra.mxu2 %v5298_v27  ;;  %2267 = vmatmul.bf16.gmra.mxu3 %v4865_v47  ;;  %v5306_v38 = vadd.f32 %v2314_v10, %v2226_v26  ;;  %v1407_v10 = vor.u32 %v1406_v35, %v1402_v20  ;;  %v1072_v21 = vpack.c.bf16 %v1018_v42, %v1018_v42  ;;  %v1416_v20 = vshll.u32 %v4784_v24, 16  ;;  %v4251_v35 = vld [vmem:[%s5703_s1 + $0x180] sm:$0xff] }
 0x11e   : > { %2671 = vmatpush.bf16.msra.mxu2 %v4251_v35 }
 0x11f   : > { %5769 = vst [vmem:[#allocation36_spill] sm:$0xff] %v5306_v38  ;;  %v508_v38 = vmul.f32 %v5031_v44, %v4362_v39  ;;  %v5318_v18 = vsel %vm1244_vm2, %v1407_v10, %v1411_v25  ;;  %v1222_v53 = vunpack.c.l.b16 %v1072_v21  ;;  %v1414_v21 = vshrl.u32 %v4784_v24, 16 }
 0x120   : > { %v1995_v8 = vpop.f32.mrf.mxu2  ;;  %v2228_v55 = vpop.f32.mrf.mxu3 }
 0x121   : > { %v1996_v2 = vadd.f32 %v1995_v8, %v1907_v46  ;;  %v1908_v16 = vpop.f32.mrf.mxu1  ;;  %v2319_v41 = vpop.f32.mrf.mxu0  ;;  %v1519_v46 = vrot.slane %v4664_v49, 1  ;;  %v1520_v8 = vrot.slane %v1239_v45, 1  ;;  %v1240_v45 = vpack.c.b16 %v1222_v53, %v1222_v53 }
 0x122   : > { %v1909_v9 = vadd.f32 %v1908_v16, %v5185_v57 }
 0x123   : > { %v2229_v31 = vadd.f32 %v2228_v55, %v1996_v2  ;;  %v5321_v55 = vsel %vm1479_vm3, %v1519_v46, %v1520_v8  ;;  %v1418_v46 = vrot.slane %v1416_v20, 1  ;;  %v1421_v8 = vshll.u32 %v1240_v45, 16 }
 0x125   : > { %v5313_v26 = vadd.f32 %v2317_v60, %v2229_v31  ;;  %v565_v60 = vadd.f32 %v5047_v43, %v508_v38  ;;  %v4259_v38 = vld [vmem:[%s5703_s1 + $0x1c0] sm:$0xff] }
 0x126   : > { %2760 = vmatpush.bf16.msra.mxu3 %v4259_v38  ;;  %v1522_v38 = vrot.slane %v4784_v24, 1 }
 0x127   : > { %5770 = vst [vmem:[#allocation37_spill] sm:$0xff] %v5313_v26 }
 0x128   : > { %v1997_v22 = vpop.f32.mrf.mxu2  ;;  %v2230_v28 = vpop.f32.mrf.mxu3 }
 0x129   : > { %v1998_v27 = vadd.f32 %v1997_v22, %v1909_v9  ;;  %v1911_v57 = vpop.f32.mrf.mxu1  ;;  %v2322_v16 = vpop.f32.mrf.mxu0  ;;  %v400_v9 = vld [vmem:[%s4549_s10 + $0xc8] sm:$0xf] }
 0x12a   : > { %v1912_v63 = vadd.f32 %v1911_v57, %v5036_v14  ;;  %v4219_v14 = vld [vmem:[%s5703_s1 + $0x80] sm:$0xff] }
 0x12b   : > { %v2231_v2 = vadd.f32 %v2230_v28, %v1998_v27  ;;  %v619_v27 = vmax.f32 %v565_v60, 0.0  ;;  %v4267_v57 = vld [vmem:[%s5703_s1 + $0x200] sm:$0xff]  ;;  %v1419_v60 = vor.u32 %v1418_v46, %v1414_v21  ;;  %2389 = vmatpush.bf16.msra.mxu1 %v4219_v14 }
 0x12c   : > { %1950 = vmatmul.bf16.gmra.mxu1 %v5318_v18  ;;  %2361 = vmatmul.bf16.gmra.mxu0 %v5294_v6 }
 0x12d   : > { %2039 = vmatmul.bf16.gmra.mxu2 %v5321_v55  ;;  %2272 = vmatmul.bf16.gmra.mxu3 %v4914_v61  ;;  %v5335_v28 = vadd.f32 %v2319_v41, %v2231_v2  ;;  %v1021_v22 = vsel %vm343_vm1, %v619_v27, 0.0  ;;  %v454_v41 = vunpack.c.l.bf16 %v400_v9  ;;  %v1423_v2 = vrot.slane %v1421_v8, 1 }
 0x12e   : > { %v1075_v35 = vpack.c.bf16 %v1021_v22, %v1021_v22  ;;  %2849 = vmatpush.bf16.msra.mxu0 %v4267_v57  ;;  %v1523_v27 = vrot.slane %v1240_v45, 1 }
 0x12f   : > { %5771 = vst [vmem:[#allocation38_spill] sm:$0xff] %v5335_v28  ;;  %v5354_v21 = vsel %vm1244_vm2, %v1419_v60, %v1423_v2  ;;  %v1426_v2 = vshrl.u32 %v4872_v58, 16 }
 0x130   : > { %v2000_v42 = vpop.f32.mrf.mxu2  ;;  %v2233_v39 = vpop.f32.mrf.mxu3  ;;  %v1223_v46 = vunpack.c.l.b16 %v1075_v35  ;;  %v5357_v8 = vsel %vm1479_vm3, %v1522_v38, %v1523_v27 }
 0x131   : > { %v2001_v31 = vadd.f32 %v2000_v42, %v1912_v63  ;;  %v1913_v10 = vpop.f32.mrf.mxu1  ;;  %v2324_v25 = vpop.f32.mrf.mxu0  ;;  %v511_v63 = vmul.f32 %v5031_v44, %v454_v41 }
 0x132   : > { %v1914_v9 = vadd.f32 %v1913_v10, %v5067_v1  ;;  %v1241_v44 = vpack.c.b16 %v1223_v46, %v1223_v46  ;;  %v1428_v1 = vshll.u32 %v4872_v58, 16 }
 0x133   : > { %v2234_v53 = vadd.f32 %v2233_v39, %v2001_v31 }
 0x134   : > { %v1430_v35 = vrot.slane %v1428_v1, 1  ;;  %v1433_v38 = vshll.u32 %v1241_v44, 16 }
 0x135   : > { %v5348_v20 = vadd.f32 %v2322_v16, %v2234_v53  ;;  %v568_v16 = vadd.f32 %v5047_v43, %v511_v63 }
 0x137   : > { %v622_v10 = vmax.f32 %v568_v16, 0.0 }
 0x138   : > { %v2002_v42 = vpop.f32.mrf.mxu2  ;;  %v2235_v39 = vpop.f32.mrf.mxu3 }
 0x139   : > { %v2003_v31 = vadd.f32 %v2002_v42, %v1914_v9  ;;  %v1916_v28 = vpop.f32.mrf.mxu1  ;;  %v2327_v26 = vpop.f32.mrf.mxu0  ;;  %v1024_v27 = vsel %vm343_vm1, %v622_v10, 0.0  ;;  %v1431_v9 = vor.u32 %v1430_v35, %v1426_v2  ;;  %v1435_v42 = vrot.slane %v1433_v38, 1 }
 0x13a   : > { %v1917_v41 = vadd.f32 %v1916_v28, %v5087_v33  ;;  %v1525_v33 = vrot.slane %v4872_v58, 1  ;;  %v1526_v28 = vrot.slane %v1241_v44, 1 }
 0x13b   : > { %v2236_v22 = vadd.f32 %v2235_v39, %v2003_v31 }
 0x13c   : > { %1955 = vmatmul.bf16.gmra.mxu1 %v5354_v21  ;;  %2366 = vmatmul.bf16.gmra.mxu0 %v5318_v18  ;;  %v5379_v10 = vsel %vm1479_vm3, %v1525_v33, %v1526_v28 }
 0x13d   : > { %2044 = vmatmul.bf16.gmra.mxu2 %v5357_v8  ;;  %2277 = vmatmul.bf16.gmra.mxu3 %v4664_v49  ;;  %v5365_v45 = vadd.f32 %v2324_v25, %v2236_v22  ;;  %v1078_v25 = vpack.c.bf16 %v1024_v27, %v1024_v27 }
 0x13f   : > { %v1224_v7 = vunpack.c.l.b16 %v1078_v25 }
 0x140   : > { %v2005_v53 = vpop.f32.mrf.mxu2  ;;  %v2238_v14 = vpop.f32.mrf.mxu3 }
 0x141   : > { %v2006_v43 = vadd.f32 %v2005_v53, %v1917_v41  ;;  %v1918_v57 = vpop.f32.mrf.mxu1  ;;  %v2329_v60 = vpop.f32.mrf.mxu0  ;;  %v5376_v53 = vsel %vm1244_vm2, %v1431_v9, %v1435_v42 }
 0x142   : > { %v1919_v31 = vadd.f32 %v1918_v57, %v5107_v11  ;;  %v1242_v11 = vpack.c.b16 %v1224_v7, %v1224_v7 }
 0x143   : > { %v2239_v63 = vadd.f32 %v2238_v14, %v2006_v43 }
 0x144   : > { %v1445_v42 = vshll.u32 %v1242_v11, 16 }
 0x145   : > { %v5371_v39 = vadd.f32 %v2327_v26, %v2239_v63  ;;  %v1440_v26 = vshll.u32 %v4916_v52, 16  ;;  %v1438_v63 = vshrl.u32 %v4916_v52, 16 }
 0x146   : > { %v1447_v28 = vrot.slane %v1445_v42, 1 }
 0x147   : > { %v1442_v9 = vrot.slane %v1440_v26, 1 }
 0x148   : > { %v2007_v46 = vpop.f32.mrf.mxu2  ;;  %v2240_v16 = vpop.f32.mrf.mxu3 }
 0x149   : > { %v2008_v22 = vadd.f32 %v2007_v46, %v1919_v31  ;;  %v1921_v41 = vpop.f32.mrf.mxu1  ;;  %v2332_v1 = vpop.f32.mrf.mxu0  ;;  %v1443_v33 = vor.u32 %v1442_v9, %v1438_v63  ;;  %v1528_v46 = vrot.slane %v4916_v52, 1 }
 0x14a   : > { %v1922_v43 = vadd.f32 %v1921_v41, %v5121_v51 }
 0x14b   : > { %v2241_v14 = vadd.f32 %v2240_v16, %v2008_v22 }
 0x14c   : > { %1960 = vmatmul.bf16.gmra.mxu1 %v5376_v53  ;;  %2371 = vmatmul.bf16.gmra.mxu0 %v5354_v21 }
 0x14d   : > { %2049 = vmatmul.bf16.gmra.mxu2 %v5379_v10  ;;  %2282 = vmatmul.bf16.gmra.mxu3 %v4784_v24  ;;  %v5386_v44 = vadd.f32 %v2329_v60, %v2241_v14  ;;  %v1529_v60 = vrot.slane %v1242_v11, 1 }
 0x14f   : > { %v5398_v26 = vsel %vm1479_vm3, %v1528_v46, %v1529_v60  ;;  %v5734_v46 = vrot.slane %v4918_v0, 1 }
 0x150   : > { %v2010_v57 = vpop.f32.mrf.mxu2  ;;  %v2243_v2 = vpop.f32.mrf.mxu3 }
 0x151   : > { %v2011_v35 = vadd.f32 %v2010_v57, %v1922_v43  ;;  %v1923_v38 = vpop.f32.mrf.mxu1  ;;  %v2334_v27 = vpop.f32.mrf.mxu0  ;;  %v5395_v43 = vsel %vm1244_vm2, %v1443_v33, %v1447_v28 }
 0x152   : > { %v1924_v16 = vadd.f32 %v1923_v38, %v5147_v29 }
 0x153   : > { %v2244_v25 = vadd.f32 %v2243_v2, %v2011_v35 }
 0x155   : > { %v5390_v31 = vadd.f32 %v2332_v1, %v2244_v25 }
 0x158   : > { %v2012_v51 = vpop.f32.mrf.mxu2  ;;  %v2245_v22 = vpop.f32.mrf.mxu3 }
 0x159   : > { %v2013_v41 = vadd.f32 %v2012_v51, %v1924_v16  ;;  %v1926_v7 = vpop.f32.mrf.mxu1  ;;  %v2337_v14 = vpop.f32.mrf.mxu0 }
 0x15a   : > { %v1927_v1 = vadd.f32 %v1926_v7, %v5167_v4 }
 0x15b   : > { %v2246_v57 = vadd.f32 %v2245_v22, %v2013_v41 }
 0x15c   : > { %1965 = vmatmul.bf16.gmra.mxu1 %v5395_v43  ;;  %2376 = vmatmul.bf16.gmra.mxu0 %v5376_v53 }
 0x15d   : > { %2054 = vmatmul.bf16.gmra.mxu2 %v5398_v26  ;;  %2287 = vmatmul.bf16.gmra.mxu3 %v4872_v58  ;;  %v5404_v29 = vadd.f32 %v2334_v27, %v2246_v57 }
 0x160   : > { %v2015_v11 = vpop.f32.mrf.mxu2  ;;  %v2248_v2 = vpop.f32.mrf.mxu3 }
 0x161   : > { %v2016_v35 = vadd.f32 %v2015_v11, %v1927_v1  ;;  %v1928_v38 = vpop.f32.mrf.mxu1  ;;  %v2339_v63 = vpop.f32.mrf.mxu0 }
 0x162   : > { %v1929_v25 = vadd.f32 %v1928_v38, %v5187_v13 }
 0x163   : > { %v2249_v9 = vadd.f32 %v2248_v2, %v2016_v35 }
 0x165   : > { %v5407_v42 = vadd.f32 %v2337_v14, %v2249_v9 }
 0x168   : > { %v2017_v33 = vpop.f32.mrf.mxu2  ;;  %v2250_v28 = vpop.f32.mrf.mxu3 }
 0x169   : > { %v2018_v60 = vadd.f32 %v2017_v33, %v1929_v25  ;;  %v1931_v16 = vpop.f32.mrf.mxu1  ;;  %v2342_v27 = vpop.f32.mrf.mxu0 }
 0x16a   : > { %v1932_v13 = vadd.f32 %v1931_v16, %v5061_v56 }
 0x16b   : > { %v2251_v51 = vadd.f32 %v2250_v28, %v2018_v60 }
 0x16c   : > { %2390 = vmatmul.bf16.vlgmr.msra.gmra.mxu1 %v5734_v46  ;;  %2850 = vmatmul.bf16.vlgmr.msra.gmra.mxu0 %v4968_v15 }
 0x16d   : > { %2672 = vmatmul.bf16.vlgmr.msra.gmra.mxu2 %v4774_v17  ;;  %2761 = vmatmul.bf16.vlgmr.msra.gmra.mxu3 %v4965_v12  ;;  %v5416_v4 = vadd.f32 %v2339_v63, %v2251_v51 }
 0x170   : > { %v2020_v22 = vpop.f32.mrf.mxu2  ;;  %v2253_v41 = vpop.f32.mrf.mxu3 }
 0x171   : > { %v2021_v7 = vadd.f32 %v2020_v22, %v1932_v13  ;;  %v1933_v14 = vpop.f32.mrf.mxu1  ;;  %v2344_v57 = vpop.f32.mrf.mxu0 }
 0x172   : > { %v1934_v2 = vadd.f32 %v1933_v14, %v5081_v30  ;;  %v5773_v14 = vld [vmem:[#allocation8_spill] sm:$0xff] }
 0x173   : > { %v2254_v1 = vadd.f32 %v2253_v41, %v2021_v7 }
 0x175   : > { %v5419_v11 = vadd.f32 %v2342_v27, %v2254_v1  ;;  %v5774_v1 = vld [vmem:[#allocation19_spill] sm:$0xff] }
 0x178   : > { %v2022_v35 = vpop.f32.mrf.mxu2  ;;  %v2255_v38 = vpop.f32.mrf.mxu3 }
 0x179   : > { %v2023_v9 = vadd.f32 %v2022_v35, %v1934_v2  ;;  %v1936_v17 = vpop.f32.mrf.mxu1  ;;  %v2347_v25 = vpop.f32.mrf.mxu0 }
 0x17a   : > { %v1937_v63 = vadd.f32 %v1936_v17, %v5101_v54  ;;  %v5772_v54 = vld [vmem:[#allocation5_spill] sm:$0xff] }
 0x17b   : > { %v2256_v12 = vadd.f32 %v2255_v38, %v2023_v9 }
 0x17c   : > { %2395 = vmatmul.bf16.gmra.mxu1 %v4939_v3  ;;  %2855 = vmatmul.bf16.gmra.mxu0 %v4985_v37 }
 0x17d   : > { %2677 = vmatmul.bf16.gmra.mxu2 %v4854_v40  ;;  %2766 = vmatmul.bf16.gmra.mxu3 %v4982_v36  ;;  %v5426_v56 = vadd.f32 %v2344_v57, %v2256_v12 }
 0x180   : > { %v2025_v33 = vpop.f32.mrf.mxu2  ;;  %v2258_v30 = vpop.f32.mrf.mxu3 }
 0x181   : > { %v2026_v28 = vadd.f32 %v2025_v33, %v1937_v63  ;;  %v1938_v60 = vpop.f32.mrf.mxu1  ;;  %v2349_v16 = vpop.f32.mrf.mxu0  ;;  %v5775_v63 = vld [vmem:[#allocation21_spill] sm:$0xff] }
 0x182   : > { %v1939_v3 = vadd.f32 %v1938_v60, %v5115_v62 }
 0x183   : > { %v2259_v27 = vadd.f32 %v2258_v30, %v2026_v28 }
 0x185   : > { %v5429_v51 = vadd.f32 %v2347_v25, %v2259_v27 }
 0x188   : > { %v2027_v13 = vpop.f32.mrf.mxu2  ;;  %v2260_v22 = vpop.f32.mrf.mxu3 }
 0x189   : > { %v2028_v41 = vadd.f32 %v2027_v13, %v1939_v3  ;;  %v1941_v40 = vpop.f32.mrf.mxu1  ;;  %v2352_v7 = vpop.f32.mrf.mxu0  ;;  %v5777_v13 = vld [vmem:[#allocation2_spill] sm:$0xff] }
 0x18a   : > { %v1942_v2 = vadd.f32 %v1941_v40, %v5774_v1  ;;  %v5779_v40 = vld [vmem:[#allocation25_spill] sm:$0xff] }
 0x18b   : > { %v2261_v36 = vadd.f32 %v2260_v22, %v2028_v41  ;;  %v5778_v22 = vld [vmem:[#allocation9_spill] sm:$0xff] }
 0x18c   : > { %2400 = vmatmul.bf16.gmra.mxu1 %v4968_v15  ;;  %2860 = vmatmul.bf16.gmra.mxu0 %v5015_v19 }
 0x18d   : > { %2682 = vmatmul.bf16.gmra.mxu2 %v5772_v54  ;;  %2771 = vmatmul.bf16.gmra.mxu3 %v5773_v14  ;;  %v5436_v57 = vadd.f32 %v2349_v16, %v2261_v36  ;;  %v5776_v16 = vld [vmem:[#allocation10_spill] sm:$0xff] }
 0x190   : > { %v2030_v35 = vpop.f32.mrf.mxu2  ;;  %v2263_v62 = vpop.f32.mrf.mxu3 }
 0x191   : > { %v2031_v38 = vadd.f32 %v2030_v35, %v1942_v2  ;;  %v1943_v9 = vpop.f32.mrf.mxu1  ;;  %v2354_v17 = vpop.f32.mrf.mxu0 }
 0x192   : > { %v1944_v15 = vadd.f32 %v1943_v9, %v5775_v63 }
 0x193   : > { %v2264_v25 = vadd.f32 %v2263_v62, %v2031_v38  ;;  %v5780_v38 = vld [vmem:[#allocation27_spill] sm:$0xff] }
 0x195   : > { %v5439_v12 = vadd.f32 %v2352_v7, %v2264_v25 }
 0x198   : > { %v2032_v33 = vpop.f32.mrf.mxu2  ;;  %v2265_v30 = vpop.f32.mrf.mxu3 }
 0x199   : > { %v2033_v28 = vadd.f32 %v2032_v33, %v1944_v15  ;;  %v1946_v60 = vpop.f32.mrf.mxu1  ;;  %v2357_v27 = vpop.f32.mrf.mxu0 }
 0x19a   : > { %v1947_v7 = vadd.f32 %v1946_v60, %v5779_v40  ;;  %v5783_v60 = vld [vmem:[#allocation13_spill] sm:$0xff] }
 0x19b   : > { %v2266_v3 = vadd.f32 %v2265_v30, %v2033_v28  ;;  %v5782_v28 = vld [vmem:[#allocation3_spill] sm:$0xff] }
 0x19c   : > { %2405 = vmatmul.bf16.gmra.mxu1 %v4985_v37  ;;  %2865 = vmatmul.bf16.gmra.mxu0 %v5776_v16 }
 0x19d   : > { %2687 = vmatmul.bf16.gmra.mxu2 %v5777_v13  ;;  %2776 = vmatmul.bf16.gmra.mxu3 %v5778_v22  ;;  %v5446_v41 = vadd.f32 %v2354_v17, %v2266_v3  ;;  %v5781_v17 = vld [vmem:[#allocation14_spill] sm:$0xff] }
 0x1a0   : > { %v2035_v36 = vpop.f32.mrf.mxu2  ;;  %v2268_v54 = vpop.f32.mrf.mxu3 }
 0x1a1   : > { %v2036_v14 = vadd.f32 %v2035_v36, %v1947_v7  ;;  %v1948_v1 = vpop.f32.mrf.mxu1  ;;  %v2359_v2 = vpop.f32.mrf.mxu0 }
 0x1a2   : > { %v1949_v37 = vadd.f32 %v1948_v1, %v5780_v38 }
 0x1a3   : > { %v2269_v35 = vadd.f32 %v2268_v54, %v2036_v14 }
 0x1a5   : > { %v5449_v62 = vadd.f32 %v2357_v27, %v2269_v35  ;;  %v5784_v27 = vld [vmem:[#allocation11_spill] sm:$0xff]  ;;  %v5785_v35 = vld [vmem:[#allocation12_spill] sm:$0xff] }
 0x1a8   : > { %v2037_v9 = vpop.f32.mrf.mxu2  ;;  %v2270_v25 = vpop.f32.mrf.mxu3 }
 0x1a9   : > { %v2038_v63 = vadd.f32 %v2037_v9, %v1949_v37  ;;  %v1951_v15 = vpop.f32.mrf.mxu1  ;;  %v2362_v33 = vpop.f32.mrf.mxu0 }
 0x1aa   : > { %v1952_v13 = vadd.f32 %v1951_v15, %v5784_v27  ;;  %v5787_v15 = vld [vmem:[#allocation4_spill] sm:$0xff] }
 0x1ab   : > { %v2271_v30 = vadd.f32 %v2270_v25, %v2038_v63 }
 0x1ac   : > { %2410 = vmatmul.bf16.gmra.mxu1 %v5015_v19  ;;  %2870 = vmatmul.bf16.gmra.mxu0 %v5781_v17 }
 0x1ad   : > { %2692 = vmatmul.bf16.gmra.mxu2 %v5782_v28  ;;  %2781 = vmatmul.bf16.gmra.mxu3 %v5783_v60  ;;  %v5456_v3 = vadd.f32 %v2359_v2, %v2271_v30  ;;  %v5786_v2 = vld [vmem:[#allocation18_spill] sm:$0xff]  ;;  %v5788_v30 = vld [vmem:[#allocation17_spill] sm:$0xff] }
 0x1b0   : > { %v2040_v22 = vpop.f32.mrf.mxu2  ;;  %v2273_v40 = vpop.f32.mrf.mxu3 }
 0x1b1   : > { %v2041_v7 = vadd.f32 %v2040_v22, %v1952_v13  ;;  %v1953_v36 = vpop.f32.mrf.mxu1  ;;  %v2364_v54 = vpop.f32.mrf.mxu0 }
 0x1b2   : > { %v1954_v19 = vadd.f32 %v1953_v36, %v5785_v35 }
 0x1b3   : > { %v2274_v14 = vadd.f32 %v2273_v40, %v2041_v7 }
 0x1b5   : > { %v5459_v1 = vadd.f32 %v2362_v33, %v2274_v14  ;;  %v5790_v33 = vld [vmem:[#allocation15_spill] sm:$0xff] }
 0x1b8   : > { %v2042_v38 = vpop.f32.mrf.mxu2  ;;  %v2275_v37 = vpop.f32.mrf.mxu3 }
 0x1b9   : > { %v2043_v9 = vadd.f32 %v2042_v38, %v1954_v19  ;;  %v1956_v25 = vpop.f32.mrf.mxu1  ;;  %v2367_v63 = vpop.f32.mrf.mxu0  ;;  %v5792_v19 = vld [vmem:[#allocation16_spill] sm:$0xff] }
 0x1ba   : > { %v1957_v27 = vadd.f32 %v1956_v25, %v5790_v33  ;;  %v5794_v25 = vld [vmem:[#allocation6_spill] sm:$0xff] }
 0x1bb   : > { %v2276_v28 = vadd.f32 %v2275_v37, %v2043_v9 }
 0x1bc   : > { %2415 = vmatmul.bf16.gmra.mxu1 %v5776_v16  ;;  %2875 = vmatmul.bf16.gmra.mxu0 %v5786_v2 }
 0x1bd   : > { %2697 = vmatmul.bf16.gmra.mxu2 %v5787_v15  ;;  %2786 = vmatmul.bf16.gmra.mxu3 %v5788_v30  ;;  %v5466_v60 = vadd.f32 %v2364_v54, %v2276_v28  ;;  %v5793_v54 = vld [vmem:[#allocation24_spill] sm:$0xff]  ;;  %v5795_v28 = vld [vmem:[#allocation23_spill] sm:$0xff] }
 0x1bf   : > { %5789 = vst [vmem:[#allocation5_spill] sm:$0xff] %v5466_v60 }
 0x1c0   : > { %v2045_v13 = vpop.f32.mrf.mxu2  ;;  %v2278_v22 = vpop.f32.mrf.mxu3 }
 0x1c1   : > { %v2046_v40 = vadd.f32 %v2045_v13, %v1957_v27  ;;  %v1958_v7 = vpop.f32.mrf.mxu1  ;;  %v2369_v36 = vpop.f32.mrf.mxu0 }
 0x1c2   : > { %v1959_v16 = vadd.f32 %v1958_v7, %v5792_v19 }
 0x1c3   : > { %v2279_v14 = vadd.f32 %v2278_v22, %v2046_v40 }
 0x1c5   : > { %v5469_v35 = vadd.f32 %v2367_v63, %v2279_v14  ;;  %v5796_v63 = vld [vmem:[#allocation20_spill] sm:$0xff] }
 0x1c7   : > { %5791 = vst [vmem:[#allocation8_spill] sm:$0xff] %v5469_v35 }
 0x1c8   : > { %v2047_v38 = vpop.f32.mrf.mxu2  ;;  %v2280_v37 = vpop.f32.mrf.mxu3 }
 0x1c9   : > { %v2048_v9 = vadd.f32 %v2047_v38, %v1959_v16  ;;  %v1961_v15 = vpop.f32.mrf.mxu1  ;;  %v2372_v46 = vpop.f32.mrf.mxu0  ;;  %v5798_v38 = vld [vmem:[#allocation22_spill] sm:$0xff] }
 0x1ca   : > { %v1962_v27 = vadd.f32 %v1961_v15, %v5796_v63 }
 0x1cb   : > { %v2281_v30 = vadd.f32 %v2280_v37, %v2048_v9 }
 0x1cc   : > { %2420 = vmatmul.bf16.gmra.mxu1 %v5781_v17  ;;  %2880 = vmatmul.bf16.gmra.mxu0 %v5793_v54 }
 0x1cd   : > { %2702 = vmatmul.bf16.gmra.mxu2 %v5794_v25  ;;  %2791 = vmatmul.bf16.gmra.mxu3 %v5795_v28  ;;  %v5476_v33 = vadd.f32 %v2369_v36, %v2281_v30  ;;  %v5799_v36 = vld [vmem:[#allocation29_spill] sm:$0xff] }
 0x1d0   : > { %v2050_v13 = vpop.f32.mrf.mxu2  ;;  %v2283_v22 = vpop.f32.mrf.mxu3 }
 0x1d1   : > { %v2051_v40 = vadd.f32 %v2050_v13, %v1962_v27  ;;  %v1963_v7 = vpop.f32.mrf.mxu1  ;;  %v2374_v14 = vpop.f32.mrf.mxu0 }
 0x1d2   : > { %v1964_v17 = vadd.f32 %v1963_v7, %v5798_v38 }
 0x1d3   : > { %v2284_v19 = vadd.f32 %v2283_v22, %v2051_v40 }
 0x1d5   : > { %v5479_v16 = vadd.f32 %v2372_v46, %v2284_v19  ;;  %v5801_v46 = vld [vmem:[#allocation26_spill] sm:$0xff] }
 0x1d7   : > { %5797 = vst [vmem:[#allocation19_spill] sm:$0xff] %v5479_v16 }
 0x1d8   : > { %v2052_v37 = vpop.f32.mrf.mxu2  ;;  %v2285_v9 = vpop.f32.mrf.mxu3 }
 0x1d9   : > { %v2053_v35 = vadd.f32 %v2052_v37, %v1964_v17  ;;  %v1966_v25 = vpop.f32.mrf.mxu1  ;;  %v2377_v60 = vpop.f32.mrf.mxu0 }
 0x1da   : > { %v1967_v30 = vadd.f32 %v1966_v25, %v5801_v46 }
 0x1db   : > { %v2286_v28 = vadd.f32 %v2285_v9, %v2053_v35  ;;  %v5803_v35 = vld [vmem:[#allocation28_spill] sm:$0xff] }
 0x1dc   : > { %2425 = vmatmul.bf16.gmra.mxu1 %v5786_v2  ;;  %2885 = vmatmul.bf16.gmra.mxu0 %v5799_v36 }
 0x1dd   : > { %2707 = vmatmul.bf16.gmra.mxu2 %v4662_v48  ;;  %2796 = vmatmul.bf16.gmra.mxu3 %v5200_v34  ;;  %v5486_v15 = vadd.f32 %v2374_v14, %v2286_v28  ;;  %v5804_v14 = vld [vmem:[#allocation31_spill] sm:$0xff] }
 0x1df   : > { %5800 = vst [vmem:[#allocation21_spill] sm:$0xff] %v5486_v15 }
 0x1e0   : > { %v2055_v63 = vpop.f32.mrf.mxu2  ;;  %v2288_v27 = vpop.f32.mrf.mxu3 }
 0x1e1   : > { %v2056_v13 = vadd.f32 %v2055_v63, %v1967_v30  ;;  %v1968_v22 = vpop.f32.mrf.mxu1  ;;  %v2379_v40 = vpop.f32.mrf.mxu0 }
 0x1e2   : > { %v1969_v2 = vadd.f32 %v1968_v22, %v5803_v35 }
 0x1e3   : > { %v2289_v7 = vadd.f32 %v2288_v27, %v2056_v13  ;;  %v5806_v13 = vld [vmem:[#allocation30_spill] sm:$0xff] }
 0x1e5   : > { %v5489_v19 = vadd.f32 %v2377_v60, %v2289_v7 }
 0x1e7   : > { %5802 = vst [vmem:[#allocation10_spill] sm:$0xff] %v5489_v19 }
 0x1e8   : > { %v2057_v38 = vpop.f32.mrf.mxu2  ;;  %v2290_v17 = vpop.f32.mrf.mxu3 }
 0x1e9   : > { %v2058_v37 = vadd.f32 %v2057_v38, %v1969_v2  ;;  %v2391_v48 = vpop.f32.mrf.mxu1  ;;  %v2851_v9 = vpop.f32.mrf.mxu0 }
 0x1ea   : > { %v2392_v22 = vadd.f32 %v2391_v48, %v5806_v13 }
 0x1eb   : > { %v2291_v34 = vadd.f32 %v2290_v17, %v2058_v37  ;;  %v5807_v37 = vld [vmem:[#allocation32_spill] sm:$0xff] }
 0x1ec   : > { %2430 = vmatmul.bf16.gmra.mxu1 %v5793_v54  ;;  %2890 = vmatmul.bf16.gmra.mxu0 %v5804_v14 }
 0x1ed   : > { %2712 = vmatmul.bf16.gmra.mxu2 %v4782_v23  ;;  %2801 = vmatmul.bf16.gmra.mxu3 %v5234_v59  ;;  %v5496_v25 = vadd.f32 %v2379_v40, %v2291_v34 }
 0x1ef   : > { %5805 = vst [vmem:[#allocation2_spill] sm:$0xff] %v5496_v25 }
 0x1f0   : > { %v2673_v60 = vpop.f32.mrf.mxu2  ;;  %v2762_v28 = vpop.f32.mrf.mxu3 }
 0x1f1   : > { %v2763_v46 = vadd.f32 %v2762_v28, %v2673_v60  ;;  %v2393_v30 = vpop.f32.mrf.mxu1  ;;  %v2853_v63 = vpop.f32.mrf.mxu0 }
 0x1f2   : > { %v2394_v23 = vadd.f32 %v2393_v30, %v5807_v37 }
 0x1f3   : > { %v2852_v27 = vadd.f32 %v2851_v9, %v2763_v46 }
 0x1f5   : > { %v2931_v2 = vadd.f32 %v2852_v27, %v2392_v22 }
 0x1f7   : > { %v3075_v59 = vpack.c.bf16 %v2931_v2, %v2931_v2  ;;  %v3004_v48 = vmul.f32 %v2931_v2, %v2931_v2 }
 0x1f8   : > { %v2675_v7 = vpop.f32.mrf.mxu2  ;;  %v2764_v35 = vpop.f32.mrf.mxu3 }
 0x1f9   : > { %v2765_v54 = vadd.f32 %v2764_v35, %v2675_v7  ;;  %v2396_v38 = vpop.f32.mrf.mxu1  ;;  %v2856_v17 = vpop.f32.mrf.mxu0  ;;  %v3139_v27 = vunpack.c.l.b16 %v3075_v59 }
 0x1fb   : > { %v2854_v19 = vadd.f32 %v2853_v63, %v2765_v54 }
 0x1fc   : > { %2435 = vmatmul.bf16.gmra.mxu1 %v5799_v36  ;;  %2895 = vmatmul.bf16.gmra.mxu0 %v5262_v5 }
 0x1fd   : > { %v2932_v40 = vadd.f32 %v2854_v19, %v2394_v23  ;;  %2717 = vmatmul.bf16.gmra.mxu2 %v4865_v47  ;;  %2806 = vmatmul.bf16.gmra.mxu3 %v5258_v32  ;;  %v2397_v19 = vadd.f32 %v2396_v38, %v5253_v50 }
 0x1ff   : > { %v2964_v9 = vadd.f32 %v2932_v40, %v2931_v2  ;;  %v3005_v34 = vmul.f32 %v2932_v40, %v2932_v40  ;;  %v3076_v60 = vpack.c.bf16 %v2932_v40, %v2932_v40 }
 0x200   : > { %v2678_v28 = vpop.f32.mrf.mxu2  ;;  %v2767_v46 = vpop.f32.mrf.mxu3 }
 0x201   : > { %v3036_v13 = vadd.f32 %v3005_v34, %v3004_v48  ;;  %v3140_v30 = vunpack.c.l.b16 %v3076_v60  ;;  %v2768_v63 = vadd.f32 %v2767_v46, %v2678_v28  ;;  %v2398_v22 = vpop.f32.mrf.mxu1  ;;  %v2858_v36 = vpop.f32.mrf.mxu0 }
 0x203   : > { %v3171_v7 = vpack.c.b16 %v3140_v30, %v3139_v27  ;;  %v2857_v47 = vadd.f32 %v2856_v17, %v2768_v63  ;;  %v5810_v30 = vld [vmem:[#allocation33_spill] sm:$0xff] }
 0x204   : > { %v2399_v63 = vadd.f32 %v2398_v22, %v5810_v30  ;;  %v5812_v30 = vld [vmem:[#allocation34_spill] sm:$0xff] }
 0x205   : > { %v3188_v35 = vshrl.u32 %v3171_v7, 16  ;;  %v2933_v32 = vadd.f32 %v2857_v47, %v2397_v19  ;;  %v3191_v37 = vshll.u32 %v3171_v7, 16 }
 0x207   : > { %v3190_v54 = vrot.slane %v3188_v35, 7  ;;  %v2965_v23 = vadd.f32 %v2964_v9, %v2933_v32  ;;  %v3006_v59 = vmul.f32 %v2933_v32, %v2933_v32  ;;  %v5811_v35 = vld [vmem:[#allocation35_spill] sm:$0xff] }
 0x208   : > { %v2680_v40 = vpop.f32.mrf.mxu2  ;;  %v2769_v48 = vpop.f32.mrf.mxu3 }
 0x209   : > { %v3193_v34 = vor.u32 %v3191_v37, %v3190_v54  ;;  %v3350_v60 = vsel %vm5505_vm6, %v3190_v54, 0  ;;  %v3037_v28 = vadd.f32 %v3036_v13, %v3006_v59  ;;  %v2401_v46 = vpop.f32.mrf.mxu1  ;;  %v2861_v50 = vpop.f32.mrf.mxu0  ;;  %v2770_v17 = vadd.f32 %v2769_v48, %v2680_v40 }
 0x20a   : > { %v3401_v38 = vunpack.c.l.b16 %v3350_v60  ;;  %v3077_v37 = vpack.c.bf16 %v2933_v32, %v2933_v32 }
 0x20b   : > { %v3334_v27 = vsel %vm5505_vm6, 0, %v3193_v34  ;;  %v2859_v47 = vadd.f32 %v2858_v36, %v2770_v17 }
 0x20c   : > { %v3399_v9 = vunpack.c.l.b16 %v3334_v27  ;;  %v3400_v7 = vunpack.c.h.b16 %v3334_v27  ;;  %v3449_v19 = vpack.c.b16 %v3401_v38, %v3401_v38  ;;  %2440 = vmatmul.bf16.gmra.mxu1 %v5804_v14  ;;  %2900 = vmatmul.bf16.gmra.mxu0 %v5811_v35  ;;  %v3141_v17 = vunpack.c.l.b16 %v3077_v37 }
 0x20d   : > { %2722 = vmatmul.bf16.gmra.mxu2 %v4914_v61  ;;  %2811 = vmatmul.bf16.gmra.mxu3 %v5294_v6  ;;  %v2934_v59 = vadd.f32 %v2859_v47, %v2399_v63  ;;  %v2402_v6 = vadd.f32 %v2401_v46, %v5812_v30 }
 0x20e   : > { %v3447_v13 = vpack.c.b16 %v3399_v9, %v3399_v9  ;;  %v3448_v54 = vpack.c.b16 %v3400_v7, %v3400_v7  ;;  %4155 = vst [vmem:[%s4554_s13 + $0x14] sm:$0xf] %v3449_v19 }
 0x20f   : > { %v2966_v22 = vadd.f32 %v2965_v23, %v2934_v59  ;;  %v3007_v40 = vmul.f32 %v2934_v59, %v2934_v59  ;;  %v3078_v48 = vpack.c.bf16 %v2934_v59, %v2934_v59 }
 0x210   : > { %4153 = vst [vmem:[%s4554_s13 + $0xc] sm:$0xf] %v3447_v13  ;;  %v2683_v34 = vpop.f32.mrf.mxu2  ;;  %v2772_v36 = vpop.f32.mrf.mxu3 }
 0x211   : > { %4154 = vst [vmem:[%s4554_s13 + $0x10] sm:$0xf] %v3448_v54  ;;  %v2773_v60 = vadd.f32 %v2772_v36, %v2683_v34  ;;  %v2403_v14 = vpop.f32.mrf.mxu1  ;;  %v2863_v38 = vpop.f32.mrf.mxu0  ;;  %v3038_v27 = vadd.f32 %v3037_v28, %v3007_v40  ;;  %v3142_v61 = vunpack.c.l.b16 %v3078_v48 }
 0x213   : > { %v2862_v9 = vadd.f32 %v2861_v50, %v2773_v60  ;;  %v3172_v7 = vpack.c.b16 %v3142_v61, %v3141_v17  ;;  %v5813_v50 = vld [vmem:[#allocation36_spill] sm:$0xff] }
 0x214   : > { %v2404_v37 = vadd.f32 %v2403_v14, %v5813_v50 }
 0x215   : > { %v2935_v19 = vadd.f32 %v2862_v9, %v2402_v6  ;;  %v3195_v32 = vshrl.u32 %v3172_v7, 16  ;;  %v3198_v13 = vshll.u32 %v3172_v7, 16 }
 0x217   : > { %v2967_v63 = vadd.f32 %v2966_v22, %v2935_v19  ;;  %v3008_v47 = vmul.f32 %v2935_v19, %v2935_v19  ;;  %v3197_v23 = vrot.slane %v3195_v32, 7 }
 0x218   : > { %v2685_v59 = vpop.f32.mrf.mxu2  ;;  %v2774_v25 = vpop.f32.mrf.mxu3 }
 0x219   : > { %v3039_v15 = vadd.f32 %v3038_v27, %v3008_v47  ;;  %v2775_v54 = vadd.f32 %v2774_v25, %v2685_v59  ;;  %v2406_v34 = vpop.f32.mrf.mxu1  ;;  %v2866_v36 = vpop.f32.mrf.mxu0  ;;  %v3200_v16 = vor.u32 %v3198_v13, %v3197_v23  ;;  %v3351_v28 = vsel %vm5505_vm6, %v3197_v23, 0  ;;  %v5814_v13 = vld [vmem:[#allocation37_spill] sm:$0xff] }
 0x21a   : > { %v3404_v46 = vunpack.c.l.b16 %v3351_v28  ;;  %v3079_v27 = vpack.c.bf16 %v2935_v19, %v2935_v19  ;;  %v2407_v59 = vadd.f32 %v2406_v34, %v5814_v13 }
 0x21b   : > { %v2864_v40 = vadd.f32 %v2863_v38, %v2775_v54  ;;  %v3335_v22 = vsel %vm5505_vm6, 0, %v3200_v16 }
 0x21c   : > { %2445 = vmatmul.bf16.gmra.mxu1 %v5262_v5  ;;  %2905 = vmatmul.bf16.gmra.mxu0 %v5321_v55  ;;  %v3402_v25 = vunpack.c.l.b16 %v3335_v22  ;;  %v3403_v48 = vunpack.c.h.b16 %v3335_v22  ;;  %v3452_v60 = vpack.c.b16 %v3404_v46, %v3404_v46  ;;  %v3143_v23 = vunpack.c.l.b16 %v3079_v27 }
 0x21d   : > { %v2936_v17 = vadd.f32 %v2864_v40, %v2404_v37  ;;  %2727 = vmatmul.bf16.gmra.mxu2 %v4664_v49  ;;  %2816 = vmatmul.bf16.gmra.mxu3 %v5318_v18 }
 0x21e   : > { %v3450_v14 = vpack.c.b16 %v3402_v25, %v3402_v25  ;;  %v3451_v38 = vpack.c.b16 %v3403_v48, %v3403_v48  ;;  %4158 = vst [vmem:[%s4554_s13 + $0x20] sm:$0xf] %v3452_v60 }
 0x21f   : > { %v2968_v61 = vadd.f32 %v2967_v63, %v2936_v17  ;;  %v3009_v16 = vmul.f32 %v2936_v17, %v2936_v17  ;;  %v3080_v30 = vpack.c.bf16 %v2936_v17, %v2936_v17 }
 0x220   : > { %v2688_v5 = vpop.f32.mrf.mxu2  ;;  %v2777_v6 = vpop.f32.mrf.mxu3  ;;  %4156 = vst [vmem:[%s4554_s13 + $0x18] sm:$0xf] %v3450_v14 }
 0x221   : > { %v3040_v9 = vadd.f32 %v3039_v15, %v3009_v16  ;;  %v2778_v7 = vadd.f32 %v2777_v6, %v2688_v5  ;;  %v2408_v32 = vpop.f32.mrf.mxu1  ;;  %v2868_v47 = vpop.f32.mrf.mxu0  ;;  %4157 = vst [vmem:[%s4554_s13 + $0x1c] sm:$0xf] %v3451_v38  ;;  %v3144_v49 = vunpack.c.l.b16 %v3080_v30 }
 0x223   : > { %v2867_v18 = vadd.f32 %v2866_v36, %v2778_v7  ;;  %v3173_v19 = vpack.c.b16 %v3144_v49, %v3143_v23  ;;  %v5815_v36 = vld [vmem:[#allocation38_spill] sm:$0xff] }
 0x224   : > { %v2409_v14 = vadd.f32 %v2408_v32, %v5815_v36 }
 0x225   : > { %v2937_v54 = vadd.f32 %v2867_v18, %v2407_v59  ;;  %v3202_v28 = vshrl.u32 %v3173_v19, 16  ;;  %v3205_v37 = vshll.u32 %v3173_v19, 16 }
 0x227   : > { %v2969_v46 = vadd.f32 %v2968_v61, %v2937_v54  ;;  %v3010_v63 = vmul.f32 %v2937_v54, %v2937_v54  ;;  %v3204_v50 = vrot.slane %v3202_v28, 7 }
 0x228   : > { %v2690_v40 = vpop.f32.mrf.mxu2  ;;  %v2779_v22 = vpop.f32.mrf.mxu3 }
 0x229   : > { %v3041_v25 = vadd.f32 %v3040_v9, %v3010_v63  ;;  %v2780_v15 = vadd.f32 %v2779_v22, %v2690_v40  ;;  %v2411_v48 = vpop.f32.mrf.mxu1  ;;  %v2871_v60 = vpop.f32.mrf.mxu0  ;;  %v3207_v17 = vor.u32 %v3205_v37, %v3204_v50  ;;  %v3352_v27 = vsel %vm5505_vm6, %v3204_v50, 0 }
 0x22a   : > { %v3407_v34 = vunpack.c.l.b16 %v3352_v27  ;;  %v3081_v9 = vpack.c.bf16 %v2937_v54, %v2937_v54  ;;  %v2412_v50 = vadd.f32 %v2411_v48, %v5348_v20 }
 0x22b   : > { %v2869_v38 = vadd.f32 %v2868_v47, %v2780_v15  ;;  %v3336_v61 = vsel %vm5505_vm6, 0, %v3207_v17 }
 0x22c   : > { %2450 = vmatmul.bf16.gmra.mxu1 %v5811_v35  ;;  %2910 = vmatmul.bf16.gmra.mxu0 %v5357_v8  ;;  %v3405_v16 = vunpack.c.l.b16 %v3336_v61  ;;  %v3406_v30 = vunpack.c.h.b16 %v3336_v61  ;;  %v3455_v5 = vpack.c.b16 %v3407_v34, %v3407_v34  ;;  %v3145_v63 = vunpack.c.l.b16 %v3081_v9 }
 0x22d   : > { %v2938_v6 = vadd.f32 %v2869_v38, %v2409_v14  ;;  %2732 = vmatmul.bf16.gmra.mxu2 %v4784_v24  ;;  %2821 = vmatmul.bf16.gmra.mxu3 %v5354_v21 }
 0x22e   : > { %v3453_v7 = vpack.c.b16 %v3405_v16, %v3405_v16  ;;  %v3454_v32 = vpack.c.b16 %v3406_v30, %v3406_v30  ;;  %4161 = vst [vmem:[%s4554_s13 + $0x2c] sm:$0xf] %v3455_v5 }
 0x22f   : > { %v2970_v47 = vadd.f32 %v2969_v46, %v2938_v6  ;;  %v3011_v23 = vmul.f32 %v2938_v6, %v2938_v6  ;;  %v3082_v49 = vpack.c.bf16 %v2938_v6, %v2938_v6 }
 0x230   : > { %v2693_v35 = vpop.f32.mrf.mxu2  ;;  %v2782_v13 = vpop.f32.mrf.mxu3  ;;  %4159 = vst [vmem:[%s4554_s13 + $0x24] sm:$0xf] %v3453_v7 }
 0x231   : > { %v3042_v59 = vadd.f32 %v3041_v25, %v3011_v23  ;;  %v2783_v18 = vadd.f32 %v2782_v13, %v2693_v35  ;;  %v2413_v19 = vpop.f32.mrf.mxu1  ;;  %v2873_v28 = vpop.f32.mrf.mxu0  ;;  %4160 = vst [vmem:[%s4554_s13 + $0x28] sm:$0xf] %v3454_v32  ;;  %v3146_v24 = vunpack.c.l.b16 %v3082_v49 }
 0x232   : > { %v2414_v48 = vadd.f32 %v2413_v19, %v5365_v45 }
 0x233   : > { %v2872_v21 = vadd.f32 %v2871_v60, %v2783_v18  ;;  %v3174_v54 = vpack.c.b16 %v3146_v24, %v3145_v63 }
 0x235   : > { %v2939_v37 = vadd.f32 %v2872_v21, %v2412_v50  ;;  %v3209_v40 = vshrl.u32 %v3174_v54, 16  ;;  %v3212_v17 = vshll.u32 %v3174_v54, 16 }
 0x237   : > { %v2971_v22 = vadd.f32 %v2970_v47, %v2939_v37  ;;  %v3012_v46 = vmul.f32 %v2939_v37, %v2939_v37  ;;  %v3211_v15 = vrot.slane %v3209_v40, 7  ;;  %v3083_v32 = vpack.c.bf16 %v2939_v37, %v2939_v37 }
 0x238   : > { %v2695_v27 = vpop.f32.mrf.mxu2  ;;  %v2784_v34 = vpop.f32.mrf.mxu3 }
 0x239   : > { %v3043_v36 = vadd.f32 %v3042_v59, %v3012_v46  ;;  %v2785_v25 = vadd.f32 %v2784_v34, %v2695_v27  ;;  %v2416_v14 = vpop.f32.mrf.mxu1  ;;  %v2876_v38 = vpop.f32.mrf.mxu0  ;;  %v3214_v61 = vor.u32 %v3212_v17, %v3211_v15  ;;  %v3353_v16 = vsel %vm5505_vm6, %v3211_v15, 0 }
 0x23a   : > { %v3410_v20 = vunpack.c.l.b16 %v3353_v16  ;;  %v3147_v63 = vunpack.c.l.b16 %v3083_v32  ;;  %v2417_v24 = vadd.f32 %v2416_v14, %v5371_v39 }
 0x23b   : > { %v2874_v60 = vadd.f32 %v2873_v28, %v2785_v25  ;;  %v3337_v30 = vsel %vm5505_vm6, 0, %v3214_v61 }
 0x23c   : > { %2455 = vmatmul.bf16.gmra.mxu1 %v5321_v55  ;;  %2915 = vmatmul.bf16.gmra.mxu0 %v5379_v10  ;;  %v3408_v5 = vunpack.c.l.b16 %v3337_v30  ;;  %v3409_v6 = vunpack.c.h.b16 %v3337_v30  ;;  %v3458_v9 = vpack.c.b16 %v3410_v20, %v3410_v20 }
 0x23d   : > { %v2940_v7 = vadd.f32 %v2874_v60, %v2414_v48  ;;  %2737 = vmatmul.bf16.gmra.mxu2 %v4872_v58  ;;  %2826 = vmatmul.bf16.gmra.mxu3 %v5376_v53 }
 0x23e   : > { %v3456_v45 = vpack.c.b16 %v3408_v5, %v3408_v5  ;;  %v3457_v47 = vpack.c.b16 %v3409_v6, %v3409_v6  ;;  %4164 = vst [vmem:[%s4554_s13 + $0x38] sm:$0xf] %v3458_v9 }
 0x23f   : > { %v2972_v23 = vadd.f32 %v2971_v22, %v2940_v7  ;;  %v3013_v49 = vmul.f32 %v2940_v7, %v2940_v7  ;;  %v3084_v35 = vpack.c.bf16 %v2940_v7, %v2940_v7 }
 0x240   : > { %v2698_v55 = vpop.f32.mrf.mxu2  ;;  %v2787_v13 = vpop.f32.mrf.mxu3  ;;  %4162 = vst [vmem:[%s4554_s13 + $0x30] sm:$0xf] %v3456_v45 }
 0x241   : > { %v3044_v59 = vadd.f32 %v3043_v36, %v3013_v49  ;;  %v2788_v18 = vadd.f32 %v2787_v13, %v2698_v55  ;;  %v2418_v19 = vpop.f32.mrf.mxu1  ;;  %v2878_v28 = vpop.f32.mrf.mxu0  ;;  %4163 = vst [vmem:[%s4554_s13 + $0x34] sm:$0xf] %v3457_v47  ;;  %v3148_v58 = vunpack.c.l.b16 %v3084_v35 }
 0x242   : > { %v2419_v14 = vadd.f32 %v2418_v19, %v5386_v44 }
 0x243   : > { %v2877_v53 = vadd.f32 %v2876_v38, %v2788_v18  ;;  %v3175_v50 = vpack.c.b16 %v3148_v58, %v3147_v63 }
 0x245   : > { %v2941_v21 = vadd.f32 %v2877_v53, %v2417_v24  ;;  %v3216_v54 = vshrl.u32 %v3175_v50, 16  ;;  %v3219_v46 = vshll.u32 %v3175_v50, 16 }
 0x247   : > { %v2973_v37 = vadd.f32 %v2972_v23, %v2941_v21  ;;  %v3014_v40 = vmul.f32 %v2941_v21, %v2941_v21  ;;  %v3218_v22 = vrot.slane %v3216_v54, 7  ;;  %v3085_v6 = vpack.c.bf16 %v2941_v21, %v2941_v21 }
 0x248   : > { %v2700_v15 = vpop.f32.mrf.mxu2  ;;  %v2789_v17 = vpop.f32.mrf.mxu3 }
 0x249   : > { %v3045_v27 = vadd.f32 %v3044_v59, %v3014_v40  ;;  %v2790_v34 = vadd.f32 %v2789_v17, %v2700_v15  ;;  %v2421_v36 = vpop.f32.mrf.mxu1  ;;  %v2881_v25 = vpop.f32.mrf.mxu0  ;;  %v3221_v61 = vor.u32 %v3219_v46, %v3218_v22  ;;  %v3354_v16 = vsel %vm5505_vm6, %v3218_v22, 0 }
 0x24a   : > { %v3413_v39 = vunpack.c.l.b16 %v3354_v16  ;;  %v3149_v55 = vunpack.c.l.b16 %v3085_v6  ;;  %v2422_v13 = vadd.f32 %v2421_v36, %v5390_v31 }
 0x24b   : > { %v2879_v38 = vadd.f32 %v2878_v28, %v2790_v34  ;;  %v3338_v20 = vsel %vm5505_vm6, 0, %v3221_v61  ;;  %v5816_v34 = vrot.slane %v4918_v0, 1 }
 0x24c   : > { %2460 = vmatmul.bf16.gmra.mxu1 %v5357_v8  ;;  %2920 = vmatmul.bf16.gmra.mxu0 %v5398_v26  ;;  %v3411_v48 = vunpack.c.l.b16 %v3338_v20  ;;  %v3412_v60 = vunpack.c.h.b16 %v3338_v20  ;;  %v3461_v30 = vpack.c.b16 %v3413_v39, %v3413_v39  ;;  %v5817_v39 = vld [vmem:[#allocation7_spill] sm:$0xff] }
 0x24d   : > { %v2942_v5 = vadd.f32 %v2879_v38, %v2419_v14  ;;  %2742 = vmatmul.bf16.gmra.mxu2 %v4916_v52  ;;  %2831 = vmatmul.bf16.gmra.mxu3 %v5395_v43 }
 0x24e   : > { %v3459_v44 = vpack.c.b16 %v3411_v48, %v3411_v48  ;;  %v3460_v9 = vpack.c.b16 %v3412_v60, %v3412_v60  ;;  %4167 = vst [vmem:[%s4554_s13 + $0x44] sm:$0xf] %v3461_v30 }
 0x24f   : > { %v2974_v7 = vadd.f32 %v2973_v37, %v2942_v5  ;;  %v3015_v32 = vmul.f32 %v2942_v5, %v2942_v5  ;;  %v3086_v45 = vpack.c.bf16 %v2942_v5, %v2942_v5 }
 0x250   : > { %v2703_v8 = vpop.f32.mrf.mxu2  ;;  %v2792_v47 = vpop.f32.mrf.mxu3  ;;  %4165 = vst [vmem:[%s4554_s13 + $0x3c] sm:$0xf] %v3459_v44 }
 0x251   : > { %v3046_v26 = vadd.f32 %v3045_v27, %v3015_v32  ;;  %v2793_v23 = vadd.f32 %v2792_v47, %v2703_v8  ;;  %v2423_v49 = vpop.f32.mrf.mxu1  ;;  %v2883_v35 = vpop.f32.mrf.mxu0  ;;  %4166 = vst [vmem:[%s4554_s13 + $0x40] sm:$0xf] %v3460_v9  ;;  %v3150_v52 = vunpack.c.l.b16 %v3086_v45 }
 0x252   : > { %v2424_v15 = vadd.f32 %v2423_v49, %v5404_v29 }
 0x253   : > { %v2882_v43 = vadd.f32 %v2881_v25, %v2793_v23  ;;  %v3176_v59 = vpack.c.b16 %v3150_v52, %v3149_v55 }
 0x255   : > { %v2943_v18 = vadd.f32 %v2882_v43, %v2422_v13  ;;  %v3223_v19 = vshrl.u32 %v3176_v59, 16  ;;  %v3226_v24 = vshll.u32 %v3176_v59, 16 }
 0x257   : > { %v2975_v28 = vadd.f32 %v2974_v7, %v2943_v18  ;;  %v3016_v63 = vmul.f32 %v2943_v18, %v2943_v18  ;;  %v3225_v58 = vrot.slane %v3223_v19, 7  ;;  %v3087_v29 = vpack.c.bf16 %v2943_v18, %v2943_v18 }
 0x258   : > { %v2705_v53 = vpop.f32.mrf.mxu2  ;;  %v2794_v50 = vpop.f32.mrf.mxu3 }
 0x259   : > { %v3047_v21 = vadd.f32 %v3046_v26, %v3016_v63  ;;  %v2795_v54 = vadd.f32 %v2794_v50, %v2705_v53  ;;  %v2426_v37 = vpop.f32.mrf.mxu1  ;;  %v2886_v40 = vpop.f32.mrf.mxu0  ;;  %v3228_v22 = vor.u32 %v3226_v24, %v3225_v58  ;;  %v3355_v46 = vsel %vm5505_vm6, %v3225_v58, 0 }
 0x25a   : > { %v3416_v31 = vunpack.c.l.b16 %v3355_v46  ;;  %v3151_v7 = vunpack.c.l.b16 %v3087_v29  ;;  %v2427_v32 = vadd.f32 %v2426_v37, %v5407_v42 }
 0x25b   : > { %v2884_v17 = vadd.f32 %v2883_v35, %v2795_v54  ;;  %v3339_v27 = vsel %vm5505_vm6, 0, %v3228_v22 }
 0x25c   : > { %2465 = vmatmul.bf16.gmra.mxu1 %v5379_v10  ;;  %2925 = vmatmul.bf16.gmra.mxu0 %v5816_v34  ;;  %v3414_v36 = vunpack.c.l.b16 %v3339_v27  ;;  %v3415_v25 = vunpack.c.h.b16 %v3339_v27  ;;  %v3464_v61 = vpack.c.b16 %v3416_v31, %v3416_v31 }
 0x25d   : > { %v2944_v16 = vadd.f32 %v2884_v17, %v2424_v15  ;;  %2747 = vmatmul.bf16.gmra.mxu2 %v4918_v0  ;;  %2836 = vmatmul.bf16.gmra.mxu3 %v5817_v39 }
 0x25e   : > { %v3462_v14 = vpack.c.b16 %v3414_v36, %v3414_v36  ;;  %v3463_v38 = vpack.c.b16 %v3415_v25, %v3415_v25  ;;  %4170 = vst [vmem:[%s4554_s13 + $0x50] sm:$0xf] %v3464_v61 }
 0x25f   : > { %v2976_v20 = vadd.f32 %v2975_v28, %v2944_v16  ;;  %v3017_v48 = vmul.f32 %v2944_v16, %v2944_v16  ;;  %v3088_v10 = vpack.c.bf16 %v2944_v16, %v2944_v16 }
 0x260   : > { %v2708_v60 = vpop.f32.mrf.mxu2  ;;  %v2797_v30 = vpop.f32.mrf.mxu3  ;;  %4168 = vst [vmem:[%s4554_s13 + $0x48] sm:$0xf] %v3462_v14 }
 0x261   : > { %v3048_v5 = vadd.f32 %v3047_v21, %v3017_v48  ;;  %v2798_v6 = vadd.f32 %v2797_v30, %v2708_v60  ;;  %v2428_v44 = vpop.f32.mrf.mxu1  ;;  %v2888_v9 = vpop.f32.mrf.mxu0  ;;  %4169 = vst [vmem:[%s4554_s13 + $0x4c] sm:$0xf] %v3463_v38  ;;  %v3152_v0 = vunpack.c.l.b16 %v3088_v10 }
 0x262   : > { %v2429_v58 = vadd.f32 %v2428_v44, %v5416_v4 }
 0x263   : > { %v2887_v45 = vadd.f32 %v2886_v40, %v2798_v6  ;;  %v3177_v8 = vpack.c.b16 %v3152_v0, %v3151_v7 }
 0x265   : > { %v2945_v47 = vadd.f32 %v2887_v45, %v2427_v32  ;;  %v3230_v26 = vshrl.u32 %v3177_v8, 16  ;;  %v3233_v55 = vshll.u32 %v3177_v8, 16 }
 0x267   : > { %v2977_v23 = vadd.f32 %v2976_v20, %v2945_v47  ;;  %v3018_v49 = vmul.f32 %v2945_v47, %v2945_v47  ;;  %v3232_v35 = vrot.slane %v3230_v26, 7  ;;  %v3089_v40 = vpack.c.bf16 %v2945_v47, %v2945_v47 }
 0x268   : > { %v2710_v52 = vpop.f32.mrf.mxu2  ;;  %v2799_v13 = vpop.f32.mrf.mxu3 }
 0x269   : > { %v3049_v43 = vadd.f32 %v3048_v5, %v3018_v49  ;;  %v2800_v59 = vadd.f32 %v2799_v13, %v2710_v52  ;;  %v2431_v18 = vpop.f32.mrf.mxu1  ;;  %v2891_v19 = vpop.f32.mrf.mxu0  ;;  %v3235_v28 = vor.u32 %v3233_v55, %v3232_v35  ;;  %v3356_v63 = vsel %vm5505_vm6, %v3232_v35, 0 }
 0x26a   : > { %v3419_v42 = vunpack.c.l.b16 %v3356_v63  ;;  %v3153_v16 = vunpack.c.l.b16 %v3089_v40  ;;  %v2432_v29 = vadd.f32 %v2431_v18, %v5419_v11 }
 0x26b   : > { %v2889_v24 = vadd.f32 %v2888_v9, %v2800_v59  ;;  %v3340_v53 = vsel %vm5505_vm6, 0, %v3235_v28 }
 0x26c   : > { %v3417_v50 = vunpack.c.l.b16 %v3340_v53  ;;  %v3418_v21 = vunpack.c.h.b16 %v3340_v53  ;;  %v3467_v54 = vpack.c.b16 %v3419_v42, %v3419_v42 }
 0x26d   : > { %v2946_v37 = vadd.f32 %v2889_v24, %v2429_v58 }
 0x26e   : > { %v3465_v22 = vpack.c.b16 %v3417_v50, %v3417_v50  ;;  %v3466_v46 = vpack.c.b16 %v3418_v21, %v3418_v21  ;;  %4173 = vst [vmem:[%s4554_s13 + $0x5c] sm:$0xf] %v3467_v54 }
 0x26f   : > { %v2978_v31 = vadd.f32 %v2977_v23, %v2946_v37  ;;  %v3019_v15 = vmul.f32 %v2946_v37, %v2946_v37  ;;  %v3090_v17 = vpack.c.bf16 %v2946_v37, %v2946_v37 }
 0x270   : > { %v2713_v27 = vpop.f32.mrf.mxu2  ;;  %v2802_v34 = vpop.f32.mrf.mxu3  ;;  %4171 = vst [vmem:[%s4554_s13 + $0x54] sm:$0xf] %v3465_v22 }
 0x271   : > { %v3050_v4 = vadd.f32 %v3049_v43, %v3019_v15  ;;  %v2803_v36 = vadd.f32 %v2802_v34, %v2713_v27  ;;  %v2433_v25 = vpop.f32.mrf.mxu1  ;;  %v2893_v61 = vpop.f32.mrf.mxu0  ;;  %4172 = vst [vmem:[%s4554_s13 + $0x58] sm:$0xf] %v3466_v46  ;;  %v3154_v39 = vunpack.c.l.b16 %v3090_v17 }
 0x272   : > { %v2434_v47 = vadd.f32 %v2433_v25, %v5426_v56 }
 0x273   : > { %v2892_v14 = vadd.f32 %v2891_v19, %v2803_v36  ;;  %v3178_v38 = vpack.c.b16 %v3154_v39, %v3153_v16 }
 0x275   : > { %v2947_v20 = vadd.f32 %v2892_v14, %v2432_v29  ;;  %v3237_v48 = vshrl.u32 %v3178_v38, 16  ;;  %v3240_v5 = vshll.u32 %v3178_v38, 16 }
 0x277   : > { %v2979_v10 = vadd.f32 %v2978_v31, %v2947_v20  ;;  %v3020_v60 = vmul.f32 %v2947_v20, %v2947_v20  ;;  %v3239_v30 = vrot.slane %v3237_v48, 7  ;;  %v3091_v13 = vpack.c.bf16 %v2947_v20, %v2947_v20 }
 0x278   : > { %v2715_v6 = vpop.f32.mrf.mxu2  ;;  %v2804_v44 = vpop.f32.mrf.mxu3 }
 0x279   : > { %v3051_v9 = vadd.f32 %v3050_v4, %v3020_v60  ;;  %v2805_v7 = vadd.f32 %v2804_v44, %v2715_v6  ;;  %v2436_v0 = vpop.f32.mrf.mxu1  ;;  %v2896_v32 = vpop.f32.mrf.mxu0  ;;  %v3242_v45 = vor.u32 %v3240_v5, %v3239_v30  ;;  %v3357_v8 = vsel %vm5505_vm6, %v3239_v30, 0 }
 0x27a   : > { %v3422_v11 = vunpack.c.l.b16 %v3357_v8  ;;  %v3155_v50 = vunpack.c.l.b16 %v3091_v13  ;;  %v2437_v54 = vadd.f32 %v2436_v0, %v5429_v51 }
 0x27b   : > { %v2894_v26 = vadd.f32 %v2893_v61, %v2805_v7  ;;  %v3341_v23 = vsel %vm5505_vm6, 0, %v3242_v45 }
 0x27c   : > { %v3420_v49 = vunpack.c.l.b16 %v3341_v23  ;;  %v3421_v35 = vunpack.c.h.b16 %v3341_v23  ;;  %v3470_v55 = vpack.c.b16 %v3422_v11, %v3422_v11 }
 0x27d   : > { %v2948_v52 = vadd.f32 %v2894_v26, %v2434_v47 }
 0x27e   : > { %v3468_v43 = vpack.c.b16 %v3420_v49, %v3420_v49  ;;  %v3469_v59 = vpack.c.b16 %v3421_v35, %v3421_v35  ;;  %4176 = vst [vmem:[%s4554_s13 + $0x68] sm:$0xf] %v3470_v55 }
 0x27f   : > { %v2980_v18 = vadd.f32 %v2979_v10, %v2948_v52  ;;  %v3021_v19 = vmul.f32 %v2948_v52, %v2948_v52  ;;  %v3092_v28 = vpack.c.bf16 %v2948_v52, %v2948_v52 }
 0x280   : > { %v2718_v63 = vpop.f32.mrf.mxu2  ;;  %v2807_v42 = vpop.f32.mrf.mxu3  ;;  %4174 = vst [vmem:[%s4554_s13 + $0x60] sm:$0xf] %v3468_v43 }
 0x281   : > { %v3052_v56 = vadd.f32 %v3051_v9, %v3021_v19  ;;  %v2808_v58 = vadd.f32 %v2807_v42, %v2718_v63  ;;  %v2438_v24 = vpop.f32.mrf.mxu1  ;;  %v2898_v53 = vpop.f32.mrf.mxu0  ;;  %4175 = vst [vmem:[%s4554_s13 + $0x64] sm:$0xf] %v3469_v59  ;;  %v3156_v21 = vunpack.c.l.b16 %v3092_v28 }
 0x282   : > { %v2439_v14 = vadd.f32 %v2438_v24, %v5436_v57 }
 0x283   : > { %v2897_v37 = vadd.f32 %v2896_v32, %v2808_v58  ;;  %v3179_v40 = vpack.c.b16 %v3156_v21, %v3155_v50 }
 0x285   : > { %v2949_v22 = vadd.f32 %v2897_v37, %v2437_v54  ;;  %v3244_v46 = vshrl.u32 %v3179_v40, 16  ;;  %v3247_v27 = vshll.u32 %v3179_v40, 16 }
 0x287   : > { %v2981_v31 = vadd.f32 %v2980_v18, %v2949_v22  ;;  %v3022_v15 = vmul.f32 %v2949_v22, %v2949_v22  ;;  %v3246_v17 = vrot.slane %v3244_v46, 7  ;;  %v3093_v5 = vpack.c.bf16 %v2949_v22, %v2949_v22 }
 0x288   : > { %v2720_v34 = vpop.f32.mrf.mxu2  ;;  %v2809_v4 = vpop.f32.mrf.mxu3 }
 0x289   : > { %v3053_v36 = vadd.f32 %v3052_v56, %v3022_v15  ;;  %v2810_v25 = vadd.f32 %v2809_v4, %v2720_v34  ;;  %v2441_v61 = vpop.f32.mrf.mxu1  ;;  %v2901_v16 = vpop.f32.mrf.mxu0  ;;  %v3249_v39 = vor.u32 %v3247_v27, %v3246_v17  ;;  %v3358_v29 = vsel %vm5505_vm6, %v3246_v17, 0 }
 0x28a   : > { %v3425_v51 = vunpack.c.l.b16 %v3358_v29  ;;  %v3157_v26 = vunpack.c.l.b16 %v3093_v5  ;;  %v2442_v49 = vadd.f32 %v2441_v61, %v5439_v12 }
 0x28b   : > { %v2899_v38 = vadd.f32 %v2898_v53, %v2810_v25  ;;  %v3342_v20 = vsel %vm5505_vm6, 0, %v3249_v39 }
 0x28c   : > { %v3423_v48 = vunpack.c.l.b16 %v3342_v20  ;;  %v3424_v10 = vunpack.c.h.b16 %v3342_v20  ;;  %v3473_v60 = vpack.c.b16 %v3425_v51, %v3425_v51 }
 0x28d   : > { %v2950_v30 = vadd.f32 %v2899_v38, %v2439_v14 }
 0x28e   : > { %v3471_v6 = vpack.c.b16 %v3423_v48, %v3423_v48  ;;  %v3472_v44 = vpack.c.b16 %v3424_v10, %v3424_v10  ;;  %4179 = vst [vmem:[%s4554_s13 + $0x74] sm:$0xf] %v3473_v60 }
 0x28f   : > { %v2982_v9 = vadd.f32 %v2981_v31, %v2950_v30  ;;  %v3023_v7 = vmul.f32 %v2950_v30, %v2950_v30  ;;  %v3094_v0 = vpack.c.bf16 %v2950_v30, %v2950_v30 }
 0x290   : > { %v2723_v32 = vpop.f32.mrf.mxu2  ;;  %v2812_v45 = vpop.f32.mrf.mxu3  ;;  %4177 = vst [vmem:[%s4554_s13 + $0x6c] sm:$0xf] %v3471_v6 }
 0x291   : > { %v3054_v57 = vadd.f32 %v3053_v36, %v3023_v7  ;;  %v2813_v8 = vadd.f32 %v2812_v45, %v2723_v32  ;;  %v2443_v11 = vpop.f32.mrf.mxu1  ;;  %v2903_v47 = vpop.f32.mrf.mxu0  ;;  %4178 = vst [vmem:[%s4554_s13 + $0x70] sm:$0xf] %v3472_v44  ;;  %v3158_v23 = vunpack.c.l.b16 %v3094_v0 }
 0x292   : > { %v2444_v21 = vadd.f32 %v2443_v11, %v5446_v41 }
 0x293   : > { %v2902_v35 = vadd.f32 %v2901_v16, %v2813_v8  ;;  %v3180_v55 = vpack.c.b16 %v3158_v23, %v3157_v26 }
 0x295   : > { %v2951_v52 = vadd.f32 %v2902_v35, %v2442_v49  ;;  %v3251_v13 = vshrl.u32 %v3180_v55, 16  ;;  %v3254_v19 = vshll.u32 %v3180_v55, 16 }
 0x297   : > { %v2983_v43 = vadd.f32 %v2982_v9, %v2951_v52  ;;  %v3024_v59 = vmul.f32 %v2951_v52, %v2951_v52  ;;  %v3253_v18 = vrot.slane %v3251_v13, 7  ;;  %v3095_v15 = vpack.c.bf16 %v2951_v52, %v2951_v52 }
 0x298   : > { %v2725_v28 = vpop.f32.mrf.mxu2  ;;  %v2814_v63 = vpop.f32.mrf.mxu3 }
 0x299   : > { %v3055_v42 = vadd.f32 %v3054_v57, %v3024_v59  ;;  %v2815_v56 = vadd.f32 %v2814_v63, %v2725_v28  ;;  %v2446_v58 = vpop.f32.mrf.mxu1  ;;  %v2906_v24 = vpop.f32.mrf.mxu0  ;;  %v3256_v53 = vor.u32 %v3254_v19, %v3253_v18  ;;  %v3359_v50 = vsel %vm5505_vm6, %v3253_v18, 0 }
 0x29a   : > { %v3428_v12 = vunpack.c.l.b16 %v3359_v50  ;;  %v3159_v51 = vunpack.c.l.b16 %v3095_v15  ;;  %v2447_v38 = vadd.f32 %v2446_v58, %v5449_v62 }
 0x29b   : > { %v2904_v54 = vadd.f32 %v2903_v47, %v2815_v56  ;;  %v3343_v37 = vsel %vm5505_vm6, 0, %v3256_v53 }
 0x29c   : > { %v3426_v40 = vunpack.c.l.b16 %v3343_v37  ;;  %v3427_v22 = vunpack.c.h.b16 %v3343_v37  ;;  %v3476_v46 = vpack.c.b16 %v3428_v12, %v3428_v12 }
 0x29d   : > { %v2952_v31 = vadd.f32 %v2904_v54, %v2444_v21 }
 0x29e   : > { %v3474_v17 = vpack.c.b16 %v3426_v40, %v3426_v40  ;;  %v3475_v27 = vpack.c.b16 %v3427_v22, %v3427_v22  ;;  %4182 = vst [vmem:[%s4554_s13 + $0x80] sm:$0xf] %v3476_v46 }
 0x29f   : > { %v2984_v34 = vadd.f32 %v2983_v43, %v2952_v31  ;;  %v3025_v4 = vmul.f32 %v2952_v31, %v2952_v31  ;;  %v3096_v36 = vpack.c.bf16 %v2952_v31, %v2952_v31 }
 0x2a0   : > { %v2728_v25 = vpop.f32.mrf.mxu2  ;;  %v2817_v61 = vpop.f32.mrf.mxu3  ;;  %4180 = vst [vmem:[%s4554_s13 + $0x78] sm:$0xf] %v3474_v17 }
 0x2a1   : > { %v3056_v41 = vadd.f32 %v3055_v42, %v3025_v4  ;;  %v2818_v16 = vadd.f32 %v2817_v61, %v2728_v25  ;;  %v2448_v39 = vpop.f32.mrf.mxu1  ;;  %v2908_v29 = vpop.f32.mrf.mxu0  ;;  %4181 = vst [vmem:[%s4554_s13 + $0x7c] sm:$0xf] %v3475_v27  ;;  %v3160_v14 = vunpack.c.l.b16 %v3096_v36 }
 0x2a2   : > { %v2449_v47 = vadd.f32 %v2448_v39, %v5456_v3 }
 0x2a3   : > { %v2907_v20 = vadd.f32 %v2906_v24, %v2818_v16  ;;  %v3181_v48 = vpack.c.b16 %v3160_v14, %v3159_v51  ;;  %v5818_v16 = vld [vmem:[#allocation5_spill] sm:$0xff] }
 0x2a5   : > { %v2953_v10 = vadd.f32 %v2907_v20, %v2447_v38  ;;  %v3258_v60 = vshrl.u32 %v3181_v48, 16  ;;  %v3261_v44 = vshll.u32 %v3181_v48, 16 }
 0x2a7   : > { %v2985_v30 = vadd.f32 %v2984_v34, %v2953_v10  ;;  %v3026_v5 = vmul.f32 %v2953_v10, %v2953_v10  ;;  %v3260_v6 = vrot.slane %v3258_v60, 7  ;;  %v3097_v13 = vpack.c.bf16 %v2953_v10, %v2953_v10 }
 0x2a8   : > { %v2730_v9 = vpop.f32.mrf.mxu2  ;;  %v2819_v7 = vpop.f32.mrf.mxu3 }
 0x2a9   : > { %v3057_v0 = vadd.f32 %v3056_v41, %v3026_v5  ;;  %v2820_v32 = vadd.f32 %v2819_v7, %v2730_v9  ;;  %v2451_v45 = vpop.f32.mrf.mxu1  ;;  %v2911_v57 = vpop.f32.mrf.mxu0  ;;  %v3263_v8 = vor.u32 %v3261_v44, %v3260_v6  ;;  %v3360_v11 = vsel %vm5505_vm6, %v3260_v6, 0 }
 0x2aa   : > { %v3431_v62 = vunpack.c.l.b16 %v3360_v11  ;;  %v3161_v53 = vunpack.c.l.b16 %v3097_v13  ;;  %v2452_v12 = vadd.f32 %v2451_v45, %v5459_v1 }
 0x2ab   : > { %v2909_v26 = vadd.f32 %v2908_v29, %v2820_v32  ;;  %v3344_v23 = vsel %vm5505_vm6, 0, %v3263_v8 }
 0x2ac   : > { %v3429_v49 = vunpack.c.l.b16 %v3344_v23  ;;  %v3430_v35 = vunpack.c.h.b16 %v3344_v23  ;;  %v3479_v55 = vpack.c.b16 %v3431_v62, %v3431_v62  ;;  %v5819_v62 = vld [vmem:[#allocation8_spill] sm:$0xff] }
 0x2ad   : > { %v2954_v52 = vadd.f32 %v2909_v26, %v2449_v47 }
 0x2ae   : > { %v3477_v43 = vpack.c.b16 %v3429_v49, %v3429_v49  ;;  %v3478_v59 = vpack.c.b16 %v3430_v35, %v3430_v35  ;;  %4185 = vst [vmem:[%s4554_s13 + $0x8c] sm:$0xf] %v3479_v55 }
 0x2af   : > { %v2986_v18 = vadd.f32 %v2985_v30, %v2954_v52  ;;  %v3027_v19 = vmul.f32 %v2954_v52, %v2954_v52  ;;  %v3098_v28 = vpack.c.bf16 %v2954_v52, %v2954_v52 }
 0x2b0   : > { %v2733_v63 = vpop.f32.mrf.mxu2  ;;  %v2822_v42 = vpop.f32.mrf.mxu3  ;;  %4183 = vst [vmem:[%s4554_s13 + $0x84] sm:$0xf] %v3477_v43 }
 0x2b1   : > { %v3058_v3 = vadd.f32 %v3057_v0, %v3027_v19  ;;  %v2823_v56 = vadd.f32 %v2822_v42, %v2733_v63  ;;  %v2453_v58 = vpop.f32.mrf.mxu1  ;;  %v2913_v24 = vpop.f32.mrf.mxu0  ;;  %4184 = vst [vmem:[%s4554_s13 + $0x88] sm:$0xf] %v3478_v59  ;;  %v3162_v50 = vunpack.c.l.b16 %v3098_v28 }
 0x2b2   : > { %v2454_v39 = vadd.f32 %v2453_v58, %v5818_v16 }
 0x2b3   : > { %v2912_v21 = vadd.f32 %v2911_v57, %v2823_v56  ;;  %v3182_v54 = vpack.c.b16 %v3162_v50, %v3161_v53 }
 0x2b5   : > { %v2955_v37 = vadd.f32 %v2912_v21, %v2452_v12  ;;  %v3265_v40 = vshrl.u32 %v3182_v54, 16  ;;  %v3268_v15 = vshll.u32 %v3182_v54, 16 }
 0x2b7   : > { %v2987_v22 = vadd.f32 %v2986_v18, %v2955_v37  ;;  %v3028_v46 = vmul.f32 %v2955_v37, %v2955_v37  ;;  %v3267_v31 = vrot.slane %v3265_v40, 7  ;;  %v3099_v10 = vpack.c.bf16 %v2955_v37, %v2955_v37 }
 0x2b8   : > { %v2735_v17 = vpop.f32.mrf.mxu2  ;;  %v2824_v27 = vpop.f32.mrf.mxu3 }
 0x2b9   : > { %v3059_v34 = vadd.f32 %v3058_v3, %v3028_v46  ;;  %v2825_v4 = vadd.f32 %v2824_v27, %v2735_v17  ;;  %v2456_v36 = vpop.f32.mrf.mxu1  ;;  %v2916_v25 = vpop.f32.mrf.mxu0  ;;  %v3270_v61 = vor.u32 %v3268_v15, %v3267_v31  ;;  %v3361_v41 = vsel %vm5505_vm6, %v3267_v31, 0 }
 0x2ba   : > { %v3434_v1 = vunpack.c.l.b16 %v3361_v41  ;;  %v3163_v8 = vunpack.c.l.b16 %v3099_v10  ;;  %v2457_v47 = vadd.f32 %v2456_v36, %v5819_v62 }
 0x2bb   : > { %v2914_v29 = vadd.f32 %v2913_v24, %v2825_v4  ;;  %v3345_v51 = vsel %vm5505_vm6, 0, %v3270_v61  ;;  %v5820_v61 = vld [vmem:[#allocation19_spill] sm:$0xff] }
 0x2bc   : > { %v3432_v14 = vunpack.c.l.b16 %v3345_v51  ;;  %v3433_v38 = vunpack.c.h.b16 %v3345_v51  ;;  %v3482_v20 = vpack.c.b16 %v3434_v1, %v3434_v1 }
 0x2bd   : > { %v2956_v48 = vadd.f32 %v2914_v29, %v2454_v39  ;;  %v4478_v39 = vmov 0.0  }
 0x2be   : > { %v3480_v60 = vpack.c.b16 %v3432_v14, %v3432_v14  ;;  %v3481_v30 = vpack.c.b16 %v3433_v38, %v3433_v38  ;;  %4188 = vst [vmem:[%s4554_s13 + $0x98] sm:$0xf] %v3482_v20 }
 0x2bf   : > { %v2988_v5 = vadd.f32 %v2987_v22, %v2956_v48  ;;  %v3029_v6 = vmul.f32 %v2956_v48, %v2956_v48  ;;  %v3100_v44 = vpack.c.bf16 %v2956_v48, %v2956_v48  ;;  %323 = vst [vmem:[%s5652_s17] sm:$0x1] %v4478_v39 }
 0x2c0   : > { %v2738_v9 = vpop.f32.mrf.mxu2  ;;  %v2827_v7 = vpop.f32.mrf.mxu3  ;;  %4186 = vst [vmem:[%s4554_s13 + $0x90] sm:$0xf] %v3480_v60 }
 0x2c1   : > { %v3060_v0 = vadd.f32 %v3059_v34, %v3029_v6  ;;  %v2828_v32 = vadd.f32 %v2827_v7, %v2738_v9  ;;  %v2458_v45 = vpop.f32.mrf.mxu1  ;;  %v2918_v57 = vpop.f32.mrf.mxu0  ;;  %4187 = vst [vmem:[%s4554_s13 + $0x94] sm:$0xf] %v3481_v30  ;;  %v3164_v11 = vunpack.c.l.b16 %v3100_v44 }
 0x2c2   : > { %v2459_v58 = vadd.f32 %v2458_v45, %v5476_v33  ;;  %324 = vst [vmem:[%s5659_s20] sm:$0x1] %v4478_v39 }
 0x2c3   : > { %v2917_v26 = vadd.f32 %v2916_v25, %v2828_v32  ;;  %v3183_v23 = vpack.c.b16 %v3164_v11, %v3163_v8  ;;  %v5821_v32 = vld [vmem:[#allocation21_spill] sm:$0xff] }
 0x2c5   : > { %v2957_v49 = vadd.f32 %v2917_v26, %v2457_v47  ;;  %v3272_v35 = vshrl.u32 %v3183_v23, 16  ;;  %v3275_v43 = vshll.u32 %v3183_v23, 16 }
 0x2c7   : > { %v2989_v55 = vadd.f32 %v2988_v5, %v2957_v49  ;;  %v3030_v52 = vmul.f32 %v2957_v49, %v2957_v49  ;;  %v3274_v13 = vrot.slane %v3272_v35, 7  ;;  %v3101_v40 = vpack.c.bf16 %v2957_v49, %v2957_v49 }
 0x2c8   : > { %v2740_v59 = vpop.f32.mrf.mxu2  ;;  %v2829_v18 = vpop.f32.mrf.mxu3 }
 0x2c9   : > { %v3061_v19 = vadd.f32 %v3060_v0, %v3030_v52  ;;  %v2830_v28 = vadd.f32 %v2829_v18, %v2740_v59  ;;  %v2461_v63 = vpop.f32.mrf.mxu1  ;;  %v3277_v42 = vor.u32 %v3275_v43, %v3274_v13  ;;  %v3362_v3 = vsel %vm5505_vm6, %v3274_v13, 0  ;;  %v2921_v53 = vpop.f32.mrf.mxu0 }
 0x2ca   : > { %v3437_v56 = vunpack.c.l.b16 %v3362_v3  ;;  %v3165_v36 = vunpack.c.l.b16 %v3101_v40  ;;  %v2462_v41 = vadd.f32 %v2461_v63, %v5820_v61 }
 0x2cb   : > { %v2919_v24 = vadd.f32 %v2918_v57, %v2830_v28  ;;  %v3346_v50 = vsel %vm5505_vm6, 0, %v3277_v42 }
 0x2cc   : > { %v3435_v12 = vunpack.c.l.b16 %v3346_v50  ;;  %v3436_v21 = vunpack.c.h.b16 %v3346_v50  ;;  %v3485_v54 = vpack.c.b16 %v3437_v56, %v3437_v56  ;;  %v5822_v56 = vld [vmem:[#allocation10_spill] sm:$0xff] }
 0x2cd   : > { %v2958_v37 = vadd.f32 %v2919_v24, %v2459_v58 }
 0x2ce   : > { %v3483_v22 = vpack.c.b16 %v3435_v12, %v3435_v12  ;;  %v3484_v46 = vpack.c.b16 %v3436_v21, %v3436_v21  ;;  %4191 = vst [vmem:[%s4554_s13 + $0xa4] sm:$0xf] %v3485_v54 }
 0x2cf   : > { %v2990_v31 = vadd.f32 %v2989_v55, %v2958_v37  ;;  %v3031_v15 = vmul.f32 %v2958_v37, %v2958_v37  ;;  %v3102_v33 = vpack.c.bf16 %v2958_v37, %v2958_v37 }
 0x2d0   : > { %v2743_v17 = vpop.f32.mrf.mxu2  ;;  %v2832_v27 = vpop.f32.mrf.mxu3  ;;  %4189 = vst [vmem:[%s4554_s13 + $0x9c] sm:$0xf] %v3483_v22 }
 0x2d1   : > { %v3062_v34 = vadd.f32 %v3061_v19, %v3031_v15  ;;  %v2833_v4 = vadd.f32 %v2832_v27, %v2743_v17  ;;  %4190 = vst [vmem:[%s4554_s13 + $0xa0] sm:$0xf] %v3484_v46  ;;  %v3166_v25 = vunpack.c.l.b16 %v3102_v33  ;;  %v2463_v16 = vpop.f32.mrf.mxu1  ;;  %v2923_v14 = vpop.f32.mrf.mxu0 }
 0x2d2   : > { %v2464_v45 = vadd.f32 %v2463_v16, %v5821_v32 }
 0x2d3   : > { %v2922_v1 = vadd.f32 %v2921_v53, %v2833_v4  ;;  %v3184_v29 = vpack.c.b16 %v3166_v25, %v3165_v36  ;;  %v5823_v36 = vld [vmem:[#allocation2_spill] sm:$0xff] }
 0x2d5   : > { %v2959_v51 = vadd.f32 %v2922_v1, %v2462_v41  ;;  %v3279_v38 = vshrl.u32 %v3184_v29, 16  ;;  %v3282_v60 = vshll.u32 %v3184_v29, 16 }
 0x2d7   : > { %v2991_v20 = vadd.f32 %v2990_v31, %v2959_v51  ;;  %v3032_v48 = vmul.f32 %v2959_v51, %v2959_v51  ;;  %v3281_v10 = vrot.slane %v3279_v38, 7  ;;  %v3103_v49 = vpack.c.bf16 %v2959_v51, %v2959_v51 }
 0x2d8   : > { %v2745_v30 = vpop.f32.mrf.mxu2  ;;  %v2834_v5 = vpop.f32.mrf.mxu3 }
 0x2d9   : > { %v3063_v6 = vadd.f32 %v3062_v34, %v3032_v48  ;;  %v2835_v44 = vadd.f32 %v2834_v5, %v2745_v30  ;;  %v3284_v9 = vor.u32 %v3282_v60, %v3281_v10  ;;  %v3363_v7 = vsel %vm5505_vm6, %v3281_v10, 0  ;;  %v2466_v23 = vpop.f32.mrf.mxu1  ;;  %v2926_v43 = vpop.f32.mrf.mxu0 }
 0x2da   : > { %v3440_v0 = vunpack.c.l.b16 %v3363_v7  ;;  %v3167_v42 = vunpack.c.l.b16 %v3103_v49  ;;  %v2467_v58 = vadd.f32 %v2466_v23, %v5822_v56  ;;  %v2963_v23 = vld [vmem:[%s5652_s17] sm:$0x1] }
 0x2db   : > { %v2924_v57 = vadd.f32 %v2923_v14, %v2835_v44  ;;  %v3347_v8 = vsel %vm5505_vm6, 0, %v3284_v9 }
 0x2dc   : > { %v3438_v11 = vunpack.c.l.b16 %v3347_v8  ;;  %v3439_v62 = vunpack.c.h.b16 %v3347_v8  ;;  %v3488_v47 = vpack.c.b16 %v3440_v0, %v3440_v0 }
 0x2dd   : > { %v2960_v26 = vadd.f32 %v2924_v57, %v2464_v45 }
 0x2de   : > { %v3486_v35 = vpack.c.b16 %v3438_v11, %v3438_v11  ;;  %v3487_v55 = vpack.c.b16 %v3439_v62, %v3439_v62  ;;  %4194 = vst [vmem:[%s4554_s13 + $0xb0] sm:$0xf] %v3488_v47 }
 0x2df   : > { %v2992_v52 = vadd.f32 %v2991_v20, %v2960_v26  ;;  %v3033_v13 = vmul.f32 %v2960_v26, %v2960_v26  ;;  %v3104_v59 = vpack.c.bf16 %v2960_v26, %v2960_v26 }
 0x2e0   : > { %v2748_v18 = vpop.f32.mrf.mxu2  ;;  %v2837_v19 = vpop.f32.mrf.mxu3  ;;  %4192 = vst [vmem:[%s4554_s13 + $0xa8] sm:$0xf] %v3486_v35 }
 0x2e1   : > { %v3064_v28 = vadd.f32 %v3063_v6, %v3033_v13  ;;  %v2838_v63 = vadd.f32 %v2837_v19, %v2748_v18  ;;  %4193 = vst [vmem:[%s4554_s13 + $0xac] sm:$0xf] %v3487_v55  ;;  %v3168_v3 = vunpack.c.l.b16 %v3104_v59  ;;  %v2468_v37 = vpop.f32.mrf.mxu1  ;;  %v2928_v34 = vpop.f32.mrf.mxu0 }
 0x2e2   : > { %v2469_v25 = vadd.f32 %v2468_v37, %v5823_v36 }
 0x2e3   : > { %v2927_v24 = vadd.f32 %v2926_v43, %v2838_v63  ;;  %v3185_v53 = vpack.c.b16 %v3168_v3, %v3167_v42  ;;  %v3003_v43 = vld [vmem:[%s5659_s20] sm:$0x1] }
 0x2e5   : > { %v2961_v50 = vadd.f32 %v2927_v24, %v2467_v58  ;;  %v3286_v12 = vshrl.u32 %v3185_v53, 16  ;;  %v3289_v22 = vshll.u32 %v3185_v53, 16 }
 0x2e7   : > { %v2993_v21 = vadd.f32 %v2992_v52, %v2961_v50  ;;  %v3034_v54 = vmul.f32 %v2961_v50, %v2961_v50  ;;  %v3288_v40 = vrot.slane %v3286_v12, 7  ;;  %v3105_v51 = vpack.c.bf16 %v2961_v50, %v2961_v50 }
 0x2e8   : > { %v2750_v46 = vpop.f32.mrf.mxu2  ;;  %v2839_v31 = vpop.f32.mrf.mxu3 }
 0x2e9   : > { %v3065_v15 = vadd.f32 %v3064_v28, %v3034_v54  ;;  %v2840_v33 = vadd.f32 %v2839_v31, %v2750_v46  ;;  %v3291_v17 = vor.u32 %v3289_v22, %v3288_v40  ;;  %v3364_v27 = vsel %vm5505_vm6, %v3288_v40, 0 }
 0x2ea   : > { %v3443_v4 = vunpack.c.l.b16 %v3364_v27  ;;  %v3169_v5 = vunpack.c.l.b16 %v3105_v51 }
 0x2eb   : > { %v2929_v61 = vadd.f32 %v2928_v34, %v2840_v33  ;;  %v3348_v41 = vsel %vm5505_vm6, 0, %v3291_v17 }
 0x2ec   : > { %v3441_v1 = vunpack.c.l.b16 %v3348_v41  ;;  %v3442_v16 = vunpack.c.h.b16 %v3348_v41  ;;  %v3491_v39 = vpack.c.b16 %v3443_v4, %v3443_v4 }
 0x2ed   : > { %v2962_v29 = vadd.f32 %v2929_v61, %v2469_v25 }
 0x2ee   : > { %v3489_v14 = vpack.c.b16 %v3441_v1, %v3441_v1  ;;  %v3490_v38 = vpack.c.b16 %v3442_v16, %v3442_v16  ;;  %4197 = vst [vmem:[%s4554_s13 + $0xbc] sm:$0xf] %v3491_v39 }
 0x2ef   : > { %v2994_v20 = vadd.f32 %v2993_v21, %v2962_v29  ;;  %v3035_v48 = vmul.f32 %v2962_v29, %v2962_v29  ;;  %v3106_v10 = vpack.c.bf16 %v2962_v29, %v2962_v29 }
 0x2f0   : > { %4195 = vst [vmem:[%s4554_s13 + $0xb4] sm:$0xf] %v3489_v14 }
 0x2f1   : > { %v2995_v60 = vrot.slane %v2994_v20, 4  ;;  %v3066_v30 = vadd.f32 %v3065_v15, %v3035_v48  ;;  %4196 = vst [vmem:[%s4554_s13 + $0xb8] sm:$0xf] %v3490_v38  ;;  %v3170_v6 = vunpack.c.l.b16 %v3106_v10 }
 0x2f3   : > { %v2996_v44 = vadd.f32 %v2995_v60, %v2994_v20  ;;  %v3067_v9 = vrot.slane %v3066_v30, 4  ;;  %v3186_v7 = vpack.c.b16 %v3170_v6, %v3169_v5 }
 0x2f5   : > { %v2997_v0 = vrot.slane %v2996_v44, 2  ;;  %v3068_v32 = vadd.f32 %v3067_v9, %v3066_v30  ;;  %v3293_v45 = vshrl.u32 %v3186_v7, 16  ;;  %v3296_v62 = vshll.u32 %v3186_v7, 16 }
 0x2f7   : > { %v2998_v57 = vadd.f32 %v2997_v0, %v2996_v44  ;;  %v3069_v8 = vrot.slane %v3068_v32, 2  ;;  %v3295_v11 = vrot.slane %v3293_v45, 7 }
 0x2f9   : > { %v2999_v47 = vrot.slane %v2998_v57, 1  ;;  %v3070_v26 = vadd.f32 %v3069_v8, %v3068_v32  ;;  %v3298_v49 = vor.u32 %v3296_v62, %v3295_v11  ;;  %v3365_v35 = vsel %vm5505_vm6, %v3295_v11, 0 }
 0x2fa   : > { %v3446_v13 = vunpack.c.l.b16 %v3365_v35 }
 0x2fb   : > { %v3000_v55 = vadd.f32 %v2999_v47, %v2998_v57  ;;  %v3071_v52 = vrot.slane %v3070_v26, 1  ;;  %v3349_v59 = vsel %vm5505_vm6, 0, %v3298_v49 }
 0x2fc   : > { %v3444_v28 = vunpack.c.l.b16 %v3349_v59  ;;  %v3445_v63 = vunpack.c.h.b16 %v3349_v59  ;;  %v3494_v42 = vpack.c.b16 %v3446_v13, %v3446_v13 }
 0x2fd   : > { %v3001_v18 = vadd.f32 %v3000_v55, %v2963_v23  ;;  %v3072_v19 = vadd.f32 %v3071_v52, %v3070_v26 }
 0x2fe   : > { %v3492_v56 = vpack.c.b16 %v3444_v28, %v3444_v28  ;;  %v3493_v58 = vpack.c.b16 %v3445_v63, %v3445_v63  ;;  %4200 = vst [vmem:[%s4554_s13 + $0xc8] sm:$0xf] %v3494_v42 }
 0x2ff   : > { %3002 = vst [vmem:[%s5652_s17] sm:$0x1] %v3001_v18  ;;  %v3073_v3 = vadd.f32 %v3072_v19, %v3003_v43 }
 0x300   : > { %4198 = vst [vmem:[%s4554_s13 + $0xc0] sm:$0xf] %v3492_v56 }
 0x301   : > { %3074 = vst [vmem:[%s5659_s20] sm:$0x1] %v3073_v3 }
 0x302   : > { %4199 = vst [vmem:[%s4554_s13 + $0xc4] sm:$0xf] %v3493_v58 }
 0x303 PF: > { %s17_s23 = sadd.s32 1, %s4474_s23   ;;  %s5824_s21 = smov %s4470_s22 }
 0x304   : > { %p14_p5 = scmp.ge.s32.totalorder %s17_s23, 4   ;;  %s5825_s22 = smov %s5827_s24 }
 0x306   :  { %16 = sbr.rel (!%p14_p5) target bundleno = 2 (0x2), region = 98 }

</bundles_post_ra>
